<compile_context>
chip_gen: v7x
topology: tpu7x:2x2x1
jax: 0.10.0
libtpu: 0.0.40
codegen_flags: <defaults>
</compile_context>

<pallas_src>
import math
import jax
import jax.numpy as jnp
from jax import lax
from jax.experimental import pallas as pl
from jax.experimental.pallas import tpu as pltpu

# ----------------------------- config (small) ------------------------------
B        = 2
C_IN     = 3
IMG      = 16
PATCH    = 8
NPATCH   = (IMG // PATCH) ** 2          # 4
L        = NPATCH + 1                    # 5 tokens (cls + patches)
CPP      = C_IN * PATCH * PATCH          # 192
DIM_VIT  = 32                            # stands in for 768
DIM_VIM  = 16                            # stands in for 384
HEADS    = 4
HEAD_DIM = DIM_VIT // HEADS              # 8
MLP_DIM  = 4 * DIM_VIT                   # 128 (lane-dense)
DEPTH_VIT = 3                            # loop runs DEPTH_VIT - 1 times
NB       = DEPTH_VIT - 1                 # hybrid iterations actually executed
NL       = 2 * NB                        # vim layers actually executed
ATTR     = 6                             # attr_num
CONV_DIM = L                             # args.conv_dim == token count
# mamba mixer dims
D_INNER  = 2 * DIM_VIM                   # 32
D_STATE  = 8
DT_RANK  = 4
D_CONV   = 4

ATTN_SCALE = 1.0 / math.sqrt(HEAD_DIM)
LN_EPS = 1e-5
BN_EPS = 1e-5
MXU_DTYPE = jnp.bfloat16                 # bf16 MXU operands, f32 accumulate

_PARALLEL_B = pltpu.CompilerParams(dimension_semantics=("parallel",))


def _rep(shape):
    """BlockSpec for a grid-invariant parameter (full-array block, stays in VMEM)."""
    zeros = (0,) * len(shape)
    return pl.BlockSpec(shape, lambda b, z=zeros: z)


# ----------------------------- in-kernel helpers ---------------------------

def _mm(a, bmat):
    """MXU matmul: bf16 operands, f32 accumulation."""
    return jnp.dot(a.astype(MXU_DTYPE), bmat.astype(MXU_DTYPE),
                   preferred_element_type=jnp.float32)


def _layernorm(x, g, b, eps=LN_EPS):
    mu = jnp.mean(x, axis=-1, keepdims=True)
    var = jnp.mean(jnp.square(x - mu), axis=-1, keepdims=True)
    return (x - mu) * lax.rsqrt(var + eps) * g + b


def _sigmoid(x):
    return 1.0 / (1.0 + jnp.exp(-x))


def _softplus(x):
    # stable softplus with ops guaranteed to lower on Mosaic (exp/log/abs/max)
    return jnp.maximum(x, 0.0) + jnp.log(1.0 + jnp.exp(-jnp.abs(x)))


# ----------------------------- fused mega-kernel ---------------------------

def _hybrid_kernel(
    patch_ref,
    pvw_ref, pvb_ref, clsv_ref, posv_ref,
    pmw_ref, pmb_ref, clsm_ref, posm_ref,
    ln1g_ref, ln1b_ref, qkvw_ref, qkvb_ref, projw_ref, projb_ref,
    ln2g_ref, ln2b_ref, fc1w_ref, fc1b_ref, fc2w_ref, fc2b_ref,
    nmg_ref, nmb_ref, inw_ref, inb_ref, convw_ref, convb_ref,
    dtw_ref, dtb_ref, xbct_ref, aneg_ref, dskip_ref, outw_ref, outb_ref,
    upw_ref, upb_ref, downw_ref, downb_ref,
    cvw_ref, cvb_ref, cmw_ref, cmb_ref,
    wvw_ref, wvb_ref, wmw_ref, wmb_ref, bnv_ref, bnm_ref,
    lvit_ref, lvim_ref, kd_ref,
    vit_scr, vim_scr, conv_scr, y_scr):

    # ---------------- patch embed + cls + pos (both branches) --------------
    pat = patch_ref[...]                                   # (NPATCH, CPP)
    pv = _mm(pat, pvw_ref[...]) + pvb_ref[...]             # (NPATCH, DIM_VIT)
    pm = _mm(pat, pmw_ref[...]) + pmb_ref[...]             # (NPATCH, DIM_VIM)
    vit_scr[0:1, :] = clsv_ref[...] + posv_ref[0:1, :]
    vit_scr[1:L, :] = pv + posv_ref[1:L, :]
    vim_scr[0:1, :] = clsm_ref[...] + posm_ref[0:1, :]
    vim_scr[1:L, :] = pm + posm_ref[1:L, :]
    x_vit = vit_scr[...]
    x_vim = vim_scr[...]

    residual = jnp.zeros((L, DIM_VIM), jnp.float32)        # residual=None -> 0
    kd_acc = jnp.zeros((1, 1), jnp.float32)

    for i in range(NB):                                    # statically unrolled
        # ---------------------------- ViT block i ------------------------
        h = _layernorm(x_vit, ln1g_ref[i], ln1b_ref[i])
        qkv = _mm(h, qkvw_ref[i]) + qkvb_ref[i]            # (L, 3*DIM_VIT)
        for hd in range(HEADS):
            lo = hd * HEAD_DIM
            q = qkv[:, lo:lo + HEAD_DIM]
            k = qkv[:, DIM_VIT + lo:DIM_VIT + lo + HEAD_DIM]
            v = qkv[:, 2 * DIM_VIT + lo:2 * DIM_VIT + lo + HEAD_DIM]
            s = jnp.einsum("qd,kd->qk", q, k,
                           preferred_element_type=jnp.float32) * ATTN_SCALE
            s = s - jnp.max(s, axis=-1, keepdims=True)
            pr = jnp.exp(s)
            pr = pr * pl.reciprocal(jnp.sum(pr, axis=-1, keepdims=True),
                                    approx=True)
            vit_scr[:, lo:lo + HEAD_DIM] = jnp.einsum(
                "qk,kd->qd", pr, v, preferred_element_type=jnp.float32)
        x_vit = x_vit + _mm(vit_scr[...], projw_ref[i]) + projb_ref[i]
        h2 = _layernorm(x_vit, ln2g_ref[i], ln2b_ref[i])
        # TODO(synk): PyTorch nn.GELU defaults to exact erf; tanh approx used here.
        h2 = jax.nn.gelu(_mm(h2, fc1w_ref[i]) + fc1b_ref[i])
        x_vit = x_vit + _mm(h2, fc2w_ref[i]) + fc2b_ref[i]

        # --------------------- Vim (Mamba) layers 2i, 2i+1 ----------------
        for j in (2 * i, 2 * i + 1):
            residual = x_vim + residual                    # fused add-residual
            hm = _layernorm(residual, nmg_ref[j], nmb_ref[j])
            xz = _mm(hm, inw_ref[j]) + inb_ref[j]          # (L, 2*D_INNER)
            xs = xz[:, :D_INNER]
            z = xz[:, D_INNER:]

            # causal depthwise conv1d (k=D_CONV) + SiLU via zero-padded scratch
            conv_scr[0:D_CONV - 1, :] = jnp.zeros((D_CONV - 1, D_INNER),
                                                  jnp.float32)
            conv_scr[D_CONV - 1:, :] = xs
            cw = convw_ref[j]                               # (D_CONV, D_INNER)
            acc = jnp.zeros((L, D_INNER), jnp.float32) + convb_ref[j]
            for k in range(D_CONV):
                acc = acc + conv_scr[k:k + L, :] * cw[k:k + 1, :]
            xs = acc * _sigmoid(acc)                        # SiLU

            # dt = softplus(xs @ (W_xproj_dt @ W_dtproj) + b)  (folded at init)
            dt = _softplus(_mm(xs, dtw_ref[j]) + dtb_ref[j])    # (L, D_INNER)
            dtu = dt * xs
            a_neg = aneg_ref[j]                             # (D_STATE, D_INNER)
            d_skip = dskip_ref[j]                           # (1, D_INNER)

            # B/C projections produced pre-transposed: (2*D_STATE, L)
            bc_t = jnp.einsum("nd,td->nt", xbct_ref[j], xs,
                              preferred_element_type=jnp.float32)
            b_t = bc_t[:D_STATE, :]                         # (N, L)
            c_t = bc_t[D_STATE:, :]                         # (N, L)

            # selective scan; state vectorized as a single (D_STATE, D_INNER) tile
            hstate = jnp.zeros((D_STATE, D_INNER), jnp.float32)
            for t in range(L):
                dA_t = jnp.exp(dt[t:t + 1, :] * a_neg)                   # (N, Din)
                hstate = dA_t * hstate + b_t[:, t:t + 1] * dtu[t:t + 1, :]
                y_scr[t:t + 1, :] = (jnp.sum(c_t[:, t:t + 1] * hstate,
                                             axis=0, keepdims=True)
                                     + d_skip * xs[t:t + 1, :])
            y = y_scr[...] * (z * _sigmoid(z))              # gate
            x_vim = _mm(y, outw_ref[j]) + outb_ref[j]

        # ----------------------- adapter + KD-MSE partial ------------------
        up = _mm(x_vim, upw_ref[i]) + upb_ref[i]            # (L, DIM_VIT)
        diff = x_vit[1:, :] - up[1:, :]                      # skip cls token
        kd_acc = kd_acc + jnp.sum(jnp.sum(diff * diff, axis=1, keepdims=True),
                                  axis=0, keepdims=True)
        x_vim = x_vim + _mm(up, downw_ref[i]) + downb_ref[i]

    # ------------------------ classification epilogue ----------------------
    # Conv1d(k=1) over tokens: (ATTR, L) @ (L, D)
    cv = _mm(cvw_ref[...], x_vit) + cvb_ref[...]             # (ATTR, DIM_VIT)
    cm = _mm(cmw_ref[...], x_vim) + cmb_ref[...]             # (ATTR, DIM_VIM)
    # per-attribute 1-out Linear heads
    lv = jnp.sum(cv * wvw_ref[...], axis=-1, keepdims=True) + wvb_ref[...]
    lm = jnp.sum(cm * wmw_ref[...], axis=-1, keepdims=True) + wmb_ref[...]
    # BatchNorm1d, eval mode (columns of bn*: gamma, beta, mean, var)
    bnv = bnv_ref[...]
    bnm = bnm_ref[...]
    lv = (lv - bnv[:, 2:3]) * lax.rsqrt(bnv[:, 3:4] + BN_EPS) * bnv[:, 0:1] + bnv[:, 1:2]
    lm = (lm - bnm[:, 2:3]) * lax.rsqrt(bnm[:, 3:4] + BN_EPS) * bnm[:, 0:1] + bnm[:, 1:2]
    lvit_ref[...] = lv
    lvim_ref[...] = lm
    kd_ref[...] = kd_acc


def _hybrid_call(params, patches):
    p = params
    bsz = patches.shape[0]
    in_arrays = [
        patches,
        p["patch_vit_w"], p["patch_vit_b"], p["cls_vit"], p["pos_vit"],
        p["patch_vim_w"], p["patch_vim_b"], p["cls_vim"], p["pos_vim"],
        p["vit_ln1_g"], p["vit_ln1_b"], p["vit_qkv_w"], p["vit_qkv_b"],
        p["vit_proj_w"], p["vit_proj_b"], p["vit_ln2_g"], p["vit_ln2_b"],
        p["vit_fc1_w"], p["vit_fc1_b"], p["vit_fc2_w"], p["vit_fc2_b"],
        p["vim_norm_g"], p["vim_norm_b"], p["vim_in_w"], p["vim_in_b"],
        p["vim_conv_w"], p["vim_conv_b"], p["vim_dt_w"], p["vim_dt_b"],
        p["vim_xbc_wT"], p["vim_A_neg"], p["vim_D"], p["vim_out_w"], p["vim_out_b"],
        p["up_w"], p["up_b"], p["down_w"], p["down_b"],
        p["conv_vis_w"], p["conv_vis_b"], p["conv_vim_w"], p["conv_vim_b"],
        p["wl_vit_w"], p["wl_vit_b"], p["wl_vim_w"], p["wl_vim_b"],
        p["bn_vit"], p["bn_vim"],
    ]
    in_specs = ([pl.BlockSpec((None, NPATCH, CPP), lambda b: (b, 0, 0))]
                + [_rep(a.shape) for a in in_arrays[1:]])
    return pl.pallas_call(
        _hybrid_kernel,
        out_shape=(jax.ShapeDtypeStruct((bsz, ATTR, 1), jnp.float32),
                   jax.ShapeDtypeStruct((bsz, ATTR, 1), jnp.float32),
                   jax.ShapeDtypeStruct((bsz, 1, 1), jnp.float32)),
        grid=(bsz,),
        in_specs=in_specs,
        out_specs=(pl.BlockSpec((None, ATTR, 1), lambda b: (b, 0, 0)),
                   pl.BlockSpec((None, ATTR, 1), lambda b: (b, 0, 0)),
                   pl.BlockSpec((None, 1, 1), lambda b: (b, 0, 0))),
        scratch_shapes=[pltpu.VMEM((L, DIM_VIT), jnp.float32),
                        pltpu.VMEM((L, DIM_VIM), jnp.float32),
                        pltpu.VMEM((L + D_CONV - 1, D_INNER), jnp.float32),
                        pltpu.VMEM((L, D_INNER), jnp.float32)],
        compiler_params=_PARALLEL_B,
    )(*in_arrays)


# ----------------------------- forward --------------------------------------

def forward(params, imgs, text=None, label=None):
    B_ = imgs.shape[0]
    # patch unfold (C, kh, kw flatten order == PyTorch conv-weight flatten order)
    nh = IMG // PATCH
    patches = imgs.reshape(B_, C_IN, nh, PATCH, nh, PATCH)
    patches = patches.transpose(0, 2, 4, 1, 3, 5).reshape(B_, nh * nh, CPP)

    lvit, lvim, kd_parts = _hybrid_call(params, patches)
    logits_vit = lvit[:, :, 0]
    logits_vim = lvim[:, :, 0]
    # mse_loss per iteration is a mean over B*(L-1)*DIM_VIT; KD = mean over iters.
    kd = jnp.sum(kd_parts) / (NB * B_ * (L - 1) * DIM_VIT)
    return logits_vit, logits_vim, kd


# ----------------------------- init ------------------------------------------

def init_params(key):
    keys = iter(jax.random.split(key, 256))

    def rnd(shape, scale=0.02):
        return (scale * jax.random.normal(next(keys), shape)).astype(jnp.float32)

    zeros = lambda s: jnp.zeros(s, jnp.float32)
    ones = lambda s: jnp.ones(s, jnp.float32)

    def bn_pack():
        # columns: gamma, beta, running_mean, running_var (eval mode)
        return jnp.concatenate([ones((ATTR, 1)), zeros((ATTR, 1)),
                                zeros((ATTR, 1)), ones((ATTR, 1))], axis=1)

    # A = -exp(A_log) with A_log = log(arange(1..N)) per inner channel,
    # stored transposed (N, D_INNER) so the scan state layout needs no transposes.
    a_neg_single = -jnp.tile(jnp.arange(1, D_STATE + 1, dtype=jnp.float32)[:, None],
                             (1, D_INNER))
    a_neg = jnp.tile(a_neg_single[None], (NL, 1, 1))

    # x_proj / dt_proj, folded & pre-transposed once at init:
    #   dt_full_w = W_xproj[:, :DT_RANK] @ W_dtproj        (D_INNER, D_INNER)
    #   xbc_wT    = W_xproj[:, DT_RANK:]^T                 (2*D_STATE, D_INNER)
    xproj_w = rnd((NL, D_INNER, DT_RANK + 2 * D_STATE))
    dtproj_w = rnd((NL, DT_RANK, D_INNER))
    dt_full_w = jnp.matmul(xproj_w[:, :, :DT_RANK], dtproj_w)
    xbc_wT = jnp.swapaxes(xproj_w[:, :, DT_RANK:], 1, 2)

    params = dict(
        # token / patch embeddings (conv weight flattened to (C*P*P, D) at init)
        cls_vit=rnd((1, DIM_VIT)), pos_vit=rnd((L, DIM_VIT)),
        cls_vim=rnd((1, DIM_VIM)), pos_vim=rnd((L, DIM_VIM)),
        patch_vit_w=rnd((DIM_VIT, C_IN, PATCH, PATCH)).reshape(DIM_VIT, CPP).T,
        patch_vit_b=zeros((1, DIM_VIT)),
        patch_vim_w=rnd((DIM_VIM, C_IN, PATCH, PATCH)).reshape(DIM_VIM, CPP).T,
        patch_vim_b=zeros((1, DIM_VIM)),
        # ViT blocks, stacked over the NB blocks actually used by forward
        vit_ln1_g=ones((NB, 1, DIM_VIT)), vit_ln1_b=zeros((NB, 1, DIM_VIT)),
        vit_qkv_w=rnd((NB, DIM_VIT, 3 * DIM_VIT)), vit_qkv_b=zeros((NB, 1, 3 * DIM_VIT)),
        vit_proj_w=rnd((NB, DIM_VIT, DIM_VIT)), vit_proj_b=zeros((NB, 1, DIM_VIT)),
        vit_ln2_g=ones((NB, 1, DIM_VIT)), vit_ln2_b=zeros((NB, 1, DIM_VIT)),
        vit_fc1_w=rnd((NB, DIM_VIT, MLP_DIM)), vit_fc1_b=zeros((NB, 1, MLP_DIM)),
        vit_fc2_w=rnd((NB, MLP_DIM, DIM_VIT)), vit_fc2_b=zeros((NB, 1, DIM_VIT)),
        # Vim (Mamba) layers, stacked over the NL layers actually used
        vim_norm_g=ones((NL, 1, DIM_VIM)), vim_norm_b=zeros((NL, 1, DIM_VIM)),
        vim_in_w=rnd((NL, DIM_VIM, 2 * D_INNER)), vim_in_b=zeros((NL, 1, 2 * D_INNER)),
        vim_conv_w=rnd((NL, D_CONV, D_INNER), 0.1), vim_conv_b=zeros((NL, 1, D_INNER)),
        vim_dt_w=dt_full_w, vim_dt_b=rnd((NL, 1, D_INNER), 0.01),
        vim_xbc_wT=xbc_wT, vim_A_neg=a_neg, vim_D=ones((NL, 1, D_INNER)),
        vim_out_w=rnd((NL, D_INNER, DIM_VIM)), vim_out_b=zeros((NL, 1, DIM_VIM)),
        # up/down adapters (only the NB used slots are materialized)
        up_w=rnd((NB, DIM_VIM, DIM_VIT)), up_b=zeros((NB, 1, DIM_VIT)),
        down_w=rnd((NB, DIM_VIT, DIM_VIM)), down_b=zeros((NB, 1, DIM_VIM)),
        # classification epilogue
        conv_vis_w=rnd((ATTR, CONV_DIM)), conv_vis_b=zeros((ATTR, 1)),
        conv_vim_w=rnd((ATTR, CONV_DIM)), conv_vim_b=zeros((ATTR, 1)),
        wl_vit_w=rnd((ATTR, DIM_VIT)), wl_vit_b=zeros((ATTR, 1)),
        wl_vim_w=rnd((ATTR, DIM_VIM)), wl_vim_b=zeros((ATTR, 1)),
        bn_vit=bn_pack(), bn_vim=bn_pack(),
    )
    return params


# ----------------------------- main ------------------------------------------

if __name__ == "__main__":
    root = jax.random.PRNGKey(0)
    k_img, k_param = jax.random.split(root)
    imgs = jax.random.normal(k_img, (B, C_IN, IMG, IMG), jnp.float32)
    text = jnp.zeros((B, ATTR), jnp.float32)   # unused by forward (as in reference)
    params = init_params(k_param)

    fwd = jax.jit(forward)
    logits_vit, logits_vim, kd = fwd(params, imgs, text)
    jax.block_until_ready((logits_vit, logits_vim, kd))

    assert logits_vit.shape == (B, ATTR)
    assert logits_vim.shape == (B, ATTR)
    assert bool(jnp.all(jnp.isfinite(logits_vit)))
    assert bool(jnp.all(jnp.isfinite(logits_vim)))
    assert bool(jnp.isfinite(kd))
    print("KERNEL_OK")
</pallas_src>

<mosaic_0001>
module attributes {stable_mosaic.version = 11 : i64} {
  func.func @_hybrid_kernel(%arg0: i32, %arg1: memref<1x4x192xf32, #tpu.memory_space<vmem>>, %arg2: memref<192x32xf32, #tpu.memory_space<vmem>>, %arg3: memref<1x32xf32, #tpu.memory_space<vmem>>, %arg4: memref<1x32xf32, #tpu.memory_space<vmem>>, %arg5: memref<5x32xf32, #tpu.memory_space<vmem>>, %arg6: memref<192x16xf32, #tpu.memory_space<vmem>>, %arg7: memref<1x16xf32, #tpu.memory_space<vmem>>, %arg8: memref<1x16xf32, #tpu.memory_space<vmem>>, %arg9: memref<5x16xf32, #tpu.memory_space<vmem>>, %arg10: memref<2x1x32xf32, #tpu.memory_space<vmem>>, %arg11: memref<2x1x32xf32, #tpu.memory_space<vmem>>, %arg12: memref<2x32x96xf32, #tpu.memory_space<vmem>>, %arg13: memref<2x1x96xf32, #tpu.memory_space<vmem>>, %arg14: memref<2x32x32xf32, #tpu.memory_space<vmem>>, %arg15: memref<2x1x32xf32, #tpu.memory_space<vmem>>, %arg16: memref<2x1x32xf32, #tpu.memory_space<vmem>>, %arg17: memref<2x1x32xf32, #tpu.memory_space<vmem>>, %arg18: memref<2x32x128xf32, #tpu.memory_space<vmem>>, %arg19: memref<2x1x128xf32, #tpu.memory_space<vmem>>, %arg20: memref<2x128x32xf32, #tpu.memory_space<vmem>>, %arg21: memref<2x1x32xf32, #tpu.memory_space<vmem>>, %arg22: memref<4x1x16xf32, #tpu.memory_space<vmem>>, %arg23: memref<4x1x16xf32, #tpu.memory_space<vmem>>, %arg24: memref<4x16x64xf32, #tpu.memory_space<vmem>>, %arg25: memref<4x1x64xf32, #tpu.memory_space<vmem>>, %arg26: memref<4x4x32xf32, #tpu.memory_space<vmem>>, %arg27: memref<4x1x32xf32, #tpu.memory_space<vmem>>, %arg28: memref<4x32x32xf32, #tpu.memory_space<vmem>>, %arg29: memref<4x1x32xf32, #tpu.memory_space<vmem>>, %arg30: memref<4x16x32xf32, #tpu.memory_space<vmem>>, %arg31: memref<4x8x32xf32, #tpu.memory_space<vmem>>, %arg32: memref<4x1x32xf32, #tpu.memory_space<vmem>>, %arg33: memref<4x32x16xf32, #tpu.memory_space<vmem>>, %arg34: memref<4x1x16xf32, #tpu.memory_space<vmem>>, %arg35: memref<2x16x32xf32, #tpu.memory_space<vmem>>, %arg36: memref<2x1x32xf32, #tpu.memory_space<vmem>>, %arg37: memref<2x32x16xf32, #tpu.memory_space<vmem>>, %arg38: memref<2x1x16xf32, #tpu.memory_space<vmem>>, %arg39: memref<6x5xf32, #tpu.memory_space<vmem>>, %arg40: memref<6x1xf32, #tpu.memory_space<vmem>>, %arg41: memref<6x5xf32, #tpu.memory_space<vmem>>, %arg42: memref<6x1xf32, #tpu.memory_space<vmem>>, %arg43: memref<6x32xf32, #tpu.memory_space<vmem>>, %arg44: memref<6x1xf32, #tpu.memory_space<vmem>>, %arg45: memref<6x16xf32, #tpu.memory_space<vmem>>, %arg46: memref<6x1xf32, #tpu.memory_space<vmem>>, %arg47: memref<6x4xf32, #tpu.memory_space<vmem>>, %arg48: memref<6x4xf32, #tpu.memory_space<vmem>>, %arg49: memref<1x6x1xf32, #tpu.memory_space<vmem>>, %arg50: memref<1x6x1xf32, #tpu.memory_space<vmem>>, %arg51: memref<1x1x1xf32, #tpu.memory_space<vmem>>, %arg52: memref<5x32xf32, #tpu.memory_space<vmem>>, %arg53: memref<5x16xf32, #tpu.memory_space<vmem>>, %arg54: memref<8x32xf32, #tpu.memory_space<vmem>>, %arg55: memref<5x32xf32, #tpu.memory_space<vmem>>) attributes {dimension_semantics = [#tpu.dimension_semantics<parallel>], iteration_bounds = array<i64: 2>, scalar_prefetch = 0 : i64, scratch_operands = 4 : i64, tpu.core_type = #tpu.core_type<tc>, window_params = [{transform_indices = @transform_0, window_bounds = array<i64: 1, 4, 192>}, {pipeline_mode = #tpu.pipeline_mode<synchronous>, transform_indices = @transform_1, window_bounds = array<i64: 192, 32>}, {pipeline_mode = #tpu.pipeline_mode<synchronous>, transform_indices = @transform_2, window_bounds = array<i64: 1, 32>}, {pipeline_mode = #tpu.pipeline_mode<synchronous>, transform_indices = @transform_3, window_bounds = array<i64: 1, 32>}, {pipeline_mode = #tpu.pipeline_mode<synchronous>, transform_indices = @transform_4, window_bounds = array<i64: 5, 32>}, {pipeline_mode = #tpu.pipeline_mode<synchronous>, transform_indices = @transform_5, window_bounds = array<i64: 192, 16>}, {pipeline_mode = #tpu.pipeline_mode<synchronous>, transform_indices = @transform_6, window_bounds = array<i64: 1, 16>}, {pipeline_mode = #tpu.pipeline_mode<synchronous>, transform_indices = @transform_7, window_bounds = array<i64: 1, 16>}, {pipeline_mode = #tpu.pipeline_mode<synchronous>, transform_indices = @transform_8, window_bounds = array<i64: 5, 16>}, {pipeline_mode = #tpu.pipeline_mode<synchronous>, transform_indices = @transform_9, window_bounds = array<i64: 2, 1, 32>}, {pipeline_mode = #tpu.pipeline_mode<synchronous>, transform_indices = @transform_10, window_bounds = array<i64: 2, 1, 32>}, {pipeline_mode = #tpu.pipeline_mode<synchronous>, transform_indices = @transform_11, window_bounds = array<i64: 2, 32, 96>}, {pipeline_mode = #tpu.pipeline_mode<synchronous>, transform_indices = @transform_12, window_bounds = array<i64: 2, 1, 96>}, {pipeline_mode = #tpu.pipeline_mode<synchronous>, transform_indices = @transform_13, window_bounds = array<i64: 2, 32, 32>}, {pipeline_mode = #tpu.pipeline_mode<synchronous>, transform_indices = @transform_14, window_bounds = array<i64: 2, 1, 32>}, {pipeline_mode = #tpu.pipeline_mode<synchronous>, transform_indices = @transform_15, window_bounds = array<i64: 2, 1, 32>}, {pipeline_mode = #tpu.pipeline_mode<synchronous>, transform_indices = @transform_16, window_bounds = array<i64: 2, 1, 32>}, {pipeline_mode = #tpu.pipeline_mode<synchronous>, transform_indices = @transform_17, window_bounds = array<i64: 2, 32, 128>}, {pipeline_mode = #tpu.pipeline_mode<synchronous>, transform_indices = @transform_18, window_bounds = array<i64: 2, 1, 128>}, {pipeline_mode = #tpu.pipeline_mode<synchronous>, transform_indices = @transform_19, window_bounds = array<i64: 2, 128, 32>}, {pipeline_mode = #tpu.pipeline_mode<synchronous>, transform_indices = @transform_20, window_bounds = array<i64: 2, 1, 32>}, {pipeline_mode = #tpu.pipeline_mode<synchronous>, transform_indices = @transform_21, window_bounds = array<i64: 4, 1, 16>}, {pipeline_mode = #tpu.pipeline_mode<synchronous>, transform_indices = @transform_22, window_bounds = array<i64: 4, 1, 16>}, {pipeline_mode = #tpu.pipeline_mode<synchronous>, transform_indices = @transform_23, window_bounds = array<i64: 4, 16, 64>}, {pipeline_mode = #tpu.pipeline_mode<synchronous>, transform_indices = @transform_24, window_bounds = array<i64: 4, 1, 64>}, {pipeline_mode = #tpu.pipeline_mode<synchronous>, transform_indices = @transform_25, window_bounds = array<i64: 4, 4, 32>}, {pipeline_mode = #tpu.pipeline_mode<synchronous>, transform_indices = @transform_26, window_bounds = array<i64: 4, 1, 32>}, {pipeline_mode = #tpu.pipeline_mode<synchronous>, transform_indices = @transform_27, window_bounds = array<i64: 4, 32, 32>}, {pipeline_mode = #tpu.pipeline_mode<synchronous>, transform_indices = @transform_28, window_bounds = array<i64: 4, 1, 32>}, {pipeline_mode = #tpu.pipeline_mode<synchronous>, transform_indices = @transform_29, window_bounds = array<i64: 4, 16, 32>}, {pipeline_mode = #tpu.pipeline_mode<synchronous>, transform_indices = @transform_30, window_bounds = array<i64: 4, 8, 32>}, {pipeline_mode = #tpu.pipeline_mode<synchronous>, transform_indices = @transform_31, window_bounds = array<i64: 4, 1, 32>}, {pipeline_mode = #tpu.pipeline_mode<synchronous>, transform_indices = @transform_32, window_bounds = array<i64: 4, 32, 16>}, {pipeline_mode = #tpu.pipeline_mode<synchronous>, transform_indices = @transform_33, window_bounds = array<i64: 4, 1, 16>}, {pipeline_mode = #tpu.pipeline_mode<synchronous>, transform_indices = @transform_34, window_bounds = array<i64: 2, 16, 32>}, {pipeline_mode = #tpu.pipeline_mode<synchronous>, transform_indices = @transform_35, window_bounds = array<i64: 2, 1, 32>}, {pipeline_mode = #tpu.pipeline_mode<synchronous>, transform_indices = @transform_36, window_bounds = array<i64: 2, 32, 16>}, {pipeline_mode = #tpu.pipeline_mode<synchronous>, transform_indices = @transform_37, window_bounds = array<i64: 2, 1, 16>}, {pipeline_mode = #tpu.pipeline_mode<synchronous>, transform_indices = @transform_38, window_bounds = array<i64: 6, 5>}, {pipeline_mode = #tpu.pipeline_mode<synchronous>, transform_indices = @transform_39, window_bounds = array<i64: 6, 1>}, {pipeline_mode = #tpu.pipeline_mode<synchronous>, transform_indices = @transform_40, window_bounds = array<i64: 6, 5>}, {pipeline_mode = #tpu.pipeline_mode<synchronous>, transform_indices = @transform_41, window_bounds = array<i64: 6, 1>}, {pipeline_mode = #tpu.pipeline_mode<synchronous>, transform_indices = @transform_42, window_bounds = array<i64: 6, 32>}, {pipeline_mode = #tpu.pipeline_mode<synchronous>, transform_indices = @transform_43, window_bounds = array<i64: 6, 1>}, {pipeline_mode = #tpu.pipeline_mode<synchronous>, transform_indices = @transform_44, window_bounds = array<i64: 6, 16>}, {pipeline_mode = #tpu.pipeline_mode<synchronous>, transform_indices = @transform_45, window_bounds = array<i64: 6, 1>}, {pipeline_mode = #tpu.pipeline_mode<synchronous>, transform_indices = @transform_46, window_bounds = array<i64: 6, 4>}, {pipeline_mode = #tpu.pipeline_mode<synchronous>, transform_indices = @transform_47, window_bounds = array<i64: 6, 4>}, {transform_indices = @transform_48, window_bounds = array<i64: 1, 6, 1>}, {transform_indices = @transform_49, window_bounds = array<i64: 1, 6, 1>}, {transform_indices = @transform_50, window_bounds = array<i64: 1, 1, 1>}]} {
    %c0 = arith.constant 0 : index
    %c0_0 = arith.constant 0 : index
    %c0_1 = arith.constant 0 : index
    %0 = vector.load %arg1[%c0, %c0_0, %c0_1] : memref<1x4x192xf32, #tpu.memory_space<vmem>>, vector<1x4x192xf32>
    %1 = vector.shape_cast %0 : vector<1x4x192xf32> to vector<4x192xf32>
    %c0_2 = arith.constant 0 : index
    %c0_3 = arith.constant 0 : index
    %2 = vector.load %arg2[%c0_2, %c0_3] : memref<192x32xf32, #tpu.memory_space<vmem>>, vector<192x32xf32>
    %3 = arith.truncf %1 : vector<4x192xf32> to vector<4x192xbf16>
    %4 = arith.truncf %2 : vector<192x32xf32> to vector<192x32xbf16>
    %cst = arith.constant dense<0.000000e+00> : vector<4x32xf32>
    %5 = tpu.matmul %3, %4, %cst {dimension_numbers = #tpu.dot_dimension_numbers<[1], [0], [0], [1], [0, 0, 1, 1], [], []>} : vector<4x192xbf16>, vector<192x32xbf16>, vector<4x32xf32> -> vector<4x32xf32>
    %c0_4 = arith.constant 0 : index
    %c0_5 = arith.constant 0 : index
    %6 = vector.load %arg3[%c0_4, %c0_5] : memref<1x32xf32, #tpu.memory_space<vmem>>, vector<1x32xf32>
    %7 = vector.broadcast %6 : vector<1x32xf32> to vector<4x32xf32>
    %8 = arith.addf %5, %7 : vector<4x32xf32>
    %c0_6 = arith.constant 0 : index
    %c0_7 = arith.constant 0 : index
    %9 = vector.load %arg6[%c0_6, %c0_7] : memref<192x16xf32, #tpu.memory_space<vmem>>, vector<192x16xf32>
    %10 = arith.truncf %1 : vector<4x192xf32> to vector<4x192xbf16>
    %11 = arith.truncf %9 : vector<192x16xf32> to vector<192x16xbf16>
    %cst_8 = arith.constant dense<0.000000e+00> : vector<4x16xf32>
    %12 = tpu.matmul %10, %11, %cst_8 {dimension_numbers = #tpu.dot_dimension_numbers<[1], [0], [0], [1], [0, 0, 1, 1], [], []>} : vector<4x192xbf16>, vector<192x16xbf16>, vector<4x16xf32> -> vector<4x16xf32>
    %c0_9 = arith.constant 0 : index
    %c0_10 = arith.constant 0 : index
    %13 = vector.load %arg7[%c0_9, %c0_10] : memref<1x16xf32, #tpu.memory_space<vmem>>, vector<1x16xf32>
    %14 = vector.broadcast %13 : vector<1x16xf32> to vector<4x16xf32>
    %15 = arith.addf %12, %14 : vector<4x16xf32>
    %c0_11 = arith.constant 0 : index
    %c0_12 = arith.constant 0 : index
    %16 = vector.load %arg4[%c0_11, %c0_12] : memref<1x32xf32, #tpu.memory_space<vmem>>, vector<1x32xf32>
    %c0_13 = arith.constant 0 : index
    %c0_14 = arith.constant 0 : index
    %17 = vector.load %arg5[%c0_13, %c0_14] : memref<5x32xf32, #tpu.memory_space<vmem>>, vector<1x32xf32>
    %18 = arith.addf %16, %17 : vector<1x32xf32>
    %c0_15 = arith.constant 0 : index
    %c0_16 = arith.constant 0 : index
    %19 = vector.load %arg52[%c0_15, %c0_16] : memref<5x32xf32, #tpu.memory_space<vmem>>, vector<1x32xf32>
    tpu.vector_store %arg52[%c0_15, %c0_16], %18 {strides = array<i32>} : memref<5x32xf32, #tpu.memory_space<vmem>>, vector<1x32xf32>,
    %c1 = arith.constant 1 : index
    %c0_17 = arith.constant 0 : index
    %20 = vector.load %arg5[%c1, %c0_17] : memref<5x32xf32, #tpu.memory_space<vmem>>, vector<4x32xf32>
    %21 = arith.addf %8, %20 : vector<4x32xf32>
    %c1_18 = arith.constant 1 : index
    %c0_19 = arith.constant 0 : index
    %22 = vector.load %arg52[%c1_18, %c0_19] : memref<5x32xf32, #tpu.memory_space<vmem>>, vector<4x32xf32>
    tpu.vector_store %arg52[%c1_18, %c0_19], %21 {strides = array<i32>} : memref<5x32xf32, #tpu.memory_space<vmem>>, vector<4x32xf32>,
    %c0_20 = arith.constant 0 : index
    %c0_21 = arith.constant 0 : index
    %23 = vector.load %arg8[%c0_20, %c0_21] : memref<1x16xf32, #tpu.memory_space<vmem>>, vector<1x16xf32>
    %c0_22 = arith.constant 0 : index
    %c0_23 = arith.constant 0 : index
    %24 = vector.load %arg9[%c0_22, %c0_23] : memref<5x16xf32, #tpu.memory_space<vmem>>, vector<1x16xf32>
    %25 = arith.addf %23, %24 : vector<1x16xf32>
    %c0_24 = arith.constant 0 : index
    %c0_25 = arith.constant 0 : index
    %26 = vector.load %arg53[%c0_24, %c0_25] : memref<5x16xf32, #tpu.memory_space<vmem>>, vector<1x16xf32>
    tpu.vector_store %arg53[%c0_24, %c0_25], %25 {strides = array<i32>} : memref<5x16xf32, #tpu.memory_space<vmem>>, vector<1x16xf32>,
    %c1_26 = arith.constant 1 : index
    %c0_27 = arith.constant 0 : index
    %27 = vector.load %arg9[%c1_26, %c0_27] : memref<5x16xf32, #tpu.memory_space<vmem>>, vector<4x16xf32>
    %28 = arith.addf %15, %27 : vector<4x16xf32>
    %c1_28 = arith.constant 1 : index
    %c0_29 = arith.constant 0 : index
    %29 = vector.load %arg53[%c1_28, %c0_29] : memref<5x16xf32, #tpu.memory_space<vmem>>, vector<4x16xf32>
    tpu.vector_store %arg53[%c1_28, %c0_29], %28 {strides = array<i32>} : memref<5x16xf32, #tpu.memory_space<vmem>>, vector<4x16xf32>,
    %c0_30 = arith.constant 0 : index
    %c0_31 = arith.constant 0 : index
    %30 = vector.load %arg52[%c0_30, %c0_31] : memref<5x32xf32, #tpu.memory_space<vmem>>, vector<5x32xf32>
    %c0_32 = arith.constant 0 : index
    %c0_33 = arith.constant 0 : index
    %31 = vector.load %arg53[%c0_32, %c0_33] : memref<5x16xf32, #tpu.memory_space<vmem>>, vector<5x16xf32>
    %cst_34 = arith.constant 0.000000e+00 : f32
    %32 = vector.broadcast %cst_34 : f32 to vector<5x16xf32>
    %cst_35 = arith.constant 0.000000e+00 : f32
    %33 = vector.broadcast %cst_35 : f32 to vector<1x1xf32>
    %c0_36 = arith.constant 0 : index
    %c0_37 = arith.constant 0 : index
    %c0_38 = arith.constant 0 : index
    %34 = vector.load %arg10[%c0_36, %c0_37, %c0_38] : memref<2x1x32xf32, #tpu.memory_space<vmem>>, vector<1x1x32xf32>
    %35 = vector.shape_cast %34 : vector<1x1x32xf32> to vector<1x32xf32>
    %c0_39 = arith.constant 0 : index
    %c0_40 = arith.constant 0 : index
    %c0_41 = arith.constant 0 : index
    %36 = vector.load %arg11[%c0_39, %c0_40, %c0_41] : memref<2x1x32xf32, #tpu.memory_space<vmem>>, vector<1x1x32xf32>
    %37 = vector.shape_cast %36 : vector<1x1x32xf32> to vector<1x32xf32>
    %cst_42 = arith.constant dense<0.000000e+00> : vector<5xf32>
    %38 = vector.multi_reduction <add>, %30, %cst_42 [1] : vector<5x32xf32> to vector<5xf32>
    %39 = vector.shape_cast %38 : vector<5xf32> to vector<5x1xf32>
    %cst_43 = arith.constant 3.200000e+01 : f32
    %40 = vector.broadcast %cst_43 : f32 to vector<5x1xf32>
    %41 = arith.divf %39, %40 : vector<5x1xf32>
    %42 = vector.broadcast %41 : vector<5x1xf32> to vector<5x32xf32>
    %43 = arith.subf %30, %42 : vector<5x32xf32>
    %44 = arith.mulf %43, %43 : vector<5x32xf32>
    %cst_44 = arith.constant dense<0.000000e+00> : vector<5xf32>
    %45 = vector.multi_reduction <add>, %44, %cst_44 [1] : vector<5x32xf32> to vector<5xf32>
    %46 = vector.shape_cast %45 : vector<5xf32> to vector<5x1xf32>
    %cst_45 = arith.constant 3.200000e+01 : f32
    %47 = vector.broadcast %cst_45 : f32 to vector<5x1xf32>
    %48 = arith.divf %46, %47 : vector<5x1xf32>
    %49 = vector.broadcast %41 : vector<5x1xf32> to vector<5x32xf32>
    %50 = arith.subf %30, %49 : vector<5x32xf32>
    %cst_46 = arith.constant 9.99999974E-6 : f32
    %51 = vector.broadcast %cst_46 : f32 to vector<5x1xf32>
    %52 = arith.addf %48, %51 : vector<5x1xf32>
    %53 = math.rsqrt %52 : vector<5x1xf32>
    %54 = vector.broadcast %53 : vector<5x1xf32> to vector<5x32xf32>
    %55 = arith.mulf %50, %54 : vector<5x32xf32>
    %56 = vector.broadcast %35 : vector<1x32xf32> to vector<5x32xf32>
    %57 = arith.mulf %55, %56 : vector<5x32xf32>
    %58 = vector.broadcast %37 : vector<1x32xf32> to vector<5x32xf32>
    %59 = arith.addf %57, %58 : vector<5x32xf32>
    %c0_47 = arith.constant 0 : index
    %c0_48 = arith.constant 0 : index
    %c0_49 = arith.constant 0 : index
    %60 = vector.load %arg12[%c0_47, %c0_48, %c0_49] : memref<2x32x96xf32, #tpu.memory_space<vmem>>, vector<1x32x96xf32>
    %61 = vector.shape_cast %60 : vector<1x32x96xf32> to vector<32x96xf32>
    %62 = arith.truncf %59 : vector<5x32xf32> to vector<5x32xbf16>
    %63 = arith.truncf %61 : vector<32x96xf32> to vector<32x96xbf16>
    %cst_50 = arith.constant dense<0.000000e+00> : vector<5x96xf32>
    %64 = tpu.matmul %62, %63, %cst_50 {dimension_numbers = #tpu.dot_dimension_numbers<[1], [0], [0], [1], [0, 0, 1, 1], [], []>} : vector<5x32xbf16>, vector<32x96xbf16>, vector<5x96xf32> -> vector<5x96xf32>
    %c0_51 = arith.constant 0 : index
    %c0_52 = arith.constant 0 : index
    %c0_53 = arith.constant 0 : index
    %65 = vector.load %arg13[%c0_51, %c0_52, %c0_53] : memref<2x1x96xf32, #tpu.memory_space<vmem>>, vector<1x1x96xf32>
    %66 = vector.shape_cast %65 : vector<1x1x96xf32> to vector<1x96xf32>
    %67 = vector.broadcast %66 : vector<1x96xf32> to vector<5x96xf32>
    %68 = arith.addf %64, %67 : vector<5x96xf32>
    %69 = vector.extract_strided_slice %68 {offsets = [0, 0], sizes = [5, 8], strides = [1, 1]} : vector<5x96xf32> to vector<5x8xf32>
    %70 = vector.extract_strided_slice %68 {offsets = [0, 32], sizes = [5, 8], strides = [1, 1]} : vector<5x96xf32> to vector<5x8xf32>
    %71 = vector.extract_strided_slice %68 {offsets = [0, 64], sizes = [5, 8], strides = [1, 1]} : vector<5x96xf32> to vector<5x8xf32>
    "tpu.trace_start"() <{level = 10 : i32, message = "qd,kd->qk"}> : () -> ()
    %cst_54 = arith.constant dense<0.000000e+00> : vector<5x5xf32>
    %72 = tpu.matmul %69, %70, %cst_54 {dimension_numbers = #tpu.dot_dimension_numbers<[1], [1], [0], [0], [0, 0, 1, 0], [], []>} : vector<5x8xf32>, vector<5x8xf32>, vector<5x5xf32> -> vector<5x5xf32>
    "tpu.trace_stop"() : () -> ()
    %cst_55 = arith.constant 0.353553385 : f32
    %73 = vector.broadcast %cst_55 : f32 to vector<5x5xf32>
    %74 = arith.mulf %72, %73 : vector<5x5xf32>
    %cst_56 = arith.constant dense<0xFF800000> : vector<5xf32>
    %75 = vector.multi_reduction <maximumf>, %74, %cst_56 [1] : vector<5x5xf32> to vector<5xf32>
    %76 = vector.shape_cast %75 : vector<5xf32> to vector<5x1xf32>
    %77 = vector.broadcast %76 : vector<5x1xf32> to vector<5x5xf32>
    %78 = arith.subf %74, %77 : vector<5x5xf32>
    %79 = math.exp %78 : vector<5x5xf32>
    %cst_57 = arith.constant dense<0.000000e+00> : vector<5xf32>
    %80 = vector.multi_reduction <add>, %79, %cst_57 [1] : vector<5x5xf32> to vector<5xf32>
    %81 = vector.shape_cast %80 : vector<5xf32> to vector<5x1xf32>
    %82 = tpu.reciprocal %81 {approx = true} : vector<5x1xf32> -> vector<5x1xf32>
    %83 = vector.broadcast %82 : vector<5x1xf32> to vector<5x5xf32>
    %84 = arith.mulf %79, %83 : vector<5x5xf32>
    "tpu.trace_start"() <{level = 10 : i32, message = "qk,kd->qd"}> : () -> ()
    %cst_58 = arith.constant dense<0.000000e+00> : vector<5x8xf32>
    %85 = tpu.matmul %84, %71, %cst_58 {dimension_numbers = #tpu.dot_dimension_numbers<[1], [0], [0], [1], [0, 0, 1, 1], [], []>} : vector<5x5xf32>, vector<5x8xf32>, vector<5x8xf32> -> vector<5x8xf32>
    "tpu.trace_stop"() : () -> ()
    %c0_59 = arith.constant 0 : index
    %c0_60 = arith.constant 0 : index
    %86 = vector.load %arg52[%c0_59, %c0_60] : memref<5x32xf32, #tpu.memory_space<vmem>>, vector<5x8xf32>
    tpu.vector_store %arg52[%c0_59, %c0_60], %85 {strides = array<i32>} : memref<5x32xf32, #tpu.memory_space<vmem>>, vector<5x8xf32>,
    %87 = vector.extract_strided_slice %68 {offsets = [0, 8], sizes = [5, 8], strides = [1, 1]} : vector<5x96xf32> to vector<5x8xf32>
    %88 = vector.extract_strided_slice %68 {offsets = [0, 40], sizes = [5, 8], strides = [1, 1]} : vector<5x96xf32> to vector<5x8xf32>
    %89 = vector.extract_strided_slice %68 {offsets = [0, 72], sizes = [5, 8], strides = [1, 1]} : vector<5x96xf32> to vector<5x8xf32>
    "tpu.trace_start"() <{level = 10 : i32, message = "qd,kd->qk"}> : () -> ()
    %cst_61 = arith.constant dense<0.000000e+00> : vector<5x5xf32>
    %90 = tpu.matmul %87, %88, %cst_61 {dimension_numbers = #tpu.dot_dimension_numbers<[1], [1], [0], [0], [0, 0, 1, 0], [], []>} : vector<5x8xf32>, vector<5x8xf32>, vector<5x5xf32> -> vector<5x5xf32>
    "tpu.trace_stop"() : () -> ()
    %cst_62 = arith.constant 0.353553385 : f32
    %91 = vector.broadcast %cst_62 : f32 to vector<5x5xf32>
    %92 = arith.mulf %90, %91 : vector<5x5xf32>
    %cst_63 = arith.constant dense<0xFF800000> : vector<5xf32>
    %93 = vector.multi_reduction <maximumf>, %92, %cst_63 [1] : vector<5x5xf32> to vector<5xf32>
    %94 = vector.shape_cast %93 : vector<5xf32> to vector<5x1xf32>
    %95 = vector.broadcast %94 : vector<5x1xf32> to vector<5x5xf32>
    %96 = arith.subf %92, %95 : vector<5x5xf32>
    %97 = math.exp %96 : vector<5x5xf32>
    %cst_64 = arith.constant dense<0.000000e+00> : vector<5xf32>
    %98 = vector.multi_reduction <add>, %97, %cst_64 [1] : vector<5x5xf32> to vector<5xf32>
    %99 = vector.shape_cast %98 : vector<5xf32> to vector<5x1xf32>
    %100 = tpu.reciprocal %99 {approx = true} : vector<5x1xf32> -> vector<5x1xf32>
    %101 = vector.broadcast %100 : vector<5x1xf32> to vector<5x5xf32>
    %102 = arith.mulf %97, %101 : vector<5x5xf32>
    "tpu.trace_start"() <{level = 10 : i32, message = "qk,kd->qd"}> : () -> ()
    %cst_65 = arith.constant dense<0.000000e+00> : vector<5x8xf32>
    %103 = tpu.matmul %102, %89, %cst_65 {dimension_numbers = #tpu.dot_dimension_numbers<[1], [0], [0], [1], [0, 0, 1, 1], [], []>} : vector<5x5xf32>, vector<5x8xf32>, vector<5x8xf32> -> vector<5x8xf32>
    "tpu.trace_stop"() : () -> ()
    %c0_66 = arith.constant 0 : index
    %c8 = arith.constant 8 : index
    %104 = vector.load %arg52[%c0_66, %c8] : memref<5x32xf32, #tpu.memory_space<vmem>>, vector<5x8xf32>
    tpu.vector_store %arg52[%c0_66, %c8], %103 {strides = array<i32>} : memref<5x32xf32, #tpu.memory_space<vmem>>, vector<5x8xf32>,
    %105 = vector.extract_strided_slice %68 {offsets = [0, 16], sizes = [5, 8], strides = [1, 1]} : vector<5x96xf32> to vector<5x8xf32>
    %106 = vector.extract_strided_slice %68 {offsets = [0, 48], sizes = [5, 8], strides = [1, 1]} : vector<5x96xf32> to vector<5x8xf32>
    %107 = vector.extract_strided_slice %68 {offsets = [0, 80], sizes = [5, 8], strides = [1, 1]} : vector<5x96xf32> to vector<5x8xf32>
    "tpu.trace_start"() <{level = 10 : i32, message = "qd,kd->qk"}> : () -> ()
    %cst_67 = arith.constant dense<0.000000e+00> : vector<5x5xf32>
    %108 = tpu.matmul %105, %106, %cst_67 {dimension_numbers = #tpu.dot_dimension_numbers<[1], [1], [0], [0], [0, 0, 1, 0], [], []>} : vector<5x8xf32>, vector<5x8xf32>, vector<5x5xf32> -> vector<5x5xf32>
    "tpu.trace_stop"() : () -> ()
    %cst_68 = arith.constant 0.353553385 : f32
    %109 = vector.broadcast %cst_68 : f32 to vector<5x5xf32>
    %110 = arith.mulf %108, %109 : vector<5x5xf32>
    %cst_69 = arith.constant dense<0xFF800000> : vector<5xf32>
    %111 = vector.multi_reduction <maximumf>, %110, %cst_69 [1] : vector<5x5xf32> to vector<5xf32>
    %112 = vector.shape_cast %111 : vector<5xf32> to vector<5x1xf32>
    %113 = vector.broadcast %112 : vector<5x1xf32> to vector<5x5xf32>
    %114 = arith.subf %110, %113 : vector<5x5xf32>
    %115 = math.exp %114 : vector<5x5xf32>
    %cst_70 = arith.constant dense<0.000000e+00> : vector<5xf32>
    %116 = vector.multi_reduction <add>, %115, %cst_70 [1] : vector<5x5xf32> to vector<5xf32>
    %117 = vector.shape_cast %116 : vector<5xf32> to vector<5x1xf32>
    %118 = tpu.reciprocal %117 {approx = true} : vector<5x1xf32> -> vector<5x1xf32>
    %119 = vector.broadcast %118 : vector<5x1xf32> to vector<5x5xf32>
    %120 = arith.mulf %115, %119 : vector<5x5xf32>
    "tpu.trace_start"() <{level = 10 : i32, message = "qk,kd->qd"}> : () -> ()
    %cst_71 = arith.constant dense<0.000000e+00> : vector<5x8xf32>
    %121 = tpu.matmul %120, %107, %cst_71 {dimension_numbers = #tpu.dot_dimension_numbers<[1], [0], [0], [1], [0, 0, 1, 1], [], []>} : vector<5x5xf32>, vector<5x8xf32>, vector<5x8xf32> -> vector<5x8xf32>
    "tpu.trace_stop"() : () -> ()
    %c0_72 = arith.constant 0 : index
    %c16 = arith.constant 16 : index
    %122 = vector.load %arg52[%c0_72, %c16] : memref<5x32xf32, #tpu.memory_space<vmem>>, vector<5x8xf32>
    tpu.vector_store %arg52[%c0_72, %c16], %121 {strides = array<i32>} : memref<5x32xf32, #tpu.memory_space<vmem>>, vector<5x8xf32>,
    %123 = vector.extract_strided_slice %68 {offsets = [0, 24], sizes = [5, 8], strides = [1, 1]} : vector<5x96xf32> to vector<5x8xf32>
    %124 = vector.extract_strided_slice %68 {offsets = [0, 56], sizes = [5, 8], strides = [1, 1]} : vector<5x96xf32> to vector<5x8xf32>
    %125 = vector.extract_strided_slice %68 {offsets = [0, 88], sizes = [5, 8], strides = [1, 1]} : vector<5x96xf32> to vector<5x8xf32>
    "tpu.trace_start"() <{level = 10 : i32, message = "qd,kd->qk"}> : () -> ()
    %cst_73 = arith.constant dense<0.000000e+00> : vector<5x5xf32>
    %126 = tpu.matmul %123, %124, %cst_73 {dimension_numbers = #tpu.dot_dimension_numbers<[1], [1], [0], [0], [0, 0, 1, 0], [], []>} : vector<5x8xf32>, vector<5x8xf32>, vector<5x5xf32> -> vector<5x5xf32>
    "tpu.trace_stop"() : () -> ()
    %cst_74 = arith.constant 0.353553385 : f32
    %127 = vector.broadcast %cst_74 : f32 to vector<5x5xf32>
    %128 = arith.mulf %126, %127 : vector<5x5xf32>
    %cst_75 = arith.constant dense<0xFF800000> : vector<5xf32>
    %129 = vector.multi_reduction <maximumf>, %128, %cst_75 [1] : vector<5x5xf32> to vector<5xf32>
    %130 = vector.shape_cast %129 : vector<5xf32> to vector<5x1xf32>
    %131 = vector.broadcast %130 : vector<5x1xf32> to vector<5x5xf32>
    %132 = arith.subf %128, %131 : vector<5x5xf32>
    %133 = math.exp %132 : vector<5x5xf32>
    %cst_76 = arith.constant dense<0.000000e+00> : vector<5xf32>
    %134 = vector.multi_reduction <add>, %133, %cst_76 [1] : vector<5x5xf32> to vector<5xf32>
    %135 = vector.shape_cast %134 : vector<5xf32> to vector<5x1xf32>
    %136 = tpu.reciprocal %135 {approx = true} : vector<5x1xf32> -> vector<5x1xf32>
    %137 = vector.broadcast %136 : vector<5x1xf32> to vector<5x5xf32>
    %138 = arith.mulf %133, %137 : vector<5x5xf32>
    "tpu.trace_start"() <{level = 10 : i32, message = "qk,kd->qd"}> : () -> ()
    %cst_77 = arith.constant dense<0.000000e+00> : vector<5x8xf32>
    %139 = tpu.matmul %138, %125, %cst_77 {dimension_numbers = #tpu.dot_dimension_numbers<[1], [0], [0], [1], [0, 0, 1, 1], [], []>} : vector<5x5xf32>, vector<5x8xf32>, vector<5x8xf32> -> vector<5x8xf32>
    "tpu.trace_stop"() : () -> ()
    %c0_78 = arith.constant 0 : index
    %c24 = arith.constant 24 : index
    %140 = vector.load %arg52[%c0_78, %c24] : memref<5x32xf32, #tpu.memory_space<vmem>>, vector<5x8xf32>
    tpu.vector_store %arg52[%c0_78, %c24], %139 {strides = array<i32>} : memref<5x32xf32, #tpu.memory_space<vmem>>, vector<5x8xf32>,
    %c0_79 = arith.constant 0 : index
    %c0_80 = arith.constant 0 : index
    %141 = vector.load %arg52[%c0_79, %c0_80] : memref<5x32xf32, #tpu.memory_space<vmem>>, vector<5x32xf32>
    %c0_81 = arith.constant 0 : index
    %c0_82 = arith.constant 0 : index
    %c0_83 = arith.constant 0 : index
    %142 = vector.load %arg14[%c0_81, %c0_82, %c0_83] : memref<2x32x32xf32, #tpu.memory_space<vmem>>, vector<1x32x32xf32>
    %143 = vector.shape_cast %142 : vector<1x32x32xf32> to vector<32x32xf32>
    %144 = arith.truncf %141 : vector<5x32xf32> to vector<5x32xbf16>
    %145 = arith.truncf %143 : vector<32x32xf32> to vector<32x32xbf16>
    %cst_84 = arith.constant dense<0.000000e+00> : vector<5x32xf32>
    %146 = tpu.matmul %144, %145, %cst_84 {dimension_numbers = #tpu.dot_dimension_numbers<[1], [0], [0], [1], [0, 0, 1, 1], [], []>} : vector<5x32xbf16>, vector<32x32xbf16>, vector<5x32xf32> -> vector<5x32xf32>
    %147 = arith.addf %30, %146 : vector<5x32xf32>
    %c0_85 = arith.constant 0 : index
    %c0_86 = arith.constant 0 : index
    %c0_87 = arith.constant 0 : index
    %148 = vector.load %arg15[%c0_85, %c0_86, %c0_87] : memref<2x1x32xf32, #tpu.memory_space<vmem>>, vector<1x1x32xf32>
    %149 = vector.shape_cast %148 : vector<1x1x32xf32> to vector<1x32xf32>
    %150 = vector.broadcast %149 : vector<1x32xf32> to vector<5x32xf32>
    %151 = arith.addf %147, %150 : vector<5x32xf32>
    %c0_88 = arith.constant 0 : index
    %c0_89 = arith.constant 0 : index
    %c0_90 = arith.constant 0 : index
    %152 = vector.load %arg16[%c0_88, %c0_89, %c0_90] : memref<2x1x32xf32, #tpu.memory_space<vmem>>, vector<1x1x32xf32>
    %153 = vector.shape_cast %152 : vector<1x1x32xf32> to vector<1x32xf32>
    %c0_91 = arith.constant 0 : index
    %c0_92 = arith.constant 0 : index
    %c0_93 = arith.constant 0 : index
    %154 = vector.load %arg17[%c0_91, %c0_92, %c0_93] : memref<2x1x32xf32, #tpu.memory_space<vmem>>, vector<1x1x32xf32>
    %155 = vector.shape_cast %154 : vector<1x1x32xf32> to vector<1x32xf32>
    %cst_94 = arith.constant dense<0.000000e+00> : vector<5xf32>
    %156 = vector.multi_reduction <add>, %151, %cst_94 [1] : vector<5x32xf32> to vector<5xf32>
    %157 = vector.shape_cast %156 : vector<5xf32> to vector<5x1xf32>
    %cst_95 = arith.constant 3.200000e+01 : f32
    %158 = vector.broadcast %cst_95 : f32 to vector<5x1xf32>
    %159 = arith.divf %157, %158 : vector<5x1xf32>
    %160 = vector.broadcast %159 : vector<5x1xf32> to vector<5x32xf32>
    %161 = arith.subf %151, %160 : vector<5x32xf32>
    %162 = arith.mulf %161, %161 : vector<5x32xf32>
    %cst_96 = arith.constant dense<0.000000e+00> : vector<5xf32>
    %163 = vector.multi_reduction <add>, %162, %cst_96 [1] : vector<5x32xf32> to vector<5xf32>
    %164 = vector.shape_cast %163 : vector<5xf32> to vector<5x1xf32>
    %cst_97 = arith.constant 3.200000e+01 : f32
    %165 = vector.broadcast %cst_97 : f32 to vector<5x1xf32>
    %166 = arith.divf %164, %165 : vector<5x1xf32>
    %167 = vector.broadcast %159 : vector<5x1xf32> to vector<5x32xf32>
    %168 = arith.subf %151, %167 : vector<5x32xf32>
    %cst_98 = arith.constant 9.99999974E-6 : f32
    %169 = vector.broadcast %cst_98 : f32 to vector<5x1xf32>
    %170 = arith.addf %166, %169 : vector<5x1xf32>
    %171 = math.rsqrt %170 : vector<5x1xf32>
    %172 = vector.broadcast %171 : vector<5x1xf32> to vector<5x32xf32>
    %173 = arith.mulf %168, %172 : vector<5x32xf32>
    %174 = vector.broadcast %153 : vector<1x32xf32> to vector<5x32xf32>
    %175 = arith.mulf %173, %174 : vector<5x32xf32>
    %176 = vector.broadcast %155 : vector<1x32xf32> to vector<5x32xf32>
    %177 = arith.addf %175, %176 : vector<5x32xf32>
    %c0_99 = arith.constant 0 : index
    %c0_100 = arith.constant 0 : index
    %c0_101 = arith.constant 0 : index
    %178 = vector.load %arg18[%c0_99, %c0_100, %c0_101] : memref<2x32x128xf32, #tpu.memory_space<vmem>>, vector<1x32x128xf32>
    %179 = vector.shape_cast %178 : vector<1x32x128xf32> to vector<32x128xf32>
    %180 = arith.truncf %177 : vector<5x32xf32> to vector<5x32xbf16>
    %181 = arith.truncf %179 : vector<32x128xf32> to vector<32x128xbf16>
    %cst_102 = arith.constant dense<0.000000e+00> : vector<5x128xf32>
    %182 = tpu.matmul %180, %181, %cst_102 {dimension_numbers = #tpu.dot_dimension_numbers<[1], [0], [0], [1], [0, 0, 1, 1], [], []>} : vector<5x32xbf16>, vector<32x128xbf16>, vector<5x128xf32> -> vector<5x128xf32>
    %c0_103 = arith.constant 0 : index
    %c0_104 = arith.constant 0 : index
    %c0_105 = arith.constant 0 : index
    %183 = vector.load %arg19[%c0_103, %c0_104, %c0_105] : memref<2x1x128xf32, #tpu.memory_space<vmem>>, vector<1x1x128xf32>
    %184 = vector.shape_cast %183 : vector<1x1x128xf32> to vector<1x128xf32>
    %185 = vector.broadcast %184 : vector<1x128xf32> to vector<5x128xf32>
    %186 = arith.addf %182, %185 : vector<5x128xf32>
    %187 = arith.mulf %186, %186 : vector<5x128xf32>
    %188 = arith.mulf %186, %187 : vector<5x128xf32>
    %cst_106 = arith.constant 4.471500e-02 : f32
    %189 = vector.broadcast %cst_106 : f32 to vector<5x128xf32>
    %190 = arith.mulf %189, %188 : vector<5x128xf32>
    %191 = arith.addf %186, %190 : vector<5x128xf32>
    %cst_107 = arith.constant 0.797884583 : f32
    %192 = vector.broadcast %cst_107 : f32 to vector<5x128xf32>
    %193 = arith.mulf %192, %191 : vector<5x128xf32>
    %194 = math.tanh %193 : vector<5x128xf32>
    %cst_108 = arith.constant 1.000000e+00 : f32
    %195 = vector.broadcast %cst_108 : f32 to vector<5x128xf32>
    %196 = arith.addf %195, %194 : vector<5x128xf32>
    %cst_109 = arith.constant 5.000000e-01 : f32
    %197 = vector.broadcast %cst_109 : f32 to vector<5x128xf32>
    %198 = arith.mulf %197, %196 : vector<5x128xf32>
    %199 = arith.mulf %186, %198 : vector<5x128xf32>
    %c0_110 = arith.constant 0 : index
    %c0_111 = arith.constant 0 : index
    %c0_112 = arith.constant 0 : index
    %200 = vector.load %arg20[%c0_110, %c0_111, %c0_112] : memref<2x128x32xf32, #tpu.memory_space<vmem>>, vector<1x128x32xf32>
    %201 = vector.shape_cast %200 : vector<1x128x32xf32> to vector<128x32xf32>
    %202 = arith.truncf %199 : vector<5x128xf32> to vector<5x128xbf16>
    %203 = arith.truncf %201 : vector<128x32xf32> to vector<128x32xbf16>
    %cst_113 = arith.constant dense<0.000000e+00> : vector<5x32xf32>
    %204 = tpu.matmul %202, %203, %cst_113 {dimension_numbers = #tpu.dot_dimension_numbers<[1], [0], [0], [1], [0, 0, 1, 1], [], []>} : vector<5x128xbf16>, vector<128x32xbf16>, vector<5x32xf32> -> vector<5x32xf32>
    %205 = arith.addf %151, %204 : vector<5x32xf32>
    %c0_114 = arith.constant 0 : index
    %c0_115 = arith.constant 0 : index
    %c0_116 = arith.constant 0 : index
    %206 = vector.load %arg21[%c0_114, %c0_115, %c0_116] : memref<2x1x32xf32, #tpu.memory_space<vmem>>, vector<1x1x32xf32>
    %207 = vector.shape_cast %206 : vector<1x1x32xf32> to vector<1x32xf32>
    %208 = vector.broadcast %207 : vector<1x32xf32> to vector<5x32xf32>
    %209 = arith.addf %205, %208 : vector<5x32xf32>
    %210 = arith.addf %31, %32 : vector<5x16xf32>
    %c0_117 = arith.constant 0 : index
    %c0_118 = arith.constant 0 : index
    %c0_119 = arith.constant 0 : index
    %211 = vector.load %arg22[%c0_117, %c0_118, %c0_119] : memref<4x1x16xf32, #tpu.memory_space<vmem>>, vector<1x1x16xf32>
    %212 = vector.shape_cast %211 : vector<1x1x16xf32> to vector<1x16xf32>
    %c0_120 = arith.constant 0 : index
    %c0_121 = arith.constant 0 : index
    %c0_122 = arith.constant 0 : index
    %213 = vector.load %arg23[%c0_120, %c0_121, %c0_122] : memref<4x1x16xf32, #tpu.memory_space<vmem>>, vector<1x1x16xf32>
    %214 = vector.shape_cast %213 : vector<1x1x16xf32> to vector<1x16xf32>
    %cst_123 = arith.constant dense<0.000000e+00> : vector<5xf32>
    %215 = vector.multi_reduction <add>, %210, %cst_123 [1] : vector<5x16xf32> to vector<5xf32>
    %216 = vector.shape_cast %215 : vector<5xf32> to vector<5x1xf32>
    %cst_124 = arith.constant 1.600000e+01 : f32
    %217 = vector.broadcast %cst_124 : f32 to vector<5x1xf32>
    %218 = arith.divf %216, %217 : vector<5x1xf32>
    %219 = vector.broadcast %218 : vector<5x1xf32> to vector<5x16xf32>
    %220 = arith.subf %210, %219 : vector<5x16xf32>
    %221 = arith.mulf %220, %220 : vector<5x16xf32>
    %cst_125 = arith.constant dense<0.000000e+00> : vector<5xf32>
    %222 = vector.multi_reduction <add>, %221, %cst_125 [1] : vector<5x16xf32> to vector<5xf32>
    %223 = vector.shape_cast %222 : vector<5xf32> to vector<5x1xf32>
    %cst_126 = arith.constant 1.600000e+01 : f32
    %224 = vector.broadcast %cst_126 : f32 to vector<5x1xf32>
    %225 = arith.divf %223, %224 : vector<5x1xf32>
    %226 = vector.broadcast %218 : vector<5x1xf32> to vector<5x16xf32>
    %227 = arith.subf %210, %226 : vector<5x16xf32>
    %cst_127 = arith.constant 9.99999974E-6 : f32
    %228 = vector.broadcast %cst_127 : f32 to vector<5x1xf32>
    %229 = arith.addf %225, %228 : vector<5x1xf32>
    %230 = math.rsqrt %229 : vector<5x1xf32>
    %231 = vector.broadcast %230 : vector<5x1xf32> to vector<5x16xf32>
    %232 = arith.mulf %227, %231 : vector<5x16xf32>
    %233 = vector.broadcast %212 : vector<1x16xf32> to vector<5x16xf32>
    %234 = arith.mulf %232, %233 : vector<5x16xf32>
    %235 = vector.broadcast %214 : vector<1x16xf32> to vector<5x16xf32>
    %236 = arith.addf %234, %235 : vector<5x16xf32>
    %c0_128 = arith.constant 0 : index
    %c0_129 = arith.constant 0 : index
    %c0_130 = arith.constant 0 : index
    %237 = vector.load %arg24[%c0_128, %c0_129, %c0_130] : memref<4x16x64xf32, #tpu.memory_space<vmem>>, vector<1x16x64xf32>
    %238 = vector.shape_cast %237 : vector<1x16x64xf32> to vector<16x64xf32>
    %239 = arith.truncf %236 : vector<5x16xf32> to vector<5x16xbf16>
    %240 = arith.truncf %238 : vector<16x64xf32> to vector<16x64xbf16>
    %cst_131 = arith.constant dense<0.000000e+00> : vector<5x64xf32>
    %241 = tpu.matmul %239, %240, %cst_131 {dimension_numbers = #tpu.dot_dimension_numbers<[1], [0], [0], [1], [0, 0, 1, 1], [], []>} : vector<5x16xbf16>, vector<16x64xbf16>, vector<5x64xf32> -> vector<5x64xf32>
    %c0_132 = arith.constant 0 : index
    %c0_133 = arith.constant 0 : index
    %c0_134 = arith.constant 0 : index
    %242 = vector.load %arg25[%c0_132, %c0_133, %c0_134] : memref<4x1x64xf32, #tpu.memory_space<vmem>>, vector<1x1x64xf32>
    %243 = vector.shape_cast %242 : vector<1x1x64xf32> to vector<1x64xf32>
    %244 = vector.broadcast %243 : vector<1x64xf32> to vector<5x64xf32>
    %245 = arith.addf %241, %244 : vector<5x64xf32>
    %246 = vector.extract_strided_slice %245 {offsets = [0, 0], sizes = [5, 32], strides = [1, 1]} : vector<5x64xf32> to vector<5x32xf32>
    %247 = vector.extract_strided_slice %245 {offsets = [0, 32], sizes = [5, 32], strides = [1, 1]} : vector<5x64xf32> to vector<5x32xf32>
    %cst_135 = arith.constant 0.000000e+00 : f32
    %248 = vector.broadcast %cst_135 : f32 to vector<3x32xf32>
    %c0_136 = arith.constant 0 : index
    %c0_137 = arith.constant 0 : index
    %249 = vector.load %arg54[%c0_136, %c0_137] : memref<8x32xf32, #tpu.memory_space<vmem>>, vector<3x32xf32>
    tpu.vector_store %arg54[%c0_136, %c0_137], %248 {strides = array<i32>} : memref<8x32xf32, #tpu.memory_space<vmem>>, vector<3x32xf32>,
    %c3 = arith.constant 3 : index
    %c0_138 = arith.constant 0 : index
    %250 = vector.load %arg54[%c3, %c0_138] : memref<8x32xf32, #tpu.memory_space<vmem>>, vector<5x32xf32>
    tpu.vector_store %arg54[%c3, %c0_138], %246 {strides = array<i32>} : memref<8x32xf32, #tpu.memory_space<vmem>>, vector<5x32xf32>,
    %c0_139 = arith.constant 0 : index
    %c0_140 = arith.constant 0 : index
    %c0_141 = arith.constant 0 : index
    %251 = vector.load %arg26[%c0_139, %c0_140, %c0_141] : memref<4x4x32xf32, #tpu.memory_space<vmem>>, vector<1x4x32xf32>
    %252 = vector.shape_cast %251 : vector<1x4x32xf32> to vector<4x32xf32>
    %cst_142 = arith.constant 0.000000e+00 : f32
    %253 = vector.broadcast %cst_142 : f32 to vector<5x32xf32>
    %c0_143 = arith.constant 0 : index
    %c0_144 = arith.constant 0 : index
    %c0_145 = arith.constant 0 : index
    %254 = vector.load %arg27[%c0_143, %c0_144, %c0_145] : memref<4x1x32xf32, #tpu.memory_space<vmem>>, vector<1x1x32xf32>
    %255 = vector.shape_cast %254 : vector<1x1x32xf32> to vector<1x32xf32>
    %256 = vector.broadcast %255 : vector<1x32xf32> to vector<5x32xf32>
    %257 = arith.addf %253, %256 : vector<5x32xf32>
    %c0_146 = arith.constant 0 : index
    %c0_147 = arith.constant 0 : index
    %258 = vector.load %arg54[%c0_146, %c0_147] : memref<8x32xf32, #tpu.memory_space<vmem>>, vector<5x32xf32>
    %259 = vector.extract_strided_slice %252 {offsets = [0, 0], sizes = [1, 32], strides = [1, 1]} : vector<4x32xf32> to vector<1x32xf32>
    %260 = vector.broadcast %259 : vector<1x32xf32> to vector<5x32xf32>
    %261 = arith.mulf %258, %260 : vector<5x32xf32>
    %262 = arith.addf %257, %261 : vector<5x32xf32>
    %c1_148 = arith.constant 1 : index
    %c0_149 = arith.constant 0 : index
    %263 = vector.load %arg54[%c1_148, %c0_149] : memref<8x32xf32, #tpu.memory_space<vmem>>, vector<5x32xf32>
    %264 = vector.extract_strided_slice %252 {offsets = [1, 0], sizes = [1, 32], strides = [1, 1]} : vector<4x32xf32> to vector<1x32xf32>
    %265 = vector.broadcast %264 : vector<1x32xf32> to vector<5x32xf32>
    %266 = arith.mulf %263, %265 : vector<5x32xf32>
    %267 = arith.addf %262, %266 : vector<5x32xf32>
    %c2 = arith.constant 2 : index
    %c0_150 = arith.constant 0 : index
    %268 = vector.load %arg54[%c2, %c0_150] : memref<8x32xf32, #tpu.memory_space<vmem>>, vector<5x32xf32>
    %269 = vector.extract_strided_slice %252 {offsets = [2, 0], sizes = [1, 32], strides = [1, 1]} : vector<4x32xf32> to vector<1x32xf32>
    %270 = vector.broadcast %269 : vector<1x32xf32> to vector<5x32xf32>
    %271 = arith.mulf %268, %270 : vector<5x32xf32>
    %272 = arith.addf %267, %271 : vector<5x32xf32>
    %c3_151 = arith.constant 3 : index
    %c0_152 = arith.constant 0 : index
    %273 = vector.load %arg54[%c3_151, %c0_152] : memref<8x32xf32, #tpu.memory_space<vmem>>, vector<5x32xf32>
    %274 = vector.extract_strided_slice %252 {offsets = [3, 0], sizes = [1, 32], strides = [1, 1]} : vector<4x32xf32> to vector<1x32xf32>
    %275 = vector.broadcast %274 : vector<1x32xf32> to vector<5x32xf32>
    %276 = arith.mulf %273, %275 : vector<5x32xf32>
    %277 = arith.addf %272, %276 : vector<5x32xf32>
    %cst_153 = arith.constant 0.000000e+00 : f32
    %278 = vector.broadcast %cst_153 : f32 to vector<5x32xf32>
    %279 = arith.subf %278, %277 : vector<5x32xf32>
    %280 = math.exp %279 : vector<5x32xf32>
    %cst_154 = arith.constant 1.000000e+00 : f32
    %281 = vector.broadcast %cst_154 : f32 to vector<5x32xf32>
    %282 = arith.addf %281, %280 : vector<5x32xf32>
    %cst_155 = arith.constant 1.000000e+00 : f32
    %283 = vector.broadcast %cst_155 : f32 to vector<5x32xf32>
    %284 = arith.divf %283, %282 : vector<5x32xf32>
    %285 = arith.mulf %277, %284 : vector<5x32xf32>
    %c0_156 = arith.constant 0 : index
    %c0_157 = arith.constant 0 : index
    %c0_158 = arith.constant 0 : index
    %286 = vector.load %arg28[%c0_156, %c0_157, %c0_158] : memref<4x32x32xf32, #tpu.memory_space<vmem>>, vector<1x32x32xf32>
    %287 = vector.shape_cast %286 : vector<1x32x32xf32> to vector<32x32xf32>
    %288 = arith.truncf %285 : vector<5x32xf32> to vector<5x32xbf16>
    %289 = arith.truncf %287 : vector<32x32xf32> to vector<32x32xbf16>
    %cst_159 = arith.constant dense<0.000000e+00> : vector<5x32xf32>
    %290 = tpu.matmul %288, %289, %cst_159 {dimension_numbers = #tpu.dot_dimension_numbers<[1], [0], [0], [1], [0, 0, 1, 1], [], []>} : vector<5x32xbf16>, vector<32x32xbf16>, vector<5x32xf32> -> vector<5x32xf32>
    %c0_160 = arith.constant 0 : index
    %c0_161 = arith.constant 0 : index
    %c0_162 = arith.constant 0 : index
    %291 = vector.load %arg29[%c0_160, %c0_161, %c0_162] : memref<4x1x32xf32, #tpu.memory_space<vmem>>, vector<1x1x32xf32>
    %292 = vector.shape_cast %291 : vector<1x1x32xf32> to vector<1x32xf32>
    %293 = vector.broadcast %292 : vector<1x32xf32> to vector<5x32xf32>
    %294 = arith.addf %290, %293 : vector<5x32xf32>
    %cst_163 = arith.constant 0.000000e+00 : f32
    %295 = vector.broadcast %cst_163 : f32 to vector<5x32xf32>
    %296 = arith.maximumf %294, %295 : vector<5x32xf32>
    %297 = math.absf %294 : vector<5x32xf32>
    %cst_164 = arith.constant 0.000000e+00 : f32
    %298 = vector.broadcast %cst_164 : f32 to vector<5x32xf32>
    %299 = arith.subf %298, %297 : vector<5x32xf32>
    %300 = math.exp %299 : vector<5x32xf32>
    %cst_165 = arith.constant 1.000000e+00 : f32
    %301 = vector.broadcast %cst_165 : f32 to vector<5x32xf32>
    %302 = arith.addf %301, %300 : vector<5x32xf32>
    %303 = math.log %302 : vector<5x32xf32>
    %304 = arith.addf %296, %303 : vector<5x32xf32>
    %305 = arith.mulf %304, %285 : vector<5x32xf32>
    %c0_166 = arith.constant 0 : index
    %c0_167 = arith.constant 0 : index
    %c0_168 = arith.constant 0 : index
    %306 = vector.load %arg31[%c0_166, %c0_167, %c0_168] : memref<4x8x32xf32, #tpu.memory_space<vmem>>, vector<1x8x32xf32>
    %307 = vector.shape_cast %306 : vector<1x8x32xf32> to vector<8x32xf32>
    %c0_169 = arith.constant 0 : index
    %c0_170 = arith.constant 0 : index
    %c0_171 = arith.constant 0 : index
    %308 = vector.load %arg32[%c0_169, %c0_170, %c0_171] : memref<4x1x32xf32, #tpu.memory_space<vmem>>, vector<1x1x32xf32>
    %309 = vector.shape_cast %308 : vector<1x1x32xf32> to vector<1x32xf32>
    %c0_172 = arith.constant 0 : index
    %c0_173 = arith.constant 0 : index
    %c0_174 = arith.constant 0 : index
    %310 = vector.load %arg30[%c0_172, %c0_173, %c0_174] : memref<4x16x32xf32, #tpu.memory_space<vmem>>, vector<1x16x32xf32>
    %311 = vector.shape_cast %310 : vector<1x16x32xf32> to vector<16x32xf32>
    "tpu.trace_start"() <{level = 10 : i32, message = "nd,td->nt"}> : () -> ()
    %cst_175 = arith.constant dense<0.000000e+00> : vector<16x5xf32>
    %312 = tpu.matmul %311, %285, %cst_175 {dimension_numbers = #tpu.dot_dimension_numbers<[1], [1], [0], [0], [0, 0, 1, 0], [], []>} : vector<16x32xf32>, vector<5x32xf32>, vector<16x5xf32> -> vector<16x5xf32>
    "tpu.trace_stop"() : () -> ()
    %313 = vector.extract_strided_slice %312 {offsets = [0, 0], sizes = [8, 5], strides = [1, 1]} : vector<16x5xf32> to vector<8x5xf32>
    %314 = vector.extract_strided_slice %312 {offsets = [8, 0], sizes = [8, 5], strides = [1, 1]} : vector<16x5xf32> to vector<8x5xf32>
    %cst_176 = arith.constant 0.000000e+00 : f32
    %315 = vector.broadcast %cst_176 : f32 to vector<8x32xf32>
    %316 = vector.extract_strided_slice %304 {offsets = [0, 0], sizes = [1, 32], strides = [1, 1]} : vector<5x32xf32> to vector<1x32xf32>
    %317 = vector.broadcast %316 : vector<1x32xf32> to vector<8x32xf32>
    %318 = arith.mulf %317, %307 : vector<8x32xf32>
    %319 = math.exp %318 : vector<8x32xf32>
    %320 = arith.mulf %319, %315 : vector<8x32xf32>
    %321 = vector.extract_strided_slice %313 {offsets = [0, 0], sizes = [8, 1], strides = [1, 1]} : vector<8x5xf32> to vector<8x1xf32>
    %322 = vector.extract_strided_slice %305 {offsets = [0, 0], sizes = [1, 32], strides = [1, 1]} : vector<5x32xf32> to vector<1x32xf32>
    %323 = vector.broadcast %321 : vector<8x1xf32> to vector<8x32xf32>
    %324 = vector.broadcast %322 : vector<1x32xf32> to vector<8x32xf32>
    %325 = arith.mulf %323, %324 : vector<8x32xf32>
    %326 = arith.addf %320, %325 : vector<8x32xf32>
    %327 = vector.extract_strided_slice %314 {offsets = [0, 0], sizes = [8, 1], strides = [1, 1]} : vector<8x5xf32> to vector<8x1xf32>
    %328 = vector.broadcast %327 : vector<8x1xf32> to vector<8x32xf32>
    %329 = arith.mulf %328, %326 : vector<8x32xf32>
    %cst_177 = arith.constant dense<0.000000e+00> : vector<32xf32>
    %330 = vector.multi_reduction <add>, %329, %cst_177 [0] : vector<8x32xf32> to vector<32xf32>
    %331 = vector.shape_cast %330 : vector<32xf32> to vector<1x32xf32>
    %332 = vector.extract_strided_slice %285 {offsets = [0, 0], sizes = [1, 32], strides = [1, 1]} : vector<5x32xf32> to vector<1x32xf32>
    %333 = arith.mulf %309, %332 : vector<1x32xf32>
    %334 = arith.addf %331, %333 : vector<1x32xf32>
    %c0_178 = arith.constant 0 : index
    %c0_179 = arith.constant 0 : index
    %335 = vector.load %arg55[%c0_178, %c0_179] : memref<5x32xf32, #tpu.memory_space<vmem>>, vector<1x32xf32>
    tpu.vector_store %arg55[%c0_178, %c0_179], %334 {strides = array<i32>} : memref<5x32xf32, #tpu.memory_space<vmem>>, vector<1x32xf32>,
    %336 = vector.extract_strided_slice %304 {offsets = [1, 0], sizes = [1, 32], strides = [1, 1]} : vector<5x32xf32> to vector<1x32xf32>
    %337 = vector.broadcast %336 : vector<1x32xf32> to vector<8x32xf32>
    %338 = arith.mulf %337, %307 : vector<8x32xf32>
    %339 = math.exp %338 : vector<8x32xf32>
    %340 = arith.mulf %339, %326 : vector<8x32xf32>
    %341 = vector.extract_strided_slice %313 {offsets = [0, 1], sizes = [8, 1], strides = [1, 1]} : vector<8x5xf32> to vector<8x1xf32>
    %342 = vector.extract_strided_slice %305 {offsets = [1, 0], sizes = [1, 32], strides = [1, 1]} : vector<5x32xf32> to vector<1x32xf32>
    %343 = vector.broadcast %341 : vector<8x1xf32> to vector<8x32xf32>
    %344 = vector.broadcast %342 : vector<1x32xf32> to vector<8x32xf32>
    %345 = arith.mulf %343, %344 : vector<8x32xf32>
    %346 = arith.addf %340, %345 : vector<8x32xf32>
    %347 = vector.extract_strided_slice %314 {offsets = [0, 1], sizes = [8, 1], strides = [1, 1]} : vector<8x5xf32> to vector<8x1xf32>
    %348 = vector.broadcast %347 : vector<8x1xf32> to vector<8x32xf32>
    %349 = arith.mulf %348, %346 : vector<8x32xf32>
    %cst_180 = arith.constant dense<0.000000e+00> : vector<32xf32>
    %350 = vector.multi_reduction <add>, %349, %cst_180 [0] : vector<8x32xf32> to vector<32xf32>
    %351 = vector.shape_cast %350 : vector<32xf32> to vector<1x32xf32>
    %352 = vector.extract_strided_slice %285 {offsets = [1, 0], sizes = [1, 32], strides = [1, 1]} : vector<5x32xf32> to vector<1x32xf32>
    %353 = arith.mulf %309, %352 : vector<1x32xf32>
    %354 = arith.addf %351, %353 : vector<1x32xf32>
    %c1_181 = arith.constant 1 : index
    %c0_182 = arith.constant 0 : index
    %355 = vector.load %arg55[%c1_181, %c0_182] : memref<5x32xf32, #tpu.memory_space<vmem>>, vector<1x32xf32>
    tpu.vector_store %arg55[%c1_181, %c0_182], %354 {strides = array<i32>} : memref<5x32xf32, #tpu.memory_space<vmem>>, vector<1x32xf32>,
    %356 = vector.extract_strided_slice %304 {offsets = [2, 0], sizes = [1, 32], strides = [1, 1]} : vector<5x32xf32> to vector<1x32xf32>
    %357 = vector.broadcast %356 : vector<1x32xf32> to vector<8x32xf32>
    %358 = arith.mulf %357, %307 : vector<8x32xf32>
    %359 = math.exp %358 : vector<8x32xf32>
    %360 = arith.mulf %359, %346 : vector<8x32xf32>
    %361 = vector.extract_strided_slice %313 {offsets = [0, 2], sizes = [8, 1], strides = [1, 1]} : vector<8x5xf32> to vector<8x1xf32>
    %362 = vector.extract_strided_slice %305 {offsets = [2, 0], sizes = [1, 32], strides = [1, 1]} : vector<5x32xf32> to vector<1x32xf32>
    %363 = vector.broadcast %361 : vector<8x1xf32> to vector<8x32xf32>
    %364 = vector.broadcast %362 : vector<1x32xf32> to vector<8x32xf32>
    %365 = arith.mulf %363, %364 : vector<8x32xf32>
    %366 = arith.addf %360, %365 : vector<8x32xf32>
    %367 = vector.extract_strided_slice %314 {offsets = [0, 2], sizes = [8, 1], strides = [1, 1]} : vector<8x5xf32> to vector<8x1xf32>
    %368 = vector.broadcast %367 : vector<8x1xf32> to vector<8x32xf32>
    %369 = arith.mulf %368, %366 : vector<8x32xf32>
    %cst_183 = arith.constant dense<0.000000e+00> : vector<32xf32>
    %370 = vector.multi_reduction <add>, %369, %cst_183 [0] : vector<8x32xf32> to vector<32xf32>
    %371 = vector.shape_cast %370 : vector<32xf32> to vector<1x32xf32>
    %372 = vector.extract_strided_slice %285 {offsets = [2, 0], sizes = [1, 32], strides = [1, 1]} : vector<5x32xf32> to vector<1x32xf32>
    %373 = arith.mulf %309, %372 : vector<1x32xf32>
    %374 = arith.addf %371, %373 : vector<1x32xf32>
    %c2_184 = arith.constant 2 : index
    %c0_185 = arith.constant 0 : index
    %375 = vector.load %arg55[%c2_184, %c0_185] : memref<5x32xf32, #tpu.memory_space<vmem>>, vector<1x32xf32>
    tpu.vector_store %arg55[%c2_184, %c0_185], %374 {strides = array<i32>} : memref<5x32xf32, #tpu.memory_space<vmem>>, vector<1x32xf32>,
    %376 = vector.extract_strided_slice %304 {offsets = [3, 0], sizes = [1, 32], strides = [1, 1]} : vector<5x32xf32> to vector<1x32xf32>
    %377 = vector.broadcast %376 : vector<1x32xf32> to vector<8x32xf32>
    %378 = arith.mulf %377, %307 : vector<8x32xf32>
    %379 = math.exp %378 : vector<8x32xf32>
    %380 = arith.mulf %379, %366 : vector<8x32xf32>
    %381 = vector.extract_strided_slice %313 {offsets = [0, 3], sizes = [8, 1], strides = [1, 1]} : vector<8x5xf32> to vector<8x1xf32>
    %382 = vector.extract_strided_slice %305 {offsets = [3, 0], sizes = [1, 32], strides = [1, 1]} : vector<5x32xf32> to vector<1x32xf32>
    %383 = vector.broadcast %381 : vector<8x1xf32> to vector<8x32xf32>
    %384 = vector.broadcast %382 : vector<1x32xf32> to vector<8x32xf32>
    %385 = arith.mulf %383, %384 : vector<8x32xf32>
    %386 = arith.addf %380, %385 : vector<8x32xf32>
    %387 = vector.extract_strided_slice %314 {offsets = [0, 3], sizes = [8, 1], strides = [1, 1]} : vector<8x5xf32> to vector<8x1xf32>
    %388 = vector.broadcast %387 : vector<8x1xf32> to vector<8x32xf32>
    %389 = arith.mulf %388, %386 : vector<8x32xf32>
    %cst_186 = arith.constant dense<0.000000e+00> : vector<32xf32>
    %390 = vector.multi_reduction <add>, %389, %cst_186 [0] : vector<8x32xf32> to vector<32xf32>
    %391 = vector.shape_cast %390 : vector<32xf32> to vector<1x32xf32>
    %392 = vector.extract_strided_slice %285 {offsets = [3, 0], sizes = [1, 32], strides = [1, 1]} : vector<5x32xf32> to vector<1x32xf32>
    %393 = arith.mulf %309, %392 : vector<1x32xf32>
    %394 = arith.addf %391, %393 : vector<1x32xf32>
    %c3_187 = arith.constant 3 : index
    %c0_188 = arith.constant 0 : index
    %395 = vector.load %arg55[%c3_187, %c0_188] : memref<5x32xf32, #tpu.memory_space<vmem>>, vector<1x32xf32>
    tpu.vector_store %arg55[%c3_187, %c0_188], %394 {strides = array<i32>} : memref<5x32xf32, #tpu.memory_space<vmem>>, vector<1x32xf32>,
    %396 = vector.extract_strided_slice %304 {offsets = [4, 0], sizes = [1, 32], strides = [1, 1]} : vector<5x32xf32> to vector<1x32xf32>
    %397 = vector.broadcast %396 : vector<1x32xf32> to vector<8x32xf32>
    %398 = arith.mulf %397, %307 : vector<8x32xf32>
    %399 = math.exp %398 : vector<8x32xf32>
    %400 = arith.mulf %399, %386 : vector<8x32xf32>
    %401 = vector.extract_strided_slice %313 {offsets = [0, 4], sizes = [8, 1], strides = [1, 1]} : vector<8x5xf32> to vector<8x1xf32>
    %402 = vector.extract_strided_slice %305 {offsets = [4, 0], sizes = [1, 32], strides = [1, 1]} : vector<5x32xf32> to vector<1x32xf32>
    %403 = vector.broadcast %401 : vector<8x1xf32> to vector<8x32xf32>
    %404 = vector.broadcast %402 : vector<1x32xf32> to vector<8x32xf32>
    %405 = arith.mulf %403, %404 : vector<8x32xf32>
    %406 = arith.addf %400, %405 : vector<8x32xf32>
    %407 = vector.extract_strided_slice %314 {offsets = [0, 4], sizes = [8, 1], strides = [1, 1]} : vector<8x5xf32> to vector<8x1xf32>
    %408 = vector.broadcast %407 : vector<8x1xf32> to vector<8x32xf32>
    %409 = arith.mulf %408, %406 : vector<8x32xf32>
    %cst_189 = arith.constant dense<0.000000e+00> : vector<32xf32>
    %410 = vector.multi_reduction <add>, %409, %cst_189 [0] : vector<8x32xf32> to vector<32xf32>
    %411 = vector.shape_cast %410 : vector<32xf32> to vector<1x32xf32>
    %412 = vector.extract_strided_slice %285 {offsets = [4, 0], sizes = [1, 32], strides = [1, 1]} : vector<5x32xf32> to vector<1x32xf32>
    %413 = arith.mulf %309, %412 : vector<1x32xf32>
    %414 = arith.addf %411, %413 : vector<1x32xf32>
    %c4 = arith.constant 4 : index
    %c0_190 = arith.constant 0 : index
    %415 = vector.load %arg55[%c4, %c0_190] : memref<5x32xf32, #tpu.memory_space<vmem>>, vector<1x32xf32>
    tpu.vector_store %arg55[%c4, %c0_190], %414 {strides = array<i32>} : memref<5x32xf32, #tpu.memory_space<vmem>>, vector<1x32xf32>,
    %c0_191 = arith.constant 0 : index
    %c0_192 = arith.constant 0 : index
    %416 = vector.load %arg55[%c0_191, %c0_192] : memref<5x32xf32, #tpu.memory_space<vmem>>, vector<5x32xf32>
    %cst_193 = arith.constant 0.000000e+00 : f32
    %417 = vector.broadcast %cst_193 : f32 to vector<5x32xf32>
    %418 = arith.subf %417, %247 : vector<5x32xf32>
    %419 = math.exp %418 : vector<5x32xf32>
    %cst_194 = arith.constant 1.000000e+00 : f32
    %420 = vector.broadcast %cst_194 : f32 to vector<5x32xf32>
    %421 = arith.addf %420, %419 : vector<5x32xf32>
    %cst_195 = arith.constant 1.000000e+00 : f32
    %422 = vector.broadcast %cst_195 : f32 to vector<5x32xf32>
    %423 = arith.divf %422, %421 : vector<5x32xf32>
    %424 = arith.mulf %247, %423 : vector<5x32xf32>
    %425 = arith.mulf %416, %424 : vector<5x32xf32>
    %c0_196 = arith.constant 0 : index
    %c0_197 = arith.constant 0 : index
    %c0_198 = arith.constant 0 : index
    %426 = vector.load %arg33[%c0_196, %c0_197, %c0_198] : memref<4x32x16xf32, #tpu.memory_space<vmem>>, vector<1x32x16xf32>
    %427 = vector.shape_cast %426 : vector<1x32x16xf32> to vector<32x16xf32>
    %428 = arith.truncf %425 : vector<5x32xf32> to vector<5x32xbf16>
    %429 = arith.truncf %427 : vector<32x16xf32> to vector<32x16xbf16>
    %cst_199 = arith.constant dense<0.000000e+00> : vector<5x16xf32>
    %430 = tpu.matmul %428, %429, %cst_199 {dimension_numbers = #tpu.dot_dimension_numbers<[1], [0], [0], [1], [0, 0, 1, 1], [], []>} : vector<5x32xbf16>, vector<32x16xbf16>, vector<5x16xf32> -> vector<5x16xf32>
    %c0_200 = arith.constant 0 : index
    %c0_201 = arith.constant 0 : index
    %c0_202 = arith.constant 0 : index
    %431 = vector.load %arg34[%c0_200, %c0_201, %c0_202] : memref<4x1x16xf32, #tpu.memory_space<vmem>>, vector<1x1x16xf32>
    %432 = vector.shape_cast %431 : vector<1x1x16xf32> to vector<1x16xf32>
    %433 = vector.broadcast %432 : vector<1x16xf32> to vector<5x16xf32>
    %434 = arith.addf %430, %433 : vector<5x16xf32>
    %435 = arith.addf %434, %210 : vector<5x16xf32>
    %c1_203 = arith.constant 1 : index
    %c0_204 = arith.constant 0 : index
    %c0_205 = arith.constant 0 : index
    %436 = vector.load %arg22[%c1_203, %c0_204, %c0_205] : memref<4x1x16xf32, #tpu.memory_space<vmem>>, vector<1x1x16xf32>
    %437 = vector.shape_cast %436 : vector<1x1x16xf32> to vector<1x16xf32>
    %c1_206 = arith.constant 1 : index
    %c0_207 = arith.constant 0 : index
    %c0_208 = arith.constant 0 : index
    %438 = vector.load %arg23[%c1_206, %c0_207, %c0_208] : memref<4x1x16xf32, #tpu.memory_space<vmem>>, vector<1x1x16xf32>
    %439 = vector.shape_cast %438 : vector<1x1x16xf32> to vector<1x16xf32>
    %cst_209 = arith.constant dense<0.000000e+00> : vector<5xf32>
    %440 = vector.multi_reduction <add>, %435, %cst_209 [1] : vector<5x16xf32> to vector<5xf32>
    %441 = vector.shape_cast %440 : vector<5xf32> to vector<5x1xf32>
    %cst_210 = arith.constant 1.600000e+01 : f32
    %442 = vector.broadcast %cst_210 : f32 to vector<5x1xf32>
    %443 = arith.divf %441, %442 : vector<5x1xf32>
    %444 = vector.broadcast %443 : vector<5x1xf32> to vector<5x16xf32>
    %445 = arith.subf %435, %444 : vector<5x16xf32>
    %446 = arith.mulf %445, %445 : vector<5x16xf32>
    %cst_211 = arith.constant dense<0.000000e+00> : vector<5xf32>
    %447 = vector.multi_reduction <add>, %446, %cst_211 [1] : vector<5x16xf32> to vector<5xf32>
    %448 = vector.shape_cast %447 : vector<5xf32> to vector<5x1xf32>
    %cst_212 = arith.constant 1.600000e+01 : f32
    %449 = vector.broadcast %cst_212 : f32 to vector<5x1xf32>
    %450 = arith.divf %448, %449 : vector<5x1xf32>
    %451 = vector.broadcast %443 : vector<5x1xf32> to vector<5x16xf32>
    %452 = arith.subf %435, %451 : vector<5x16xf32>
    %cst_213 = arith.constant 9.99999974E-6 : f32
    %453 = vector.broadcast %cst_213 : f32 to vector<5x1xf32>
    %454 = arith.addf %450, %453 : vector<5x1xf32>
    %455 = math.rsqrt %454 : vector<5x1xf32>
    %456 = vector.broadcast %455 : vector<5x1xf32> to vector<5x16xf32>
    %457 = arith.mulf %452, %456 : vector<5x16xf32>
    %458 = vector.broadcast %437 : vector<1x16xf32> to vector<5x16xf32>
    %459 = arith.mulf %457, %458 : vector<5x16xf32>
    %460 = vector.broadcast %439 : vector<1x16xf32> to vector<5x16xf32>
    %461 = arith.addf %459, %460 : vector<5x16xf32>
    %c1_214 = arith.constant 1 : index
    %c0_215 = arith.constant 0 : index
    %c0_216 = arith.constant 0 : index
    %462 = vector.load %arg24[%c1_214, %c0_215, %c0_216] : memref<4x16x64xf32, #tpu.memory_space<vmem>>, vector<1x16x64xf32>
    %463 = vector.shape_cast %462 : vector<1x16x64xf32> to vector<16x64xf32>
    %464 = arith.truncf %461 : vector<5x16xf32> to vector<5x16xbf16>
    %465 = arith.truncf %463 : vector<16x64xf32> to vector<16x64xbf16>
    %cst_217 = arith.constant dense<0.000000e+00> : vector<5x64xf32>
    %466 = tpu.matmul %464, %465, %cst_217 {dimension_numbers = #tpu.dot_dimension_numbers<[1], [0], [0], [1], [0, 0, 1, 1], [], []>} : vector<5x16xbf16>, vector<16x64xbf16>, vector<5x64xf32> -> vector<5x64xf32>
    %c1_218 = arith.constant 1 : index
    %c0_219 = arith.constant 0 : index
    %c0_220 = arith.constant 0 : index
    %467 = vector.load %arg25[%c1_218, %c0_219, %c0_220] : memref<4x1x64xf32, #tpu.memory_space<vmem>>, vector<1x1x64xf32>
    %468 = vector.shape_cast %467 : vector<1x1x64xf32> to vector<1x64xf32>
    %469 = vector.broadcast %468 : vector<1x64xf32> to vector<5x64xf32>
    %470 = arith.addf %466, %469 : vector<5x64xf32>
    %471 = vector.extract_strided_slice %470 {offsets = [0, 0], sizes = [5, 32], strides = [1, 1]} : vector<5x64xf32> to vector<5x32xf32>
    %472 = vector.extract_strided_slice %470 {offsets = [0, 32], sizes = [5, 32], strides = [1, 1]} : vector<5x64xf32> to vector<5x32xf32>
    %cst_221 = arith.constant 0.000000e+00 : f32
    %473 = vector.broadcast %cst_221 : f32 to vector<3x32xf32>
    %c0_222 = arith.constant 0 : index
    %c0_223 = arith.constant 0 : index
    %474 = vector.load %arg54[%c0_222, %c0_223] : memref<8x32xf32, #tpu.memory_space<vmem>>, vector<3x32xf32>
    tpu.vector_store %arg54[%c0_222, %c0_223], %473 {strides = array<i32>} : memref<8x32xf32, #tpu.memory_space<vmem>>, vector<3x32xf32>,
    %c3_224 = arith.constant 3 : index
    %c0_225 = arith.constant 0 : index
    %475 = vector.load %arg54[%c3_224, %c0_225] : memref<8x32xf32, #tpu.memory_space<vmem>>, vector<5x32xf32>
    tpu.vector_store %arg54[%c3_224, %c0_225], %471 {strides = array<i32>} : memref<8x32xf32, #tpu.memory_space<vmem>>, vector<5x32xf32>,
    %c1_226 = arith.constant 1 : index
    %c0_227 = arith.constant 0 : index
    %c0_228 = arith.constant 0 : index
    %476 = vector.load %arg26[%c1_226, %c0_227, %c0_228] : memref<4x4x32xf32, #tpu.memory_space<vmem>>, vector<1x4x32xf32>
    %477 = vector.shape_cast %476 : vector<1x4x32xf32> to vector<4x32xf32>
    %cst_229 = arith.constant 0.000000e+00 : f32
    %478 = vector.broadcast %cst_229 : f32 to vector<5x32xf32>
    %c1_230 = arith.constant 1 : index
    %c0_231 = arith.constant 0 : index
    %c0_232 = arith.constant 0 : index
    %479 = vector.load %arg27[%c1_230, %c0_231, %c0_232] : memref<4x1x32xf32, #tpu.memory_space<vmem>>, vector<1x1x32xf32>
    %480 = vector.shape_cast %479 : vector<1x1x32xf32> to vector<1x32xf32>
    %481 = vector.broadcast %480 : vector<1x32xf32> to vector<5x32xf32>
    %482 = arith.addf %478, %481 : vector<5x32xf32>
    %c0_233 = arith.constant 0 : index
    %c0_234 = arith.constant 0 : index
    %483 = vector.load %arg54[%c0_233, %c0_234] : memref<8x32xf32, #tpu.memory_space<vmem>>, vector<5x32xf32>
    %484 = vector.extract_strided_slice %477 {offsets = [0, 0], sizes = [1, 32], strides = [1, 1]} : vector<4x32xf32> to vector<1x32xf32>
    %485 = vector.broadcast %484 : vector<1x32xf32> to vector<5x32xf32>
    %486 = arith.mulf %483, %485 : vector<5x32xf32>
    %487 = arith.addf %482, %486 : vector<5x32xf32>
    %c1_235 = arith.constant 1 : index
    %c0_236 = arith.constant 0 : index
    %488 = vector.load %arg54[%c1_235, %c0_236] : memref<8x32xf32, #tpu.memory_space<vmem>>, vector<5x32xf32>
    %489 = vector.extract_strided_slice %477 {offsets = [1, 0], sizes = [1, 32], strides = [1, 1]} : vector<4x32xf32> to vector<1x32xf32>
    %490 = vector.broadcast %489 : vector<1x32xf32> to vector<5x32xf32>
    %491 = arith.mulf %488, %490 : vector<5x32xf32>
    %492 = arith.addf %487, %491 : vector<5x32xf32>
    %c2_237 = arith.constant 2 : index
    %c0_238 = arith.constant 0 : index
    %493 = vector.load %arg54[%c2_237, %c0_238] : memref<8x32xf32, #tpu.memory_space<vmem>>, vector<5x32xf32>
    %494 = vector.extract_strided_slice %477 {offsets = [2, 0], sizes = [1, 32], strides = [1, 1]} : vector<4x32xf32> to vector<1x32xf32>
    %495 = vector.broadcast %494 : vector<1x32xf32> to vector<5x32xf32>
    %496 = arith.mulf %493, %495 : vector<5x32xf32>
    %497 = arith.addf %492, %496 : vector<5x32xf32>
    %c3_239 = arith.constant 3 : index
    %c0_240 = arith.constant 0 : index
    %498 = vector.load %arg54[%c3_239, %c0_240] : memref<8x32xf32, #tpu.memory_space<vmem>>, vector<5x32xf32>
    %499 = vector.extract_strided_slice %477 {offsets = [3, 0], sizes = [1, 32], strides = [1, 1]} : vector<4x32xf32> to vector<1x32xf32>
    %500 = vector.broadcast %499 : vector<1x32xf32> to vector<5x32xf32>
    %501 = arith.mulf %498, %500 : vector<5x32xf32>
    %502 = arith.addf %497, %501 : vector<5x32xf32>
    %cst_241 = arith.constant 0.000000e+00 : f32
    %503 = vector.broadcast %cst_241 : f32 to vector<5x32xf32>
    %504 = arith.subf %503, %502 : vector<5x32xf32>
    %505 = math.exp %504 : vector<5x32xf32>
    %cst_242 = arith.constant 1.000000e+00 : f32
    %506 = vector.broadcast %cst_242 : f32 to vector<5x32xf32>
    %507 = arith.addf %506, %505 : vector<5x32xf32>
    %cst_243 = arith.constant 1.000000e+00 : f32
    %508 = vector.broadcast %cst_243 : f32 to vector<5x32xf32>
    %509 = arith.divf %508, %507 : vector<5x32xf32>
    %510 = arith.mulf %502, %509 : vector<5x32xf32>
    %c1_244 = arith.constant 1 : index
    %c0_245 = arith.constant 0 : index
    %c0_246 = arith.constant 0 : index
    %511 = vector.load %arg28[%c1_244, %c0_245, %c0_246] : memref<4x32x32xf32, #tpu.memory_space<vmem>>, vector<1x32x32xf32>
    %512 = vector.shape_cast %511 : vector<1x32x32xf32> to vector<32x32xf32>
    %513 = arith.truncf %510 : vector<5x32xf32> to vector<5x32xbf16>
    %514 = arith.truncf %512 : vector<32x32xf32> to vector<32x32xbf16>
    %cst_247 = arith.constant dense<0.000000e+00> : vector<5x32xf32>
    %515 = tpu.matmul %513, %514, %cst_247 {dimension_numbers = #tpu.dot_dimension_numbers<[1], [0], [0], [1], [0, 0, 1, 1], [], []>} : vector<5x32xbf16>, vector<32x32xbf16>, vector<5x32xf32> -> vector<5x32xf32>
    %c1_248 = arith.constant 1 : index
    %c0_249 = arith.constant 0 : index
    %c0_250 = arith.constant 0 : index
    %516 = vector.load %arg29[%c1_248, %c0_249, %c0_250] : memref<4x1x32xf32, #tpu.memory_space<vmem>>, vector<1x1x32xf32>
    %517 = vector.shape_cast %516 : vector<1x1x32xf32> to vector<1x32xf32>
    %518 = vector.broadcast %517 : vector<1x32xf32> to vector<5x32xf32>
    %519 = arith.addf %515, %518 : vector<5x32xf32>
    %cst_251 = arith.constant 0.000000e+00 : f32
    %520 = vector.broadcast %cst_251 : f32 to vector<5x32xf32>
    %521 = arith.maximumf %519, %520 : vector<5x32xf32>
    %522 = math.absf %519 : vector<5x32xf32>
    %cst_252 = arith.constant 0.000000e+00 : f32
    %523 = vector.broadcast %cst_252 : f32 to vector<5x32xf32>
    %524 = arith.subf %523, %522 : vector<5x32xf32>
    %525 = math.exp %524 : vector<5x32xf32>
    %cst_253 = arith.constant 1.000000e+00 : f32
    %526 = vector.broadcast %cst_253 : f32 to vector<5x32xf32>
    %527 = arith.addf %526, %525 : vector<5x32xf32>
    %528 = math.log %527 : vector<5x32xf32>
    %529 = arith.addf %521, %528 : vector<5x32xf32>
    %530 = arith.mulf %529, %510 : vector<5x32xf32>
    %c1_254 = arith.constant 1 : index
    %c0_255 = arith.constant 0 : index
    %c0_256 = arith.constant 0 : index
    %531 = vector.load %arg31[%c1_254, %c0_255, %c0_256] : memref<4x8x32xf32, #tpu.memory_space<vmem>>, vector<1x8x32xf32>
    %532 = vector.shape_cast %531 : vector<1x8x32xf32> to vector<8x32xf32>
    %c1_257 = arith.constant 1 : index
    %c0_258 = arith.constant 0 : index
    %c0_259 = arith.constant 0 : index
    %533 = vector.load %arg32[%c1_257, %c0_258, %c0_259] : memref<4x1x32xf32, #tpu.memory_space<vmem>>, vector<1x1x32xf32>
    %534 = vector.shape_cast %533 : vector<1x1x32xf32> to vector<1x32xf32>
    %c1_260 = arith.constant 1 : index
    %c0_261 = arith.constant 0 : index
    %c0_262 = arith.constant 0 : index
    %535 = vector.load %arg30[%c1_260, %c0_261, %c0_262] : memref<4x16x32xf32, #tpu.memory_space<vmem>>, vector<1x16x32xf32>
    %536 = vector.shape_cast %535 : vector<1x16x32xf32> to vector<16x32xf32>
    "tpu.trace_start"() <{level = 10 : i32, message = "nd,td->nt"}> : () -> ()
    %cst_263 = arith.constant dense<0.000000e+00> : vector<16x5xf32>
    %537 = tpu.matmul %536, %510, %cst_263 {dimension_numbers = #tpu.dot_dimension_numbers<[1], [1], [0], [0], [0, 0, 1, 0], [], []>} : vector<16x32xf32>, vector<5x32xf32>, vector<16x5xf32> -> vector<16x5xf32>
    "tpu.trace_stop"() : () -> ()
    %538 = vector.extract_strided_slice %537 {offsets = [0, 0], sizes = [8, 5], strides = [1, 1]} : vector<16x5xf32> to vector<8x5xf32>
    %539 = vector.extract_strided_slice %537 {offsets = [8, 0], sizes = [8, 5], strides = [1, 1]} : vector<16x5xf32> to vector<8x5xf32>
    %cst_264 = arith.constant 0.000000e+00 : f32
    %540 = vector.broadcast %cst_264 : f32 to vector<8x32xf32>
    %541 = vector.extract_strided_slice %529 {offsets = [0, 0], sizes = [1, 32], strides = [1, 1]} : vector<5x32xf32> to vector<1x32xf32>
    %542 = vector.broadcast %541 : vector<1x32xf32> to vector<8x32xf32>
    %543 = arith.mulf %542, %532 : vector<8x32xf32>
    %544 = math.exp %543 : vector<8x32xf32>
    %545 = arith.mulf %544, %540 : vector<8x32xf32>
    %546 = vector.extract_strided_slice %538 {offsets = [0, 0], sizes = [8, 1], strides = [1, 1]} : vector<8x5xf32> to vector<8x1xf32>
    %547 = vector.extract_strided_slice %530 {offsets = [0, 0], sizes = [1, 32], strides = [1, 1]} : vector<5x32xf32> to vector<1x32xf32>
    %548 = vector.broadcast %546 : vector<8x1xf32> to vector<8x32xf32>
    %549 = vector.broadcast %547 : vector<1x32xf32> to vector<8x32xf32>
    %550 = arith.mulf %548, %549 : vector<8x32xf32>
    %551 = arith.addf %545, %550 : vector<8x32xf32>
    %552 = vector.extract_strided_slice %539 {offsets = [0, 0], sizes = [8, 1], strides = [1, 1]} : vector<8x5xf32> to vector<8x1xf32>
    %553 = vector.broadcast %552 : vector<8x1xf32> to vector<8x32xf32>
    %554 = arith.mulf %553, %551 : vector<8x32xf32>
    %cst_265 = arith.constant dense<0.000000e+00> : vector<32xf32>
    %555 = vector.multi_reduction <add>, %554, %cst_265 [0] : vector<8x32xf32> to vector<32xf32>
    %556 = vector.shape_cast %555 : vector<32xf32> to vector<1x32xf32>
    %557 = vector.extract_strided_slice %510 {offsets = [0, 0], sizes = [1, 32], strides = [1, 1]} : vector<5x32xf32> to vector<1x32xf32>
    %558 = arith.mulf %534, %557 : vector<1x32xf32>
    %559 = arith.addf %556, %558 : vector<1x32xf32>
    %c0_266 = arith.constant 0 : index
    %c0_267 = arith.constant 0 : index
    %560 = vector.load %arg55[%c0_266, %c0_267] : memref<5x32xf32, #tpu.memory_space<vmem>>, vector<1x32xf32>
    tpu.vector_store %arg55[%c0_266, %c0_267], %559 {strides = array<i32>} : memref<5x32xf32, #tpu.memory_space<vmem>>, vector<1x32xf32>,
    %561 = vector.extract_strided_slice %529 {offsets = [1, 0], sizes = [1, 32], strides = [1, 1]} : vector<5x32xf32> to vector<1x32xf32>
    %562 = vector.broadcast %561 : vector<1x32xf32> to vector<8x32xf32>
    %563 = arith.mulf %562, %532 : vector<8x32xf32>
    %564 = math.exp %563 : vector<8x32xf32>
    %565 = arith.mulf %564, %551 : vector<8x32xf32>
    %566 = vector.extract_strided_slice %538 {offsets = [0, 1], sizes = [8, 1], strides = [1, 1]} : vector<8x5xf32> to vector<8x1xf32>
    %567 = vector.extract_strided_slice %530 {offsets = [1, 0], sizes = [1, 32], strides = [1, 1]} : vector<5x32xf32> to vector<1x32xf32>
    %568 = vector.broadcast %566 : vector<8x1xf32> to vector<8x32xf32>
    %569 = vector.broadcast %567 : vector<1x32xf32> to vector<8x32xf32>
    %570 = arith.mulf %568, %569 : vector<8x32xf32>
    %571 = arith.addf %565, %570 : vector<8x32xf32>
    %572 = vector.extract_strided_slice %539 {offsets = [0, 1], sizes = [8, 1], strides = [1, 1]} : vector<8x5xf32> to vector<8x1xf32>
    %573 = vector.broadcast %572 : vector<8x1xf32> to vector<8x32xf32>
    %574 = arith.mulf %573, %571 : vector<8x32xf32>
    %cst_268 = arith.constant dense<0.000000e+00> : vector<32xf32>
    %575 = vector.multi_reduction <add>, %574, %cst_268 [0] : vector<8x32xf32> to vector<32xf32>
    %576 = vector.shape_cast %575 : vector<32xf32> to vector<1x32xf32>
    %577 = vector.extract_strided_slice %510 {offsets = [1, 0], sizes = [1, 32], strides = [1, 1]} : vector<5x32xf32> to vector<1x32xf32>
    %578 = arith.mulf %534, %577 : vector<1x32xf32>
    %579 = arith.addf %576, %578 : vector<1x32xf32>
    %c1_269 = arith.constant 1 : index
    %c0_270 = arith.constant 0 : index
    %580 = vector.load %arg55[%c1_269, %c0_270] : memref<5x32xf32, #tpu.memory_space<vmem>>, vector<1x32xf32>
    tpu.vector_store %arg55[%c1_269, %c0_270], %579 {strides = array<i32>} : memref<5x32xf32, #tpu.memory_space<vmem>>, vector<1x32xf32>,
    %581 = vector.extract_strided_slice %529 {offsets = [2, 0], sizes = [1, 32], strides = [1, 1]} : vector<5x32xf32> to vector<1x32xf32>
    %582 = vector.broadcast %581 : vector<1x32xf32> to vector<8x32xf32>
    %583 = arith.mulf %582, %532 : vector<8x32xf32>
    %584 = math.exp %583 : vector<8x32xf32>
    %585 = arith.mulf %584, %571 : vector<8x32xf32>
    %586 = vector.extract_strided_slice %538 {offsets = [0, 2], sizes = [8, 1], strides = [1, 1]} : vector<8x5xf32> to vector<8x1xf32>
    %587 = vector.extract_strided_slice %530 {offsets = [2, 0], sizes = [1, 32], strides = [1, 1]} : vector<5x32xf32> to vector<1x32xf32>
    %588 = vector.broadcast %586 : vector<8x1xf32> to vector<8x32xf32>
    %589 = vector.broadcast %587 : vector<1x32xf32> to vector<8x32xf32>
    %590 = arith.mulf %588, %589 : vector<8x32xf32>
    %591 = arith.addf %585, %590 : vector<8x32xf32>
    %592 = vector.extract_strided_slice %539 {offsets = [0, 2], sizes = [8, 1], strides = [1, 1]} : vector<8x5xf32> to vector<8x1xf32>
    %593 = vector.broadcast %592 : vector<8x1xf32> to vector<8x32xf32>
    %594 = arith.mulf %593, %591 : vector<8x32xf32>
    %cst_271 = arith.constant dense<0.000000e+00> : vector<32xf32>
    %595 = vector.multi_reduction <add>, %594, %cst_271 [0] : vector<8x32xf32> to vector<32xf32>
    %596 = vector.shape_cast %595 : vector<32xf32> to vector<1x32xf32>
    %597 = vector.extract_strided_slice %510 {offsets = [2, 0], sizes = [1, 32], strides = [1, 1]} : vector<5x32xf32> to vector<1x32xf32>
    %598 = arith.mulf %534, %597 : vector<1x32xf32>
    %599 = arith.addf %596, %598 : vector<1x32xf32>
    %c2_272 = arith.constant 2 : index
    %c0_273 = arith.constant 0 : index
    %600 = vector.load %arg55[%c2_272, %c0_273] : memref<5x32xf32, #tpu.memory_space<vmem>>, vector<1x32xf32>
    tpu.vector_store %arg55[%c2_272, %c0_273], %599 {strides = array<i32>} : memref<5x32xf32, #tpu.memory_space<vmem>>, vector<1x32xf32>,
    %601 = vector.extract_strided_slice %529 {offsets = [3, 0], sizes = [1, 32], strides = [1, 1]} : vector<5x32xf32> to vector<1x32xf32>
    %602 = vector.broadcast %601 : vector<1x32xf32> to vector<8x32xf32>
    %603 = arith.mulf %602, %532 : vector<8x32xf32>
    %604 = math.exp %603 : vector<8x32xf32>
    %605 = arith.mulf %604, %591 : vector<8x32xf32>
    %606 = vector.extract_strided_slice %538 {offsets = [0, 3], sizes = [8, 1], strides = [1, 1]} : vector<8x5xf32> to vector<8x1xf32>
    %607 = vector.extract_strided_slice %530 {offsets = [3, 0], sizes = [1, 32], strides = [1, 1]} : vector<5x32xf32> to vector<1x32xf32>
    %608 = vector.broadcast %606 : vector<8x1xf32> to vector<8x32xf32>
    %609 = vector.broadcast %607 : vector<1x32xf32> to vector<8x32xf32>
    %610 = arith.mulf %608, %609 : vector<8x32xf32>
    %611 = arith.addf %605, %610 : vector<8x32xf32>
    %612 = vector.extract_strided_slice %539 {offsets = [0, 3], sizes = [8, 1], strides = [1, 1]} : vector<8x5xf32> to vector<8x1xf32>
    %613 = vector.broadcast %612 : vector<8x1xf32> to vector<8x32xf32>
    %614 = arith.mulf %613, %611 : vector<8x32xf32>
    %cst_274 = arith.constant dense<0.000000e+00> : vector<32xf32>
    %615 = vector.multi_reduction <add>, %614, %cst_274 [0] : vector<8x32xf32> to vector<32xf32>
    %616 = vector.shape_cast %615 : vector<32xf32> to vector<1x32xf32>
    %617 = vector.extract_strided_slice %510 {offsets = [3, 0], sizes = [1, 32], strides = [1, 1]} : vector<5x32xf32> to vector<1x32xf32>
    %618 = arith.mulf %534, %617 : vector<1x32xf32>
    %619 = arith.addf %616, %618 : vector<1x32xf32>
    %c3_275 = arith.constant 3 : index
    %c0_276 = arith.constant 0 : index
    %620 = vector.load %arg55[%c3_275, %c0_276] : memref<5x32xf32, #tpu.memory_space<vmem>>, vector<1x32xf32>
    tpu.vector_store %arg55[%c3_275, %c0_276], %619 {strides = array<i32>} : memref<5x32xf32, #tpu.memory_space<vmem>>, vector<1x32xf32>,
    %621 = vector.extract_strided_slice %529 {offsets = [4, 0], sizes = [1, 32], strides = [1, 1]} : vector<5x32xf32> to vector<1x32xf32>
    %622 = vector.broadcast %621 : vector<1x32xf32> to vector<8x32xf32>
    %623 = arith.mulf %622, %532 : vector<8x32xf32>
    %624 = math.exp %623 : vector<8x32xf32>
    %625 = arith.mulf %624, %611 : vector<8x32xf32>
    %626 = vector.extract_strided_slice %538 {offsets = [0, 4], sizes = [8, 1], strides = [1, 1]} : vector<8x5xf32> to vector<8x1xf32>
    %627 = vector.extract_strided_slice %530 {offsets = [4, 0], sizes = [1, 32], strides = [1, 1]} : vector<5x32xf32> to vector<1x32xf32>
    %628 = vector.broadcast %626 : vector<8x1xf32> to vector<8x32xf32>
    %629 = vector.broadcast %627 : vector<1x32xf32> to vector<8x32xf32>
    %630 = arith.mulf %628, %629 : vector<8x32xf32>
    %631 = arith.addf %625, %630 : vector<8x32xf32>
    %632 = vector.extract_strided_slice %539 {offsets = [0, 4], sizes = [8, 1], strides = [1, 1]} : vector<8x5xf32> to vector<8x1xf32>
    %633 = vector.broadcast %632 : vector<8x1xf32> to vector<8x32xf32>
    %634 = arith.mulf %633, %631 : vector<8x32xf32>
    %cst_277 = arith.constant dense<0.000000e+00> : vector<32xf32>
    %635 = vector.multi_reduction <add>, %634, %cst_277 [0] : vector<8x32xf32> to vector<32xf32>
    %636 = vector.shape_cast %635 : vector<32xf32> to vector<1x32xf32>
    %637 = vector.extract_strided_slice %510 {offsets = [4, 0], sizes = [1, 32], strides = [1, 1]} : vector<5x32xf32> to vector<1x32xf32>
    %638 = arith.mulf %534, %637 : vector<1x32xf32>
    %639 = arith.addf %636, %638 : vector<1x32xf32>
    %c4_278 = arith.constant 4 : index
    %c0_279 = arith.constant 0 : index
    %640 = vector.load %arg55[%c4_278, %c0_279] : memref<5x32xf32, #tpu.memory_space<vmem>>, vector<1x32xf32>
    tpu.vector_store %arg55[%c4_278, %c0_279], %639 {strides = array<i32>} : memref<5x32xf32, #tpu.memory_space<vmem>>, vector<1x32xf32>,
    %c0_280 = arith.constant 0 : index
    %c0_281 = arith.constant 0 : index
    %641 = vector.load %arg55[%c0_280, %c0_281] : memref<5x32xf32, #tpu.memory_space<vmem>>, vector<5x32xf32>
    %cst_282 = arith.constant 0.000000e+00 : f32
    %642 = vector.broadcast %cst_282 : f32 to vector<5x32xf32>
    %643 = arith.subf %642, %472 : vector<5x32xf32>
    %644 = math.exp %643 : vector<5x32xf32>
    %cst_283 = arith.constant 1.000000e+00 : f32
    %645 = vector.broadcast %cst_283 : f32 to vector<5x32xf32>
    %646 = arith.addf %645, %644 : vector<5x32xf32>
    %cst_284 = arith.constant 1.000000e+00 : f32
    %647 = vector.broadcast %cst_284 : f32 to vector<5x32xf32>
    %648 = arith.divf %647, %646 : vector<5x32xf32>
    %649 = arith.mulf %472, %648 : vector<5x32xf32>
    %650 = arith.mulf %641, %649 : vector<5x32xf32>
    %c1_285 = arith.constant 1 : index
    %c0_286 = arith.constant 0 : index
    %c0_287 = arith.constant 0 : index
    %651 = vector.load %arg33[%c1_285, %c0_286, %c0_287] : memref<4x32x16xf32, #tpu.memory_space<vmem>>, vector<1x32x16xf32>
    %652 = vector.shape_cast %651 : vector<1x32x16xf32> to vector<32x16xf32>
    %653 = arith.truncf %650 : vector<5x32xf32> to vector<5x32xbf16>
    %654 = arith.truncf %652 : vector<32x16xf32> to vector<32x16xbf16>
    %cst_288 = arith.constant dense<0.000000e+00> : vector<5x16xf32>
    %655 = tpu.matmul %653, %654, %cst_288 {dimension_numbers = #tpu.dot_dimension_numbers<[1], [0], [0], [1], [0, 0, 1, 1], [], []>} : vector<5x32xbf16>, vector<32x16xbf16>, vector<5x16xf32> -> vector<5x16xf32>
    %c1_289 = arith.constant 1 : index
    %c0_290 = arith.constant 0 : index
    %c0_291 = arith.constant 0 : index
    %656 = vector.load %arg34[%c1_289, %c0_290, %c0_291] : memref<4x1x16xf32, #tpu.memory_space<vmem>>, vector<1x1x16xf32>
    %657 = vector.shape_cast %656 : vector<1x1x16xf32> to vector<1x16xf32>
    %658 = vector.broadcast %657 : vector<1x16xf32> to vector<5x16xf32>
    %659 = arith.addf %655, %658 : vector<5x16xf32>
    %c0_292 = arith.constant 0 : index
    %c0_293 = arith.constant 0 : index
    %c0_294 = arith.constant 0 : index
    %660 = vector.load %arg35[%c0_292, %c0_293, %c0_294] : memref<2x16x32xf32, #tpu.memory_space<vmem>>, vector<1x16x32xf32>
    %661 = vector.shape_cast %660 : vector<1x16x32xf32> to vector<16x32xf32>
    %662 = arith.truncf %659 : vector<5x16xf32> to vector<5x16xbf16>
    %663 = arith.truncf %661 : vector<16x32xf32> to vector<16x32xbf16>
    %cst_295 = arith.constant dense<0.000000e+00> : vector<5x32xf32>
    %664 = tpu.matmul %662, %663, %cst_295 {dimension_numbers = #tpu.dot_dimension_numbers<[1], [0], [0], [1], [0, 0, 1, 1], [], []>} : vector<5x16xbf16>, vector<16x32xbf16>, vector<5x32xf32> -> vector<5x32xf32>
    %c0_296 = arith.constant 0 : index
    %c0_297 = arith.constant 0 : index
    %c0_298 = arith.constant 0 : index
    %665 = vector.load %arg36[%c0_296, %c0_297, %c0_298] : memref<2x1x32xf32, #tpu.memory_space<vmem>>, vector<1x1x32xf32>
    %666 = vector.shape_cast %665 : vector<1x1x32xf32> to vector<1x32xf32>
    %667 = vector.broadcast %666 : vector<1x32xf32> to vector<5x32xf32>
    %668 = arith.addf %664, %667 : vector<5x32xf32>
    %669 = vector.extract_strided_slice %209 {offsets = [1, 0], sizes = [4, 32], strides = [1, 1]} : vector<5x32xf32> to vector<4x32xf32>
    %670 = vector.extract_strided_slice %668 {offsets = [1, 0], sizes = [4, 32], strides = [1, 1]} : vector<5x32xf32> to vector<4x32xf32>
    %671 = arith.subf %669, %670 : vector<4x32xf32>
    %672 = arith.mulf %671, %671 : vector<4x32xf32>
    %cst_299 = arith.constant dense<0.000000e+00> : vector<4xf32>
    %673 = vector.multi_reduction <add>, %672, %cst_299 [1] : vector<4x32xf32> to vector<4xf32>
    %674 = vector.shape_cast %673 : vector<4xf32> to vector<4x1xf32>
    %cst_300 = arith.constant dense<0.000000e+00> : vector<1xf32>
    %675 = vector.multi_reduction <add>, %674, %cst_300 [0] : vector<4x1xf32> to vector<1xf32>
    %676 = vector.shape_cast %675 : vector<1xf32> to vector<1x1xf32>
    %677 = arith.addf %33, %676 : vector<1x1xf32>
    %c0_301 = arith.constant 0 : index
    %c0_302 = arith.constant 0 : index
    %c0_303 = arith.constant 0 : index
    %678 = vector.load %arg37[%c0_301, %c0_302, %c0_303] : memref<2x32x16xf32, #tpu.memory_space<vmem>>, vector<1x32x16xf32>
    %679 = vector.shape_cast %678 : vector<1x32x16xf32> to vector<32x16xf32>
    %680 = arith.truncf %668 : vector<5x32xf32> to vector<5x32xbf16>
    %681 = arith.truncf %679 : vector<32x16xf32> to vector<32x16xbf16>
    %cst_304 = arith.constant dense<0.000000e+00> : vector<5x16xf32>
    %682 = tpu.matmul %680, %681, %cst_304 {dimension_numbers = #tpu.dot_dimension_numbers<[1], [0], [0], [1], [0, 0, 1, 1], [], []>} : vector<5x32xbf16>, vector<32x16xbf16>, vector<5x16xf32> -> vector<5x16xf32>
    %683 = arith.addf %659, %682 : vector<5x16xf32>
    %c0_305 = arith.constant 0 : index
    %c0_306 = arith.constant 0 : index
    %c0_307 = arith.constant 0 : index
    %684 = vector.load %arg38[%c0_305, %c0_306, %c0_307] : memref<2x1x16xf32, #tpu.memory_space<vmem>>, vector<1x1x16xf32>
    %685 = vector.shape_cast %684 : vector<1x1x16xf32> to vector<1x16xf32>
    %686 = vector.broadcast %685 : vector<1x16xf32> to vector<5x16xf32>
    %687 = arith.addf %683, %686 : vector<5x16xf32>
    %c1_308 = arith.constant 1 : index
    %c0_309 = arith.constant 0 : index
    %c0_310 = arith.constant 0 : index
    %688 = vector.load %arg10[%c1_308, %c0_309, %c0_310] : memref<2x1x32xf32, #tpu.memory_space<vmem>>, vector<1x1x32xf32>
    %689 = vector.shape_cast %688 : vector<1x1x32xf32> to vector<1x32xf32>
    %c1_311 = arith.constant 1 : index
    %c0_312 = arith.constant 0 : index
    %c0_313 = arith.constant 0 : index
    %690 = vector.load %arg11[%c1_311, %c0_312, %c0_313] : memref<2x1x32xf32, #tpu.memory_space<vmem>>, vector<1x1x32xf32>
    %691 = vector.shape_cast %690 : vector<1x1x32xf32> to vector<1x32xf32>
    %cst_314 = arith.constant dense<0.000000e+00> : vector<5xf32>
    %692 = vector.multi_reduction <add>, %209, %cst_314 [1] : vector<5x32xf32> to vector<5xf32>
    %693 = vector.shape_cast %692 : vector<5xf32> to vector<5x1xf32>
    %cst_315 = arith.constant 3.200000e+01 : f32
    %694 = vector.broadcast %cst_315 : f32 to vector<5x1xf32>
    %695 = arith.divf %693, %694 : vector<5x1xf32>
    %696 = vector.broadcast %695 : vector<5x1xf32> to vector<5x32xf32>
    %697 = arith.subf %209, %696 : vector<5x32xf32>
    %698 = arith.mulf %697, %697 : vector<5x32xf32>
    %cst_316 = arith.constant dense<0.000000e+00> : vector<5xf32>
    %699 = vector.multi_reduction <add>, %698, %cst_316 [1] : vector<5x32xf32> to vector<5xf32>
    %700 = vector.shape_cast %699 : vector<5xf32> to vector<5x1xf32>
    %cst_317 = arith.constant 3.200000e+01 : f32
    %701 = vector.broadcast %cst_317 : f32 to vector<5x1xf32>
    %702 = arith.divf %700, %701 : vector<5x1xf32>
    %703 = vector.broadcast %695 : vector<5x1xf32> to vector<5x32xf32>
    %704 = arith.subf %209, %703 : vector<5x32xf32>
    %cst_318 = arith.constant 9.99999974E-6 : f32
    %705 = vector.broadcast %cst_318 : f32 to vector<5x1xf32>
    %706 = arith.addf %702, %705 : vector<5x1xf32>
    %707 = math.rsqrt %706 : vector<5x1xf32>
    %708 = vector.broadcast %707 : vector<5x1xf32> to vector<5x32xf32>
    %709 = arith.mulf %704, %708 : vector<5x32xf32>
    %710 = vector.broadcast %689 : vector<1x32xf32> to vector<5x32xf32>
    %711 = arith.mulf %709, %710 : vector<5x32xf32>
    %712 = vector.broadcast %691 : vector<1x32xf32> to vector<5x32xf32>
    %713 = arith.addf %711, %712 : vector<5x32xf32>
    %c1_319 = arith.constant 1 : index
    %c0_320 = arith.constant 0 : index
    %c0_321 = arith.constant 0 : index
    %714 = vector.load %arg12[%c1_319, %c0_320, %c0_321] : memref<2x32x96xf32, #tpu.memory_space<vmem>>, vector<1x32x96xf32>
    %715 = vector.shape_cast %714 : vector<1x32x96xf32> to vector<32x96xf32>
    %716 = arith.truncf %713 : vector<5x32xf32> to vector<5x32xbf16>
    %717 = arith.truncf %715 : vector<32x96xf32> to vector<32x96xbf16>
    %cst_322 = arith.constant dense<0.000000e+00> : vector<5x96xf32>
    %718 = tpu.matmul %716, %717, %cst_322 {dimension_numbers = #tpu.dot_dimension_numbers<[1], [0], [0], [1], [0, 0, 1, 1], [], []>} : vector<5x32xbf16>, vector<32x96xbf16>, vector<5x96xf32> -> vector<5x96xf32>
    %c1_323 = arith.constant 1 : index
    %c0_324 = arith.constant 0 : index
    %c0_325 = arith.constant 0 : index
    %719 = vector.load %arg13[%c1_323, %c0_324, %c0_325] : memref<2x1x96xf32, #tpu.memory_space<vmem>>, vector<1x1x96xf32>
    %720 = vector.shape_cast %719 : vector<1x1x96xf32> to vector<1x96xf32>
    %721 = vector.broadcast %720 : vector<1x96xf32> to vector<5x96xf32>
    %722 = arith.addf %718, %721 : vector<5x96xf32>
    %723 = vector.extract_strided_slice %722 {offsets = [0, 0], sizes = [5, 8], strides = [1, 1]} : vector<5x96xf32> to vector<5x8xf32>
    %724 = vector.extract_strided_slice %722 {offsets = [0, 32], sizes = [5, 8], strides = [1, 1]} : vector<5x96xf32> to vector<5x8xf32>
    %725 = vector.extract_strided_slice %722 {offsets = [0, 64], sizes = [5, 8], strides = [1, 1]} : vector<5x96xf32> to vector<5x8xf32>
    "tpu.trace_start"() <{level = 10 : i32, message = "qd,kd->qk"}> : () -> ()
    %cst_326 = arith.constant dense<0.000000e+00> : vector<5x5xf32>
    %726 = tpu.matmul %723, %724, %cst_326 {dimension_numbers = #tpu.dot_dimension_numbers<[1], [1], [0], [0], [0, 0, 1, 0], [], []>} : vector<5x8xf32>, vector<5x8xf32>, vector<5x5xf32> -> vector<5x5xf32>
    "tpu.trace_stop"() : () -> ()
    %cst_327 = arith.constant 0.353553385 : f32
    %727 = vector.broadcast %cst_327 : f32 to vector<5x5xf32>
    %728 = arith.mulf %726, %727 : vector<5x5xf32>
    %cst_328 = arith.constant dense<0xFF800000> : vector<5xf32>
    %729 = vector.multi_reduction <maximumf>, %728, %cst_328 [1] : vector<5x5xf32> to vector<5xf32>
    %730 = vector.shape_cast %729 : vector<5xf32> to vector<5x1xf32>
    %731 = vector.broadcast %730 : vector<5x1xf32> to vector<5x5xf32>
    %732 = arith.subf %728, %731 : vector<5x5xf32>
    %733 = math.exp %732 : vector<5x5xf32>
    %cst_329 = arith.constant dense<0.000000e+00> : vector<5xf32>
    %734 = vector.multi_reduction <add>, %733, %cst_329 [1] : vector<5x5xf32> to vector<5xf32>
    %735 = vector.shape_cast %734 : vector<5xf32> to vector<5x1xf32>
    %736 = tpu.reciprocal %735 {approx = true} : vector<5x1xf32> -> vector<5x1xf32>
    %737 = vector.broadcast %736 : vector<5x1xf32> to vector<5x5xf32>
    %738 = arith.mulf %733, %737 : vector<5x5xf32>
    "tpu.trace_start"() <{level = 10 : i32, message = "qk,kd->qd"}> : () -> ()
    %cst_330 = arith.constant dense<0.000000e+00> : vector<5x8xf32>
    %739 = tpu.matmul %738, %725, %cst_330 {dimension_numbers = #tpu.dot_dimension_numbers<[1], [0], [0], [1], [0, 0, 1, 1], [], []>} : vector<5x5xf32>, vector<5x8xf32>, vector<5x8xf32> -> vector<5x8xf32>
    "tpu.trace_stop"() : () -> ()
    %c0_331 = arith.constant 0 : index
    %c0_332 = arith.constant 0 : index
    %740 = vector.load %arg52[%c0_331, %c0_332] : memref<5x32xf32, #tpu.memory_space<vmem>>, vector<5x8xf32>
    tpu.vector_store %arg52[%c0_331, %c0_332], %739 {strides = array<i32>} : memref<5x32xf32, #tpu.memory_space<vmem>>, vector<5x8xf32>,
    %741 = vector.extract_strided_slice %722 {offsets = [0, 8], sizes = [5, 8], strides = [1, 1]} : vector<5x96xf32> to vector<5x8xf32>
    %742 = vector.extract_strided_slice %722 {offsets = [0, 40], sizes = [5, 8], strides = [1, 1]} : vector<5x96xf32> to vector<5x8xf32>
    %743 = vector.extract_strided_slice %722 {offsets = [0, 72], sizes = [5, 8], strides = [1, 1]} : vector<5x96xf32> to vector<5x8xf32>
    "tpu.trace_start"() <{level = 10 : i32, message = "qd,kd->qk"}> : () -> ()
    %cst_333 = arith.constant dense<0.000000e+00> : vector<5x5xf32>
    %744 = tpu.matmul %741, %742, %cst_333 {dimension_numbers = #tpu.dot_dimension_numbers<[1], [1], [0], [0], [0, 0, 1, 0], [], []>} : vector<5x8xf32>, vector<5x8xf32>, vector<5x5xf32> -> vector<5x5xf32>
    "tpu.trace_stop"() : () -> ()
    %cst_334 = arith.constant 0.353553385 : f32
    %745 = vector.broadcast %cst_334 : f32 to vector<5x5xf32>
    %746 = arith.mulf %744, %745 : vector<5x5xf32>
    %cst_335 = arith.constant dense<0xFF800000> : vector<5xf32>
    %747 = vector.multi_reduction <maximumf>, %746, %cst_335 [1] : vector<5x5xf32> to vector<5xf32>
    %748 = vector.shape_cast %747 : vector<5xf32> to vector<5x1xf32>
    %749 = vector.broadcast %748 : vector<5x1xf32> to vector<5x5xf32>
    %750 = arith.subf %746, %749 : vector<5x5xf32>
    %751 = math.exp %750 : vector<5x5xf32>
    %cst_336 = arith.constant dense<0.000000e+00> : vector<5xf32>
    %752 = vector.multi_reduction <add>, %751, %cst_336 [1] : vector<5x5xf32> to vector<5xf32>
    %753 = vector.shape_cast %752 : vector<5xf32> to vector<5x1xf32>
    %754 = tpu.reciprocal %753 {approx = true} : vector<5x1xf32> -> vector<5x1xf32>
    %755 = vector.broadcast %754 : vector<5x1xf32> to vector<5x5xf32>
    %756 = arith.mulf %751, %755 : vector<5x5xf32>
    "tpu.trace_start"() <{level = 10 : i32, message = "qk,kd->qd"}> : () -> ()
    %cst_337 = arith.constant dense<0.000000e+00> : vector<5x8xf32>
    %757 = tpu.matmul %756, %743, %cst_337 {dimension_numbers = #tpu.dot_dimension_numbers<[1], [0], [0], [1], [0, 0, 1, 1], [], []>} : vector<5x5xf32>, vector<5x8xf32>, vector<5x8xf32> -> vector<5x8xf32>
    "tpu.trace_stop"() : () -> ()
    %c0_338 = arith.constant 0 : index
    %c8_339 = arith.constant 8 : index
    %758 = vector.load %arg52[%c0_338, %c8_339] : memref<5x32xf32, #tpu.memory_space<vmem>>, vector<5x8xf32>
    tpu.vector_store %arg52[%c0_338, %c8_339], %757 {strides = array<i32>} : memref<5x32xf32, #tpu.memory_space<vmem>>, vector<5x8xf32>,
    %759 = vector.extract_strided_slice %722 {offsets = [0, 16], sizes = [5, 8], strides = [1, 1]} : vector<5x96xf32> to vector<5x8xf32>
    %760 = vector.extract_strided_slice %722 {offsets = [0, 48], sizes = [5, 8], strides = [1, 1]} : vector<5x96xf32> to vector<5x8xf32>
    %761 = vector.extract_strided_slice %722 {offsets = [0, 80], sizes = [5, 8], strides = [1, 1]} : vector<5x96xf32> to vector<5x8xf32>
    "tpu.trace_start"() <{level = 10 : i32, message = "qd,kd->qk"}> : () -> ()
    %cst_340 = arith.constant dense<0.000000e+00> : vector<5x5xf32>
    %762 = tpu.matmul %759, %760, %cst_340 {dimension_numbers = #tpu.dot_dimension_numbers<[1], [1], [0], [0], [0, 0, 1, 0], [], []>} : vector<5x8xf32>, vector<5x8xf32>, vector<5x5xf32> -> vector<5x5xf32>
    "tpu.trace_stop"() : () -> ()
    %cst_341 = arith.constant 0.353553385 : f32
    %763 = vector.broadcast %cst_341 : f32 to vector<5x5xf32>
    %764 = arith.mulf %762, %763 : vector<5x5xf32>
    %cst_342 = arith.constant dense<0xFF800000> : vector<5xf32>
    %765 = vector.multi_reduction <maximumf>, %764, %cst_342 [1] : vector<5x5xf32> to vector<5xf32>
    %766 = vector.shape_cast %765 : vector<5xf32> to vector<5x1xf32>
    %767 = vector.broadcast %766 : vector<5x1xf32> to vector<5x5xf32>
    %768 = arith.subf %764, %767 : vector<5x5xf32>
    %769 = math.exp %768 : vector<5x5xf32>
    %cst_343 = arith.constant dense<0.000000e+00> : vector<5xf32>
    %770 = vector.multi_reduction <add>, %769, %cst_343 [1] : vector<5x5xf32> to vector<5xf32>
    %771 = vector.shape_cast %770 : vector<5xf32> to vector<5x1xf32>
    %772 = tpu.reciprocal %771 {approx = true} : vector<5x1xf32> -> vector<5x1xf32>
    %773 = vector.broadcast %772 : vector<5x1xf32> to vector<5x5xf32>
    %774 = arith.mulf %769, %773 : vector<5x5xf32>
    "tpu.trace_start"() <{level = 10 : i32, message = "qk,kd->qd"}> : () -> ()
    %cst_344 = arith.constant dense<0.000000e+00> : vector<5x8xf32>
    %775 = tpu.matmul %774, %761, %cst_344 {dimension_numbers = #tpu.dot_dimension_numbers<[1], [0], [0], [1], [0, 0, 1, 1], [], []>} : vector<5x5xf32>, vector<5x8xf32>, vector<5x8xf32> -> vector<5x8xf32>
    "tpu.trace_stop"() : () -> ()
    %c0_345 = arith.constant 0 : index
    %c16_346 = arith.constant 16 : index
    %776 = vector.load %arg52[%c0_345, %c16_346] : memref<5x32xf32, #tpu.memory_space<vmem>>, vector<5x8xf32>
    tpu.vector_store %arg52[%c0_345, %c16_346], %775 {strides = array<i32>} : memref<5x32xf32, #tpu.memory_space<vmem>>, vector<5x8xf32>,
    %777 = vector.extract_strided_slice %722 {offsets = [0, 24], sizes = [5, 8], strides = [1, 1]} : vector<5x96xf32> to vector<5x8xf32>
    %778 = vector.extract_strided_slice %722 {offsets = [0, 56], sizes = [5, 8], strides = [1, 1]} : vector<5x96xf32> to vector<5x8xf32>
    %779 = vector.extract_strided_slice %722 {offsets = [0, 88], sizes = [5, 8], strides = [1, 1]} : vector<5x96xf32> to vector<5x8xf32>
    "tpu.trace_start"() <{level = 10 : i32, message = "qd,kd->qk"}> : () -> ()
    %cst_347 = arith.constant dense<0.000000e+00> : vector<5x5xf32>
    %780 = tpu.matmul %777, %778, %cst_347 {dimension_numbers = #tpu.dot_dimension_numbers<[1], [1], [0], [0], [0, 0, 1, 0], [], []>} : vector<5x8xf32>, vector<5x8xf32>, vector<5x5xf32> -> vector<5x5xf32>
    "tpu.trace_stop"() : () -> ()
    %cst_348 = arith.constant 0.353553385 : f32
    %781 = vector.broadcast %cst_348 : f32 to vector<5x5xf32>
    %782 = arith.mulf %780, %781 : vector<5x5xf32>
    %cst_349 = arith.constant dense<0xFF800000> : vector<5xf32>
    %783 = vector.multi_reduction <maximumf>, %782, %cst_349 [1] : vector<5x5xf32> to vector<5xf32>
    %784 = vector.shape_cast %783 : vector<5xf32> to vector<5x1xf32>
    %785 = vector.broadcast %784 : vector<5x1xf32> to vector<5x5xf32>
    %786 = arith.subf %782, %785 : vector<5x5xf32>
    %787 = math.exp %786 : vector<5x5xf32>
    %cst_350 = arith.constant dense<0.000000e+00> : vector<5xf32>
    %788 = vector.multi_reduction <add>, %787, %cst_350 [1] : vector<5x5xf32> to vector<5xf32>
    %789 = vector.shape_cast %788 : vector<5xf32> to vector<5x1xf32>
    %790 = tpu.reciprocal %789 {approx = true} : vector<5x1xf32> -> vector<5x1xf32>
    %791 = vector.broadcast %790 : vector<5x1xf32> to vector<5x5xf32>
    %792 = arith.mulf %787, %791 : vector<5x5xf32>
    "tpu.trace_start"() <{level = 10 : i32, message = "qk,kd->qd"}> : () -> ()
    %cst_351 = arith.constant dense<0.000000e+00> : vector<5x8xf32>
    %793 = tpu.matmul %792, %779, %cst_351 {dimension_numbers = #tpu.dot_dimension_numbers<[1], [0], [0], [1], [0, 0, 1, 1], [], []>} : vector<5x5xf32>, vector<5x8xf32>, vector<5x8xf32> -> vector<5x8xf32>
    "tpu.trace_stop"() : () -> ()
    %c0_352 = arith.constant 0 : index
    %c24_353 = arith.constant 24 : index
    %794 = vector.load %arg52[%c0_352, %c24_353] : memref<5x32xf32, #tpu.memory_space<vmem>>, vector<5x8xf32>
    tpu.vector_store %arg52[%c0_352, %c24_353], %793 {strides = array<i32>} : memref<5x32xf32, #tpu.memory_space<vmem>>, vector<5x8xf32>,
    %c0_354 = arith.constant 0 : index
    %c0_355 = arith.constant 0 : index
    %795 = vector.load %arg52[%c0_354, %c0_355] : memref<5x32xf32, #tpu.memory_space<vmem>>, vector<5x32xf32>
    %c1_356 = arith.constant 1 : index
    %c0_357 = arith.constant 0 : index
    %c0_358 = arith.constant 0 : index
    %796 = vector.load %arg14[%c1_356, %c0_357, %c0_358] : memref<2x32x32xf32, #tpu.memory_space<vmem>>, vector<1x32x32xf32>
    %797 = vector.shape_cast %796 : vector<1x32x32xf32> to vector<32x32xf32>
    %798 = arith.truncf %795 : vector<5x32xf32> to vector<5x32xbf16>
    %799 = arith.truncf %797 : vector<32x32xf32> to vector<32x32xbf16>
    %cst_359 = arith.constant dense<0.000000e+00> : vector<5x32xf32>
    %800 = tpu.matmul %798, %799, %cst_359 {dimension_numbers = #tpu.dot_dimension_numbers<[1], [0], [0], [1], [0, 0, 1, 1], [], []>} : vector<5x32xbf16>, vector<32x32xbf16>, vector<5x32xf32> -> vector<5x32xf32>
    %801 = arith.addf %209, %800 : vector<5x32xf32>
    %c1_360 = arith.constant 1 : index
    %c0_361 = arith.constant 0 : index
    %c0_362 = arith.constant 0 : index
    %802 = vector.load %arg15[%c1_360, %c0_361, %c0_362] : memref<2x1x32xf32, #tpu.memory_space<vmem>>, vector<1x1x32xf32>
    %803 = vector.shape_cast %802 : vector<1x1x32xf32> to vector<1x32xf32>
    %804 = vector.broadcast %803 : vector<1x32xf32> to vector<5x32xf32>
    %805 = arith.addf %801, %804 : vector<5x32xf32>
    %c1_363 = arith.constant 1 : index
    %c0_364 = arith.constant 0 : index
    %c0_365 = arith.constant 0 : index
    %806 = vector.load %arg16[%c1_363, %c0_364, %c0_365] : memref<2x1x32xf32, #tpu.memory_space<vmem>>, vector<1x1x32xf32>
    %807 = vector.shape_cast %806 : vector<1x1x32xf32> to vector<1x32xf32>
    %c1_366 = arith.constant 1 : index
    %c0_367 = arith.constant 0 : index
    %c0_368 = arith.constant 0 : index
    %808 = vector.load %arg17[%c1_366, %c0_367, %c0_368] : memref<2x1x32xf32, #tpu.memory_space<vmem>>, vector<1x1x32xf32>
    %809 = vector.shape_cast %808 : vector<1x1x32xf32> to vector<1x32xf32>
    %cst_369 = arith.constant dense<0.000000e+00> : vector<5xf32>
    %810 = vector.multi_reduction <add>, %805, %cst_369 [1] : vector<5x32xf32> to vector<5xf32>
    %811 = vector.shape_cast %810 : vector<5xf32> to vector<5x1xf32>
    %cst_370 = arith.constant 3.200000e+01 : f32
    %812 = vector.broadcast %cst_370 : f32 to vector<5x1xf32>
    %813 = arith.divf %811, %812 : vector<5x1xf32>
    %814 = vector.broadcast %813 : vector<5x1xf32> to vector<5x32xf32>
    %815 = arith.subf %805, %814 : vector<5x32xf32>
    %816 = arith.mulf %815, %815 : vector<5x32xf32>
    %cst_371 = arith.constant dense<0.000000e+00> : vector<5xf32>
    %817 = vector.multi_reduction <add>, %816, %cst_371 [1] : vector<5x32xf32> to vector<5xf32>
    %818 = vector.shape_cast %817 : vector<5xf32> to vector<5x1xf32>
    %cst_372 = arith.constant 3.200000e+01 : f32
    %819 = vector.broadcast %cst_372 : f32 to vector<5x1xf32>
    %820 = arith.divf %818, %819 : vector<5x1xf32>
    %821 = vector.broadcast %813 : vector<5x1xf32> to vector<5x32xf32>
    %822 = arith.subf %805, %821 : vector<5x32xf32>
    %cst_373 = arith.constant 9.99999974E-6 : f32
    %823 = vector.broadcast %cst_373 : f32 to vector<5x1xf32>
    %824 = arith.addf %820, %823 : vector<5x1xf32>
    %825 = math.rsqrt %824 : vector<5x1xf32>
    %826 = vector.broadcast %825 : vector<5x1xf32> to vector<5x32xf32>
    %827 = arith.mulf %822, %826 : vector<5x32xf32>
    %828 = vector.broadcast %807 : vector<1x32xf32> to vector<5x32xf32>
    %829 = arith.mulf %827, %828 : vector<5x32xf32>
    %830 = vector.broadcast %809 : vector<1x32xf32> to vector<5x32xf32>
    %831 = arith.addf %829, %830 : vector<5x32xf32>
    %c1_374 = arith.constant 1 : index
    %c0_375 = arith.constant 0 : index
    %c0_376 = arith.constant 0 : index
    %832 = vector.load %arg18[%c1_374, %c0_375, %c0_376] : memref<2x32x128xf32, #tpu.memory_space<vmem>>, vector<1x32x128xf32>
    %833 = vector.shape_cast %832 : vector<1x32x128xf32> to vector<32x128xf32>
    %834 = arith.truncf %831 : vector<5x32xf32> to vector<5x32xbf16>
    %835 = arith.truncf %833 : vector<32x128xf32> to vector<32x128xbf16>
    %cst_377 = arith.constant dense<0.000000e+00> : vector<5x128xf32>
    %836 = tpu.matmul %834, %835, %cst_377 {dimension_numbers = #tpu.dot_dimension_numbers<[1], [0], [0], [1], [0, 0, 1, 1], [], []>} : vector<5x32xbf16>, vector<32x128xbf16>, vector<5x128xf32> -> vector<5x128xf32>
    %c1_378 = arith.constant 1 : index
    %c0_379 = arith.constant 0 : index
    %c0_380 = arith.constant 0 : index
    %837 = vector.load %arg19[%c1_378, %c0_379, %c0_380] : memref<2x1x128xf32, #tpu.memory_space<vmem>>, vector<1x1x128xf32>
    %838 = vector.shape_cast %837 : vector<1x1x128xf32> to vector<1x128xf32>
    %839 = vector.broadcast %838 : vector<1x128xf32> to vector<5x128xf32>
    %840 = arith.addf %836, %839 : vector<5x128xf32>
    %841 = arith.mulf %840, %840 : vector<5x128xf32>
    %842 = arith.mulf %840, %841 : vector<5x128xf32>
    %cst_381 = arith.constant 4.471500e-02 : f32
    %843 = vector.broadcast %cst_381 : f32 to vector<5x128xf32>
    %844 = arith.mulf %843, %842 : vector<5x128xf32>
    %845 = arith.addf %840, %844 : vector<5x128xf32>
    %cst_382 = arith.constant 0.797884583 : f32
    %846 = vector.broadcast %cst_382 : f32 to vector<5x128xf32>
    %847 = arith.mulf %846, %845 : vector<5x128xf32>
    %848 = math.tanh %847 : vector<5x128xf32>
    %cst_383 = arith.constant 1.000000e+00 : f32
    %849 = vector.broadcast %cst_383 : f32 to vector<5x128xf32>
    %850 = arith.addf %849, %848 : vector<5x128xf32>
    %cst_384 = arith.constant 5.000000e-01 : f32
    %851 = vector.broadcast %cst_384 : f32 to vector<5x128xf32>
    %852 = arith.mulf %851, %850 : vector<5x128xf32>
    %853 = arith.mulf %840, %852 : vector<5x128xf32>
    %c1_385 = arith.constant 1 : index
    %c0_386 = arith.constant 0 : index
    %c0_387 = arith.constant 0 : index
    %854 = vector.load %arg20[%c1_385, %c0_386, %c0_387] : memref<2x128x32xf32, #tpu.memory_space<vmem>>, vector<1x128x32xf32>
    %855 = vector.shape_cast %854 : vector<1x128x32xf32> to vector<128x32xf32>
    %856 = arith.truncf %853 : vector<5x128xf32> to vector<5x128xbf16>
    %857 = arith.truncf %855 : vector<128x32xf32> to vector<128x32xbf16>
    %cst_388 = arith.constant dense<0.000000e+00> : vector<5x32xf32>
    %858 = tpu.matmul %856, %857, %cst_388 {dimension_numbers = #tpu.dot_dimension_numbers<[1], [0], [0], [1], [0, 0, 1, 1], [], []>} : vector<5x128xbf16>, vector<128x32xbf16>, vector<5x32xf32> -> vector<5x32xf32>
    %859 = arith.addf %805, %858 : vector<5x32xf32>
    %c1_389 = arith.constant 1 : index
    %c0_390 = arith.constant 0 : index
    %c0_391 = arith.constant 0 : index
    %860 = vector.load %arg21[%c1_389, %c0_390, %c0_391] : memref<2x1x32xf32, #tpu.memory_space<vmem>>, vector<1x1x32xf32>
    %861 = vector.shape_cast %860 : vector<1x1x32xf32> to vector<1x32xf32>
    %862 = vector.broadcast %861 : vector<1x32xf32> to vector<5x32xf32>
    %863 = arith.addf %859, %862 : vector<5x32xf32>
    %864 = arith.addf %687, %435 : vector<5x16xf32>
    %c2_392 = arith.constant 2 : index
    %c0_393 = arith.constant 0 : index
    %c0_394 = arith.constant 0 : index
    %865 = vector.load %arg22[%c2_392, %c0_393, %c0_394] : memref<4x1x16xf32, #tpu.memory_space<vmem>>, vector<1x1x16xf32>
    %866 = vector.shape_cast %865 : vector<1x1x16xf32> to vector<1x16xf32>
    %c2_395 = arith.constant 2 : index
    %c0_396 = arith.constant 0 : index
    %c0_397 = arith.constant 0 : index
    %867 = vector.load %arg23[%c2_395, %c0_396, %c0_397] : memref<4x1x16xf32, #tpu.memory_space<vmem>>, vector<1x1x16xf32>
    %868 = vector.shape_cast %867 : vector<1x1x16xf32> to vector<1x16xf32>
    %cst_398 = arith.constant dense<0.000000e+00> : vector<5xf32>
    %869 = vector.multi_reduction <add>, %864, %cst_398 [1] : vector<5x16xf32> to vector<5xf32>
    %870 = vector.shape_cast %869 : vector<5xf32> to vector<5x1xf32>
    %cst_399 = arith.constant 1.600000e+01 : f32
    %871 = vector.broadcast %cst_399 : f32 to vector<5x1xf32>
    %872 = arith.divf %870, %871 : vector<5x1xf32>
    %873 = vector.broadcast %872 : vector<5x1xf32> to vector<5x16xf32>
    %874 = arith.subf %864, %873 : vector<5x16xf32>
    %875 = arith.mulf %874, %874 : vector<5x16xf32>
    %cst_400 = arith.constant dense<0.000000e+00> : vector<5xf32>
    %876 = vector.multi_reduction <add>, %875, %cst_400 [1] : vector<5x16xf32> to vector<5xf32>
    %877 = vector.shape_cast %876 : vector<5xf32> to vector<5x1xf32>
    %cst_401 = arith.constant 1.600000e+01 : f32
    %878 = vector.broadcast %cst_401 : f32 to vector<5x1xf32>
    %879 = arith.divf %877, %878 : vector<5x1xf32>
    %880 = vector.broadcast %872 : vector<5x1xf32> to vector<5x16xf32>
    %881 = arith.subf %864, %880 : vector<5x16xf32>
    %cst_402 = arith.constant 9.99999974E-6 : f32
    %882 = vector.broadcast %cst_402 : f32 to vector<5x1xf32>
    %883 = arith.addf %879, %882 : vector<5x1xf32>
    %884 = math.rsqrt %883 : vector<5x1xf32>
    %885 = vector.broadcast %884 : vector<5x1xf32> to vector<5x16xf32>
    %886 = arith.mulf %881, %885 : vector<5x16xf32>
    %887 = vector.broadcast %866 : vector<1x16xf32> to vector<5x16xf32>
    %888 = arith.mulf %886, %887 : vector<5x16xf32>
    %889 = vector.broadcast %868 : vector<1x16xf32> to vector<5x16xf32>
    %890 = arith.addf %888, %889 : vector<5x16xf32>
    %c2_403 = arith.constant 2 : index
    %c0_404 = arith.constant 0 : index
    %c0_405 = arith.constant 0 : index
    %891 = vector.load %arg24[%c2_403, %c0_404, %c0_405] : memref<4x16x64xf32, #tpu.memory_space<vmem>>, vector<1x16x64xf32>
    %892 = vector.shape_cast %891 : vector<1x16x64xf32> to vector<16x64xf32>
    %893 = arith.truncf %890 : vector<5x16xf32> to vector<5x16xbf16>
    %894 = arith.truncf %892 : vector<16x64xf32> to vector<16x64xbf16>
    %cst_406 = arith.constant dense<0.000000e+00> : vector<5x64xf32>
    %895 = tpu.matmul %893, %894, %cst_406 {dimension_numbers = #tpu.dot_dimension_numbers<[1], [0], [0], [1], [0, 0, 1, 1], [], []>} : vector<5x16xbf16>, vector<16x64xbf16>, vector<5x64xf32> -> vector<5x64xf32>
    %c2_407 = arith.constant 2 : index
    %c0_408 = arith.constant 0 : index
    %c0_409 = arith.constant 0 : index
    %896 = vector.load %arg25[%c2_407, %c0_408, %c0_409] : memref<4x1x64xf32, #tpu.memory_space<vmem>>, vector<1x1x64xf32>
    %897 = vector.shape_cast %896 : vector<1x1x64xf32> to vector<1x64xf32>
    %898 = vector.broadcast %897 : vector<1x64xf32> to vector<5x64xf32>
    %899 = arith.addf %895, %898 : vector<5x64xf32>
    %900 = vector.extract_strided_slice %899 {offsets = [0, 0], sizes = [5, 32], strides = [1, 1]} : vector<5x64xf32> to vector<5x32xf32>
    %901 = vector.extract_strided_slice %899 {offsets = [0, 32], sizes = [5, 32], strides = [1, 1]} : vector<5x64xf32> to vector<5x32xf32>
    %cst_410 = arith.constant 0.000000e+00 : f32
    %902 = vector.broadcast %cst_410 : f32 to vector<3x32xf32>
    %c0_411 = arith.constant 0 : index
    %c0_412 = arith.constant 0 : index
    %903 = vector.load %arg54[%c0_411, %c0_412] : memref<8x32xf32, #tpu.memory_space<vmem>>, vector<3x32xf32>
    tpu.vector_store %arg54[%c0_411, %c0_412], %902 {strides = array<i32>} : memref<8x32xf32, #tpu.memory_space<vmem>>, vector<3x32xf32>,
    %c3_413 = arith.constant 3 : index
    %c0_414 = arith.constant 0 : index
    %904 = vector.load %arg54[%c3_413, %c0_414] : memref<8x32xf32, #tpu.memory_space<vmem>>, vector<5x32xf32>
    tpu.vector_store %arg54[%c3_413, %c0_414], %900 {strides = array<i32>} : memref<8x32xf32, #tpu.memory_space<vmem>>, vector<5x32xf32>,
    %c2_415 = arith.constant 2 : index
    %c0_416 = arith.constant 0 : index
    %c0_417 = arith.constant 0 : index
    %905 = vector.load %arg26[%c2_415, %c0_416, %c0_417] : memref<4x4x32xf32, #tpu.memory_space<vmem>>, vector<1x4x32xf32>
    %906 = vector.shape_cast %905 : vector<1x4x32xf32> to vector<4x32xf32>
    %cst_418 = arith.constant 0.000000e+00 : f32
    %907 = vector.broadcast %cst_418 : f32 to vector<5x32xf32>
    %c2_419 = arith.constant 2 : index
    %c0_420 = arith.constant 0 : index
    %c0_421 = arith.constant 0 : index
    %908 = vector.load %arg27[%c2_419, %c0_420, %c0_421] : memref<4x1x32xf32, #tpu.memory_space<vmem>>, vector<1x1x32xf32>
    %909 = vector.shape_cast %908 : vector<1x1x32xf32> to vector<1x32xf32>
    %910 = vector.broadcast %909 : vector<1x32xf32> to vector<5x32xf32>
    %911 = arith.addf %907, %910 : vector<5x32xf32>
    %c0_422 = arith.constant 0 : index
    %c0_423 = arith.constant 0 : index
    %912 = vector.load %arg54[%c0_422, %c0_423] : memref<8x32xf32, #tpu.memory_space<vmem>>, vector<5x32xf32>
    %913 = vector.extract_strided_slice %906 {offsets = [0, 0], sizes = [1, 32], strides = [1, 1]} : vector<4x32xf32> to vector<1x32xf32>
    %914 = vector.broadcast %913 : vector<1x32xf32> to vector<5x32xf32>
    %915 = arith.mulf %912, %914 : vector<5x32xf32>
    %916 = arith.addf %911, %915 : vector<5x32xf32>
    %c1_424 = arith.constant 1 : index
    %c0_425 = arith.constant 0 : index
    %917 = vector.load %arg54[%c1_424, %c0_425] : memref<8x32xf32, #tpu.memory_space<vmem>>, vector<5x32xf32>
    %918 = vector.extract_strided_slice %906 {offsets = [1, 0], sizes = [1, 32], strides = [1, 1]} : vector<4x32xf32> to vector<1x32xf32>
    %919 = vector.broadcast %918 : vector<1x32xf32> to vector<5x32xf32>
    %920 = arith.mulf %917, %919 : vector<5x32xf32>
    %921 = arith.addf %916, %920 : vector<5x32xf32>
    %c2_426 = arith.constant 2 : index
    %c0_427 = arith.constant 0 : index
    %922 = vector.load %arg54[%c2_426, %c0_427] : memref<8x32xf32, #tpu.memory_space<vmem>>, vector<5x32xf32>
    %923 = vector.extract_strided_slice %906 {offsets = [2, 0], sizes = [1, 32], strides = [1, 1]} : vector<4x32xf32> to vector<1x32xf32>
    %924 = vector.broadcast %923 : vector<1x32xf32> to vector<5x32xf32>
    %925 = arith.mulf %922, %924 : vector<5x32xf32>
    %926 = arith.addf %921, %925 : vector<5x32xf32>
    %c3_428 = arith.constant 3 : index
    %c0_429 = arith.constant 0 : index
    %927 = vector.load %arg54[%c3_428, %c0_429] : memref<8x32xf32, #tpu.memory_space<vmem>>, vector<5x32xf32>
    %928 = vector.extract_strided_slice %906 {offsets = [3, 0], sizes = [1, 32], strides = [1, 1]} : vector<4x32xf32> to vector<1x32xf32>
    %929 = vector.broadcast %928 : vector<1x32xf32> to vector<5x32xf32>
    %930 = arith.mulf %927, %929 : vector<5x32xf32>
    %931 = arith.addf %926, %930 : vector<5x32xf32>
    %cst_430 = arith.constant 0.000000e+00 : f32
    %932 = vector.broadcast %cst_430 : f32 to vector<5x32xf32>
    %933 = arith.subf %932, %931 : vector<5x32xf32>
    %934 = math.exp %933 : vector<5x32xf32>
    %cst_431 = arith.constant 1.000000e+00 : f32
    %935 = vector.broadcast %cst_431 : f32 to vector<5x32xf32>
    %936 = arith.addf %935, %934 : vector<5x32xf32>
    %cst_432 = arith.constant 1.000000e+00 : f32
    %937 = vector.broadcast %cst_432 : f32 to vector<5x32xf32>
    %938 = arith.divf %937, %936 : vector<5x32xf32>
    %939 = arith.mulf %931, %938 : vector<5x32xf32>
    %c2_433 = arith.constant 2 : index
    %c0_434 = arith.constant 0 : index
    %c0_435 = arith.constant 0 : index
    %940 = vector.load %arg28[%c2_433, %c0_434, %c0_435] : memref<4x32x32xf32, #tpu.memory_space<vmem>>, vector<1x32x32xf32>
    %941 = vector.shape_cast %940 : vector<1x32x32xf32> to vector<32x32xf32>
    %942 = arith.truncf %939 : vector<5x32xf32> to vector<5x32xbf16>
    %943 = arith.truncf %941 : vector<32x32xf32> to vector<32x32xbf16>
    %cst_436 = arith.constant dense<0.000000e+00> : vector<5x32xf32>
    %944 = tpu.matmul %942, %943, %cst_436 {dimension_numbers = #tpu.dot_dimension_numbers<[1], [0], [0], [1], [0, 0, 1, 1], [], []>} : vector<5x32xbf16>, vector<32x32xbf16>, vector<5x32xf32> -> vector<5x32xf32>
    %c2_437 = arith.constant 2 : index
    %c0_438 = arith.constant 0 : index
    %c0_439 = arith.constant 0 : index
    %945 = vector.load %arg29[%c2_437, %c0_438, %c0_439] : memref<4x1x32xf32, #tpu.memory_space<vmem>>, vector<1x1x32xf32>
    %946 = vector.shape_cast %945 : vector<1x1x32xf32> to vector<1x32xf32>
    %947 = vector.broadcast %946 : vector<1x32xf32> to vector<5x32xf32>
    %948 = arith.addf %944, %947 : vector<5x32xf32>
    %cst_440 = arith.constant 0.000000e+00 : f32
    %949 = vector.broadcast %cst_440 : f32 to vector<5x32xf32>
    %950 = arith.maximumf %948, %949 : vector<5x32xf32>
    %951 = math.absf %948 : vector<5x32xf32>
    %cst_441 = arith.constant 0.000000e+00 : f32
    %952 = vector.broadcast %cst_441 : f32 to vector<5x32xf32>
    %953 = arith.subf %952, %951 : vector<5x32xf32>
    %954 = math.exp %953 : vector<5x32xf32>
    %cst_442 = arith.constant 1.000000e+00 : f32
    %955 = vector.broadcast %cst_442 : f32 to vector<5x32xf32>
    %956 = arith.addf %955, %954 : vector<5x32xf32>
    %957 = math.log %956 : vector<5x32xf32>
    %958 = arith.addf %950, %957 : vector<5x32xf32>
    %959 = arith.mulf %958, %939 : vector<5x32xf32>
    %c2_443 = arith.constant 2 : index
    %c0_444 = arith.constant 0 : index
    %c0_445 = arith.constant 0 : index
    %960 = vector.load %arg31[%c2_443, %c0_444, %c0_445] : memref<4x8x32xf32, #tpu.memory_space<vmem>>, vector<1x8x32xf32>
    %961 = vector.shape_cast %960 : vector<1x8x32xf32> to vector<8x32xf32>
    %c2_446 = arith.constant 2 : index
    %c0_447 = arith.constant 0 : index
    %c0_448 = arith.constant 0 : index
    %962 = vector.load %arg32[%c2_446, %c0_447, %c0_448] : memref<4x1x32xf32, #tpu.memory_space<vmem>>, vector<1x1x32xf32>
    %963 = vector.shape_cast %962 : vector<1x1x32xf32> to vector<1x32xf32>
    %c2_449 = arith.constant 2 : index
    %c0_450 = arith.constant 0 : index
    %c0_451 = arith.constant 0 : index
    %964 = vector.load %arg30[%c2_449, %c0_450, %c0_451] : memref<4x16x32xf32, #tpu.memory_space<vmem>>, vector<1x16x32xf32>
    %965 = vector.shape_cast %964 : vector<1x16x32xf32> to vector<16x32xf32>
    "tpu.trace_start"() <{level = 10 : i32, message = "nd,td->nt"}> : () -> ()
    %cst_452 = arith.constant dense<0.000000e+00> : vector<16x5xf32>
    %966 = tpu.matmul %965, %939, %cst_452 {dimension_numbers = #tpu.dot_dimension_numbers<[1], [1], [0], [0], [0, 0, 1, 0], [], []>} : vector<16x32xf32>, vector<5x32xf32>, vector<16x5xf32> -> vector<16x5xf32>
    "tpu.trace_stop"() : () -> ()
    %967 = vector.extract_strided_slice %966 {offsets = [0, 0], sizes = [8, 5], strides = [1, 1]} : vector<16x5xf32> to vector<8x5xf32>
    %968 = vector.extract_strided_slice %966 {offsets = [8, 0], sizes = [8, 5], strides = [1, 1]} : vector<16x5xf32> to vector<8x5xf32>
    %cst_453 = arith.constant 0.000000e+00 : f32
    %969 = vector.broadcast %cst_453 : f32 to vector<8x32xf32>
    %970 = vector.extract_strided_slice %958 {offsets = [0, 0], sizes = [1, 32], strides = [1, 1]} : vector<5x32xf32> to vector<1x32xf32>
    %971 = vector.broadcast %970 : vector<1x32xf32> to vector<8x32xf32>
    %972 = arith.mulf %971, %961 : vector<8x32xf32>
    %973 = math.exp %972 : vector<8x32xf32>
    %974 = arith.mulf %973, %969 : vector<8x32xf32>
    %975 = vector.extract_strided_slice %967 {offsets = [0, 0], sizes = [8, 1], strides = [1, 1]} : vector<8x5xf32> to vector<8x1xf32>
    %976 = vector.extract_strided_slice %959 {offsets = [0, 0], sizes = [1, 32], strides = [1, 1]} : vector<5x32xf32> to vector<1x32xf32>
    %977 = vector.broadcast %975 : vector<8x1xf32> to vector<8x32xf32>
    %978 = vector.broadcast %976 : vector<1x32xf32> to vector<8x32xf32>
    %979 = arith.mulf %977, %978 : vector<8x32xf32>
    %980 = arith.addf %974, %979 : vector<8x32xf32>
    %981 = vector.extract_strided_slice %968 {offsets = [0, 0], sizes = [8, 1], strides = [1, 1]} : vector<8x5xf32> to vector<8x1xf32>
    %982 = vector.broadcast %981 : vector<8x1xf32> to vector<8x32xf32>
    %983 = arith.mulf %982, %980 : vector<8x32xf32>
    %cst_454 = arith.constant dense<0.000000e+00> : vector<32xf32>
    %984 = vector.multi_reduction <add>, %983, %cst_454 [0] : vector<8x32xf32> to vector<32xf32>
    %985 = vector.shape_cast %984 : vector<32xf32> to vector<1x32xf32>
    %986 = vector.extract_strided_slice %939 {offsets = [0, 0], sizes = [1, 32], strides = [1, 1]} : vector<5x32xf32> to vector<1x32xf32>
    %987 = arith.mulf %963, %986 : vector<1x32xf32>
    %988 = arith.addf %985, %987 : vector<1x32xf32>
    %c0_455 = arith.constant 0 : index
    %c0_456 = arith.constant 0 : index
    %989 = vector.load %arg55[%c0_455, %c0_456] : memref<5x32xf32, #tpu.memory_space<vmem>>, vector<1x32xf32>
    tpu.vector_store %arg55[%c0_455, %c0_456], %988 {strides = array<i32>} : memref<5x32xf32, #tpu.memory_space<vmem>>, vector<1x32xf32>,
    %990 = vector.extract_strided_slice %958 {offsets = [1, 0], sizes = [1, 32], strides = [1, 1]} : vector<5x32xf32> to vector<1x32xf32>
    %991 = vector.broadcast %990 : vector<1x32xf32> to vector<8x32xf32>
    %992 = arith.mulf %991, %961 : vector<8x32xf32>
    %993 = math.exp %992 : vector<8x32xf32>
    %994 = arith.mulf %993, %980 : vector<8x32xf32>
    %995 = vector.extract_strided_slice %967 {offsets = [0, 1], sizes = [8, 1], strides = [1, 1]} : vector<8x5xf32> to vector<8x1xf32>
    %996 = vector.extract_strided_slice %959 {offsets = [1, 0], sizes = [1, 32], strides = [1, 1]} : vector<5x32xf32> to vector<1x32xf32>
    %997 = vector.broadcast %995 : vector<8x1xf32> to vector<8x32xf32>
    %998 = vector.broadcast %996 : vector<1x32xf32> to vector<8x32xf32>
    %999 = arith.mulf %997, %998 : vector<8x32xf32>
    %1000 = arith.addf %994, %999 : vector<8x32xf32>
    %1001 = vector.extract_strided_slice %968 {offsets = [0, 1], sizes = [8, 1], strides = [1, 1]} : vector<8x5xf32> to vector<8x1xf32>
    %1002 = vector.broadcast %1001 : vector<8x1xf32> to vector<8x32xf32>
    %1003 = arith.mulf %1002, %1000 : vector<8x32xf32>
    %cst_457 = arith.constant dense<0.000000e+00> : vector<32xf32>
    %1004 = vector.multi_reduction <add>, %1003, %cst_457 [0] : vector<8x32xf32> to vector<32xf32>
    %1005 = vector.shape_cast %1004 : vector<32xf32> to vector<1x32xf32>
    %1006 = vector.extract_strided_slice %939 {offsets = [1, 0], sizes = [1, 32], strides = [1, 1]} : vector<5x32xf32> to vector<1x32xf32>
    %1007 = arith.mulf %963, %1006 : vector<1x32xf32>
    %1008 = arith.addf %1005, %1007 : vector<1x32xf32>
    %c1_458 = arith.constant 1 : index
    %c0_459 = arith.constant 0 : index
    %1009 = vector.load %arg55[%c1_458, %c0_459] : memref<5x32xf32, #tpu.memory_space<vmem>>, vector<1x32xf32>
    tpu.vector_store %arg55[%c1_458, %c0_459], %1008 {strides = array<i32>} : memref<5x32xf32, #tpu.memory_space<vmem>>, vector<1x32xf32>,
    %1010 = vector.extract_strided_slice %958 {offsets = [2, 0], sizes = [1, 32], strides = [1, 1]} : vector<5x32xf32> to vector<1x32xf32>
    %1011 = vector.broadcast %1010 : vector<1x32xf32> to vector<8x32xf32>
    %1012 = arith.mulf %1011, %961 : vector<8x32xf32>
    %1013 = math.exp %1012 : vector<8x32xf32>
    %1014 = arith.mulf %1013, %1000 : vector<8x32xf32>
    %1015 = vector.extract_strided_slice %967 {offsets = [0, 2], sizes = [8, 1], strides = [1, 1]} : vector<8x5xf32> to vector<8x1xf32>
    %1016 = vector.extract_strided_slice %959 {offsets = [2, 0], sizes = [1, 32], strides = [1, 1]} : vector<5x32xf32> to vector<1x32xf32>
    %1017 = vector.broadcast %1015 : vector<8x1xf32> to vector<8x32xf32>
    %1018 = vector.broadcast %1016 : vector<1x32xf32> to vector<8x32xf32>
    %1019 = arith.mulf %1017, %1018 : vector<8x32xf32>
    %1020 = arith.addf %1014, %1019 : vector<8x32xf32>
    %1021 = vector.extract_strided_slice %968 {offsets = [0, 2], sizes = [8, 1], strides = [1, 1]} : vector<8x5xf32> to vector<8x1xf32>
    %1022 = vector.broadcast %1021 : vector<8x1xf32> to vector<8x32xf32>
    %1023 = arith.mulf %1022, %1020 : vector<8x32xf32>
    %cst_460 = arith.constant dense<0.000000e+00> : vector<32xf32>
    %1024 = vector.multi_reduction <add>, %1023, %cst_460 [0] : vector<8x32xf32> to vector<32xf32>
    %1025 = vector.shape_cast %1024 : vector<32xf32> to vector<1x32xf32>
    %1026 = vector.extract_strided_slice %939 {offsets = [2, 0], sizes = [1, 32], strides = [1, 1]} : vector<5x32xf32> to vector<1x32xf32>
    %1027 = arith.mulf %963, %1026 : vector<1x32xf32>
    %1028 = arith.addf %1025, %1027 : vector<1x32xf32>
    %c2_461 = arith.constant 2 : index
    %c0_462 = arith.constant 0 : index
    %1029 = vector.load %arg55[%c2_461, %c0_462] : memref<5x32xf32, #tpu.memory_space<vmem>>, vector<1x32xf32>
    tpu.vector_store %arg55[%c2_461, %c0_462], %1028 {strides = array<i32>} : memref<5x32xf32, #tpu.memory_space<vmem>>, vector<1x32xf32>,
    %1030 = vector.extract_strided_slice %958 {offsets = [3, 0], sizes = [1, 32], strides = [1, 1]} : vector<5x32xf32> to vector<1x32xf32>
    %1031 = vector.broadcast %1030 : vector<1x32xf32> to vector<8x32xf32>
    %1032 = arith.mulf %1031, %961 : vector<8x32xf32>
    %1033 = math.exp %1032 : vector<8x32xf32>
    %1034 = arith.mulf %1033, %1020 : vector<8x32xf32>
    %1035 = vector.extract_strided_slice %967 {offsets = [0, 3], sizes = [8, 1], strides = [1, 1]} : vector<8x5xf32> to vector<8x1xf32>
    %1036 = vector.extract_strided_slice %959 {offsets = [3, 0], sizes = [1, 32], strides = [1, 1]} : vector<5x32xf32> to vector<1x32xf32>
    %1037 = vector.broadcast %1035 : vector<8x1xf32> to vector<8x32xf32>
    %1038 = vector.broadcast %1036 : vector<1x32xf32> to vector<8x32xf32>
    %1039 = arith.mulf %1037, %1038 : vector<8x32xf32>
    %1040 = arith.addf %1034, %1039 : vector<8x32xf32>
    %1041 = vector.extract_strided_slice %968 {offsets = [0, 3], sizes = [8, 1], strides = [1, 1]} : vector<8x5xf32> to vector<8x1xf32>
    %1042 = vector.broadcast %1041 : vector<8x1xf32> to vector<8x32xf32>
    %1043 = arith.mulf %1042, %1040 : vector<8x32xf32>
    %cst_463 = arith.constant dense<0.000000e+00> : vector<32xf32>
    %1044 = vector.multi_reduction <add>, %1043, %cst_463 [0] : vector<8x32xf32> to vector<32xf32>
    %1045 = vector.shape_cast %1044 : vector<32xf32> to vector<1x32xf32>
    %1046 = vector.extract_strided_slice %939 {offsets = [3, 0], sizes = [1, 32], strides = [1, 1]} : vector<5x32xf32> to vector<1x32xf32>
    %1047 = arith.mulf %963, %1046 : vector<1x32xf32>
    %1048 = arith.addf %1045, %1047 : vector<1x32xf32>
    %c3_464 = arith.constant 3 : index
    %c0_465 = arith.constant 0 : index
    %1049 = vector.load %arg55[%c3_464, %c0_465] : memref<5x32xf32, #tpu.memory_space<vmem>>, vector<1x32xf32>
    tpu.vector_store %arg55[%c3_464, %c0_465], %1048 {strides = array<i32>} : memref<5x32xf32, #tpu.memory_space<vmem>>, vector<1x32xf32>,
    %1050 = vector.extract_strided_slice %958 {offsets = [4, 0], sizes = [1, 32], strides = [1, 1]} : vector<5x32xf32> to vector<1x32xf32>
    %1051 = vector.broadcast %1050 : vector<1x32xf32> to vector<8x32xf32>
    %1052 = arith.mulf %1051, %961 : vector<8x32xf32>
    %1053 = math.exp %1052 : vector<8x32xf32>
    %1054 = arith.mulf %1053, %1040 : vector<8x32xf32>
    %1055 = vector.extract_strided_slice %967 {offsets = [0, 4], sizes = [8, 1], strides = [1, 1]} : vector<8x5xf32> to vector<8x1xf32>
    %1056 = vector.extract_strided_slice %959 {offsets = [4, 0], sizes = [1, 32], strides = [1, 1]} : vector<5x32xf32> to vector<1x32xf32>
    %1057 = vector.broadcast %1055 : vector<8x1xf32> to vector<8x32xf32>
    %1058 = vector.broadcast %1056 : vector<1x32xf32> to vector<8x32xf32>
    %1059 = arith.mulf %1057, %1058 : vector<8x32xf32>
    %1060 = arith.addf %1054, %1059 : vector<8x32xf32>
    %1061 = vector.extract_strided_slice %968 {offsets = [0, 4], sizes = [8, 1], strides = [1, 1]} : vector<8x5xf32> to vector<8x1xf32>
    %1062 = vector.broadcast %1061 : vector<8x1xf32> to vector<8x32xf32>
    %1063 = arith.mulf %1062, %1060 : vector<8x32xf32>
    %cst_466 = arith.constant dense<0.000000e+00> : vector<32xf32>
    %1064 = vector.multi_reduction <add>, %1063, %cst_466 [0] : vector<8x32xf32> to vector<32xf32>
    %1065 = vector.shape_cast %1064 : vector<32xf32> to vector<1x32xf32>
    %1066 = vector.extract_strided_slice %939 {offsets = [4, 0], sizes = [1, 32], strides = [1, 1]} : vector<5x32xf32> to vector<1x32xf32>
    %1067 = arith.mulf %963, %1066 : vector<1x32xf32>
    %1068 = arith.addf %1065, %1067 : vector<1x32xf32>
    %c4_467 = arith.constant 4 : index
    %c0_468 = arith.constant 0 : index
    %1069 = vector.load %arg55[%c4_467, %c0_468] : memref<5x32xf32, #tpu.memory_space<vmem>>, vector<1x32xf32>
    tpu.vector_store %arg55[%c4_467, %c0_468], %1068 {strides = array<i32>} : memref<5x32xf32, #tpu.memory_space<vmem>>, vector<1x32xf32>,
    %c0_469 = arith.constant 0 : index
    %c0_470 = arith.constant 0 : index
    %1070 = vector.load %arg55[%c0_469, %c0_470] : memref<5x32xf32, #tpu.memory_space<vmem>>, vector<5x32xf32>
    %cst_471 = arith.constant 0.000000e+00 : f32
    %1071 = vector.broadcast %cst_471 : f32 to vector<5x32xf32>
    %1072 = arith.subf %1071, %901 : vector<5x32xf32>
    %1073 = math.exp %1072 : vector<5x32xf32>
    %cst_472 = arith.constant 1.000000e+00 : f32
    %1074 = vector.broadcast %cst_472 : f32 to vector<5x32xf32>
    %1075 = arith.addf %1074, %1073 : vector<5x32xf32>
    %cst_473 = arith.constant 1.000000e+00 : f32
    %1076 = vector.broadcast %cst_473 : f32 to vector<5x32xf32>
    %1077 = arith.divf %1076, %1075 : vector<5x32xf32>
    %1078 = arith.mulf %901, %1077 : vector<5x32xf32>
    %1079 = arith.mulf %1070, %1078 : vector<5x32xf32>
    %c2_474 = arith.constant 2 : index
    %c0_475 = arith.constant 0 : index
    %c0_476 = arith.constant 0 : index
    %1080 = vector.load %arg33[%c2_474, %c0_475, %c0_476] : memref<4x32x16xf32, #tpu.memory_space<vmem>>, vector<1x32x16xf32>
    %1081 = vector.shape_cast %1080 : vector<1x32x16xf32> to vector<32x16xf32>
    %1082 = arith.truncf %1079 : vector<5x32xf32> to vector<5x32xbf16>
    %1083 = arith.truncf %1081 : vector<32x16xf32> to vector<32x16xbf16>
    %cst_477 = arith.constant dense<0.000000e+00> : vector<5x16xf32>
    %1084 = tpu.matmul %1082, %1083, %cst_477 {dimension_numbers = #tpu.dot_dimension_numbers<[1], [0], [0], [1], [0, 0, 1, 1], [], []>} : vector<5x32xbf16>, vector<32x16xbf16>, vector<5x16xf32> -> vector<5x16xf32>
    %c2_478 = arith.constant 2 : index
    %c0_479 = arith.constant 0 : index
    %c0_480 = arith.constant 0 : index
    %1085 = vector.load %arg34[%c2_478, %c0_479, %c0_480] : memref<4x1x16xf32, #tpu.memory_space<vmem>>, vector<1x1x16xf32>
    %1086 = vector.shape_cast %1085 : vector<1x1x16xf32> to vector<1x16xf32>
    %1087 = vector.broadcast %1086 : vector<1x16xf32> to vector<5x16xf32>
    %1088 = arith.addf %1084, %1087 : vector<5x16xf32>
    %1089 = arith.addf %1088, %864 : vector<5x16xf32>
    %c3_481 = arith.constant 3 : index
    %c0_482 = arith.constant 0 : index
    %c0_483 = arith.constant 0 : index
    %1090 = vector.load %arg22[%c3_481, %c0_482, %c0_483] : memref<4x1x16xf32, #tpu.memory_space<vmem>>, vector<1x1x16xf32>
    %1091 = vector.shape_cast %1090 : vector<1x1x16xf32> to vector<1x16xf32>
    %c3_484 = arith.constant 3 : index
    %c0_485 = arith.constant 0 : index
    %c0_486 = arith.constant 0 : index
    %1092 = vector.load %arg23[%c3_484, %c0_485, %c0_486] : memref<4x1x16xf32, #tpu.memory_space<vmem>>, vector<1x1x16xf32>
    %1093 = vector.shape_cast %1092 : vector<1x1x16xf32> to vector<1x16xf32>
    %cst_487 = arith.constant dense<0.000000e+00> : vector<5xf32>
    %1094 = vector.multi_reduction <add>, %1089, %cst_487 [1] : vector<5x16xf32> to vector<5xf32>
    %1095 = vector.shape_cast %1094 : vector<5xf32> to vector<5x1xf32>
    %cst_488 = arith.constant 1.600000e+01 : f32
    %1096 = vector.broadcast %cst_488 : f32 to vector<5x1xf32>
    %1097 = arith.divf %1095, %1096 : vector<5x1xf32>
    %1098 = vector.broadcast %1097 : vector<5x1xf32> to vector<5x16xf32>
    %1099 = arith.subf %1089, %1098 : vector<5x16xf32>
    %1100 = arith.mulf %1099, %1099 : vector<5x16xf32>
    %cst_489 = arith.constant dense<0.000000e+00> : vector<5xf32>
    %1101 = vector.multi_reduction <add>, %1100, %cst_489 [1] : vector<5x16xf32> to vector<5xf32>
    %1102 = vector.shape_cast %1101 : vector<5xf32> to vector<5x1xf32>
    %cst_490 = arith.constant 1.600000e+01 : f32
    %1103 = vector.broadcast %cst_490 : f32 to vector<5x1xf32>
    %1104 = arith.divf %1102, %1103 : vector<5x1xf32>
    %1105 = vector.broadcast %1097 : vector<5x1xf32> to vector<5x16xf32>
    %1106 = arith.subf %1089, %1105 : vector<5x16xf32>
    %cst_491 = arith.constant 9.99999974E-6 : f32
    %1107 = vector.broadcast %cst_491 : f32 to vector<5x1xf32>
    %1108 = arith.addf %1104, %1107 : vector<5x1xf32>
    %1109 = math.rsqrt %1108 : vector<5x1xf32>
    %1110 = vector.broadcast %1109 : vector<5x1xf32> to vector<5x16xf32>
    %1111 = arith.mulf %1106, %1110 : vector<5x16xf32>
    %1112 = vector.broadcast %1091 : vector<1x16xf32> to vector<5x16xf32>
    %1113 = arith.mulf %1111, %1112 : vector<5x16xf32>
    %1114 = vector.broadcast %1093 : vector<1x16xf32> to vector<5x16xf32>
    %1115 = arith.addf %1113, %1114 : vector<5x16xf32>
    %c3_492 = arith.constant 3 : index
    %c0_493 = arith.constant 0 : index
    %c0_494 = arith.constant 0 : index
    %1116 = vector.load %arg24[%c3_492, %c0_493, %c0_494] : memref<4x16x64xf32, #tpu.memory_space<vmem>>, vector<1x16x64xf32>
    %1117 = vector.shape_cast %1116 : vector<1x16x64xf32> to vector<16x64xf32>
    %1118 = arith.truncf %1115 : vector<5x16xf32> to vector<5x16xbf16>
    %1119 = arith.truncf %1117 : vector<16x64xf32> to vector<16x64xbf16>
    %cst_495 = arith.constant dense<0.000000e+00> : vector<5x64xf32>
    %1120 = tpu.matmul %1118, %1119, %cst_495 {dimension_numbers = #tpu.dot_dimension_numbers<[1], [0], [0], [1], [0, 0, 1, 1], [], []>} : vector<5x16xbf16>, vector<16x64xbf16>, vector<5x64xf32> -> vector<5x64xf32>
    %c3_496 = arith.constant 3 : index
    %c0_497 = arith.constant 0 : index
    %c0_498 = arith.constant 0 : index
    %1121 = vector.load %arg25[%c3_496, %c0_497, %c0_498] : memref<4x1x64xf32, #tpu.memory_space<vmem>>, vector<1x1x64xf32>
    %1122 = vector.shape_cast %1121 : vector<1x1x64xf32> to vector<1x64xf32>
    %1123 = vector.broadcast %1122 : vector<1x64xf32> to vector<5x64xf32>
    %1124 = arith.addf %1120, %1123 : vector<5x64xf32>
    %1125 = vector.extract_strided_slice %1124 {offsets = [0, 0], sizes = [5, 32], strides = [1, 1]} : vector<5x64xf32> to vector<5x32xf32>
    %1126 = vector.extract_strided_slice %1124 {offsets = [0, 32], sizes = [5, 32], strides = [1, 1]} : vector<5x64xf32> to vector<5x32xf32>
    %cst_499 = arith.constant 0.000000e+00 : f32
    %1127 = vector.broadcast %cst_499 : f32 to vector<3x32xf32>
    %c0_500 = arith.constant 0 : index
    %c0_501 = arith.constant 0 : index
    %1128 = vector.load %arg54[%c0_500, %c0_501] : memref<8x32xf32, #tpu.memory_space<vmem>>, vector<3x32xf32>
    tpu.vector_store %arg54[%c0_500, %c0_501], %1127 {strides = array<i32>} : memref<8x32xf32, #tpu.memory_space<vmem>>, vector<3x32xf32>,
    %c3_502 = arith.constant 3 : index
    %c0_503 = arith.constant 0 : index
    %1129 = vector.load %arg54[%c3_502, %c0_503] : memref<8x32xf32, #tpu.memory_space<vmem>>, vector<5x32xf32>
    tpu.vector_store %arg54[%c3_502, %c0_503], %1125 {strides = array<i32>} : memref<8x32xf32, #tpu.memory_space<vmem>>, vector<5x32xf32>,
    %c3_504 = arith.constant 3 : index
    %c0_505 = arith.constant 0 : index
    %c0_506 = arith.constant 0 : index
    %1130 = vector.load %arg26[%c3_504, %c0_505, %c0_506] : memref<4x4x32xf32, #tpu.memory_space<vmem>>, vector<1x4x32xf32>
    %1131 = vector.shape_cast %1130 : vector<1x4x32xf32> to vector<4x32xf32>
    %cst_507 = arith.constant 0.000000e+00 : f32
    %1132 = vector.broadcast %cst_507 : f32 to vector<5x32xf32>
    %c3_508 = arith.constant 3 : index
    %c0_509 = arith.constant 0 : index
    %c0_510 = arith.constant 0 : index
    %1133 = vector.load %arg27[%c3_508, %c0_509, %c0_510] : memref<4x1x32xf32, #tpu.memory_space<vmem>>, vector<1x1x32xf32>
    %1134 = vector.shape_cast %1133 : vector<1x1x32xf32> to vector<1x32xf32>
    %1135 = vector.broadcast %1134 : vector<1x32xf32> to vector<5x32xf32>
    %1136 = arith.addf %1132, %1135 : vector<5x32xf32>
    %c0_511 = arith.constant 0 : index
    %c0_512 = arith.constant 0 : index
    %1137 = vector.load %arg54[%c0_511, %c0_512] : memref<8x32xf32, #tpu.memory_space<vmem>>, vector<5x32xf32>
    %1138 = vector.extract_strided_slice %1131 {offsets = [0, 0], sizes = [1, 32], strides = [1, 1]} : vector<4x32xf32> to vector<1x32xf32>
    %1139 = vector.broadcast %1138 : vector<1x32xf32> to vector<5x32xf32>
    %1140 = arith.mulf %1137, %1139 : vector<5x32xf32>
    %1141 = arith.addf %1136, %1140 : vector<5x32xf32>
    %c1_513 = arith.constant 1 : index
    %c0_514 = arith.constant 0 : index
    %1142 = vector.load %arg54[%c1_513, %c0_514] : memref<8x32xf32, #tpu.memory_space<vmem>>, vector<5x32xf32>
    %1143 = vector.extract_strided_slice %1131 {offsets = [1, 0], sizes = [1, 32], strides = [1, 1]} : vector<4x32xf32> to vector<1x32xf32>
    %1144 = vector.broadcast %1143 : vector<1x32xf32> to vector<5x32xf32>
    %1145 = arith.mulf %1142, %1144 : vector<5x32xf32>
    %1146 = arith.addf %1141, %1145 : vector<5x32xf32>
    %c2_515 = arith.constant 2 : index
    %c0_516 = arith.constant 0 : index
    %1147 = vector.load %arg54[%c2_515, %c0_516] : memref<8x32xf32, #tpu.memory_space<vmem>>, vector<5x32xf32>
    %1148 = vector.extract_strided_slice %1131 {offsets = [2, 0], sizes = [1, 32], strides = [1, 1]} : vector<4x32xf32> to vector<1x32xf32>
    %1149 = vector.broadcast %1148 : vector<1x32xf32> to vector<5x32xf32>
    %1150 = arith.mulf %1147, %1149 : vector<5x32xf32>
    %1151 = arith.addf %1146, %1150 : vector<5x32xf32>
    %c3_517 = arith.constant 3 : index
    %c0_518 = arith.constant 0 : index
    %1152 = vector.load %arg54[%c3_517, %c0_518] : memref<8x32xf32, #tpu.memory_space<vmem>>, vector<5x32xf32>
    %1153 = vector.extract_strided_slice %1131 {offsets = [3, 0], sizes = [1, 32], strides = [1, 1]} : vector<4x32xf32> to vector<1x32xf32>
    %1154 = vector.broadcast %1153 : vector<1x32xf32> to vector<5x32xf32>
    %1155 = arith.mulf %1152, %1154 : vector<5x32xf32>
    %1156 = arith.addf %1151, %1155 : vector<5x32xf32>
    %cst_519 = arith.constant 0.000000e+00 : f32
    %1157 = vector.broadcast %cst_519 : f32 to vector<5x32xf32>
    %1158 = arith.subf %1157, %1156 : vector<5x32xf32>
    %1159 = math.exp %1158 : vector<5x32xf32>
    %cst_520 = arith.constant 1.000000e+00 : f32
    %1160 = vector.broadcast %cst_520 : f32 to vector<5x32xf32>
    %1161 = arith.addf %1160, %1159 : vector<5x32xf32>
    %cst_521 = arith.constant 1.000000e+00 : f32
    %1162 = vector.broadcast %cst_521 : f32 to vector<5x32xf32>
    %1163 = arith.divf %1162, %1161 : vector<5x32xf32>
    %1164 = arith.mulf %1156, %1163 : vector<5x32xf32>
    %c3_522 = arith.constant 3 : index
    %c0_523 = arith.constant 0 : index
    %c0_524 = arith.constant 0 : index
    %1165 = vector.load %arg28[%c3_522, %c0_523, %c0_524] : memref<4x32x32xf32, #tpu.memory_space<vmem>>, vector<1x32x32xf32>
    %1166 = vector.shape_cast %1165 : vector<1x32x32xf32> to vector<32x32xf32>
    %1167 = arith.truncf %1164 : vector<5x32xf32> to vector<5x32xbf16>
    %1168 = arith.truncf %1166 : vector<32x32xf32> to vector<32x32xbf16>
    %cst_525 = arith.constant dense<0.000000e+00> : vector<5x32xf32>
    %1169 = tpu.matmul %1167, %1168, %cst_525 {dimension_numbers = #tpu.dot_dimension_numbers<[1], [0], [0], [1], [0, 0, 1, 1], [], []>} : vector<5x32xbf16>, vector<32x32xbf16>, vector<5x32xf32> -> vector<5x32xf32>
    %c3_526 = arith.constant 3 : index
    %c0_527 = arith.constant 0 : index
    %c0_528 = arith.constant 0 : index
    %1170 = vector.load %arg29[%c3_526, %c0_527, %c0_528] : memref<4x1x32xf32, #tpu.memory_space<vmem>>, vector<1x1x32xf32>
    %1171 = vector.shape_cast %1170 : vector<1x1x32xf32> to vector<1x32xf32>
    %1172 = vector.broadcast %1171 : vector<1x32xf32> to vector<5x32xf32>
    %1173 = arith.addf %1169, %1172 : vector<5x32xf32>
    %cst_529 = arith.constant 0.000000e+00 : f32
    %1174 = vector.broadcast %cst_529 : f32 to vector<5x32xf32>
    %1175 = arith.maximumf %1173, %1174 : vector<5x32xf32>
    %1176 = math.absf %1173 : vector<5x32xf32>
    %cst_530 = arith.constant 0.000000e+00 : f32
    %1177 = vector.broadcast %cst_530 : f32 to vector<5x32xf32>
    %1178 = arith.subf %1177, %1176 : vector<5x32xf32>
    %1179 = math.exp %1178 : vector<5x32xf32>
    %cst_531 = arith.constant 1.000000e+00 : f32
    %1180 = vector.broadcast %cst_531 : f32 to vector<5x32xf32>
    %1181 = arith.addf %1180, %1179 : vector<5x32xf32>
    %1182 = math.log %1181 : vector<5x32xf32>
    %1183 = arith.addf %1175, %1182 : vector<5x32xf32>
    %1184 = arith.mulf %1183, %1164 : vector<5x32xf32>
    %c3_532 = arith.constant 3 : index
    %c0_533 = arith.constant 0 : index
    %c0_534 = arith.constant 0 : index
    %1185 = vector.load %arg31[%c3_532, %c0_533, %c0_534] : memref<4x8x32xf32, #tpu.memory_space<vmem>>, vector<1x8x32xf32>
    %1186 = vector.shape_cast %1185 : vector<1x8x32xf32> to vector<8x32xf32>
    %c3_535 = arith.constant 3 : index
    %c0_536 = arith.constant 0 : index
    %c0_537 = arith.constant 0 : index
    %1187 = vector.load %arg32[%c3_535, %c0_536, %c0_537] : memref<4x1x32xf32, #tpu.memory_space<vmem>>, vector<1x1x32xf32>
    %1188 = vector.shape_cast %1187 : vector<1x1x32xf32> to vector<1x32xf32>
    %c3_538 = arith.constant 3 : index
    %c0_539 = arith.constant 0 : index
    %c0_540 = arith.constant 0 : index
    %1189 = vector.load %arg30[%c3_538, %c0_539, %c0_540] : memref<4x16x32xf32, #tpu.memory_space<vmem>>, vector<1x16x32xf32>
    %1190 = vector.shape_cast %1189 : vector<1x16x32xf32> to vector<16x32xf32>
    "tpu.trace_start"() <{level = 10 : i32, message = "nd,td->nt"}> : () -> ()
    %cst_541 = arith.constant dense<0.000000e+00> : vector<16x5xf32>
    %1191 = tpu.matmul %1190, %1164, %cst_541 {dimension_numbers = #tpu.dot_dimension_numbers<[1], [1], [0], [0], [0, 0, 1, 0], [], []>} : vector<16x32xf32>, vector<5x32xf32>, vector<16x5xf32> -> vector<16x5xf32>
    "tpu.trace_stop"() : () -> ()
    %1192 = vector.extract_strided_slice %1191 {offsets = [0, 0], sizes = [8, 5], strides = [1, 1]} : vector<16x5xf32> to vector<8x5xf32>
    %1193 = vector.extract_strided_slice %1191 {offsets = [8, 0], sizes = [8, 5], strides = [1, 1]} : vector<16x5xf32> to vector<8x5xf32>
    %cst_542 = arith.constant 0.000000e+00 : f32
    %1194 = vector.broadcast %cst_542 : f32 to vector<8x32xf32>
    %1195 = vector.extract_strided_slice %1183 {offsets = [0, 0], sizes = [1, 32], strides = [1, 1]} : vector<5x32xf32> to vector<1x32xf32>
    %1196 = vector.broadcast %1195 : vector<1x32xf32> to vector<8x32xf32>
    %1197 = arith.mulf %1196, %1186 : vector<8x32xf32>
    %1198 = math.exp %1197 : vector<8x32xf32>
    %1199 = arith.mulf %1198, %1194 : vector<8x32xf32>
    %1200 = vector.extract_strided_slice %1192 {offsets = [0, 0], sizes = [8, 1], strides = [1, 1]} : vector<8x5xf32> to vector<8x1xf32>
    %1201 = vector.extract_strided_slice %1184 {offsets = [0, 0], sizes = [1, 32], strides = [1, 1]} : vector<5x32xf32> to vector<1x32xf32>
    %1202 = vector.broadcast %1200 : vector<8x1xf32> to vector<8x32xf32>
    %1203 = vector.broadcast %1201 : vector<1x32xf32> to vector<8x32xf32>
    %1204 = arith.mulf %1202, %1203 : vector<8x32xf32>
    %1205 = arith.addf %1199, %1204 : vector<8x32xf32>
    %1206 = vector.extract_strided_slice %1193 {offsets = [0, 0], sizes = [8, 1], strides = [1, 1]} : vector<8x5xf32> to vector<8x1xf32>
    %1207 = vector.broadcast %1206 : vector<8x1xf32> to vector<8x32xf32>
    %1208 = arith.mulf %1207, %1205 : vector<8x32xf32>
    %cst_543 = arith.constant dense<0.000000e+00> : vector<32xf32>
    %1209 = vector.multi_reduction <add>, %1208, %cst_543 [0] : vector<8x32xf32> to vector<32xf32>
    %1210 = vector.shape_cast %1209 : vector<32xf32> to vector<1x32xf32>
    %1211 = vector.extract_strided_slice %1164 {offsets = [0, 0], sizes = [1, 32], strides = [1, 1]} : vector<5x32xf32> to vector<1x32xf32>
    %1212 = arith.mulf %1188, %1211 : vector<1x32xf32>
    %1213 = arith.addf %1210, %1212 : vector<1x32xf32>
    %c0_544 = arith.constant 0 : index
    %c0_545 = arith.constant 0 : index
    %1214 = vector.load %arg55[%c0_544, %c0_545] : memref<5x32xf32, #tpu.memory_space<vmem>>, vector<1x32xf32>
    tpu.vector_store %arg55[%c0_544, %c0_545], %1213 {strides = array<i32>} : memref<5x32xf32, #tpu.memory_space<vmem>>, vector<1x32xf32>,
    %1215 = vector.extract_strided_slice %1183 {offsets = [1, 0], sizes = [1, 32], strides = [1, 1]} : vector<5x32xf32> to vector<1x32xf32>
    %1216 = vector.broadcast %1215 : vector<1x32xf32> to vector<8x32xf32>
    %1217 = arith.mulf %1216, %1186 : vector<8x32xf32>
    %1218 = math.exp %1217 : vector<8x32xf32>
    %1219 = arith.mulf %1218, %1205 : vector<8x32xf32>
    %1220 = vector.extract_strided_slice %1192 {offsets = [0, 1], sizes = [8, 1], strides = [1, 1]} : vector<8x5xf32> to vector<8x1xf32>
    %1221 = vector.extract_strided_slice %1184 {offsets = [1, 0], sizes = [1, 32], strides = [1, 1]} : vector<5x32xf32> to vector<1x32xf32>
    %1222 = vector.broadcast %1220 : vector<8x1xf32> to vector<8x32xf32>
    %1223 = vector.broadcast %1221 : vector<1x32xf32> to vector<8x32xf32>
    %1224 = arith.mulf %1222, %1223 : vector<8x32xf32>
    %1225 = arith.addf %1219, %1224 : vector<8x32xf32>
    %1226 = vector.extract_strided_slice %1193 {offsets = [0, 1], sizes = [8, 1], strides = [1, 1]} : vector<8x5xf32> to vector<8x1xf32>
    %1227 = vector.broadcast %1226 : vector<8x1xf32> to vector<8x32xf32>
    %1228 = arith.mulf %1227, %1225 : vector<8x32xf32>
    %cst_546 = arith.constant dense<0.000000e+00> : vector<32xf32>
    %1229 = vector.multi_reduction <add>, %1228, %cst_546 [0] : vector<8x32xf32> to vector<32xf32>
    %1230 = vector.shape_cast %1229 : vector<32xf32> to vector<1x32xf32>
    %1231 = vector.extract_strided_slice %1164 {offsets = [1, 0], sizes = [1, 32], strides = [1, 1]} : vector<5x32xf32> to vector<1x32xf32>
    %1232 = arith.mulf %1188, %1231 : vector<1x32xf32>
    %1233 = arith.addf %1230, %1232 : vector<1x32xf32>
    %c1_547 = arith.constant 1 : index
    %c0_548 = arith.constant 0 : index
    %1234 = vector.load %arg55[%c1_547, %c0_548] : memref<5x32xf32, #tpu.memory_space<vmem>>, vector<1x32xf32>
    tpu.vector_store %arg55[%c1_547, %c0_548], %1233 {strides = array<i32>} : memref<5x32xf32, #tpu.memory_space<vmem>>, vector<1x32xf32>,
    %1235 = vector.extract_strided_slice %1183 {offsets = [2, 0], sizes = [1, 32], strides = [1, 1]} : vector<5x32xf32> to vector<1x32xf32>
    %1236 = vector.broadcast %1235 : vector<1x32xf32> to vector<8x32xf32>
    %1237 = arith.mulf %1236, %1186 : vector<8x32xf32>
    %1238 = math.exp %1237 : vector<8x32xf32>
    %1239 = arith.mulf %1238, %1225 : vector<8x32xf32>
    %1240 = vector.extract_strided_slice %1192 {offsets = [0, 2], sizes = [8, 1], strides = [1, 1]} : vector<8x5xf32> to vector<8x1xf32>
    %1241 = vector.extract_strided_slice %1184 {offsets = [2, 0], sizes = [1, 32], strides = [1, 1]} : vector<5x32xf32> to vector<1x32xf32>
    %1242 = vector.broadcast %1240 : vector<8x1xf32> to vector<8x32xf32>
    %1243 = vector.broadcast %1241 : vector<1x32xf32> to vector<8x32xf32>
    %1244 = arith.mulf %1242, %1243 : vector<8x32xf32>
    %1245 = arith.addf %1239, %1244 : vector<8x32xf32>
    %1246 = vector.extract_strided_slice %1193 {offsets = [0, 2], sizes = [8, 1], strides = [1, 1]} : vector<8x5xf32> to vector<8x1xf32>
    %1247 = vector.broadcast %1246 : vector<8x1xf32> to vector<8x32xf32>
    %1248 = arith.mulf %1247, %1245 : vector<8x32xf32>
    %cst_549 = arith.constant dense<0.000000e+00> : vector<32xf32>
    %1249 = vector.multi_reduction <add>, %1248, %cst_549 [0] : vector<8x32xf32> to vector<32xf32>
    %1250 = vector.shape_cast %1249 : vector<32xf32> to vector<1x32xf32>
    %1251 = vector.extract_strided_slice %1164 {offsets = [2, 0], sizes = [1, 32], strides = [1, 1]} : vector<5x32xf32> to vector<1x32xf32>
    %1252 = arith.mulf %1188, %1251 : vector<1x32xf32>
    %1253 = arith.addf %1250, %1252 : vector<1x32xf32>
    %c2_550 = arith.constant 2 : index
    %c0_551 = arith.constant 0 : index
    %1254 = vector.load %arg55[%c2_550, %c0_551] : memref<5x32xf32, #tpu.memory_space<vmem>>, vector<1x32xf32>
    tpu.vector_store %arg55[%c2_550, %c0_551], %1253 {strides = array<i32>} : memref<5x32xf32, #tpu.memory_space<vmem>>, vector<1x32xf32>,
    %1255 = vector.extract_strided_slice %1183 {offsets = [3, 0], sizes = [1, 32], strides = [1, 1]} : vector<5x32xf32> to vector<1x32xf32>
    %1256 = vector.broadcast %1255 : vector<1x32xf32> to vector<8x32xf32>
    %1257 = arith.mulf %1256, %1186 : vector<8x32xf32>
    %1258 = math.exp %1257 : vector<8x32xf32>
    %1259 = arith.mulf %1258, %1245 : vector<8x32xf32>
    %1260 = vector.extract_strided_slice %1192 {offsets = [0, 3], sizes = [8, 1], strides = [1, 1]} : vector<8x5xf32> to vector<8x1xf32>
    %1261 = vector.extract_strided_slice %1184 {offsets = [3, 0], sizes = [1, 32], strides = [1, 1]} : vector<5x32xf32> to vector<1x32xf32>
    %1262 = vector.broadcast %1260 : vector<8x1xf32> to vector<8x32xf32>
    %1263 = vector.broadcast %1261 : vector<1x32xf32> to vector<8x32xf32>
    %1264 = arith.mulf %1262, %1263 : vector<8x32xf32>
    %1265 = arith.addf %1259, %1264 : vector<8x32xf32>
    %1266 = vector.extract_strided_slice %1193 {offsets = [0, 3], sizes = [8, 1], strides = [1, 1]} : vector<8x5xf32> to vector<8x1xf32>
    %1267 = vector.broadcast %1266 : vector<8x1xf32> to vector<8x32xf32>
    %1268 = arith.mulf %1267, %1265 : vector<8x32xf32>
    %cst_552 = arith.constant dense<0.000000e+00> : vector<32xf32>
    %1269 = vector.multi_reduction <add>, %1268, %cst_552 [0] : vector<8x32xf32> to vector<32xf32>
    %1270 = vector.shape_cast %1269 : vector<32xf32> to vector<1x32xf32>
    %1271 = vector.extract_strided_slice %1164 {offsets = [3, 0], sizes = [1, 32], strides = [1, 1]} : vector<5x32xf32> to vector<1x32xf32>
    %1272 = arith.mulf %1188, %1271 : vector<1x32xf32>
    %1273 = arith.addf %1270, %1272 : vector<1x32xf32>
    %c3_553 = arith.constant 3 : index
    %c0_554 = arith.constant 0 : index
    %1274 = vector.load %arg55[%c3_553, %c0_554] : memref<5x32xf32, #tpu.memory_space<vmem>>, vector<1x32xf32>
    tpu.vector_store %arg55[%c3_553, %c0_554], %1273 {strides = array<i32>} : memref<5x32xf32, #tpu.memory_space<vmem>>, vector<1x32xf32>,
    %1275 = vector.extract_strided_slice %1183 {offsets = [4, 0], sizes = [1, 32], strides = [1, 1]} : vector<5x32xf32> to vector<1x32xf32>
    %1276 = vector.broadcast %1275 : vector<1x32xf32> to vector<8x32xf32>
    %1277 = arith.mulf %1276, %1186 : vector<8x32xf32>
    %1278 = math.exp %1277 : vector<8x32xf32>
    %1279 = arith.mulf %1278, %1265 : vector<8x32xf32>
    %1280 = vector.extract_strided_slice %1192 {offsets = [0, 4], sizes = [8, 1], strides = [1, 1]} : vector<8x5xf32> to vector<8x1xf32>
    %1281 = vector.extract_strided_slice %1184 {offsets = [4, 0], sizes = [1, 32], strides = [1, 1]} : vector<5x32xf32> to vector<1x32xf32>
    %1282 = vector.broadcast %1280 : vector<8x1xf32> to vector<8x32xf32>
    %1283 = vector.broadcast %1281 : vector<1x32xf32> to vector<8x32xf32>
    %1284 = arith.mulf %1282, %1283 : vector<8x32xf32>
    %1285 = arith.addf %1279, %1284 : vector<8x32xf32>
    %1286 = vector.extract_strided_slice %1193 {offsets = [0, 4], sizes = [8, 1], strides = [1, 1]} : vector<8x5xf32> to vector<8x1xf32>
    %1287 = vector.broadcast %1286 : vector<8x1xf32> to vector<8x32xf32>
    %1288 = arith.mulf %1287, %1285 : vector<8x32xf32>
    %cst_555 = arith.constant dense<0.000000e+00> : vector<32xf32>
    %1289 = vector.multi_reduction <add>, %1288, %cst_555 [0] : vector<8x32xf32> to vector<32xf32>
    %1290 = vector.shape_cast %1289 : vector<32xf32> to vector<1x32xf32>
    %1291 = vector.extract_strided_slice %1164 {offsets = [4, 0], sizes = [1, 32], strides = [1, 1]} : vector<5x32xf32> to vector<1x32xf32>
    %1292 = arith.mulf %1188, %1291 : vector<1x32xf32>
    %1293 = arith.addf %1290, %1292 : vector<1x32xf32>
    %c4_556 = arith.constant 4 : index
    %c0_557 = arith.constant 0 : index
    %1294 = vector.load %arg55[%c4_556, %c0_557] : memref<5x32xf32, #tpu.memory_space<vmem>>, vector<1x32xf32>
    tpu.vector_store %arg55[%c4_556, %c0_557], %1293 {strides = array<i32>} : memref<5x32xf32, #tpu.memory_space<vmem>>, vector<1x32xf32>,
    %c0_558 = arith.constant 0 : index
    %c0_559 = arith.constant 0 : index
    %1295 = vector.load %arg55[%c0_558, %c0_559] : memref<5x32xf32, #tpu.memory_space<vmem>>, vector<5x32xf32>
    %cst_560 = arith.constant 0.000000e+00 : f32
    %1296 = vector.broadcast %cst_560 : f32 to vector<5x32xf32>
    %1297 = arith.subf %1296, %1126 : vector<5x32xf32>
    %1298 = math.exp %1297 : vector<5x32xf32>
    %cst_561 = arith.constant 1.000000e+00 : f32
    %1299 = vector.broadcast %cst_561 : f32 to vector<5x32xf32>
    %1300 = arith.addf %1299, %1298 : vector<5x32xf32>
    %cst_562 = arith.constant 1.000000e+00 : f32
    %1301 = vector.broadcast %cst_562 : f32 to vector<5x32xf32>
    %1302 = arith.divf %1301, %1300 : vector<5x32xf32>
    %1303 = arith.mulf %1126, %1302 : vector<5x32xf32>
    %1304 = arith.mulf %1295, %1303 : vector<5x32xf32>
    %c3_563 = arith.constant 3 : index
    %c0_564 = arith.constant 0 : index
    %c0_565 = arith.constant 0 : index
    %1305 = vector.load %arg33[%c3_563, %c0_564, %c0_565] : memref<4x32x16xf32, #tpu.memory_space<vmem>>, vector<1x32x16xf32>
    %1306 = vector.shape_cast %1305 : vector<1x32x16xf32> to vector<32x16xf32>
    %1307 = arith.truncf %1304 : vector<5x32xf32> to vector<5x32xbf16>
    %1308 = arith.truncf %1306 : vector<32x16xf32> to vector<32x16xbf16>
    %cst_566 = arith.constant dense<0.000000e+00> : vector<5x16xf32>
    %1309 = tpu.matmul %1307, %1308, %cst_566 {dimension_numbers = #tpu.dot_dimension_numbers<[1], [0], [0], [1], [0, 0, 1, 1], [], []>} : vector<5x32xbf16>, vector<32x16xbf16>, vector<5x16xf32> -> vector<5x16xf32>
    %c3_567 = arith.constant 3 : index
    %c0_568 = arith.constant 0 : index
    %c0_569 = arith.constant 0 : index
    %1310 = vector.load %arg34[%c3_567, %c0_568, %c0_569] : memref<4x1x16xf32, #tpu.memory_space<vmem>>, vector<1x1x16xf32>
    %1311 = vector.shape_cast %1310 : vector<1x1x16xf32> to vector<1x16xf32>
    %1312 = vector.broadcast %1311 : vector<1x16xf32> to vector<5x16xf32>
    %1313 = arith.addf %1309, %1312 : vector<5x16xf32>
    %c1_570 = arith.constant 1 : index
    %c0_571 = arith.constant 0 : index
    %c0_572 = arith.constant 0 : index
    %1314 = vector.load %arg35[%c1_570, %c0_571, %c0_572] : memref<2x16x32xf32, #tpu.memory_space<vmem>>, vector<1x16x32xf32>
    %1315 = vector.shape_cast %1314 : vector<1x16x32xf32> to vector<16x32xf32>
    %1316 = arith.truncf %1313 : vector<5x16xf32> to vector<5x16xbf16>
    %1317 = arith.truncf %1315 : vector<16x32xf32> to vector<16x32xbf16>
    %cst_573 = arith.constant dense<0.000000e+00> : vector<5x32xf32>
    %1318 = tpu.matmul %1316, %1317, %cst_573 {dimension_numbers = #tpu.dot_dimension_numbers<[1], [0], [0], [1], [0, 0, 1, 1], [], []>} : vector<5x16xbf16>, vector<16x32xbf16>, vector<5x32xf32> -> vector<5x32xf32>
    %c1_574 = arith.constant 1 : index
    %c0_575 = arith.constant 0 : index
    %c0_576 = arith.constant 0 : index
    %1319 = vector.load %arg36[%c1_574, %c0_575, %c0_576] : memref<2x1x32xf32, #tpu.memory_space<vmem>>, vector<1x1x32xf32>
    %1320 = vector.shape_cast %1319 : vector<1x1x32xf32> to vector<1x32xf32>
    %1321 = vector.broadcast %1320 : vector<1x32xf32> to vector<5x32xf32>
    %1322 = arith.addf %1318, %1321 : vector<5x32xf32>
    %1323 = vector.extract_strided_slice %863 {offsets = [1, 0], sizes = [4, 32], strides = [1, 1]} : vector<5x32xf32> to vector<4x32xf32>
    %1324 = vector.extract_strided_slice %1322 {offsets = [1, 0], sizes = [4, 32], strides = [1, 1]} : vector<5x32xf32> to vector<4x32xf32>
    %1325 = arith.subf %1323, %1324 : vector<4x32xf32>
    %1326 = arith.mulf %1325, %1325 : vector<4x32xf32>
    %cst_577 = arith.constant dense<0.000000e+00> : vector<4xf32>
    %1327 = vector.multi_reduction <add>, %1326, %cst_577 [1] : vector<4x32xf32> to vector<4xf32>
    %1328 = vector.shape_cast %1327 : vector<4xf32> to vector<4x1xf32>
    %cst_578 = arith.constant dense<0.000000e+00> : vector<1xf32>
    %1329 = vector.multi_reduction <add>, %1328, %cst_578 [0] : vector<4x1xf32> to vector<1xf32>
    %1330 = vector.shape_cast %1329 : vector<1xf32> to vector<1x1xf32>
    %1331 = arith.addf %677, %1330 : vector<1x1xf32>
    %c1_579 = arith.constant 1 : index
    %c0_580 = arith.constant 0 : index
    %c0_581 = arith.constant 0 : index
    %1332 = vector.load %arg37[%c1_579, %c0_580, %c0_581] : memref<2x32x16xf32, #tpu.memory_space<vmem>>, vector<1x32x16xf32>
    %1333 = vector.shape_cast %1332 : vector<1x32x16xf32> to vector<32x16xf32>
    %1334 = arith.truncf %1322 : vector<5x32xf32> to vector<5x32xbf16>
    %1335 = arith.truncf %1333 : vector<32x16xf32> to vector<32x16xbf16>
    %cst_582 = arith.constant dense<0.000000e+00> : vector<5x16xf32>
    %1336 = tpu.matmul %1334, %1335, %cst_582 {dimension_numbers = #tpu.dot_dimension_numbers<[1], [0], [0], [1], [0, 0, 1, 1], [], []>} : vector<5x32xbf16>, vector<32x16xbf16>, vector<5x16xf32> -> vector<5x16xf32>
    %1337 = arith.addf %1313, %1336 : vector<5x16xf32>
    %c1_583 = arith.constant 1 : index
    %c0_584 = arith.constant 0 : index
    %c0_585 = arith.constant 0 : index
    %1338 = vector.load %arg38[%c1_583, %c0_584, %c0_585] : memref<2x1x16xf32, #tpu.memory_space<vmem>>, vector<1x1x16xf32>
    %1339 = vector.shape_cast %1338 : vector<1x1x16xf32> to vector<1x16xf32>
    %1340 = vector.broadcast %1339 : vector<1x16xf32> to vector<5x16xf32>
    %1341 = arith.addf %1337, %1340 : vector<5x16xf32>
    %c0_586 = arith.constant 0 : index
    %c0_587 = arith.constant 0 : index
    %1342 = vector.load %arg39[%c0_586, %c0_587] : memref<6x5xf32, #tpu.memory_space<vmem>>, vector<6x5xf32>
    %1343 = arith.truncf %1342 : vector<6x5xf32> to vector<6x5xbf16>
    %1344 = arith.truncf %863 : vector<5x32xf32> to vector<5x32xbf16>
    %cst_588 = arith.constant dense<0.000000e+00> : vector<6x32xf32>
    %1345 = tpu.matmul %1343, %1344, %cst_588 {dimension_numbers = #tpu.dot_dimension_numbers<[1], [0], [0], [1], [0, 0, 1, 1], [], []>} : vector<6x5xbf16>, vector<5x32xbf16>, vector<6x32xf32> -> vector<6x32xf32>
    %c0_589 = arith.constant 0 : index
    %c0_590 = arith.constant 0 : index
    %1346 = vector.load %arg40[%c0_589, %c0_590] : memref<6x1xf32, #tpu.memory_space<vmem>>, vector<6x1xf32>
    %1347 = vector.broadcast %1346 : vector<6x1xf32> to vector<6x32xf32>
    %1348 = arith.addf %1345, %1347 : vector<6x32xf32>
    %c0_591 = arith.constant 0 : index
    %c0_592 = arith.constant 0 : index
    %1349 = vector.load %arg41[%c0_591, %c0_592] : memref<6x5xf32, #tpu.memory_space<vmem>>, vector<6x5xf32>
    %1350 = arith.truncf %1349 : vector<6x5xf32> to vector<6x5xbf16>
    %1351 = arith.truncf %1341 : vector<5x16xf32> to vector<5x16xbf16>
    %cst_593 = arith.constant dense<0.000000e+00> : vector<6x16xf32>
    %1352 = tpu.matmul %1350, %1351, %cst_593 {dimension_numbers = #tpu.dot_dimension_numbers<[1], [0], [0], [1], [0, 0, 1, 1], [], []>} : vector<6x5xbf16>, vector<5x16xbf16>, vector<6x16xf32> -> vector<6x16xf32>
    %c0_594 = arith.constant 0 : index
    %c0_595 = arith.constant 0 : index
    %1353 = vector.load %arg42[%c0_594, %c0_595] : memref<6x1xf32, #tpu.memory_space<vmem>>, vector<6x1xf32>
    %1354 = vector.broadcast %1353 : vector<6x1xf32> to vector<6x16xf32>
    %1355 = arith.addf %1352, %1354 : vector<6x16xf32>
    %c0_596 = arith.constant 0 : index
    %c0_597 = arith.constant 0 : index
    %1356 = vector.load %arg43[%c0_596, %c0_597] : memref<6x32xf32, #tpu.memory_space<vmem>>, vector<6x32xf32>
    %1357 = arith.mulf %1348, %1356 : vector<6x32xf32>
    %cst_598 = arith.constant dense<0.000000e+00> : vector<6xf32>
    %1358 = vector.multi_reduction <add>, %1357, %cst_598 [1] : vector<6x32xf32> to vector<6xf32>
    %1359 = vector.shape_cast %1358 : vector<6xf32> to vector<6x1xf32>
    %c0_599 = arith.constant 0 : index
    %c0_600 = arith.constant 0 : index
    %1360 = vector.load %arg44[%c0_599, %c0_600] : memref<6x1xf32, #tpu.memory_space<vmem>>, vector<6x1xf32>
    %1361 = arith.addf %1359, %1360 : vector<6x1xf32>
    %c0_601 = arith.constant 0 : index
    %c0_602 = arith.constant 0 : index
    %1362 = vector.load %arg45[%c0_601, %c0_602] : memref<6x16xf32, #tpu.memory_space<vmem>>, vector<6x16xf32>
    %1363 = arith.mulf %1355, %1362 : vector<6x16xf32>
    %cst_603 = arith.constant dense<0.000000e+00> : vector<6xf32>
    %1364 = vector.multi_reduction <add>, %1363, %cst_603 [1] : vector<6x16xf32> to vector<6xf32>
    %1365 = vector.shape_cast %1364 : vector<6xf32> to vector<6x1xf32>
    %c0_604 = arith.constant 0 : index
    %c0_605 = arith.constant 0 : index
    %1366 = vector.load %arg46[%c0_604, %c0_605] : memref<6x1xf32, #tpu.memory_space<vmem>>, vector<6x1xf32>
    %1367 = arith.addf %1365, %1366 : vector<6x1xf32>
    %c0_606 = arith.constant 0 : index
    %c0_607 = arith.constant 0 : index
    %1368 = vector.load %arg47[%c0_606, %c0_607] : memref<6x4xf32, #tpu.memory_space<vmem>>, vector<6x4xf32>
    %c0_608 = arith.constant 0 : index
    %c0_609 = arith.constant 0 : index
    %1369 = vector.load %arg48[%c0_608, %c0_609] : memref<6x4xf32, #tpu.memory_space<vmem>>, vector<6x4xf32>
    %1370 = vector.extract_strided_slice %1368 {offsets = [0, 2], sizes = [6, 1], strides = [1, 1]} : vector<6x4xf32> to vector<6x1xf32>
    %1371 = arith.subf %1361, %1370 : vector<6x1xf32>
    %1372 = vector.extract_strided_slice %1368 {offsets = [0, 3], sizes = [6, 1], strides = [1, 1]} : vector<6x4xf32> to vector<6x1xf32>
    %cst_610 = arith.constant 9.99999974E-6 : f32
    %1373 = vector.broadcast %cst_610 : f32 to vector<6x1xf32>
    %1374 = arith.addf %1372, %1373 : vector<6x1xf32>
    %1375 = math.rsqrt %1374 : vector<6x1xf32>
    %1376 = arith.mulf %1371, %1375 : vector<6x1xf32>
    %1377 = vector.extract_strided_slice %1368 {offsets = [0, 0], sizes = [6, 1], strides = [1, 1]} : vector<6x4xf32> to vector<6x1xf32>
    %1378 = arith.mulf %1376, %1377 : vector<6x1xf32>
    %1379 = vector.extract_strided_slice %1368 {offsets = [0, 1], sizes = [6, 1], strides = [1, 1]} : vector<6x4xf32> to vector<6x1xf32>
    %1380 = arith.addf %1378, %1379 : vector<6x1xf32>
    %1381 = vector.extract_strided_slice %1369 {offsets = [0, 2], sizes = [6, 1], strides = [1, 1]} : vector<6x4xf32> to vector<6x1xf32>
    %1382 = arith.subf %1367, %1381 : vector<6x1xf32>
    %1383 = vector.extract_strided_slice %1369 {offsets = [0, 3], sizes = [6, 1], strides = [1, 1]} : vector<6x4xf32> to vector<6x1xf32>
    %cst_611 = arith.constant 9.99999974E-6 : f32
    %1384 = vector.broadcast %cst_611 : f32 to vector<6x1xf32>
    %1385 = arith.addf %1383, %1384 : vector<6x1xf32>
    %1386 = math.rsqrt %1385 : vector<6x1xf32>
    %1387 = arith.mulf %1382, %1386 : vector<6x1xf32>
    %1388 = vector.extract_strided_slice %1369 {offsets = [0, 0], sizes = [6, 1], strides = [1, 1]} : vector<6x4xf32> to vector<6x1xf32>
    %1389 = arith.mulf %1387, %1388 : vector<6x1xf32>
    %1390 = vector.extract_strided_slice %1369 {offsets = [0, 1], sizes = [6, 1], strides = [1, 1]} : vector<6x4xf32> to vector<6x1xf32>
    %1391 = arith.addf %1389, %1390 : vector<6x1xf32>
    %c0_612 = arith.constant 0 : index
    %c0_613 = arith.constant 0 : index
    %c0_614 = arith.constant 0 : index
    %1392 = vector.load %arg49[%c0_612, %c0_613, %c0_614] : memref<1x6x1xf32, #tpu.memory_space<vmem>>, vector<1x6x1xf32>
    %1393 = vector.shape_cast %1392 : vector<1x6x1xf32> to vector<6x1xf32>
    %1394 = vector.shape_cast %1380 : vector<6x1xf32> to vector<1x6x1xf32>
    tpu.vector_store %arg49[%c0_612, %c0_613, %c0_614], %1394 {strides = array<i32>} : memref<1x6x1xf32, #tpu.memory_space<vmem>>, vector<1x6x1xf32>,
    %c0_615 = arith.constant 0 : index
    %c0_616 = arith.constant 0 : index
    %c0_617 = arith.constant 0 : index
    %1395 = vector.load %arg50[%c0_615, %c0_616, %c0_617] : memref<1x6x1xf32, #tpu.memory_space<vmem>>, vector<1x6x1xf32>
    %1396 = vector.shape_cast %1395 : vector<1x6x1xf32> to vector<6x1xf32>
    %1397 = vector.shape_cast %1391 : vector<6x1xf32> to vector<1x6x1xf32>
    tpu.vector_store %arg50[%c0_615, %c0_616, %c0_617], %1397 {strides = array<i32>} : memref<1x6x1xf32, #tpu.memory_space<vmem>>, vector<1x6x1xf32>,
    %c0_618 = arith.constant 0 : index
    %c0_619 = arith.constant 0 : index
    %c0_620 = arith.constant 0 : index
    %1398 = vector.load %arg51[%c0_618, %c0_619, %c0_620] : memref<1x1x1xf32, #tpu.memory_space<vmem>>, vector<1x1x1xf32>
    %1399 = vector.shape_cast %1398 : vector<1x1x1xf32> to vector<1x1xf32>
    %1400 = vector.shape_cast %1331 : vector<1x1xf32> to vector<1x1x1xf32>
    tpu.vector_store %arg51[%c0_618, %c0_619, %c0_620], %1400 {strides = array<i32>} : memref<1x1x1xf32, #tpu.memory_space<vmem>>, vector<1x1x1xf32>,
    return
  }
  func.func @transform_0(%arg0: i32) -> (i32, i32, i32) {
    %c0_i32 = arith.constant 0 : i32
    %c0_i32_0 = arith.constant 0 : i32
    %c0_i32_1 = arith.constant 0 : i32
    return %arg0, %c0_i32, %c0_i32_0 : i32, i32, i32
  }
  func.func @transform_1(%arg0: i32) -> (i32, i32) {
    %c0_i32 = arith.constant 0 : i32
    %c0_i32_0 = arith.constant 0 : i32
    %c0_i32_1 = arith.constant 0 : i32
    return %c0_i32, %c0_i32_0 : i32, i32
  }
  func.func @transform_2(%arg0: i32) -> (i32, i32) {
    %c0_i32 = arith.constant 0 : i32
    %c0_i32_0 = arith.constant 0 : i32
    %c0_i32_1 = arith.constant 0 : i32
    return %c0_i32, %c0_i32_0 : i32, i32
  }
  func.func @transform_3(%arg0: i32) -> (i32, i32) {
    %c0_i32 = arith.constant 0 : i32
    %c0_i32_0 = arith.constant 0 : i32
    %c0_i32_1 = arith.constant 0 : i32
    return %c0_i32, %c0_i32_0 : i32, i32
  }
  func.func @transform_4(%arg0: i32) -> (i32, i32) {
    %c0_i32 = arith.constant 0 : i32
    %c0_i32_0 = arith.constant 0 : i32
    %c0_i32_1 = arith.constant 0 : i32
    return %c0_i32, %c0_i32_0 : i32, i32
  }
  func.func @transform_5(%arg0: i32) -> (i32, i32) {
    %c0_i32 = arith.constant 0 : i32
    %c0_i32_0 = arith.constant 0 : i32
    %c0_i32_1 = arith.constant 0 : i32
    return %c0_i32, %c0_i32_0 : i32, i32
  }
  func.func @transform_6(%arg0: i32) -> (i32, i32) {
    %c0_i32 = arith.constant 0 : i32
    %c0_i32_0 = arith.constant 0 : i32
    %c0_i32_1 = arith.constant 0 : i32
    return %c0_i32, %c0_i32_0 : i32, i32
  }
  func.func @transform_7(%arg0: i32) -> (i32, i32) {
    %c0_i32 = arith.constant 0 : i32
    %c0_i32_0 = arith.constant 0 : i32
    %c0_i32_1 = arith.constant 0 : i32
    return %c0_i32, %c0_i32_0 : i32, i32
  }
  func.func @transform_8(%arg0: i32) -> (i32, i32) {
    %c0_i32 = arith.constant 0 : i32
    %c0_i32_0 = arith.constant 0 : i32
    %c0_i32_1 = arith.constant 0 : i32
    return %c0_i32, %c0_i32_0 : i32, i32
  }
  func.func @transform_9(%arg0: i32) -> (i32, i32, i32) {
    %c0_i32 = arith.constant 0 : i32
    %c0_i32_0 = arith.constant 0 : i32
    %c0_i32_1 = arith.constant 0 : i32
    %c0_i32_2 = arith.constant 0 : i32
    return %c0_i32, %c0_i32_0, %c0_i32_1 : i32, i32, i32
  }
  func.func @transform_10(%arg0: i32) -> (i32, i32, i32) {
    %c0_i32 = arith.constant 0 : i32
    %c0_i32_0 = arith.constant 0 : i32
    %c0_i32_1 = arith.constant 0 : i32
    %c0_i32_2 = arith.constant 0 : i32
    return %c0_i32, %c0_i32_0, %c0_i32_1 : i32, i32, i32
  }
  func.func @transform_11(%arg0: i32) -> (i32, i32, i32) {
    %c0_i32 = arith.constant 0 : i32
    %c0_i32_0 = arith.constant 0 : i32
    %c0_i32_1 = arith.constant 0 : i32
    %c0_i32_2 = arith.constant 0 : i32
    return %c0_i32, %c0_i32_0, %c0_i32_1 : i32, i32, i32
  }
  func.func @transform_12(%arg0: i32) -> (i32, i32, i32) {
    %c0_i32 = arith.constant 0 : i32
    %c0_i32_0 = arith.constant 0 : i32
    %c0_i32_1 = arith.constant 0 : i32
    %c0_i32_2 = arith.constant 0 : i32
    return %c0_i32, %c0_i32_0, %c0_i32_1 : i32, i32, i32
  }
  func.func @transform_13(%arg0: i32) -> (i32, i32, i32) {
    %c0_i32 = arith.constant 0 : i32
    %c0_i32_0 = arith.constant 0 : i32
    %c0_i32_1 = arith.constant 0 : i32
    %c0_i32_2 = arith.constant 0 : i32
    return %c0_i32, %c0_i32_0, %c0_i32_1 : i32, i32, i32
  }
  func.func @transform_14(%arg0: i32) -> (i32, i32, i32) {
    %c0_i32 = arith.constant 0 : i32
    %c0_i32_0 = arith.constant 0 : i32
    %c0_i32_1 = arith.constant 0 : i32
    %c0_i32_2 = arith.constant 0 : i32
    return %c0_i32, %c0_i32_0, %c0_i32_1 : i32, i32, i32
  }
  func.func @transform_15(%arg0: i32) -> (i32, i32, i32) {
    %c0_i32 = arith.constant 0 : i32
    %c0_i32_0 = arith.constant 0 : i32
    %c0_i32_1 = arith.constant 0 : i32
    %c0_i32_2 = arith.constant 0 : i32
    return %c0_i32, %c0_i32_0, %c0_i32_1 : i32, i32, i32
  }
  func.func @transform_16(%arg0: i32) -> (i32, i32, i32) {
    %c0_i32 = arith.constant 0 : i32
    %c0_i32_0 = arith.constant 0 : i32
    %c0_i32_1 = arith.constant 0 : i32
    %c0_i32_2 = arith.constant 0 : i32
    return %c0_i32, %c0_i32_0, %c0_i32_1 : i32, i32, i32
  }
  func.func @transform_17(%arg0: i32) -> (i32, i32, i32) {
    %c0_i32 = arith.constant 0 : i32
    %c0_i32_0 = arith.constant 0 : i32
    %c0_i32_1 = arith.constant 0 : i32
    %c0_i32_2 = arith.constant 0 : i32
    return %c0_i32, %c0_i32_0, %c0_i32_1 : i32, i32, i32
  }
  func.func @transform_18(%arg0: i32) -> (i32, i32, i32) {
    %c0_i32 = arith.constant 0 : i32
    %c0_i32_0 = arith.constant 0 : i32
    %c0_i32_1 = arith.constant 0 : i32
    %c0_i32_2 = arith.constant 0 : i32
    return %c0_i32, %c0_i32_0, %c0_i32_1 : i32, i32, i32
  }
  func.func @transform_19(%arg0: i32) -> (i32, i32, i32) {
    %c0_i32 = arith.constant 0 : i32
    %c0_i32_0 = arith.constant 0 : i32
    %c0_i32_1 = arith.constant 0 : i32
    %c0_i32_2 = arith.constant 0 : i32
    return %c0_i32, %c0_i32_0, %c0_i32_1 : i32, i32, i32
  }
  func.func @transform_20(%arg0: i32) -> (i32, i32, i32) {
    %c0_i32 = arith.constant 0 : i32
    %c0_i32_0 = arith.constant 0 : i32
    %c0_i32_1 = arith.constant 0 : i32
    %c0_i32_2 = arith.constant 0 : i32
    return %c0_i32, %c0_i32_0, %c0_i32_1 : i32, i32, i32
  }
  func.func @transform_21(%arg0: i32) -> (i32, i32, i32) {
    %c0_i32 = arith.constant 0 : i32
    %c0_i32_0 = arith.constant 0 : i32
    %c0_i32_1 = arith.constant 0 : i32
    %c0_i32_2 = arith.constant 0 : i32
    return %c0_i32, %c0_i32_0, %c0_i32_1 : i32, i32, i32
  }
  func.func @transform_22(%arg0: i32) -> (i32, i32, i32) {
    %c0_i32 = arith.constant 0 : i32
    %c0_i32_0 = arith.constant 0 : i32
    %c0_i32_1 = arith.constant 0 : i32
    %c0_i32_2 = arith.constant 0 : i32
    return %c0_i32, %c0_i32_0, %c0_i32_1 : i32, i32, i32
  }
  func.func @transform_23(%arg0: i32) -> (i32, i32, i32) {
    %c0_i32 = arith.constant 0 : i32
    %c0_i32_0 = arith.constant 0 : i32
    %c0_i32_1 = arith.constant 0 : i32
    %c0_i32_2 = arith.constant 0 : i32
    return %c0_i32, %c0_i32_0, %c0_i32_1 : i32, i32, i32
  }
  func.func @transform_24(%arg0: i32) -> (i32, i32, i32) {
    %c0_i32 = arith.constant 0 : i32
    %c0_i32_0 = arith.constant 0 : i32
    %c0_i32_1 = arith.constant 0 : i32
    %c0_i32_2 = arith.constant 0 : i32
    return %c0_i32, %c0_i32_0, %c0_i32_1 : i32, i32, i32
  }
  func.func @transform_25(%arg0: i32) -> (i32, i32, i32) {
    %c0_i32 = arith.constant 0 : i32
    %c0_i32_0 = arith.constant 0 : i32
    %c0_i32_1 = arith.constant 0 : i32
    %c0_i32_2 = arith.constant 0 : i32
    return %c0_i32, %c0_i32_0, %c0_i32_1 : i32, i32, i32
  }
  func.func @transform_26(%arg0: i32) -> (i32, i32, i32) {
    %c0_i32 = arith.constant 0 : i32
    %c0_i32_0 = arith.constant 0 : i32
    %c0_i32_1 = arith.constant 0 : i32
    %c0_i32_2 = arith.constant 0 : i32
    return %c0_i32, %c0_i32_0, %c0_i32_1 : i32, i32, i32
  }
  func.func @transform_27(%arg0: i32) -> (i32, i32, i32) {
    %c0_i32 = arith.constant 0 : i32
    %c0_i32_0 = arith.constant 0 : i32
    %c0_i32_1 = arith.constant 0 : i32
    %c0_i32_2 = arith.constant 0 : i32
    return %c0_i32, %c0_i32_0, %c0_i32_1 : i32, i32, i32
  }
  func.func @transform_28(%arg0: i32) -> (i32, i32, i32) {
    %c0_i32 = arith.constant 0 : i32
    %c0_i32_0 = arith.constant 0 : i32
    %c0_i32_1 = arith.constant 0 : i32
    %c0_i32_2 = arith.constant 0 : i32
    return %c0_i32, %c0_i32_0, %c0_i32_1 : i32, i32, i32
  }
  func.func @transform_29(%arg0: i32) -> (i32, i32, i32) {
    %c0_i32 = arith.constant 0 : i32
    %c0_i32_0 = arith.constant 0 : i32
    %c0_i32_1 = arith.constant 0 : i32
    %c0_i32_2 = arith.constant 0 : i32
    return %c0_i32, %c0_i32_0, %c0_i32_1 : i32, i32, i32
  }
  func.func @transform_30(%arg0: i32) -> (i32, i32, i32) {
    %c0_i32 = arith.constant 0 : i32
    %c0_i32_0 = arith.constant 0 : i32
    %c0_i32_1 = arith.constant 0 : i32
    %c0_i32_2 = arith.constant 0 : i32
    return %c0_i32, %c0_i32_0, %c0_i32_1 : i32, i32, i32
  }
  func.func @transform_31(%arg0: i32) -> (i32, i32, i32) {
    %c0_i32 = arith.constant 0 : i32
    %c0_i32_0 = arith.constant 0 : i32
    %c0_i32_1 = arith.constant 0 : i32
    %c0_i32_2 = arith.constant 0 : i32
    return %c0_i32, %c0_i32_0, %c0_i32_1 : i32, i32, i32
  }
  func.func @transform_32(%arg0: i32) -> (i32, i32, i32) {
    %c0_i32 = arith.constant 0 : i32
    %c0_i32_0 = arith.constant 0 : i32
    %c0_i32_1 = arith.constant 0 : i32
    %c0_i32_2 = arith.constant 0 : i32
    return %c0_i32, %c0_i32_0, %c0_i32_1 : i32, i32, i32
  }
  func.func @transform_33(%arg0: i32) -> (i32, i32, i32) {
    %c0_i32 = arith.constant 0 : i32
    %c0_i32_0 = arith.constant 0 : i32
    %c0_i32_1 = arith.constant 0 : i32
    %c0_i32_2 = arith.constant 0 : i32
    return %c0_i32, %c0_i32_0, %c0_i32_1 : i32, i32, i32
  }
  func.func @transform_34(%arg0: i32) -> (i32, i32, i32) {
    %c0_i32 = arith.constant 0 : i32
    %c0_i32_0 = arith.constant 0 : i32
    %c0_i32_1 = arith.constant 0 : i32
    %c0_i32_2 = arith.constant 0 : i32
    return %c0_i32, %c0_i32_0, %c0_i32_1 : i32, i32, i32
  }
  func.func @transform_35(%arg0: i32) -> (i32, i32, i32) {
    %c0_i32 = arith.constant 0 : i32
    %c0_i32_0 = arith.constant 0 : i32
    %c0_i32_1 = arith.constant 0 : i32
    %c0_i32_2 = arith.constant 0 : i32
    return %c0_i32, %c0_i32_0, %c0_i32_1 : i32, i32, i32
  }
  func.func @transform_36(%arg0: i32) -> (i32, i32, i32) {
    %c0_i32 = arith.constant 0 : i32
    %c0_i32_0 = arith.constant 0 : i32
    %c0_i32_1 = arith.constant 0 : i32
    %c0_i32_2 = arith.constant 0 : i32
    return %c0_i32, %c0_i32_0, %c0_i32_1 : i32, i32, i32
  }
  func.func @transform_37(%arg0: i32) -> (i32, i32, i32) {
    %c0_i32 = arith.constant 0 : i32
    %c0_i32_0 = arith.constant 0 : i32
    %c0_i32_1 = arith.constant 0 : i32
    %c0_i32_2 = arith.constant 0 : i32
    return %c0_i32, %c0_i32_0, %c0_i32_1 : i32, i32, i32
  }
  func.func @transform_38(%arg0: i32) -> (i32, i32) {
    %c0_i32 = arith.constant 0 : i32
    %c0_i32_0 = arith.constant 0 : i32
    %c0_i32_1 = arith.constant 0 : i32
    return %c0_i32, %c0_i32_0 : i32, i32
  }
  func.func @transform_39(%arg0: i32) -> (i32, i32) {
    %c0_i32 = arith.constant 0 : i32
    %c0_i32_0 = arith.constant 0 : i32
    %c0_i32_1 = arith.constant 0 : i32
    return %c0_i32, %c0_i32_0 : i32, i32
  }
  func.func @transform_40(%arg0: i32) -> (i32, i32) {
    %c0_i32 = arith.constant 0 : i32
    %c0_i32_0 = arith.constant 0 : i32
    %c0_i32_1 = arith.constant 0 : i32
    return %c0_i32, %c0_i32_0 : i32, i32
  }
  func.func @transform_41(%arg0: i32) -> (i32, i32) {
    %c0_i32 = arith.constant 0 : i32
    %c0_i32_0 = arith.constant 0 : i32
    %c0_i32_1 = arith.constant 0 : i32
    return %c0_i32, %c0_i32_0 : i32, i32
  }
  func.func @transform_42(%arg0: i32) -> (i32, i32) {
    %c0_i32 = arith.constant 0 : i32
    %c0_i32_0 = arith.constant 0 : i32
    %c0_i32_1 = arith.constant 0 : i32
    return %c0_i32, %c0_i32_0 : i32, i32
  }
  func.func @transform_43(%arg0: i32) -> (i32, i32) {
    %c0_i32 = arith.constant 0 : i32
    %c0_i32_0 = arith.constant 0 : i32
    %c0_i32_1 = arith.constant 0 : i32
    return %c0_i32, %c0_i32_0 : i32, i32
  }
  func.func @transform_44(%arg0: i32) -> (i32, i32) {
    %c0_i32 = arith.constant 0 : i32
    %c0_i32_0 = arith.constant 0 : i32
    %c0_i32_1 = arith.constant 0 : i32
    return %c0_i32, %c0_i32_0 : i32, i32
  }
  func.func @transform_45(%arg0: i32) -> (i32, i32) {
    %c0_i32 = arith.constant 0 : i32
    %c0_i32_0 = arith.constant 0 : i32
    %c0_i32_1 = arith.constant 0 : i32
    return %c0_i32, %c0_i32_0 : i32, i32
  }
  func.func @transform_46(%arg0: i32) -> (i32, i32) {
    %c0_i32 = arith.constant 0 : i32
    %c0_i32_0 = arith.constant 0 : i32
    %c0_i32_1 = arith.constant 0 : i32
    return %c0_i32, %c0_i32_0 : i32, i32
  }
  func.func @transform_47(%arg0: i32) -> (i32, i32) {
    %c0_i32 = arith.constant 0 : i32
    %c0_i32_0 = arith.constant 0 : i32
    %c0_i32_1 = arith.constant 0 : i32
    return %c0_i32, %c0_i32_0 : i32, i32
  }
  func.func @transform_48(%arg0: i32) -> (i32, i32, i32) {
    %c0_i32 = arith.constant 0 : i32
    %c0_i32_0 = arith.constant 0 : i32
    %c0_i32_1 = arith.constant 0 : i32
    return %arg0, %c0_i32, %c0_i32_0 : i32, i32, i32
  }
  func.func @transform_49(%arg0: i32) -> (i32, i32, i32) {
    %c0_i32 = arith.constant 0 : i32
    %c0_i32_0 = arith.constant 0 : i32
    %c0_i32_1 = arith.constant 0 : i32
    return %arg0, %c0_i32, %c0_i32_0 : i32, i32, i32
  }
  func.func @transform_50(%arg0: i32) -> (i32, i32, i32) {
    %c0_i32 = arith.constant 0 : i32
    %c0_i32_0 = arith.constant 0 : i32
    %c0_i32_1 = arith.constant 0 : i32
    return %arg0, %c0_i32, %c0_i32_0 : i32, i32, i32
  }
}

</mosaic_0001>

<bundles_post_ra>
// kernel: forward.1
= control target key start
LH: loop header
LB: loop body
LE: loop exit
PB: predicated region body
PF: predicated region fallthrough
CT: control target
= control target key end

     0   :  { %s7773_s6 = smov 1   ;;  %s7774_s10 = smov 2   ;;  %s9191_s0 = inlined_call_operand.smem [shape: u32[51], index: -1, kind: input, shape index: {}] }
   0x1   :  { %s7860_s5 = sld [smem:[%s9191_s0]]   ;;  %s7775_s14 = smov 3  }
   0x2   :  { %s7865_s9 = sld [smem:[%s9191_s0 + %s7773_s6]]   ;;  %s7776_s18 = smov 4  }
   0x3   :  { %s7870_s13 = sld [smem:[%s9191_s0 + %s7774_s10]]   ;;  %s7777_s22 = smov 5  }
   0x4   :  { %s7875_s17 = sld [smem:[%s9191_s0 + %s7775_s14]]   ;;  %s7778_s26 = smov 6  }
   0x5   :  { %s7880_s21 = sld [smem:[%s9191_s0 + %s7776_s18]]   ;;  %s7779_s30 = smov 7  }
   0x6   :  { %s7885_s25 = sld [smem:[%s9191_s0 + %s7777_s22]]   ;;  %s7780_s4 = smov 8  }
   0x7   :  { %9251 = sst [smem:[#allocation13_spill]] %s7860_s5  ;;  %s7781_s10 = smov 9  }
   0x8   :  { %9252 = sst [smem:[#allocation14_spill]] %s7865_s9  ;;  %s7782_s15 = smov 10  }
   0x9   :  { %9253 = sst [smem:[#allocation15_spill]] %s7870_s13  ;;  %s7783_s20 = smov 11  }
   0xa   :  { %9254 = sst [smem:[#allocation16_spill]] %s7875_s17  ;;  %s7785_s1 = smov 13  }
   0xb   :  { %9255 = sst [smem:[#allocation17_spill]] %s7880_s21  ;;  %s7786_s7 = smov 14  }
   0xc   :  { %9256 = sst [smem:[#allocation18_spill]] %s7885_s25  ;;  %s7788_s22 = smov 16  }
   0xd   :  { %s7890_s29 = sld [smem:[%s9191_s0 + %s7778_s26]]   ;;  %s7784_s26 = smov 12  }
   0xe   :  { %s7895_s3 = sld [smem:[%s9191_s0 + %s7779_s30]]   ;;  %s7789_s28 = smov 17  }
   0xf   :  { %s7900_s8 = sld [smem:[%s9191_s0 + %s7780_s4]]  }
  0x10   :  { %s7905_s14 = sld [smem:[%s9191_s0 + %s7781_s10]]  }
  0x11   :  { %s7910_s19 = sld [smem:[%s9191_s0 + %s7782_s15]]   ;;  %s7787_s15 = smov 15  }
  0x12   :  { %s7915_s24 = sld [smem:[%s9191_s0 + %s7783_s20]]  }
  0x13   :  { %9257 = sst [smem:[#allocation19_spill]] %s7890_s29 }
  0x14   :  { %9258 = sst [smem:[#allocation20_spill]] %s7895_s3 }
  0x15   :  { %9259 = sst [smem:[#allocation21_spill]] %s7900_s8 }
  0x16   :  { %9260 = sst [smem:[#allocation22_spill]] %s7905_s14 }
  0x17   :  { %9261 = sst [smem:[#allocation23_spill]] %s7910_s19 }
  0x18   :  { %9262 = sst [smem:[#allocation24_spill]] %s7915_s24 }
  0x19   :  { %s7920_s30 = sld [smem:[%s9191_s0 + %s7784_s26]]  }
  0x1a   :  { %s7925_s6 = sld [smem:[%s9191_s0 + %s7785_s1]]  }
  0x1b   :  { %s7930_s12 = sld [smem:[%s9191_s0 + %s7786_s7]]   ;;  %s7790_s7 = smov 18  }
  0x1c   :  { %s7935_s20 = sld [smem:[%s9191_s0 + %s7787_s15]]   ;;  %s7791_s15 = smov 19  }
  0x1d   :  { %s7940_s27 = sld [smem:[%s9191_s0 + %s7788_s22]]   ;;  %s7792_s22 = smov 20  }
  0x1e   :  { %s7945_s4 = sld [smem:[%s9191_s0 + %s7789_s28]]   ;;  %s7793_s28 = smov 21  }
  0x1f   :  { %9263 = sst [smem:[#allocation25_spill]] %s7920_s30 }
  0x21   :  { %9264 = sst [smem:[#allocation26_spill]] %s7930_s12 }
  0x22   :  { %9265 = sst [smem:[#allocation27_spill]] %s7935_s20 }
  0x23   :  { %9266 = sst [smem:[#allocation28_spill]] %s7940_s27 }
  0x24   :  { %9267 = sst [smem:[#allocation29_spill]] %s7945_s4 }
  0x25   :  { %s7950_s12 = sld [smem:[%s9191_s0 + %s7790_s7]]   ;;  %s7794_s7 = smov 22  }
  0x26   :  { %s7955_s20 = sld [smem:[%s9191_s0 + %s7791_s15]]   ;;  %s7795_s15 = smov 23  }
  0x27   :  { %s7960_s27 = sld [smem:[%s9191_s0 + %s7792_s22]]   ;;  %s7796_s22 = smov 24  }
  0x28   :  { %s7965_s4 = sld [smem:[%s9191_s0 + %s7793_s28]]   ;;  %s7797_s28 = smov 25  }
  0x2b   :  { %9268 = sst [smem:[#allocation30_spill]] %s7950_s12 }
  0x2c   :  { %9269 = sst [smem:[#allocation31_spill]] %s7955_s20 }
  0x2d   :  { %9270 = sst [smem:[#allocation32_spill]] %s7960_s27 }
  0x2e   :  { %9271 = sst [smem:[#allocation33_spill]] %s7965_s4 }
  0x2f   :  { %s7970_s12 = sld [smem:[%s9191_s0 + %s7794_s7]]   ;;  %s7798_s7 = smov 26  }
  0x30   :  { %s7975_s20 = sld [smem:[%s9191_s0 + %s7795_s15]]   ;;  %s7799_s15 = smov 27  }
  0x31   :  { %s7980_s27 = sld [smem:[%s9191_s0 + %s7796_s22]]   ;;  %s7800_s22 = smov 28  }
  0x32   :  { %s7985_s4 = sld [smem:[%s9191_s0 + %s7797_s28]]   ;;  %s7801_s28 = smov 29  }
  0x35   :  { %9272 = sst [smem:[#allocation34_spill]] %s7970_s12 }
  0x36   :  { %9273 = sst [smem:[#allocation35_spill]] %s7975_s20 }
  0x37   :  { %9274 = sst [smem:[#allocation36_spill]] %s7980_s27 }
  0x38   :  { %9275 = sst [smem:[#allocation37_spill]] %s7985_s4 }
  0x39   :  { %s7990_s12 = sld [smem:[%s9191_s0 + %s7798_s7]]   ;;  %s7802_s7 = smov 30  }
  0x3a   :  { %s7995_s20 = sld [smem:[%s9191_s0 + %s7799_s15]]   ;;  %s7803_s15 = smov 31  }
  0x3b   :  { %s8000_s27 = sld [smem:[%s9191_s0 + %s7800_s22]]   ;;  %s7804_s22 = smov 32  }
  0x3c   :  { %s8005_s4 = sld [smem:[%s9191_s0 + %s7801_s28]]   ;;  %s7805_s28 = smov 33  }
  0x3f   :  { %9276 = sst [smem:[#allocation38_spill]] %s7990_s12 }
  0x40   :  { %9277 = sst [smem:[#allocation39_spill]] %s7995_s20 }
  0x41   :  { %9278 = sst [smem:[#allocation40_spill]] %s8000_s27 }
  0x42   :  { %9279 = sst [smem:[#allocation41_spill]] %s8005_s4 }
  0x43   :  { %s8010_s12 = sld [smem:[%s9191_s0 + %s7802_s7]]   ;;  %s7806_s7 = smov 34  }
  0x44   :  { %s8015_s20 = sld [smem:[%s9191_s0 + %s7803_s15]]   ;;  %s7807_s15 = smov 35  }
  0x45   :  { %s8020_s27 = sld [smem:[%s9191_s0 + %s7804_s22]]   ;;  %s7808_s22 = smov 36  }
  0x46   :  { %s8025_s4 = sld [smem:[%s9191_s0 + %s7805_s28]]   ;;  %s7809_s28 = smov 37  }
  0x49   :  { %9280 = sst [smem:[#allocation42_spill]] %s8010_s12 }
  0x4a   :  { %9281 = sst [smem:[#allocation43_spill]] %s8015_s20 }
  0x4b   :  { %9282 = sst [smem:[#allocation44_spill]] %s8020_s27 }
  0x4c   :  { %9283 = sst [smem:[#allocation45_spill]] %s8025_s4 }
  0x4d   :  { %s8030_s12 = sld [smem:[%s9191_s0 + %s7806_s7]]   ;;  %s7810_s7 = smov 38  }
  0x4e   :  { %s8035_s20 = sld [smem:[%s9191_s0 + %s7807_s15]]   ;;  %s7811_s15 = smov 39  }
  0x4f   :  { %s8040_s27 = sld [smem:[%s9191_s0 + %s7808_s22]]   ;;  %s7812_s22 = smov 40  }
  0x50   :  { %s8045_s4 = sld [smem:[%s9191_s0 + %s7809_s28]]   ;;  %s7813_s28 = smov 41  }
  0x53   :  { %9284 = sst [smem:[#allocation46_spill]] %s8030_s12 }
  0x54   :  { %9285 = sst [smem:[#allocation47_spill]] %s8035_s20 }
  0x55   :  { %9286 = sst [smem:[#allocation48_spill]] %s8040_s27 }
  0x56   :  { %9287 = sst [smem:[#allocation49_spill]] %s8045_s4 }
  0x57   :  { %s8050_s12 = sld [smem:[%s9191_s0 + %s7810_s7]]   ;;  %s7814_s7 = smov 42  }
  0x58   :  { %s8055_s20 = sld [smem:[%s9191_s0 + %s7811_s15]]   ;;  %s7815_s15 = smov 43  }
  0x59   :  { %s8060_s27 = sld [smem:[%s9191_s0 + %s7812_s22]]   ;;  %s7816_s22 = smov 44  }
  0x5a   :  { %s8065_s4 = sld [smem:[%s9191_s0 + %s7813_s28]]   ;;  %s7817_s28 = smov 45  }
  0x5d   :  { %9288 = sst [smem:[#allocation50_spill]] %s8050_s12 }
  0x5e   :  { %9289 = sst [smem:[#allocation51_spill]] %s8055_s20 }
  0x5f   :  { %9290 = sst [smem:[#allocation52_spill]] %s8060_s27 }
  0x60   :  { %9291 = sst [smem:[#allocation53_spill]] %s8065_s4 }
  0x61   :  { %s8070_s12 = sld [smem:[%s9191_s0 + %s7814_s7]]   ;;  %s7818_s7 = smov 46  }
  0x62   :  { %s8075_s20 = sld [smem:[%s9191_s0 + %s7815_s15]]   ;;  %s7819_s15 = smov 47  }
  0x63   :  { %s8080_s27 = sld [smem:[%s9191_s0 + %s7816_s22]]   ;;  %s7820_s22 = smov 48  }
  0x64   :  { %s8085_s4 = sld [smem:[%s9191_s0 + %s7817_s28]]   ;;  %s7821_s28 = smov 49  }
  0x67   :  { %9292 = sst [smem:[#allocation54_spill]] %s8070_s12 }
  0x68   :  { %9293 = sst [smem:[#allocation55_spill]] %s8075_s20 }
  0x69   :  { %9294 = sst [smem:[#allocation56_spill]] %s8080_s27 }
  0x6a   :  { %9295 = sst [smem:[#allocation57_spill]] %s8085_s4 }
  0x6b   :  { %s8090_s12 = sld [smem:[%s9191_s0 + %s7818_s7]]   ;;  %s7822_s7 = smov 50  }
  0x6c   :  { %s8095_s20 = sld [smem:[%s9191_s0 + %s7819_s15]]  }
  0x6d   :  { %s8100_s27 = sld [smem:[%s9191_s0 + %s7820_s22]]  }
  0x6e   :  { %s8105_s4 = sld [smem:[%s9191_s0 + %s7821_s28]]  }
  0x71   :  { %9296 = sst [smem:[#allocation58_spill]] %s8090_s12 }
  0x72   :  { %9297 = sst [smem:[#allocation59_spill]] %s8095_s20 }
  0x73   :  { %9298 = sst [smem:[#allocation60_spill]] %s8100_s27 }
  0x74   :  { %9299 = sst [smem:[#allocation61_spill]] %s8105_s4 }
  0x75   :  { %s8110_s12 = sld [smem:[%s9191_s0 + %s7822_s7]]  }
  0x7b   :  { %9300 = sst [smem:[#allocation62_spill]] %s8110_s12 }
  0x7c   :  { %107 = vsyncpa [#allocation7], 0 }
  0x7d   :  { %108 = vsyncpa [#allocation9], 0  ;;  %s8112_s15 = smov 0  }
  0x7e LB: > { %s9301_s30 = sld [smem:[#allocation25_spill]]  ;;  %s9302_s24 = sld [smem:[#allocation24_spill]]  ;;  %s7771_s15 = sphi %s8112_s15, %s114_s15  }
  0x7f   : > { %s9303_s19 = sld [smem:[#allocation23_spill]]  ;;  %s9304_s14 = sld [smem:[#allocation22_spill]] }
  0x80   : > { %s9305_s29 = sld [smem:[#allocation19_spill]]  ;;  %s9306_s25 = sld [smem:[#allocation18_spill]] }
  0x81   : > { %s9307_s21 = sld [smem:[#allocation17_spill]]  ;;  %s9308_s17 = sld [smem:[#allocation16_spill]] }
  0x82   : > { %s9309_s9 = sld [smem:[#allocation14_spill]]  ;;  %s9310_s8 = sld [smem:[#allocation21_spill]] }
  0x83   : > { %s9311_s3 = sld [smem:[#allocation20_spill]]  ;;  %9312 = sst [smem:[#allocation63_spill]] %s7771_s15 }
  0x84   : > { %s8118_s16 = sadd.s32 4294967295, %s7771_s15   ;;  %p6692_p0 = scmp.ge.s32.totalorder %s7771_s15, 1 }
  0x85   : > { %p1210_p1 = scmp.lt.s32.totalorder %s7771_s15, 3  ;;  %p9216_p2 = scmp.eq.s32.totalorder %s8118_s16, 0 }
  0x86   : > { %s7823_s18 = smov [#allocation8]   ;;  %s7824_s23 = smov [#allocation6]  }
  0x87   : > { %p8123_p3 = pnand %p6692_p0, %p1210_p1  ;;  %s1246_s22 = sshll.u32 %s7823_s18, 4  ;;  %s1247_s22 = int_to_ptr.vmem [resolvable:$true] %s1246_s22 }
  0x88   : > { %s1229_s26 = sshll.u32 %s7824_s23, 4  ;;  %s7825_s28 = smov [#allocation10]   ;;  %s8135_s26 = int_to_ptr.vmem [resolvable:$true] %s1229_s26 }
  0x89   : > { %s9313_s0 = scalar_select %p8123_p3, 1, 0 }
  0x8a   : > { %p7385_p4 = pneg %p8123_p3  ;;  %s1257_s1 = sshll.u32 %s7825_s28, 4  ;;  %s8137_s1 = int_to_ptr.vmem [resolvable:$true] %s1257_s1 }
  0x8b   : > { %s7673_s7 = scalar_lea.hbm %s9305_s29, 16 }
  0x8c   : > { %p8131_p5 = pnand %p9216_p2, %p7385_p4  ;;  %p7674_p6 = scmp.ne.s32.totalorder %s9305_s29, %s7673_s7 }
  0x8d   : > { %p7680_p10 = scmp.lt.u32.totalorder %s7673_s7, %s9305_s29 }
  0x8e   : > { %p8143_p7 = pneg %p8131_p5 }
  0x90   : > { %p7676_p8 = pnand %p8143_p7, %p7674_p6 }
  0x92   : > { %p7677_p9 = pneg %p7676_p8 }
  0x94   : > { %p7682_p11 = pnand %p7680_p10, %p7677_p9 }
  0x96   : > { %7685 = shalt.err (!%p7682_p11)
}
  0x97   : > { %s7686_s11 = scalar_lea.vmem %s1247_s22, 16  ;;  %s7693_s18 = scalar_lea.vmem %s1247_s22, 32 }
  0x98   : > { %p7687_p12 = scmp.ne.s32.totalorder %s1247_s22, %s7686_s11  ;;  %p7694_p1 = scmp.lt.s32.totalorder %s1247_s22, %s1247_s22 }
  0x99   : > { %p7695_p4 = scmp.lt.s32.totalorder %s7693_s18, %s7686_s11 }
  0x9a   : > { %p7689_p13 = pnand %p7687_p12, %p8143_p7 }
  0x9b   : > { %p7696_p2 = por %p7695_p4, %p7694_p1 }
  0x9c   : > { %p7690_p0 = pneg %p7689_p13 }
  0x9e   : > { %p7697_p3 = pnand %p7696_p2, %p7690_p0 }
  0xa0   : > { %7700 = shalt.err (!%p7697_p3)
}
  0xa1   : > { %7391 = dma.hbm_to_vmem [thread:$0]  (!%p8131_p5), %s9305_s29, 16, %s1247_s22, [#allocation9]  }
  0xa2   : > { %s7701_s23 = scalar_lea.hbm %s9308_s17, 16 }
  0xa3   : > { %p7702_p6 = scmp.ne.s32.totalorder %s9308_s17, %s7701_s23  ;;  %p7708_p10 = scmp.lt.u32.totalorder %s7701_s23, %s9308_s17 }
  0xa5   : > { %p7704_p8 = pnand %p7702_p6, %p8143_p7 }
  0xa7   : > { %p7705_p9 = pneg %p7704_p8 }
  0xa9   : > { %p7710_p11 = pnand %p7708_p10, %p7705_p9 }
  0xab   : > { %7713 = shalt.err (!%p7710_p11)
}
  0xac   : > { %s7714_s28 = scalar_lea.vmem %s8135_s26, 16  ;;  %s7721_s7 = scalar_lea.vmem %s8135_s26, 32 }
  0xad   : > { %p7715_p2 = scmp.ne.s32.totalorder %s8135_s26, %s7714_s28  ;;  %p7722_p13 = scmp.lt.s32.totalorder %s8135_s26, %s8135_s26 }
  0xae   : > { %p7723_p0 = scmp.lt.s32.totalorder %s7721_s7, %s7714_s28 }
  0xaf   : > { %p7717_p3 = pnand %p7715_p2, %p8143_p7 }
  0xb0   : > { %p7724_p1 = por %p7723_p0, %p7722_p13 }
  0xb1   : > { %p7718_p12 = pneg %p7717_p3 }
  0xb3   : > { %p7725_p4 = pnand %p7724_p1, %p7718_p12 }
  0xb5   : > { %7728 = shalt.err (!%p7725_p4)
}
  0xb6   : > { %7388 = dma.hbm_to_vmem [thread:$0]  (!%p8131_p5), %s9308_s17, 16, %s8135_s26, [#allocation7]  }
  0xb7   : > { %s7729_s22 = scalar_lea.hbm %s9311_s3, 16 }
  0xb8   : > { %p7730_p6 = scmp.ne.s32.totalorder %s9311_s3, %s7729_s22  ;;  %p7736_p10 = scmp.lt.u32.totalorder %s7729_s22, %s9311_s3 }
  0xba   : > { %p7732_p8 = pnand %p7730_p6, %p8143_p7 }
  0xbc   : > { %p7733_p9 = pneg %p7732_p8 }
  0xbe   : > { %p7738_p11 = pnand %p7736_p10, %p7733_p9 }
  0xc0   : > { %7741 = shalt.err (!%p7738_p11)
}
  0xc1   : > { %s7742_s11 = scalar_lea.vmem %s8137_s1, 16  ;;  %s7749_s18 = scalar_lea.vmem %s8137_s1, 32 }
  0xc2   : > { %p7743_p2 = scmp.ne.s32.totalorder %s8137_s1, %s7742_s11  ;;  %p7750_p13 = scmp.lt.s32.totalorder %s8137_s1, %s8137_s1 }
  0xc3   : > { %p7751_p0 = scmp.lt.s32.totalorder %s7749_s18, %s7742_s11 }
  0xc4   : > { %p7745_p3 = pnand %p7743_p2, %p8143_p7 }
  0xc5   : > { %p7752_p1 = por %p7751_p0, %p7750_p13 }
  0xc6   : > { %p7746_p12 = pneg %p7745_p3 }
  0xc8   : > { %p7753_p4 = pnand %p7752_p1, %p7746_p12 }
  0xca   : > { %7756 = shalt.err (!%p7753_p4)
}
  0xcb   : > { %7394 = dma.hbm_to_vmem [thread:$0]  (!%p8131_p5), %s9311_s3, 16, %s8137_s1, [#allocation9]  }
  0xcc   : > { %p9316_p6 = scmp.ne.s32.totalorder %s9313_s0, 0 }
  0xce   : > { %1398 = sbr.rel (%p9316_p6) target bundleno = 9890 (0x26a2), region = 212 }
  0xd5   : > { %p9317_p8 = scmp.eq.s32.totalorder %s8118_s16, 0 }
  0xd7   : > { %7762 = dma.done.wait (%p9317_p8), [#allocation7], 16   ;;  %p9318_p7 = pmov %p9317_p8 }
  0xd9   : > { %7764 = vsyncadd (%p9318_p7), [#allocation7], 4294967280  ;;  %p9319_p9 = pmov %p9318_p7 }
  0xda   : > { %p9320_p10 = pmov %p9318_p7 }
  0xdb   : > { %7766 = dma.done.wait (%p9319_p9), [#allocation9], 32  }
  0xdc   : > { %7768 = vsyncadd (%p9320_p10), [#allocation9], 4294967264  ;;  %v7826_v0 = vmov 0   ;;  %p1530_p5 = scmp.lt.s32.totalorder %s8118_s16, 1  ;;  %s9321_s5 = sld [smem:[#allocation13_spill]]  ;;  %v1548_v1 = vld [vmem:[%s9309_s9] sm:$0xff] }
  0xdd   : > { %1600 = vmatprep.subr.bf16.mxu0 %v7826_v0  ;;  %1683 = vmatprep.subr.bf16.mxu1 %v7826_v0  ;;  %v1549_v2 = vld [vmem:[%s9309_s9 + $0x8] sm:$0xff]  ;;  %v1550_v3 = vld [vmem:[%s9309_s9 + $0x10] sm:$0xff]  ;;  %v1551_v5 = vld [vmem:[%s9309_s9 + $0x18] sm:$0xff]  ;;  %vm1596_vm0 = vcmask 523264   ;;  %s9324_s13 = sld [smem:[#allocation15_spill]]  ;;  %vm1726_vm1 = vcmask 253952  }
  0xde   : > { %7489 = vset.pattern.permute.xlu1 %v7826_v0  ;;  %7488 = vset.pattern.permute.xlu0 %v7826_v0  ;;  %s9386_s16 = smov (!%p1530_p5, %s8118_s16), 1  ;;  %v1577_v4 = vpack.c.bf16 %v1549_v2, %v1548_v1  ;;  %v1578_v6 = vpack.c.bf16 %v1551_v5, %v1550_v3  ;;  %v1552_v7 = vld [vmem:[%s9309_s9 + $0x20] sm:$0xff]  ;;  %v1553_v8 = vld [vmem:[%s9309_s9 + $0x28] sm:$0xff]  ;;  %v1554_v10 = vld [vmem:[%s9309_s9 + $0x30] sm:$0xff]  ;;  %vm1730_vm2 = vcmask 257024   ;;  %vm1745_vm3 = vcmask 258048  }
  0xdf   : > { %9322 = sst [smem:[#allocation64_spill]] %s9386_s16  ;;  %s8210_s0 = sshll.u32 %s9386_s16, 3  ;;  %v1579_v9 = vpack.c.bf16 %v1553_v8, %v1552_v7  ;;  %v1555_v11 = vld [vmem:[%s9309_s9 + $0x38] sm:$0xff]  ;;  %v1556_v16 = vld [vmem:[%s9309_s9 + $0x40] sm:$0xff]  ;;  %v1557_v17 = vld [vmem:[%s9309_s9 + $0x48] sm:$0xff]  ;;  %v7827_v62 = vmov 0.0  }
  0xe0   : > { %9323 = sst [smem:[#allocation65_spill]] %s8210_s0  ;;  %1601 = vmatpush1.bf16.msra.mxu0 %v1577_v4  ;;  %v1580_v14 = vpack.c.bf16 %v1555_v11, %v1554_v10  ;;  %v1581_v18 = vpack.c.bf16 %v1557_v17, %v1556_v16  ;;  %v1558_v19 = vld [vmem:[%s9309_s9 + $0x50] sm:$0xff]  ;;  %v1559_v20 = vld [vmem:[%s9309_s9 + $0x58] sm:$0xff]  ;;  %v1560_v22 = vld [vmem:[%s9309_s9 + $0x60] sm:$0xff]  ;;  %vm7828_vm4 = vmmov 0   ;;  %vm1788_vm5 = vcmask 261120  }
  0xe1   : > { %1602 = vmatprep.subr.bf16.mxu0 %v7826_v0  ;;  %v1582_v21 = vpack.c.bf16 %v1559_v20, %v1558_v19  ;;  %v1561_v23 = vld [vmem:[%s9309_s9 + $0x68] sm:$0xff]  ;;  %v1562_v25 = vld [vmem:[%s9309_s9 + $0x70] sm:$0xff]  ;;  %v1563_v26 = vld [vmem:[%s9309_s9 + $0x78] sm:$0xff]  ;;  %s9218_s1 = smov 64   ;;  %s9231_s2 = smov 96   ;;  %vm1835_vm6 = vcmask 64512  }
  0xe2   : > { %s1534_s26 = scalar_lea.vmem %s9321_s5, %s8210_s0  ;;  %v1583_v24 = vpack.c.bf16 %v1561_v23, %v1560_v22  ;;  %v1584_v27 = vpack.c.bf16 %v1563_v26, %v1562_v25  ;;  %v1564_v28 = vld [vmem:[%s9309_s9 + $0x80] sm:$0xff]  ;;  %v1565_v29 = vld [vmem:[%s9309_s9 + $0x88] sm:$0xff]  ;;  %v1566_v31 = vld [vmem:[%s9309_s9 + $0x90] sm:$0xff]  ;;  %s9230_s10 = smov 88   ;;  %vm1929_vm7 = vcmask 1044480   ;;  %vm1739_vm8 = vcmask 125952  }
  0xe3   : > { %v1547_v12 = vld [vmem:[%s1534_s26] sm:$0xff]  ;;  %v1585_v30 = vpack.c.bf16 %v1565_v29, %v1564_v28  ;;  %v1567_v32 = vld [vmem:[%s9309_s9 + $0x98] sm:$0xff]  ;;  %v1569_v35 = vld [vmem:[%s9309_s9 + $0xa8] sm:$0xff]  ;;  %s9229_s23 = smov 120   ;;  %vm1735_vm9 = vcmask 122880   ;;  %vm1911_vm10 = vcmask 36864  }
  0xe4   : > { %1603 = vmatpush1.bf16.msra.mxu0 %v1578_v6  ;;  %v1573_v13 = vcombine.high %v1547_v12, %v1547_v12  ;;  %v1586_v33 = vpack.c.bf16 %v1567_v32, %v1566_v31  ;;  %v1568_v34 = vld [vmem:[%s9309_s9 + $0xa0] sm:$0xff]  ;;  %v1570_v37 = vld [vmem:[%s9309_s9 + $0xb0] sm:$0xff]  ;;  %v1571_v38 = vld [vmem:[%s9309_s9 + $0xb8] sm:$0xff]  ;;  %v8245_v40 = vpack.c.bf16 %v1547_v12, %v1547_v12  ;;  %s9228_s28 = smov 80   ;;  %s9227_s7 = smov 112   ;;  %vm1925_vm11 = vcmask 39936  }
  0xe5   : > { %1604 = vmatprep.subr.bf16.mxu0 %v7826_v0  ;;  %v1587_v36 = vpack.c.bf16 %v1569_v35, %v1568_v34  ;;  %v1588_v39 = vpack.c.bf16 %v1571_v38, %v1570_v37  ;;  %v1723_v41 = vld [vmem:[#allocation6] sm:$0x1]  ;;  %v1728_v46 = vld [vmem:[%s9307_s21 + $0x1] sm:$0xf]  ;;  %v1775_v60 = vld [vmem:[%s9302_s24 + $0x8] sm:$0xff]  ;;  %s9226_s22 = smov 72  }
  0xe6   : > { %v1576_v15 = vpack.c.bf16 %v1573_v13, %v1573_v13  ;;  %v1724_v42 = vld [vmem:[%s9307_s21] sm:$0x1]  ;;  %v1776_v63 = vld [vmem:[%s9302_s24 + $0x10] sm:$0xff]  ;;  %v1777_v1 = vld [vmem:[%s9302_s24 + $0x18] sm:$0xff]  ;;  %s9225_s11 = smov 104   ;;  %vm2002_vm12 = vcmask 61440  }
  0xe7   : > { %v1725_v43 = vadd.f32 %v1724_v42, %v1723_v41  ;;  %v6705_v44 = vld [vmem:[%s9324_s13] ss:$0 sm:$0xff]  ;;  %v1780_v2 = vpack.c.bf16 %v1777_v1, %v1776_v63  ;;  %v1643_v17 = vld [vmem:[%s9306_s25 + $0x18] sm:$0xff]  ;;  %v1645_v20 = vld [vmem:[%s9306_s25 + $0x28] sm:$0xff]  ;;  %s9220_s18 = smov 48   ;;  %s9221_s26 = smov 56  }
  0xe8   : > { %1605 = vmatpush1.bf16.msra.mxu0 %v1579_v9  ;;  %6706 = vmatprep.mubr.msk.bf16.mxu0 %vm1596_vm0, %v1576_v15  ;;  %v1774_v59 = vld [vmem:[%s9302_s24] sm:$0xff]  ;;  %v1646_v22 = vld [vmem:[%s9306_s25 + $0x30] sm:$0xff]  ;;  %v1647_v23 = vld [vmem:[%s9306_s25 + $0x38] sm:$0xff]  ;;  %vm2755_vm13 = vcmask 126976   ;;  %vm2175_vm14 = vcmask 127040   ;;  %vm2348_vm15 = vcmask 192640  }
  0xe9   : > { %1606 = vmatprep.subr.bf16.mxu0 %v7826_v0  ;;  %6708 = vmatprep.mubr.msk.bf16.mxu1 %vm1596_vm0, %v1576_v15  ;;  %1727 = vst.msk [vmem:[#allocation2] sm:$0x1] %vm1726_vm1, %v1725_v43  ;;  %v1779_v61 = vpack.c.bf16 %v1775_v60, %v1774_v59  ;;  %v6709_v7 = vld [vmem:[%s9304_s14] ss:$0 sm:$0xff]  ;;  %v1642_v15 = vld [vmem:[%s9306_s25 + $0x10] sm:$0xff]  ;;  %v1649_v26 = vld [vmem:[%s9306_s25 + $0x48] sm:$0xff] }
  0xea   : > { %v6710_v9 = vld [vmem:[%s9303_s19] ss:$0 sm:$0xff]  ;;  %v1650_v28 = vld [vmem:[%s9306_s25 + $0x50] sm:$0xff]  ;;  %v1651_v29 = vld [vmem:[%s9306_s25 + $0x58] sm:$0xff]  ;;  %vm2521_vm0 = vcmask 258240   ;;  %s9335_s3 = sld [smem:[#allocation36_spill]] }
  0xeb   : > { %v1640_v13 = vld [vmem:[%s9306_s25] sm:$0xff]  ;;  %v1653_v32 = vld [vmem:[%s9306_s25 + $0x68] sm:$0xff]  ;;  %v1654_v34 = vld [vmem:[%s9306_s25 + $0x70] sm:$0xff]  ;;  %s9336_s5 = sld [smem:[#allocation37_spill]]  ;;  %s9338_s9 = sld [smem:[#allocation41_spill]] }
  0xec   : > { %1607 = vmatpush1.bf16.msra.mxu0 %v1580_v14  ;;  %v1641_v14 = vld [vmem:[%s9306_s25 + $0x8] sm:$0xff]  ;;  %v1644_v19 = vld [vmem:[%s9306_s25 + $0x20] sm:$0xff]  ;;  %v1655_v35 = vld [vmem:[%s9306_s25 + $0x78] sm:$0xff]  ;;  %s9339_s13 = sld [smem:[#allocation40_spill]]  ;;  %s9340_s17 = sld [smem:[#allocation44_spill]] }
  0xed   : > { %1608 = vmatprep.subr.bf16.mxu0 %v7826_v0  ;;  %v1664_v16 = vpack.c.bf16 %v1641_v14, %v1640_v13  ;;  %v1648_v25 = vld [vmem:[%s9306_s25 + $0x40] sm:$0xff]  ;;  %v1657_v38 = vld [vmem:[%s9306_s25 + $0x88] sm:$0xff]  ;;  %v1658_v41 = vld [vmem:[%s9306_s25 + $0x90] sm:$0xff]  ;;  %s9341_s21 = smov 96   ;;  %s9343_s29 = sld [smem:[#allocation43_spill]] }
  0xee   : > { %v1652_v31 = vld [vmem:[%s9306_s25 + $0x60] sm:$0xff]  ;;  %v1659_v42 = vld [vmem:[%s9306_s25 + $0x98] sm:$0xff]  ;;  %s9344_s15 = sld [smem:[#allocation45_spill]]  ;;  %s9350_s20 = sld [smem:[#allocation48_spill]] }
  0xef   : > { %1684 = vmatpush1.bf16.msra.mxu1 %v1664_v16  ;;  %v1656_v37 = vld [vmem:[%s9306_s25 + $0x80] sm:$0xff]  ;;  %v1673_v43 = vpack.c.bf16 %v1659_v42, %v1658_v41  ;;  %s9358_s16 = smov 104  }
  0xf0   : > { %1609 = vmatpush1.bf16.msra.mxu0 %v1581_v18  ;;  %v1665_v18 = vpack.c.bf16 %v1643_v17, %v1642_v15  ;;  %1685 = vmatprep.subr.bf16.mxu1 %v7826_v0  ;;  %v1737_v60 = vld [vmem:[%s9310_s8 + $0x1] sm:$0xf] }
  0xf1   : > { %1610 = vmatprep.subr.bf16.mxu0 %v7826_v0 }
  0xf3   : > { %1686 = vmatpush1.bf16.msra.mxu1 %v1665_v18 }
  0xf4   : > { %1611 = vmatpush1.bf16.msra.mxu0 %v1582_v21  ;;  %v1666_v21 = vpack.c.bf16 %v1645_v20, %v1644_v19  ;;  %1687 = vmatprep.subr.bf16.mxu1 %v7826_v0  ;;  %s9345_s4 = smov %s9344_s15 }
  0xf5   : > { %1612 = vmatprep.subr.bf16.mxu0 %v7826_v0 }
  0xf7   : > { %1688 = vmatpush1.bf16.msra.mxu1 %v1666_v21 }
  0xf8   : > { %1613 = vmatpush1.bf16.msra.mxu0 %v1583_v24  ;;  %v1667_v24 = vpack.c.bf16 %v1647_v23, %v1646_v22  ;;  %1689 = vmatprep.subr.bf16.mxu1 %v7826_v0 }
  0xf9   : > { %1614 = vmatprep.subr.bf16.mxu0 %v7826_v0 }
  0xfb   : > { %1690 = vmatpush1.bf16.msra.mxu1 %v1667_v24 }
  0xfc   : > { %1615 = vmatpush1.bf16.msra.mxu0 %v1584_v27  ;;  %v1668_v27 = vpack.c.bf16 %v1649_v26, %v1648_v25  ;;  %1691 = vmatprep.subr.bf16.mxu1 %v7826_v0 }
  0xfd   : > { %1616 = vmatprep.subr.bf16.mxu0 %v7826_v0 }
  0xff   : > { %1692 = vmatpush1.bf16.msra.mxu1 %v1668_v27 }
 0x100   : > { %1617 = vmatpush1.bf16.msra.mxu0 %v1585_v30  ;;  %v1669_v30 = vpack.c.bf16 %v1651_v29, %v1650_v28  ;;  %1693 = vmatprep.subr.bf16.mxu1 %v7826_v0 }
 0x101   : > { %1618 = vmatprep.subr.bf16.mxu0 %v7826_v0 }
 0x103   : > { %1694 = vmatpush1.bf16.msra.mxu1 %v1669_v30 }
 0x104   : > { %1619 = vmatpush1.bf16.msra.mxu0 %v1586_v33  ;;  %v1670_v33 = vpack.c.bf16 %v1653_v32, %v1652_v31  ;;  %1695 = vmatprep.subr.bf16.mxu1 %v7826_v0 }
 0x105   : > { %1620 = vmatprep.subr.bf16.mxu0 %v7826_v0 }
 0x107   : > { %1696 = vmatpush1.bf16.msra.mxu1 %v1670_v33 }
 0x108   : > { %1621 = vmatpush1.bf16.msra.mxu0 %v1587_v36  ;;  %v1671_v36 = vpack.c.bf16 %v1655_v35, %v1654_v34  ;;  %1697 = vmatprep.subr.bf16.mxu1 %v7826_v0 }
 0x109   : > { %1622 = vmatprep.subr.bf16.mxu0 %v7826_v0 }
 0x10b   : > { %1698 = vmatpush1.bf16.msra.mxu1 %v1671_v36 }
 0x10c   : > { %1623 = vmatpush1.bf16.msra.mxu0 %v1588_v39  ;;  %v1672_v39 = vpack.c.bf16 %v1657_v38, %v1656_v37  ;;  %1699 = vmatprep.subr.bf16.mxu1 %v7826_v0 }
 0x10d   : > { %7057 = vmatprep.subr.bf16.mxu0 %v7827_v62 }
 0x10f   : > { %1633 = vmatmul.mubr.bf16.vlgmr.msra.gmra.mrb[0].mxu0 %v8245_v40  ;;  %1700 = vmatpush1.bf16.msra.mxu1 %v1672_v39 }
 0x110   : > { %7058 = vmatpush3.bf16.msra.mxu0 %v1779_v61  ;;  %7061 = vmatprep.mubr.msk.bf16.mxu0 %vm7828_vm4, %v7827_v62 }
 0x111   : > { %7059 = vmatprep.subr.bf16.mxu0 %v7827_v62  ;;  %1701 = vmatprep.subr.bf16.mxu1 %v7826_v0 }
 0x113   : > { %1702 = vmatpush1.bf16.msra.mxu1 %v1673_v43 }
 0x114   : > { %7060 = vmatpush3.bf16.msra.mxu0 %v1780_v2  ;;  %1703 = vmatprep.subr.bf16.mxu1 %v7826_v0 }
 0x115   : > { %7085 = vmatprep.subr.mxu0 %v7827_v62 }
 0x1e2   : > { %v1634_v45 = vpop.f32.mrb[0].mxu0 }
 0x1e3   : > { %v1635_v47 = vadd.f32 %v6705_v44, %v1634_v45  ;;  %v1636_v48 = vpop.f32.mrb[1].mxu0  ;;  %v1660_v44 = vld [vmem:[%s9306_s25 + $0xa0] sm:$0xff]  ;;  %v1661_v45 = vld [vmem:[%s9306_s25 + $0xa8] sm:$0xff] }
 0x1e4   : > { %v1637_v49 = vpop.f32.mrb[2].mxu0  ;;  %v1663_v48 = vld [vmem:[%s9306_s25 + $0xb8] sm:$0xff] }
 0x1e5   : > { %v1729_v50 = vadd.f32 %v1728_v46, %v1635_v47  ;;  %v1638_v51 = vpop.f32.mrb[3].mxu0  ;;  %v1674_v46 = vpack.c.bf16 %v1661_v45, %v1660_v44  ;;  %v1662_v47 = vld [vmem:[%s9306_s25 + $0xb0] sm:$0xff]  ;;  %s9342_s25 = sld [smem:[#allocation42_spill]] }
 0x1e6   : > { %v1675_v49 = vpack.c.bf16 %v1663_v48, %v1662_v47 }
 0x1e7   : > { %1731 = vst.msk [vmem:[#allocation2 + $0x1] sm:$0xf] %vm1730_vm2, %v1729_v50  ;;  %1704 = vmatpush1.bf16.msra.mxu1 %v1674_v46  ;;  %v6711_v50 = vld [vmem:[%s9301_s30] ss:$0 sm:$0xff]  ;;  %vm2795_vm2 = vcmask 130048  }
 0x1e8   : > { %1705 = vmatprep.subr.bf16.mxu1 %v7826_v0 }
 0x1eb   : > { %1706 = vmatpush1.bf16.msra.mxu1 %v1675_v49 }
 0x1ec   : > { %7065 = vmatprep.subr.mxu1 %v7827_v62 }
 0x1ee   : > { %v8252_v52 = vld [vmem:[#allocation2] sm:$0x1f]  ;;  %1716 = vmatmul.mubr.bf16.vlgmr.msra.gmra.mrb[0].mxu1 %v8245_v40 }
 0x1ef   : > { %v1746_v53 = vsel %vm1745_vm3, %v8252_v52, 0.0  ;;  %7067 = vmatprep.mubr.msk.f32.mxu1 %vm7828_vm4, %v7827_v62 }
 0x1f0   : > { %1747 = vadd.xlane.f32.xlu0 %v1746_v53 }
 0x27d   : > { %v1748_v54 = vpop.xlane.xlu0 %1747 }
 0x27e   : > { %v1750_v55 = vmul.f32 0.03125, %v1748_v54 }
 0x280   : > { %v1751_v56 = vsub.f32 %v8252_v52, %v1750_v55 }
 0x282   : > { %v1752_v57 = vmul.f32 %v1751_v56, %v1751_v56 }
 0x284   : > { %v1753_v58 = vsel %vm1745_vm3, %v1752_v57, 0.0 }
 0x285   : > { %1754 = vadd.xlane.f32.xlu0 %v1753_v58  ;;  %v6707_v58 = vld [vmem:[#allocation8] ss:$0 sm:$0xff] }
 0x2c1   : > { %v1717_v59 = vpop.f32.mrb[0].mxu1 }
 0x2c2   : > { %v1718_v61 = vadd.f32 %v6707_v58, %v1717_v59  ;;  %v1719_v63 = vpop.f32.mrb[1].mxu1 }
 0x2c3   : > { %v1720_v1 = vpop.f32.mrb[2].mxu1 }
 0x2c4   : > { %v1738_v2 = vadd.f32 %v1737_v60, %v1718_v61 }
 0x2c6   : > { %1740 = vst.msk [vmem:[#allocation3 + $0x1] sm:$0xf] %vm1739_vm8, %v1738_v2  ;;  %vm2839_vm8 = vcmask 256000  }
 0x2c7   : > { %2840 = vst.msk [vmem:[#allocation4] sm:$0x7] %vm2839_vm8, %v7827_v62 }
 0x312   : > { %v1755_v3 = vpop.xlane.xlu0 %1754 }
 0x313   : > { %v1756_v4 = vmul.f32 0.03125, %v1755_v3  ;;  %v1721_v3 = vpop.f32.mrb[3].mxu1 }
 0x315   : > { %v1757_v5 = vadd.f32 1e-05, %v1756_v4  ;;  %v1732_v4 = vld [vmem:[#allocation10] sm:$0x1] }
 0x317   : > { %7529 = vrsqrt.f32 %v1757_v5  ;;  %v1733_v5 = vld [vmem:[%s9310_s8] sm:$0x1]  ;;  %s9337_s8 = sld [smem:[#allocation38_spill]] }
 0x321   : > { %v7530_v6 = vpop.eup %7529 }
 0x322   : > { %v1759_v8 = vmul.f32 %v7530_v6, %v1751_v56  ;;  %v1734_v6 = vadd.f32 %v1733_v5, %v1732_v4  ;;  %v2524_v5 = vld [vmem:[%s7925_s6] sm:$0xff] }
 0x324   : > { %v1766_v10 = vmul.f32 %v6709_v7, %v1759_v8  ;;  %1736 = vst.msk [vmem:[#allocation3] sm:$0x1] %vm1735_vm9, %v1734_v6  ;;  %v2525_v6 = vld [vmem:[%s7925_s6 + $0x8] sm:$0xff]  ;;  %vm6453_vm9 = vcmask 128000  }
 0x326   : > { %v1773_v11 = vadd.f32 %v6710_v9, %v1766_v10 }
 0x328   : > { %v1778_v12 = vpack.c.bf16 %v1773_v11, %v1773_v11 }
 0x32a   : > { %7062 = vmatmul.mubr.msk.bf16.vlgmr.msra.gmra.mrb[4].mxu0 %vm1788_vm5, %v1778_v12 }
 0x32b   : > { %7087 = vmatprep.mubr.msk.f32.mxu0 %vm7828_vm4, %v7827_v62 }
 0x3fd   : > { %v1826_v51 = vpop.f32.mrb[4].mxu0 }
 0x3fe   : > { %v8312_v53 = vadd.f32 %v6711_v50, %v1826_v51  ;;  %v7063_v54 = vpop.f32.mrb[5].mxu0 }
 0x3ff   : > { %v1829_v55 = vpop.f32.mrb[6].mxu0 }
 0x400   : > { %1923 = vrot.lane.b32.xlu0 %v8312_v53, %s9218_s1  ;;  %1833 = vrot.lane.b32.xlu1 %v8312_v53, %s9231_s2  ;;  %v7064_v56 = vpop.f32.mrb[7].mxu0  ;;  %s9219_s1 = smov 40   ;;  %s9334_s2 = sld [smem:[#allocation30_spill]] }
 0x404   : > { %2006 = vrot.lane.b32.xlu0 %v8312_v53, %s9230_s10  ;;  %s9333_s10 = sld [smem:[#allocation39_spill]] }
 0x408   : > { %2004 = vrot.lane.b32.xlu0 %v8312_v53, %s9229_s23  ;;  %s9332_s23 = sld [smem:[#allocation31_spill]] }
 0x472   : > { %v1834_v40 = vpop.permute.xlu1 %1833  ;;  %v1924_v57 = vpop.permute.xlu0 %1923 }
 0x473   : > { %7066 = vmatpush3.xpose.msk.msra.mxu1 %vm1835_vm6, %v1834_v40 }
 0x474   : > { %7070 = vmatprep.subr.mxu1 %v7827_v62 }
 0x476   : > { %7068 = vmatmul.mubr.msk.f32.vlgmr.msra.gmra.mrb[4].mxu1 %vm1835_vm6, %v8312_v53  ;;  %v2007_v17 = vpop.permute.xlu0 %2006 }
 0x477   : > { %7071 = vmatpush3.msk.msra.mxu1 %vm1929_vm7, %v1924_v57  ;;  %7072 = vmatprep.mubr.msk.f32.mxu1 %vm7828_vm4, %v7827_v62 }
 0x478   : > { %7075 = vmatprep.subr.mxu1 %v7827_v62 }
 0x47a   : > { %v2005_v18 = vpop.permute.xlu0 %2004 }
 0x549   : > { %v1906_v7 = vpop.f32.mrb[4].mxu1 }
 0x54a   : > { %v1910_v8 = vmul.f32 0.35355338, %v1906_v7  ;;  %v7069_v9 = vpop.f32.mrb[5].mxu1  ;;  %v2526_v7 = vld [vmem:[%s7925_s6 + $0x10] sm:$0xff] }
 0x54b   : > { %v2527_v9 = vld [vmem:[%s7925_s6 + $0x18] sm:$0xff] }
 0x54c   : > { %v1912_v10 = vsel %vm1911_vm10, %v1910_v8, -inf }
 0x54d   : > { %1913 = vmax.xlane.f32.xlu1 %v1912_v10  ;;  %v2530_v10 = vpack.c.bf16 %v2527_v9, %v2526_v7  ;;  %v2678_v9 = vld [vmem:[%s9332_s23] sm:$0xff] }
 0x55e   : > { %2179 = vrot.lane.b32.xlu1 %v8312_v53, %s9228_s28  ;;  %s9331_s28 = sld [smem:[#allocation34_spill]] }
 0x5da   : > { %v1914_v11 = vpop.xlane.xlu1 %1913 }
 0x5db   : > { %v1915_v12 = vsub.f32 %v1910_v8, %v1914_v11  ;;  %v2529_v8 = vpack.c.bf16 %v2525_v6, %v2524_v5  ;;  %v6737_v6 = vld [vmem:[%s9331_s28] ss:$0 sm:$0xff] }
 0x5dd   : > { %v1916_v13 = vmul.f32 1.442695, %v1915_v12 }
 0x5de   : > { %v2180_v14 = vpop.permute.xlu1 %2179 }
 0x5df   : > { %7531 = vpow2.f32 %v1916_v13  ;;  %7086 = vmatpush3.xpose.msk.msra.mxu0 %vm1835_vm6, %v2180_v14 }
 0x5e0   : > { %7095 = vmatprep.subr.mxu0 %v7827_v62 }
 0x5e9   : > { %v7532_v15 = vpop.eup %7531 }
 0x5ea   : > { %v1918_v16 = vsel %vm1911_vm10, %v7532_v15, 0.0 }
 0x5eb   : > { %1919 = vadd.xlane.f32.xlu0 %v1918_v16 }
 0x601   : > { %2177 = vrot.lane.b32.xlu0 %v8312_v53, %s9227_s7  ;;  %s9330_s7 = sld [smem:[#allocation33_spill]] }
 0x605   : > { %2352 = vrot.lane.b32.xlu0 %v8312_v53, %s9226_s22  ;;  %s9329_s22 = sld [smem:[#allocation35_spill]] }
 0x609   : > { %2350 = vrot.lane.b32.xlu0 %v8312_v53, %s9225_s11  ;;  %s9328_s11 = sld [smem:[#allocation28_spill]] }
 0x678   : > { %v1920_v19 = vpop.xlane.xlu0 %1919 }
 0x679   : > { %7533 = vrcp.f32 %v1920_v19 }
 0x67c   : > { %v2178_v20 = vpop.permute.xlu0 %2177 }
 0x67d   : > { %7088 = vmatmul.mubr.msk.f32.vlgmr.msra.gmra.mrb[8].mxu0 %vm1835_vm6, %v2178_v20 }
 0x67e   : > { %7097 = vmatprep.mubr.msk.f32.mxu0 %vm7828_vm4, %v7827_v62 }
 0x680   : > { %v2353_v21 = vpop.permute.xlu0 %2352 }
 0x681   : > { %7096 = vmatpush3.xpose.msk.msra.mxu0 %vm1835_vm6, %v2353_v21 }
 0x682   : > { %7105 = vmatprep.subr.bf16.mxu0 %v7827_v62 }
 0x683   : > { %v7534_v22 = vpop.eup %7533 }
 0x684   : > { %v1922_v23 = vmul.f32 %v7534_v22, %v7532_v15  ;;  %v2351_v24 = vpop.permute.xlu0 %2350 }
 0x685   : > { %7098 = vmatmul.mubr.msk.f32.vlgmr.msra.gmra.mrb[10].mxu0 %vm1835_vm6, %v2351_v24 }
 0x686   : > { %7073 = vmatmul.mubr.msk.f32.vlgmr.msra.gmra.mrb[6].mxu1 %vm1925_vm11, %v1922_v23  ;;  %7109 = vmatprep.mubr.msk.bf16.mxu0 %vm7828_vm4, %v7827_v62 }
 0x687   : > { %7076 = vmatpush3.xpose.msk.msra.mxu1 %vm1835_vm6, %v2007_v17  ;;  %7077 = vmatprep.mubr.msk.f32.mxu1 %vm7828_vm4, %v7827_v62  ;;  %v8397_v17 = vld [vmem:[#allocation3] sm:$0x1f] }
 0x688   : > { %7080 = vmatprep.subr.mxu1 %v7827_v62  ;;  %7106 = vmatpush3.bf16.msra.mxu0 %v2529_v8 }
 0x689   : > { %7107 = vmatprep.subr.bf16.mxu0 %v7827_v62 }
 0x68a   : > { %7078 = vmatmul.mubr.msk.f32.vlgmr.msra.gmra.mrb[8].mxu1 %vm1835_vm6, %v2005_v18  ;;  %v2756_v18 = vsel %vm2755_vm13, %v8397_v17, 0.0 }
 0x68b   : > { %7082 = vmatprep.mubr.msk.f32.mxu1 %vm7828_vm4, %v7827_v62 }
 0x68c   : > { %7108 = vmatpush3.bf16.msra.mxu0 %v2530_v10  ;;  %v2679_v10 = vld [vmem:[%s9332_s23 + $0x8] sm:$0xff] }
 0x68d   : > { %7121 = vmatprep.subr.bf16.mxu0 %v7827_v62 }
 0x750   : > { %v2251_v25 = vpop.f32.mrb[8].mxu0 }
 0x751   : > { %v2255_v26 = vmul.f32 0.35355338, %v2251_v25  ;;  %v7089_v27 = vpop.f32.mrb[9].mxu0 }
 0x753   : > { %v2256_v28 = vsel %vm1911_vm10, %v2255_v26, -inf }
 0x754   : > { %2257 = vmax.xlane.f32.xlu1 %v2256_v28 }
 0x758   : > { %v2424_v29 = vpop.f32.mrb[10].mxu0 }
 0x759   : > { %v1998_v30 = vpop.f32.mrb[6].mxu1  ;;  %v7099_v31 = vpop.f32.mrb[11].mxu0  ;;  %v2428_v36 = vmul.f32 0.35355338, %v2424_v29 }
 0x75a   : > { %2003 = vst.msk [vmem:[#allocation2] sm:$0x1f] %vm2002_vm12, %v1998_v30  ;;  %v7074_v32 = vpop.f32.mrb[7].mxu1 }
 0x75b   : > { %v2429_v38 = vsel %vm1911_vm10, %v2428_v36, -inf }
 0x75d   : > { %v2078_v33 = vpop.f32.mrb[8].mxu1 }
 0x75e   : > { %v2082_v34 = vmul.f32 0.35355338, %v2078_v33  ;;  %v7079_v35 = vpop.f32.mrb[9].mxu1 }
 0x760   : > { %v2083_v37 = vsel %vm1911_vm10, %v2082_v34, -inf }
 0x761   : > { %2084 = vmax.xlane.f32.xlu0 %v2083_v37 }
 0x765   : > { %2430 = vmax.xlane.f32.xlu0 %v2429_v38 }
 0x7e1   : > { %v2258_v39 = vpop.xlane.xlu1 %2257 }
 0x7e2   : > { %v2259_v41 = vsub.f32 %v2255_v26, %v2258_v39 }
 0x7e4   : > { %v2260_v42 = vmul.f32 1.442695, %v2259_v41 }
 0x7e6   : > { %7535 = vpow2.f32 %v2260_v42 }
 0x7ee   : > { %v2085_v43 = vpop.xlane.xlu0 %2084 }
 0x7ef   : > { %v2086_v44 = vsub.f32 %v2082_v34, %v2085_v43 }
 0x7f0   : > { %v7536_v45 = vpop.eup %7535 }
 0x7f1   : > { %v2087_v46 = vmul.f32 1.442695, %v2086_v44  ;;  %v2262_v47 = vsel %vm1911_vm10, %v7536_v45, 0.0 }
 0x7f2   : > { %2263 = vadd.xlane.f32.xlu0 %v2262_v47  ;;  %v2431_v48 = vpop.xlane.xlu0 %2430 }
 0x7f3   : > { %7537 = vpow2.f32 %v2087_v46  ;;  %v2432_v49 = vsub.f32 %v2428_v36, %v2431_v48 }
 0x7f5   : > { %v2433_v50 = vmul.f32 1.442695, %v2432_v49 }
 0x7f7   : > { %7539 = vpow2.f32 %v2433_v50 }
 0x7fd   : > { %v7538_v51 = vpop.eup %7537 }
 0x7fe   : > { %v2089_v54 = vsel %vm1911_vm10, %v7538_v51, 0.0 }
 0x7ff   : > { %2090 = vadd.xlane.f32.xlu0 %v2089_v54 }
 0x801   : > { %v7540_v55 = vpop.eup %7539 }
 0x802   : > { %v2435_v56 = vsel %vm1911_vm10, %v7540_v55, 0.0 }
 0x803   : > { %2436 = vadd.xlane.f32.xlu1 %v2435_v56 }
 0x814   : > { %2267 = vrot.lane.b32.xlu1 %v8312_v53, %s9220_s18  ;;  %s9224_s18 = smov 16  }
 0x815   : > { %2094 = vrot.lane.b32.xlu0 %v8312_v53, %s9221_s26  ;;  %s9223_s26 = smov 24  }
 0x818   : > { %2440 = vrot.lane.b32.xlu1 %v8312_v53, %s9219_s1  ;;  %s9222_s1 = smov 8  }
 0x87f   : > { %v2264_v40 = vpop.xlane.xlu0 %2263 }
 0x88c   : > { %v2091_v57 = vpop.xlane.xlu0 %2090 }
 0x88d   : > { %7541 = vrcp.f32 %v2091_v57 }
 0x88e   : > { %7543 = vrcp.f32 %v2264_v40 }
 0x890   : > { %v2437_v58 = vpop.xlane.xlu1 %2436  ;;  %v2095_v59 = vpop.permute.xlu0 %2094 }
 0x891   : > { %7081 = vmatpush3.msk.msra.mxu1 %vm1929_vm7, %v2095_v59  ;;  %7545 = vrcp.f32 %v2437_v58  ;;  %v6732_v58 = vld [vmem:[%s9328_s11] ss:$0 sm:$0xff] }
 0x892   : > { %7090 = vmatprep.subr.mxu1 %v7827_v62 }
 0x894   : > { %v2268_v63 = vpop.permute.xlu1 %2267 }
 0x897   : > { %v7542_v60 = vpop.eup %7541 }
 0x898   : > { %v2093_v61 = vmul.f32 %v7542_v60, %v7538_v51  ;;  %v7544_v1 = vpop.eup %7543  ;;  %v2441_v3 = vpop.permute.xlu1 %2440  ;;  %v2784_v60 = vld [vmem:[%s9329_s22] sm:$0xff] }
 0x899   : > { %v2266_v53 = vmul.f32 %v7544_v1, %v7536_v45  ;;  %v6736_v1 = vld [vmem:[%s9330_s7] ss:$0 sm:$0xff] }
 0x89a   : > { %7083 = vmatmul.mubr.msk.f32.vlgmr.msra.gmra.mrb[10].mxu1 %vm1925_vm11, %v2093_v61  ;;  %v2785_v61 = vld [vmem:[%s9329_s22 + $0x8] sm:$0xff] }
 0x89b   : > { %7091 = vmatpush3.msk.msra.mxu1 %vm1929_vm7, %v2268_v63  ;;  %7092 = vmatprep.mubr.msk.f32.mxu1 %vm7828_vm4, %v7827_v62  ;;  %v7546_v2 = vpop.eup %7545 }
 0x89c   : > { %7100 = vmatprep.subr.mxu1 %v7827_v62  ;;  %v2439_v4 = vmul.f32 %v7546_v2, %v7540_v55 }
 0x89e   : > { %7093 = vmatmul.mubr.msk.f32.vlgmr.msra.gmra.mrb[12].mxu1 %vm1925_vm11, %v2266_v53 }
 0x89f   : > { %7101 = vmatpush3.msk.msra.mxu1 %vm1929_vm7, %v2441_v3  ;;  %7102 = vmatprep.mubr.msk.f32.mxu1 %vm7828_vm4, %v7827_v62  ;;  %v2787_v3 = vpack.c.bf16 %v2785_v61, %v2784_v60 }
 0x8a0   : > { %7113 = vmatprep.subr.bf16.mxu1 %v7827_v62 }
 0x8a2   : > { %7103 = vmatmul.mubr.msk.f32.vlgmr.msra.gmra.mrb[14].mxu1 %vm1925_vm11, %v2439_v4 }
 0x8a3   : > { %7117 = vmatprep.mubr.msk.bf16.mxu1 %vm7828_vm4, %v7827_v62 }
 0x96d   : > { %v2167_v11 = vpop.f32.mrb[10].mxu1 }
 0x96e   : > { %2172 = vrot.lane.b32.xlu1 %v2167_v11, %s9222_s1  ;;  %v7084_v12 = vpop.f32.mrb[11].mxu1  ;;  %s9325_s1 = sld [smem:[#allocation26_spill]]  ;;  %v2695_v11 = vpack.c.bf16 %v2679_v10, %v2678_v9 }
 0x96f   : > { %v2680_v12 = vld [vmem:[%s9332_s23 + $0x10] sm:$0xff] }
 0x971   : > { %v2340_v13 = vpop.f32.mrb[12].mxu1 }
 0x972   : > { %2345 = vrot.lane.b32.xlu0 %v2340_v13, %s9224_s18  ;;  %v7094_v14 = vpop.f32.mrb[13].mxu1  ;;  %s9327_s18 = sld [smem:[#allocation27_spill]]  ;;  %v2681_v13 = vld [vmem:[%s9332_s23 + $0x18] sm:$0xff] }
 0x973   : > { %v2696_v14 = vpack.c.bf16 %v2681_v13, %v2680_v12 }
 0x974   : > { %v6730_v25 = vld [vmem:[%s9325_s1] ss:$0 sm:$0xff] }
 0x975   : > { %v2513_v15 = vpop.f32.mrb[14].mxu1 }
 0x976   : > { %2518 = vrot.lane.b32.xlu1 %v2513_v15, %s9223_s26  ;;  %v7104_v16 = vpop.f32.mrb[15].mxu1  ;;  %s9326_s26 = sld [smem:[#allocation29_spill]]  ;;  %v2682_v15 = vld [vmem:[%s9332_s23 + $0x20] sm:$0xff] }
 0x977   : > { %v2683_v16 = vld [vmem:[%s9332_s23 + $0x28] sm:$0xff] }
 0x978   : > { %v6731_v40 = vld [vmem:[%s9327_s18] ss:$0 sm:$0xff] }
 0x97c   : > { %v2612_v42 = vld [vmem:[%s9326_s26] sm:$0xff]  ;;  %v2613_v43 = vld [vmem:[%s9326_s26 + $0x8] sm:$0xff]  ;;  %v2614_v45 = vld [vmem:[%s9326_s26 + $0x10] sm:$0xff] }
 0x97d   : > { %v2617_v44 = vpack.c.bf16 %v2613_v43, %v2612_v42  ;;  %v2615_v46 = vld [vmem:[%s9326_s26 + $0x18] sm:$0xff] }
 0x97e   : > { %v2618_v47 = vpack.c.bf16 %v2615_v46, %v2614_v45 }
 0x97f   : > { %7114 = vmatpush3.bf16.msra.mxu1 %v2617_v44 }
 0x980   : > { %7115 = vmatprep.subr.bf16.mxu1 %v7827_v62 }
 0x983   : > { %7116 = vmatpush3.bf16.msra.mxu1 %v2618_v47 }
 0x984   : > { %7141 = vmatprep.subr.bf16.mxu1 %v7827_v62 }
 0x99a   : > { %2757 = vadd.xlane.f32.xlu1 %v2756_v18  ;;  %v2697_v18 = vpack.c.bf16 %v2683_v16, %v2682_v15 }
 0x9e0   : > { %v2173_v19 = vpop.permute.xlu1 %2172 }
 0x9e1   : > { %2176 = vst.msk [vmem:[#allocation2] sm:$0x1f] %vm2175_vm14, %v2173_v19  ;;  %v2684_v19 = vld [vmem:[%s9332_s23 + $0x30] sm:$0xff] }
 0x9e4   : > { %v2346_v20 = vpop.permute.xlu0 %2345 }
 0x9e5   : > { %2349 = vst.msk [vmem:[#allocation2] sm:$0x1f] %vm2348_vm15, %v2346_v20  ;;  %v2685_v20 = vld [vmem:[%s9332_s23 + $0x38] sm:$0xff] }
 0x9e8   : > { %v2519_v21 = vpop.permute.xlu1 %2518 }
 0x9e9   : > { %2522 = vst.msk [vmem:[#allocation2] sm:$0x1f] %vm2521_vm0, %v2519_v21  ;;  %v2698_v21 = vpack.c.bf16 %v2685_v20, %v2684_v19 }
 0x9f0   : > { %v2523_v22 = vld [vmem:[#allocation2] sm:$0x1f] }
 0x9f1   : > { %v2528_v23 = vpack.c.bf16 %v2523_v22, %v2523_v22  ;;  %v2686_v22 = vld [vmem:[%s9332_s23 + $0x40] sm:$0xff] }
 0x9f3   : > { %7110 = vmatmul.mubr.msk.bf16.vlgmr.msra.gmra.mrb[12].mxu0 %vm1788_vm5, %v2528_v23  ;;  %v2687_v23 = vld [vmem:[%s9332_s23 + $0x48] sm:$0xff] }
 0x9f4   : > { %7137 = vmatprep.mubr.msk.bf16.mxu0 %vm7828_vm4, %v7827_v62  ;;  %7122 = vmatpush3.bf16.msra.mxu0 %v2695_v11 }
 0x9f5   : > { %7123 = vmatprep.subr.bf16.mxu0 %v7827_v62 }
 0x9f8   : > { %7124 = vmatpush3.bf16.msra.mxu0 %v2696_v14 }
 0x9f9   : > { %7125 = vmatprep.subr.bf16.mxu0 %v7827_v62 }
 0x9fc   : > { %7126 = vmatpush3.bf16.msra.mxu0 %v2697_v18 }
 0x9fd   : > { %7127 = vmatprep.subr.bf16.mxu0 %v7827_v62 }
 0xa00   : > { %7128 = vmatpush3.bf16.msra.mxu0 %v2698_v21 }
 0xa01   : > { %7129 = vmatprep.subr.bf16.mxu0 %v7827_v62 }
 0xa27   : > { %v2758_v32 = vpop.xlane.xlu1 %2757 }
 0xa28   : > { %v2760_v33 = vmul.f32 0.0625, %v2758_v32  ;;  %v2692_v32 = vld [vmem:[%s9332_s23 + $0x70] sm:$0xff] }
 0xa2a   : > { %v2761_v36 = vsub.f32 %v8397_v17, %v2760_v33  ;;  %v2693_v33 = vld [vmem:[%s9332_s23 + $0x78] sm:$0xff] }
 0xa2c   : > { %v2762_v39 = vmul.f32 %v2761_v36, %v2761_v36 }
 0xa2e   : > { %v2763_v41 = vsel %vm2755_vm13, %v2762_v39, 0.0 }
 0xac6   : > { %v2568_v24 = vpop.f32.mrb[12].mxu0 }
 0xac7   : > { %v2574_v26 = vadd.f32 %v2568_v24, %v8252_v52  ;;  %v7111_v27 = vpop.f32.mrb[13].mxu0  ;;  %v2699_v24 = vpack.c.bf16 %v2687_v23, %v2686_v22 }
 0xac8   : > { %v2571_v28 = vpop.f32.mrb[14].mxu0 }
 0xac9   : > { %v8409_v29 = vadd.f32 %v6730_v25, %v2574_v26  ;;  %v7112_v30 = vpop.f32.mrb[15].mxu0  ;;  %7130 = vmatpush3.bf16.msra.mxu0 %v2699_v24  ;;  %v2688_v25 = vld [vmem:[%s9332_s23 + $0x50] sm:$0xff]  ;;  %v2689_v26 = vld [vmem:[%s9332_s23 + $0x58] sm:$0xff]  ;;  %v2690_v28 = vld [vmem:[%s9332_s23 + $0x60] sm:$0xff] }
 0xaca   : > { %7131 = vmatprep.subr.bf16.mxu0 %v7827_v62  ;;  %v2700_v27 = vpack.c.bf16 %v2689_v26, %v2688_v25  ;;  %v2691_v30 = vld [vmem:[%s9332_s23 + $0x68] sm:$0xff] }
 0xacb   : > { %v2585_v31 = vsel %vm1745_vm3, %v8409_v29, 0.0 }
 0xacc   : > { %2586 = vadd.xlane.f32.xlu0 %v2585_v31  ;;  %v2701_v31 = vpack.c.bf16 %v2691_v30, %v2690_v28 }
 0xacd   : > { %7132 = vmatpush3.bf16.msra.mxu0 %v2700_v27 }
 0xace   : > { %7133 = vmatprep.subr.bf16.mxu0 %v7827_v62 }
 0xad1   : > { %7134 = vmatpush3.bf16.msra.mxu0 %v2701_v31 }
 0xad2   : > { %7135 = vmatprep.subr.bf16.mxu0 %v7827_v62 }
 0xb59   : > { %v2587_v34 = vpop.xlane.xlu0 %2586 }
 0xb5a   : > { %v2588_v35 = vmul.f32 0.03125, %v2587_v34  ;;  %v2702_v34 = vpack.c.bf16 %v2693_v33, %v2692_v32 }
 0xb5c   : > { %v2589_v52 = vsub.f32 %v8409_v29, %v2588_v35  ;;  %7136 = vmatpush3.bf16.msra.mxu0 %v2702_v34  ;;  %v2886_v35 = vld [vmem:[%s9333_s10] sm:$0xff] }
 0xb5d   : > { %7168 = vmatprep.subr.bf16.mxu0 %v7827_v62  ;;  %v2955_v34 = vld [vmem:[%s9338_s9] sm:$0xff] }
 0xb5e   : > { %v2590_v37 = vmul.f32 %v2589_v52, %v2589_v52 }
 0xb60   : > { %v2591_v38 = vsel %vm1745_vm3, %v2590_v37, 0.0 }
 0xb61   : > { %2592 = vadd.xlane.f32.xlu0 %v2591_v38  ;;  %v2889_v38 = vld [vmem:[%s9333_s10 + $0x18] sm:$0xff] }
 0xb65   : > { %2764 = vadd.xlane.f32.xlu0 %v2763_v41  ;;  %v6733_v41 = vld [vmem:[%s9334_s2] ss:$0 sm:$0xff] }
 0xbee   : > { %v2593_v48 = vpop.xlane.xlu0 %2592 }
 0xbef   : > { %v2594_v49 = vmul.f32 0.03125, %v2593_v48  ;;  %v2852_v48 = vlaneseq }
 0xbf1   : > { %v2595_v50 = vadd.f32 1e-05, %v2594_v49 }
 0xbf2   : > { %v2765_v51 = vpop.xlane.xlu0 %2764 }
 0xbf3   : > { %7547 = vrsqrt.f32 %v2595_v50  ;;  %v2766_v54 = vmul.f32 0.0625, %v2765_v51  ;;  %v6738_v50 = vld [vmem:[%s9335_s3] ss:$0 sm:$0xff] }
 0xbf5   : > { %v2767_v55 = vadd.f32 1e-05, %v2766_v54  ;;  %v8469_v54 = vshrl.u32 %v2852_v48, 7  ;;  %v7843_v48 = vmov 1  }
 0xbf7   : > { %7549 = vrsqrt.f32 %v2767_v55  ;;  %v8476_v61 = vsub.s32 0, %v8469_v54 }
 0xbfd   : > { %v7548_v56 = vpop.eup %7547 }
 0xbfe   : > { %v2597_v57 = vmul.f32 %v7548_v56, %v2589_v52  ;;  %v2888_v52 = vld [vmem:[%s9333_s10 + $0x10] sm:$0xff] }
 0xbff   : > { %v2892_v39 = vpack.c.bf16 %v2889_v38, %v2888_v52 }
 0xc00   : > { %v2604_v59 = vmul.f32 %v6731_v40, %v2597_v57 }
 0xc01   : > { %v7550_v63 = vpop.eup %7549 }
 0xc02   : > { %v2769_v53 = vmul.f32 %v7550_v63, %v2761_v36  ;;  %v2611_v2 = vadd.f32 %v6732_v58, %v2604_v59  ;;  %v2887_v36 = vld [vmem:[%s9333_s10 + $0x8] sm:$0xff]  ;;  %v2842_v63 = vld [vmem:[%s9336_s5] sm:$0xf] }
 0xc03   : > { %v2891_v37 = vpack.c.bf16 %v2887_v36, %v2886_v35  ;;  %v2956_v35 = vld [vmem:[%s9338_s9 + $0x8] sm:$0xff] }
 0xc04   : > { %v2616_v4 = vpack.c.bf16 %v2611_v2, %v2611_v2  ;;  %v2776_v5 = vmul.f32 %v6736_v1, %v2769_v53  ;;  %v8480_v1 = vsub.s32 1, %v8469_v54  ;;  %v2855_v53 = vrot.slane %v2842_v63, %v8476_v61 }
 0xc05   : > { %v8484_v2 = vsub.s32 2, %v8469_v54 }
 0xc06   : > { %7118 = vmatmul.mubr.msk.bf16.vlgmr.msra.gmra.mrb[16].mxu1 %vm1788_vm5, %v2616_v4  ;;  %v2783_v7 = vadd.f32 %v6737_v6, %v2776_v5  ;;  %v2862_v4 = vrot.slane %v2842_v63, %v8480_v1  ;;  %v8489_v5 = vsub.s32 3, %v8469_v54 }
 0xc07   : > { %7142 = vmatpush3.bf16.msra.mxu1 %v2787_v3  ;;  %7143 = vmatprep.mubr.msk.bf16.mxu1 %vm7828_vm4, %v7827_v62  ;;  %v6740_v3 = vld [vmem:[%s9337_s8] ss:$0 sm:$0xff]  ;;  %v2869_v10 = vrot.slane %v2842_v63, %v8484_v2 }
 0xc08   : > { %7147 = vmatprep.subr.bf16.mxu1 %v7827_v62  ;;  %v2786_v8 = vpack.c.bf16 %v2783_v7, %v2783_v7  ;;  %v2876_v13 = vrot.slane %v2842_v63, %v8489_v5 }
 0xc0e   : > { %7144 = vmatmul.mubr.msk.bf16.vlgmr.msra.gmra.mrb[20].mxu1 %vm2795_vm2, %v2786_v8 }
 0xc0f   : > { %7151 = vmatprep.mubr.msk.bf16.mxu1 %vm7828_vm4, %v7827_v62  ;;  %7148 = vmatpush3.bf16.msra.mxu1 %v2891_v37 }
 0xc10   : > { %7149 = vmatprep.subr.bf16.mxu1 %v7827_v62 }
 0xc13   : > { %7150 = vmatpush3.bf16.msra.mxu1 %v2892_v39 }
 0xcd9   : > { %v2663_v42 = vpop.f32.mrb[16].mxu1 }
 0xcda   : > { %v2664_v43 = vadd.f32 %v6733_v41, %v2663_v42  ;;  %v7119_v44 = vpop.f32.mrb[17].mxu1 }
 0xcdb   : > { %v2666_v45 = vpop.f32.mrb[18].mxu1 }
 0xcdc   : > { %v2669_v46 = vmul.f32 %v2664_v43, %v2664_v43  ;;  %v7120_v47 = vpop.f32.mrb[19].mxu1 }
 0xcde   : > { %v2670_v49 = vmul.f32 %v2669_v46, %v2664_v43 }
 0xce0   : > { %v2671_v51 = vmul.f32 0.044715, %v2670_v49  ;;  %v7844_v49 = vmov 4  }
 0xce1   : > { %v2833_v55 = vpop.f32.mrb[20].mxu1 }
 0xce2   : > { %v2672_v56 = vadd.f32 %v2671_v51, %v2664_v43  ;;  %v8471_v40 = vadd.f32 %v6738_v50, %v2833_v55  ;;  %v7145_v57 = vpop.f32.mrb[21].mxu1  ;;  %v7845_v50 = vmov 2  }
 0xce3   : > { %v2836_v58 = vpop.f32.mrb[22].mxu1 }
 0xce4   : > { %v2673_v59 = vmul.f32 0.7978846, %v2672_v56  ;;  %2841 = vst.msk [vmem:[#allocation4 + $0x3] sm:$0x1f] %vm1745_vm3, %v8471_v40  ;;  %v7146_v60 = vpop.f32.mrb[23].mxu1  ;;  %v3252_v44 = vsub.f32 0.0, %v8471_v40 }
 0xce5   : > { %v7846_v56 = vmov 3  }
 0xce6   : > { %7551 = vtanh.f32 %v2673_v59  ;;  %v3253_v47 = vmul.f32 1.442695, %v3252_v44  ;;  %v6741_v59 = vld [vmem:[%s9339_s13] ss:$0 sm:$0xff] }
 0xceb   : > { %v2851_v6 = vld [vmem:[#allocation4] sm:$0x1f] }
 0xcec   : > { %v2858_v7 = vld [vmem:[#allocation4 + $0x1] sm:$0x1f]  ;;  %v2856_v9 = vmul.f32 %v2855_v53, %v2851_v6 }
 0xced   : > { %v2865_v8 = vld [vmem:[#allocation4 + $0x2] sm:$0x1f]  ;;  %v2863_v12 = vmul.f32 %v2862_v4, %v2858_v7  ;;  %v3265_v4 = vld [vmem:[%s9340_s17 + $0x8] sm:$0xff] }
 0xcee   : > { %3409 = vst.msk [vmem:[#allocation4] sm:$0x7] %vm2839_vm8, %v7827_v62  ;;  %v2857_v11 = vadd.f32 %v6740_v3, %v2856_v9  ;;  %v2872_v14 = vld [vmem:[#allocation4 + $0x3] sm:$0x1f]  ;;  %v2870_v18 = vmul.f32 %v2869_v10, %v2865_v8  ;;  %v3264_v3 = vld [vmem:[%s9340_s17] sm:$0xff]  ;;  %v3267_v9 = vld [vmem:[%s9340_s17 + $0x18] sm:$0xff] }
 0xcef   : > { %v2877_v21 = vmul.f32 %v2876_v13, %v2872_v14  ;;  %v3269_v6 = vpack.c.bf16 %v3265_v4, %v3264_v3  ;;  %v3266_v8 = vld [vmem:[%s9340_s17 + $0x10] sm:$0xff] }
 0xcf0   : > { %v7552_v15 = vpop.eup %7551  ;;  %v2864_v16 = vadd.f32 %v2863_v12, %v2857_v11  ;;  %v3270_v10 = vpack.c.bf16 %v3267_v9, %v3266_v8 }
 0xcf1   : > { %v2675_v19 = vadd.f32 1.0, %v7552_v15 }
 0xcf2   : > { %v2871_v20 = vadd.f32 %v2870_v18, %v2864_v16  ;;  %v2953_v18 = vld [vmem:[%s9342_s25] sm:$0xff] }
 0xcf3   : > { %v2676_v22 = vmul.f32 0.5, %v2675_v19 }
 0xcf4   : > { %v2878_v23 = vadd.f32 %v2877_v21, %v2871_v20 }
 0xcf5   : > { %v2677_v24 = vmul.f32 %v2676_v22, %v2664_v43 }
 0xcf6   : > { %v2879_v25 = vsub.f32 0.0, %v2878_v23 }
 0xcf7   : > { %v2694_v26 = vpack.c.bf16 %v2677_v24, %v2677_v24 }
 0xcf8   : > { %v2880_v27 = vmul.f32 1.442695, %v2879_v25 }
 0xcf9   : > { %7138 = vmatmul.mubr.bf16.vlgmr.msra.gmra.mrb[16].mxu0 %v2694_v26 }
 0xcfa   : > { %7553 = vpow2.f32 %v2880_v27  ;;  %7170 = vmatprep.mubr.msk.bf16.mxu0 %vm7828_vm4, %v7827_v62 }
 0xd04   : > { %v7554_v28 = vpop.eup %7553 }
 0xd05   : > { %v2882_v30 = vadd.f32 1.0, %v7554_v28 }
 0xd07   : > { %7555 = vrcp.f32 %v2882_v30 }
 0xd08   : > { %7557 = vpow2.f32 %v3253_v47 }
 0xd11   : > { %v7556_v31 = vpop.eup %7555 }
 0xd12   : > { %v8497_v32 = vmul.f32 %v7556_v31, %v2878_v23  ;;  %v7558_v51 = vpop.eup %7557 }
 0xd13   : > { %v3255_v55 = vadd.f32 1.0, %v7558_v51 }
 0xd14   : > { %7155 = vmatprep.subr.msk.mxu1 %vm1788_vm5, %v8497_v32  ;;  %v2890_v33 = vpack.c.bf16 %v8497_v32, %v8497_v32 }
 0xd15   : > { %7559 = vrcp.f32 %v3255_v55 }
 0xd16   : > { %7152 = vmatmul.mubr.msk.bf16.vlgmr.msra.gmra.mrb[24].mxu1 %vm1788_vm5, %v2890_v33 }
 0xd17   : > { %7156 = vmatpush3.xpose.msk.msra.mxu1 %vm1788_vm5, %v8497_v32  ;;  %7157 = vmatprep.mubr.msk.f32.mxu1 %vm1788_vm5, %v2955_v34 }
 0xd18   : > { %7160 = vmatprep.subr.bf16.mxu1 %v7827_v62 }
 0xd1e   : > { %7158 = vmatmul.mubr.msk.f32.vlgmr.msra.gmra.mrb[28].mxu1 %vm1788_vm5, %v2956_v35 }
 0xd1f   : > { %7164 = vmatprep.mubr.msk.bf16.mxu1 %vm7828_vm4, %v7827_v62  ;;  %v7560_v57 = vpop.eup %7559  ;;  %7161 = vmatpush3.bf16.msra.mxu1 %v3269_v6 }
 0xd20   : > { %v3258_v58 = vmul.f32 %v7560_v57, %v8471_v40  ;;  %7162 = vmatprep.subr.bf16.mxu1 %v7827_v62 }
 0xd23   : > { %7163 = vmatpush3.bf16.msra.mxu1 %v3270_v10 }
 0xd24   : > { %7174 = vmatprep.subr.bf16.mxu1 %v7827_v62 }
 0xdcc   : > { %v8513_v36 = vpop.f32.mrb[16].mxu0 }
 0xdcd   : > { %v7139_v52 = vpop.f32.mrb[17].mxu0 }
 0xdce   : > { %v2740_v37 = vpop.f32.mrb[18].mxu0  ;;  %v8546_v52 = vsub.s32 4, %v8469_v54 }
 0xdcf   : > { %v7140_v38 = vpop.f32.mrb[19].mxu0 }
 0xde9   : > { %v2937_v39 = vpop.f32.mrb[24].mxu1 }
 0xdea   : > { %v7153_v41 = vpop.f32.mrb[25].mxu1  ;;  %v2938_v60 = vadd.f32 %v6741_v59, %v2937_v39 }
 0xdeb   : > { %v2940_v42 = vpop.f32.mrb[26].mxu1 }
 0xdec   : > { %v7154_v43 = vpop.f32.mrb[27].mxu1  ;;  %v2944_v63 = vand.u32 2147483647, %v2938_v60  ;;  %v2943_v14 = vmax.f32 %v2938_v60, 0.0 }
 0xdee   : > { %v2945_v53 = vsub.f32 0.0, %v2944_v63 }
 0xdf0   : > { %v2946_v7 = vmul.f32 1.442695, %v2945_v53 }
 0xdf1   : > { %v7159_v45 = vpop.f32.mrb[28].mxu1 }
 0xdf2   : > { %3062 = vperm.xlu1 %7489, %v7159_v45   ;;  %v3032_v46 = vpop.f32.mrb[29].mxu1  ;;  %7561 = vpow2.f32 %v2946_v7  ;;  %v8553_v7 = vld [vmem:[%s9343_s29] sm:$0x1] }
 0xdf3   : > { %3051 = vperm.xlu0 %7488, %v3032_v46  }
 0xdf6   : > { %7490 = vset.pattern.permute.xlu1 %v7843_v48 }
 0xdf7   : > { %3095 = vperm.xlu1 %7490, %v7159_v45   ;;  %7497 = vset.pattern.permute.xlu0 %v7844_v49 }
 0xdf8   : > { %3221 = vperm.xlu0 %7497, %v7159_v45  }
 0xdfb   : > { %7491 = vset.pattern.permute.xlu1 %v7845_v50 }
 0xdfc   : > { %3151 = vperm.xlu1 %7491, %v7159_v45   ;;  %7498 = vset.pattern.permute.xlu0 %v7826_v0  ;;  %v7562_v40 = vpop.eup %7561 }
 0xdfd   : > { %v2948_v11 = vadd.f32 1.0, %v7562_v40 }
 0xdff   : > { %7563 = vlog2.f32 %v2948_v11 }
 0xe00   : > { %7492 = vset.pattern.permute.xlu1 %v7843_v48 }
 0xe01   : > { %3085 = vperm.xlu1 %7492, %v3032_v46  }
 0xe05   : > { %7493 = vset.pattern.permute.xlu1 %v7845_v50 }
 0xe06   : > { %3141 = vperm.xlu1 %7493, %v3032_v46  }
 0xe09   : > { %v7564_v12 = vpop.eup %7563 }
 0xe0a   : > { %7494 = vset.pattern.permute.xlu1 %v7846_v56  ;;  %v2950_v13 = vmul.f32 0.6931472, %v7564_v12 }
 0xe0b   : > { %3176 = vperm.xlu1 %7494, %v3032_v46  }
 0xe0c   : > { %v2951_v15 = vadd.f32 %v2950_v13, %v2943_v14  ;;  %v3073_v13 = vmul.f32 %v8553_v7, %v8497_v32 }
 0xe0e   : > { %v3044_v16 = vrot.slane %v2951_v15, %v8476_v61  ;;  %v3079_v21 = vrot.slane %v2951_v15, %v8480_v1  ;;  %v8539_v22 = vmul.f32 %v2951_v15, %v8497_v32  ;;  %v3135_v24 = vrot.slane %v2951_v15, %v8484_v2 }
 0xe0f   : > { %7495 = vset.pattern.permute.xlu1 %v7844_v49  ;;  %v3170_v35 = vrot.slane %v2951_v15, %v8489_v5  ;;  %v3205_v43 = vrot.slane %v2951_v15, %v8546_v52 }
 0xe10   : > { %3211 = vperm.xlu1 %7495, %v3032_v46   ;;  %v3045_v19 = vmul.f32 %v3044_v16, %v2953_v18  ;;  %v3080_v23 = vmul.f32 %v3079_v21, %v2953_v18  ;;  %v3057_v27 = vrot.slane %v8539_v22, %v8476_v61  ;;  %v3136_v31 = vmul.f32 %v3135_v24, %v2953_v18 }
 0xe11   : > { %v3171_v42 = vmul.f32 %v3170_v35, %v2953_v18  ;;  %v3091_v63 = vrot.slane %v8539_v22, %v8480_v1  ;;  %v3147_v15 = vrot.slane %v8539_v22, %v8484_v2 }
 0xe12   : > { %v3046_v20 = vmul.f32 1.442695, %v3045_v19  ;;  %v3081_v28 = vmul.f32 1.442695, %v3080_v23  ;;  %v3137_v39 = vmul.f32 1.442695, %v3136_v31 }
 0xe13   : > { %v3172_v55 = vmul.f32 1.442695, %v3171_v42 }
 0xe14   : > { %7496 = vset.pattern.permute.xlu1 %v7846_v56  ;;  %7565 = vpow2.f32 %v3046_v20 }
 0xe15   : > { %3186 = vperm.xlu1 %7496, %v7159_v45   ;;  %7567 = vpow2.f32 %v3081_v28  ;;  %v7847_v45 = vmov 1966171168  }
 0xe16   : > { %v3107_v46 = vunpack.c.l.s4 %v7847_v45  ;;  %7569 = vpow2.f32 %v3137_v39  ;;  %v3217_v45 = vrot.slane %v8539_v22, %v8546_v52 }
 0xe17   : > { %7571 = vpow2.f32 %v3172_v55 }
 0xe18   : > { %v3108_v59 = vunpack.c.0.s8 %v3107_v46 }
 0xe19   : > { %3260 = vrot.lane.b32.xlu1 %v3258_v58, %s9341_s21  ;;  %v3206_v58 = vmul.f32 %v3205_v43, %v2953_v18 }
 0xe1a   : > { %7499 = vset.pattern.permute.xlu1 %v7826_v0  ;;  %v8556_v10 = vsub.s32 %v3108_v59, %v8469_v54 }
 0xe1b   : > { %v3207_v6 = vmul.f32 1.442695, %v3206_v58 }
 0xe1c   : > { %v3112_v21 = vrot.slane %v8497_v32, %v8556_v10 }
 0xe1d   : > { %7573 = vpow2.f32 %v3207_v6 }
 0xe1e   : > { %v7566_v25 = vpop.eup %7565  ;;  %v3113_v28 = vcombine.high %v3112_v21, %v3112_v21  ;;  %v3120_v46 = vrot.slane %v3112_v21, %v8556_v10 }
 0xe1f   : > { %v3048_v33 = vmul.f32 0.0, %v7566_v25  ;;  %v7568_v53 = vpop.eup %7567 }
 0xe20   : > { %v7570_v12 = vpop.eup %7569  ;;  %v3127_v43 = vrot.slane %v3113_v28, %v8556_v10 }
 0xe71   : > { %v3063_v26 = vpop.permute.xlu1 %3062 }
 0xe72   : > { %v3052_v30 = vpop.permute.xlu0 %3051 }
 0xe73   : > { %v3058_v34 = vmul.f32 %v3057_v27, %v3052_v30  ;;  %v3182_v27 = vrot.slane %v8539_v22, %v8489_v5  ;;  %v3232_v22 = vcombine.high %v8497_v32, %v8497_v32 }
 0xe75   : > { %v3059_v37 = vadd.f32 %v3058_v34, %v3048_v33  ;;  %v3239_v21 = vrot.slane %v3232_v22, %v8556_v10  ;;  %v6750_v22 = vld [vmem:[%s9330_s7 + $0x1] ss:$0 sm:$0xff] }
 0xe76   : > { %v3096_v38 = vpop.permute.xlu1 %3095 }
 0xe77   : > { %v3065_v41 = vmul.f32 %v3063_v26, %v3059_v37  ;;  %v3083_v8 = vmul.f32 %v7568_v53, %v3059_v37  ;;  %v7572_v26 = vpop.eup %7571 }
 0xe78   : > { %v7574_v42 = vpop.eup %7573 }
 0xe79   : > { %v3066_v44 = vsel %vm1788_vm5, %v3065_v41, 0.0 }
 0xe7a   : > { %v3067_v47 = vrot.slane %v3066_v44, 4 }
 0xe7b   : > { %v3152_v51 = vpop.permute.xlu1 %3151 }
 0xe7c   : > { %v3068_v57 = vadd.f32 %v3067_v47, %v3066_v44 }
 0xe7e   : > { %v3069_v60 = vrot.slane %v3068_v57, 2 }
 0xe80   : > { %v3070_v3 = vadd.f32 %v3069_v60, %v3068_v57  ;;  %v3086_v4 = vpop.permute.xlu1 %3085  ;;  %v3129_v60 = vmul.f32 %v3127_v43, %v8553_v7 }
 0xe81   : > { %v3092_v9 = vmul.f32 %v3091_v63, %v3086_v4  ;;  %v3162_v4 = vcombine.high %v3120_v46, %v3120_v46 }
 0xe82   : > { %v3071_v40 = vrot.slane %v3070_v3, 1 }
 0xe83   : > { %v3093_v11 = vadd.f32 %v3092_v9, %v3083_v8 }
 0xe84   : > { %v3072_v14 = vadd.f32 %v3071_v40, %v3070_v3  ;;  %v3222_v3 = vpop.permute.xlu0 %3221 }
 0xe85   : > { %v3098_v16 = vmul.f32 %v3096_v38, %v3093_v11  ;;  %v3142_v18 = vpop.permute.xlu1 %3141  ;;  %v3139_v19 = vmul.f32 %v7570_v12, %v3093_v11 }
 0xe86   : > { %v3074_v20 = vadd.f32 %v3073_v13, %v3072_v14  ;;  %v3148_v54 = vmul.f32 %v3147_v15, %v3142_v18  ;;  %v3164_v14 = vmul.f32 %v3162_v4, %v8553_v7  ;;  %v6752_v4 = vld [vmem:[%s9329_s22 + $0x10] sm:$0xff] }
 0xe87   : > { %v3099_v23 = vsel %vm1788_vm5, %v3098_v16, 0.0 }
 0xe88   : > { %3075 = vst.msk [vmem:[#allocation5] sm:$0x1] %vm1726_vm1, %v3074_v20  ;;  %v3100_v24 = vrot.slane %v3099_v23, 4  ;;  %v3149_v25 = vadd.f32 %v3148_v54, %v3139_v19 }
 0xe8a   : > { %v3101_v30 = vadd.f32 %v3100_v24, %v3099_v23  ;;  %v3154_v31 = vmul.f32 %v3152_v51, %v3149_v25  ;;  %v3177_v33 = vpop.permute.xlu1 %3176  ;;  %v3174_v34 = vmul.f32 %v7572_v26, %v3149_v25  ;;  %v3246_v25 = vrot.slane %v3239_v21, %v8556_v10 }
 0xe8b   : > { %v3183_v35 = vmul.f32 %v3182_v27, %v3177_v33  ;;  %v3197_v27 = vcombine.high %v3127_v43, %v3127_v43 }
 0xe8c   : > { %v3102_v37 = vrot.slane %v3101_v30, 2  ;;  %v3155_v38 = vsel %vm1788_vm5, %v3154_v31, 0.0  ;;  %v3248_v33 = vmul.f32 %v3246_v25, %v8553_v7 }
 0xe8d   : > { %v3156_v39 = vrot.slane %v3155_v38, 4  ;;  %v3184_v41 = vadd.f32 %v3183_v35, %v3174_v34  ;;  %v3199_v35 = vmul.f32 %v3197_v27, %v8553_v7 }
 0xe8e   : > { %v3103_v44 = vadd.f32 %v3102_v37, %v3101_v30 }
 0xe8f   : > { %v3157_v47 = vadd.f32 %v3156_v39, %v3155_v38  ;;  %v3212_v55 = vpop.permute.xlu1 %3211  ;;  %v3209_v51 = vmul.f32 %v7574_v42, %v3184_v41 }
 0xe90   : > { %v3104_v57 = vrot.slane %v3103_v44, 1  ;;  %v3218_v58 = vmul.f32 %v3217_v45, %v3212_v55  ;;  %v6746_v45 = vld [vmem:[%s9344_s15] ss:$0 sm:$0xff]  ;;  %s9346_s15 = sld [smem:[#allocation32_spill]] }
 0xe91   : > { %v3158_v59 = vrot.slane %v3157_v47, 2 }
 0xe92   : > { %v3105_v63 = vadd.f32 %v3104_v57, %v3103_v44  ;;  %v3219_v53 = vadd.f32 %v3218_v58, %v3209_v51 }
 0xe93   : > { %v3159_v6 = vadd.f32 %v3158_v59, %v3157_v47 }
 0xe94   : > { %v3130_v8 = vadd.f32 %v3129_v60, %v3105_v63  ;;  %v3224_v9 = vmul.f32 %v3222_v3, %v3219_v53  ;;  %v3187_v40 = vpop.permute.xlu1 %3186 }
 0xe95   : > { %v3160_v11 = vrot.slane %v3159_v6, 1  ;;  %v3189_v12 = vmul.f32 %v3187_v40, %v3184_v41 }
 0xe96   : > { %3131 = vst.msk [vmem:[#allocation5 + $0x1] sm:$0x1] %vm1726_vm1, %v3130_v8  ;;  %v3225_v13 = vsel %vm1788_vm5, %v3224_v9, 0.0  ;;  %s9347_s27 = smov %s9346_s15 }
 0xe97   : > { %v3161_v15 = vadd.f32 %v3160_v11, %v3159_v6  ;;  %v3226_v16 = vrot.slane %v3225_v13, 4  ;;  %v3190_v18 = vsel %vm1788_vm5, %v3189_v12, 0.0  ;;  %v6753_v6 = vld [vmem:[%s9329_s22 + $0x18] sm:$0xff] }
 0xe98   : > { %v3191_v19 = vrot.slane %v3190_v18, 4  ;;  %v3261_v42 = vpop.permute.xlu1 %3260 }
 0xe99   : > { %v3165_v20 = vadd.f32 %v3164_v14, %v3161_v15  ;;  %v3227_v54 = vadd.f32 %v3226_v16, %v3225_v13  ;;  %v6751_v13 = vld [vmem:[%s9331_s28 + $0x1] ss:$0 sm:$0xff] }
 0xe9a   : > { %v3192_v23 = vadd.f32 %v3191_v19, %v3190_v18  ;;  %v6760_v18 = vld [vmem:[%s9333_s10 + $0x20] sm:$0xff]  ;;  %v6761_v19 = vld [vmem:[%s9333_s10 + $0x28] sm:$0xff] }
 0xe9b   : > { %3166 = vst.msk [vmem:[#allocation5 + $0x2] sm:$0x1] %vm1726_vm1, %v3165_v20  ;;  %v3228_v32 = vrot.slane %v3227_v54, 2  ;;  %v6762_v20 = vld [vmem:[%s9333_s10 + $0x30] sm:$0xff]  ;;  %v3463_v21 = vpack.c.bf16 %v6761_v19, %v6760_v18 }
 0xe9c   : > { %v3193_v24 = vrot.slane %v3192_v23, 2 }
 0xe9d   : > { %v3229_v26 = vadd.f32 %v3228_v32, %v3227_v54  ;;  %v6763_v54 = vld [vmem:[%s9333_s10 + $0x38] sm:$0xff]  ;;  %v6769_v32 = vld [vmem:[%s9338_s9 + $0x10] sm:$0xff] }
 0xe9e   : > { %v3194_v28 = vadd.f32 %v3193_v24, %v3192_v23  ;;  %v3464_v23 = vpack.c.bf16 %v6763_v54, %v6762_v20  ;;  %v6755_v24 = vld [vmem:[%s9335_s3 + $0x1] ss:$0 sm:$0xff] }
 0xe9f   : > { %v3230_v30 = vrot.slane %v3229_v26, 1  ;;  %v6765_v20 = vld [vmem:[%s9339_s13 + $0x1] ss:$0 sm:$0xff] }
 0xea0   : > { %v3195_v31 = vrot.slane %v3194_v28, 1 }
 0xea1   : > { %v3231_v34 = vadd.f32 %v3230_v30, %v3229_v26 }
 0xea2   : > { %v3196_v37 = vadd.f32 %v3195_v31, %v3194_v28  ;;  %v6757_v31 = vld [vmem:[%s9336_s5 + $0x4] sm:$0xf] }
 0xea3   : > { %v3249_v38 = vadd.f32 %v3248_v33, %v3231_v34  ;;  %v3426_v33 = vrot.slane %v6757_v31, %v8476_v61  ;;  %v6759_v34 = vld [vmem:[%s9337_s8 + $0x1] ss:$0 sm:$0xff] }
 0xea4   : > { %v3200_v39 = vadd.f32 %v3199_v35, %v3196_v37  ;;  %v3433_v35 = vrot.slane %v6757_v31, %v8480_v1 }
 0xea5   : > { %3250 = vst.msk [vmem:[#allocation5 + $0x4] sm:$0x1] %vm1726_vm1, %v3249_v38 }
 0xea6   : > { %3201 = vst.msk [vmem:[#allocation5 + $0x3] sm:$0x1] %vm1726_vm1, %v3200_v39 }
 0xead   : > { %v3251_v41 = vld [vmem:[#allocation5] sm:$0x1f] }
 0xeae   : > { %v3263_v44 = vmul.f32 %v3261_v42, %v3251_v41  ;;  %v3440_v42 = vrot.slane %v6757_v31, %v8484_v2 }
 0xeb0   : > { %v3268_v43 = vpack.c.bf16 %v3263_v44, %v3263_v44 }
 0xeb2   : > { %7165 = vmatmul.mubr.msk.bf16.vlgmr.msra.gmra.mrb[32].mxu1 %vm1788_vm5, %v3268_v43 }
 0xeb3   : > { %7178 = vmatprep.mubr.msk.bf16.mxu1 %vm7828_vm4, %v7827_v62  ;;  %7175 = vmatpush3.bf16.msra.mxu1 %v3463_v21 }
 0xeb4   : > { %7176 = vmatprep.subr.bf16.mxu1 %v7827_v62 }
 0xeb7   : > { %7177 = vmatpush3.bf16.msra.mxu1 %v3464_v23 }
 0xeb8   : > { %7187 = vmatprep.subr.bf16.mxu1 %v7827_v62 }
 0xf85   : > { %v3315_v7 = vpop.f32.mrb[32].mxu1 }
 0xf86   : > { %v3316_v46 = vadd.f32 %v6746_v45, %v3315_v7  ;;  %v7166_v47 = vpop.f32.mrb[33].mxu1  ;;  %v3447_v45 = vrot.slane %v6757_v31, %v8489_v5 }
 0xf87   : > { %v3318_v55 = vpop.f32.mrb[34].mxu1 }
 0xf88   : > { %v8592_v51 = vadd.f32 %v3316_v46, %v8397_v17  ;;  %v7167_v57 = vpop.f32.mrb[35].mxu1  ;;  %v3357_v17 = vpack.c.bf16 %v6753_v6, %v6752_v4 }
 0xf8a   : > { %v3326_v58 = vsel %vm2755_vm13, %v8592_v51, 0.0  ;;  %7169 = vmatpush3.bf16.msra.mxu0 %v3357_v17  ;;  %v6770_v17 = vld [vmem:[%s9338_s9 + $0x18] sm:$0xff] }
 0xf8b   : > { %3327 = vadd.xlane.f32.xlu1 %v3326_v58 }
0x1018   : > { %v3328_v59 = vpop.xlane.xlu1 %3327 }
0x1019   : > { %v3329_v60 = vmul.f32 0.0625, %v3328_v59 }
0x101b   : > { %v3330_v63 = vsub.f32 %v8592_v51, %v3329_v60 }
0x101d   : > { %v3331_v53 = vmul.f32 %v3330_v63, %v3330_v63 }
0x101f   : > { %v3332_v3 = vsel %vm2755_vm13, %v3331_v53, 0.0 }
0x1020   : > { %3333 = vadd.xlane.f32.xlu0 %v3332_v3 }
0x10ad   : > { %v3334_v8 = vpop.xlane.xlu0 %3333 }
0x10ae   : > { %v3335_v9 = vmul.f32 0.0625, %v3334_v8 }
0x10b0   : > { %v3336_v40 = vadd.f32 1e-05, %v3335_v9 }
0x10b2   : > { %7575 = vrsqrt.f32 %v3336_v40 }
0x10bc   : > { %v7576_v11 = vpop.eup %7575 }
0x10bd   : > { %v3338_v12 = vmul.f32 %v7576_v11, %v3330_v63 }
0x10bf   : > { %v3345_v14 = vmul.f32 %v6750_v22, %v3338_v12 }
0x10c1   : > { %v3352_v15 = vadd.f32 %v6751_v13, %v3345_v14 }
0x10c3   : > { %v3356_v16 = vpack.c.bf16 %v3352_v15, %v3352_v15 }
0x10c5   : > { %7171 = vmatmul.mubr.msk.bf16.vlgmr.msra.gmra.mrb[20].mxu0 %vm2795_vm2, %v3356_v16 }
0x10c6   : > { %7184 = vmatprep.mubr.msk.f32.mxu0 %vm1788_vm5, %v6769_v32  ;;  %v6774_v32 = vld [vmem:[%s9340_s17 + $0x20] sm:$0xff] }
0x1198   : > { %v3403_v25 = vpop.f32.mrb[20].mxu0 }
0x1199   : > { %v8612_v26 = vadd.f32 %v6755_v24, %v3403_v25  ;;  %v7172_v27 = vpop.f32.mrb[21].mxu0  ;;  %v6775_v24 = vld [vmem:[%s9340_s17 + $0x28] sm:$0xff] }
0x119a   : > { %v3406_v28 = vpop.f32.mrb[22].mxu0  ;;  %v3846_v25 = vpack.c.bf16 %v6775_v24, %v6774_v32 }
0x119b   : > { %3410 = vst.msk [vmem:[#allocation4 + $0x3] sm:$0x1f] %vm1745_vm3, %v8612_v26  ;;  %v7173_v30 = vpop.f32.mrb[23].mxu0  ;;  %v3828_v40 = vsub.f32 0.0, %v8612_v26  ;;  %v6776_v28 = vld [vmem:[%s9340_s17 + $0x30] sm:$0xff] }
0x119c   : > { %v6777_v30 = vld [vmem:[%s9340_s17 + $0x38] sm:$0xff] }
0x119d   : > { %v3829_v14 = vmul.f32 1.442695, %v3828_v40  ;;  %v3847_v31 = vpack.c.bf16 %v6777_v30, %v6776_v28 }
0x11a2   : > { %v3422_v37 = vld [vmem:[#allocation4] sm:$0x1f] }
0x11a3   : > { %v3429_v38 = vld [vmem:[#allocation4 + $0x1] sm:$0x1f]  ;;  %v3427_v41 = vmul.f32 %v3426_v33, %v3422_v37  ;;  %v6735_v33 = vld [vmem:[%s9346_s15] ss:$0 sm:$0xff]  ;;  %s9348_s15 = sld [smem:[#allocation46_spill]] }
0x11a4   : > { %v3436_v39 = vld [vmem:[#allocation4 + $0x2] sm:$0x1f]  ;;  %v3434_v43 = vmul.f32 %v3433_v35, %v3429_v38 }
0x11a5   : > { %5128 = vst.msk [vmem:[#allocation4] sm:$0x7] %vm2839_vm8, %v7827_v62  ;;  %v3428_v44 = vadd.f32 %v6759_v34, %v3427_v41  ;;  %v3443_v7 = vld [vmem:[#allocation4 + $0x3] sm:$0x1f]  ;;  %v3441_v47 = vmul.f32 %v3440_v42, %v3436_v39 }
0x11a6   : > { %v3448_v57 = vmul.f32 %v3447_v45, %v3443_v7 }
0x11a7   : > { %v3435_v46 = vadd.f32 %v3434_v43, %v3428_v44 }
0x11a9   : > { %v3442_v55 = vadd.f32 %v3441_v47, %v3435_v46  ;;  %s9349_s0 = smov %s9348_s15 }
0x11ab   : > { %v3449_v58 = vadd.f32 %v3448_v57, %v3442_v55 }
0x11ad   : > { %v3450_v59 = vsub.f32 0.0, %v3449_v58 }
0x11af   : > { %v3451_v60 = vmul.f32 1.442695, %v3450_v59 }
0x11b1   : > { %7577 = vpow2.f32 %v3451_v60 }
0x11bb   : > { %v7578_v63 = vpop.eup %7577 }
0x11bc   : > { %v3453_v53 = vadd.f32 1.0, %v7578_v63 }
0x11be   : > { %7579 = vrcp.f32 %v3453_v53 }
0x11bf   : > { %7581 = vpow2.f32 %v3829_v14 }
0x11c8   : > { %v7580_v3 = vpop.eup %7579 }
0x11c9   : > { %v8624_v4 = vmul.f32 %v7580_v3, %v3449_v58  ;;  %v7582_v15 = vpop.eup %7581 }
0x11ca   : > { %v3831_v16 = vadd.f32 1.0, %v7582_v15 }
0x11cb   : > { %7182 = vmatprep.subr.msk.mxu0 %vm1788_vm5, %v8624_v4  ;;  %v3462_v6 = vpack.c.bf16 %v8624_v4, %v8624_v4 }
0x11cc   : > { %7183 = vmatpush3.xpose.msk.msra.mxu0 %vm1788_vm5, %v8624_v4  ;;  %7583 = vrcp.f32 %v3831_v16 }
0x11cd   : > { %7179 = vmatmul.mubr.msk.bf16.vlgmr.msra.gmra.mrb[36].mxu1 %vm1788_vm5, %v3462_v6  ;;  %7195 = vmatprep.subr.bf16.mxu0 %v7827_v62 }
0x11ce   : > { %7191 = vmatprep.mubr.msk.bf16.mxu1 %vm7828_vm4, %v7827_v62  ;;  %7188 = vmatpush3.bf16.msra.mxu1 %v3846_v25  ;;  %v8682_v25 = vld [vmem:[%s9343_s29 + $0x1] sm:$0x1] }
0x11cf   : > { %7185 = vmatmul.mubr.msk.f32.vlgmr.msra.gmra.mrb[24].mxu0 %vm1788_vm5, %v6770_v17  ;;  %7189 = vmatprep.subr.bf16.mxu1 %v7827_v62 }
0x11d0   : > { %7197 = vmatprep.mubr.msk.bf16.mxu0 %vm7828_vm4, %v7827_v62 }
0x11d2   : > { %7190 = vmatpush3.bf16.msra.mxu1 %v3847_v31 }
0x11d3   : > { %7201 = vmatprep.subr.bf16.mxu1 %v7827_v62 }
0x11d6   : > { %v7584_v18 = vpop.eup %7583 }
0x11d7   : > { %v3834_v19 = vmul.f32 %v7584_v18, %v8612_v26  ;;  %v2743_v26 = vadd.f32 %v8513_v36, %v8409_v29  ;;  %v6767_v29 = vld [vmem:[%s9342_s25 + $0x8] sm:$0xff] }
0x11d9   : > { %v8663_v34 = vadd.f32 %v6735_v33, %v2743_v26  ;;  %v3649_v33 = vmul.f32 %v8682_v25, %v8624_v4 }
0x11db   : > { %v4034_v35 = vsel %vm1745_vm3, %v8663_v34, 0.0 }
0x12a0   : > { %v3510_v8 = vpop.f32.mrb[36].mxu1 }
0x12a1   : > { %v7180_v9 = vpop.f32.mrb[37].mxu1  ;;  %v3511_v21 = vadd.f32 %v6765_v20, %v3510_v8 }
0x12a2   : > { %v3513_v11 = vpop.f32.mrb[38].mxu1  ;;  %v7186_v22 = vpop.f32.mrb[24].mxu0 }
0x12a3   : > { %v7181_v12 = vpop.f32.mrb[39].mxu1  ;;  %3638 = vperm.xlu1 %7499, %v7186_v22   ;;  %v3608_v13 = vpop.f32.mrb[25].mxu0  ;;  %v3517_v54 = vand.u32 2147483647, %v3511_v21  ;;  %v3516_v42 = vmax.f32 %v3511_v21, 0.0 }
0x12a4   : > { %3627 = vperm.xlu0 %7498, %v3608_v13  }
0x12a5   : > { %v3518_v23 = vsub.f32 0.0, %v3517_v54 }
0x12a7   : > { %7500 = vset.pattern.permute.xlu1 %v7843_v48  ;;  %v3519_v27 = vmul.f32 1.442695, %v3518_v23 }
0x12a8   : > { %3671 = vperm.xlu1 %7500, %v7186_v22   ;;  %7507 = vset.pattern.permute.xlu0 %v7844_v49 }
0x12a9   : > { %3797 = vperm.xlu0 %7507, %v7186_v22   ;;  %7585 = vpow2.f32 %v3519_v27 }
0x12ac   : > { %7501 = vset.pattern.permute.xlu1 %v7845_v50 }
0x12ad   : > { %3727 = vperm.xlu1 %7501, %v7186_v22   ;;  %7509 = vset.pattern.permute.xlu0 %v7843_v48 }
0x12b1   : > { %7502 = vset.pattern.permute.xlu1 %v7843_v48 }
0x12b2   : > { %3661 = vperm.xlu1 %7502, %v3608_v13  }
0x12b3   : > { %v7586_v37 = vpop.eup %7585 }
0x12b4   : > { %v3521_v38 = vadd.f32 1.0, %v7586_v37 }
0x12b6   : > { %7503 = vset.pattern.permute.xlu1 %v7845_v50  ;;  %7587 = vlog2.f32 %v3521_v38 }
0x12b7   : > { %3717 = vperm.xlu1 %7503, %v3608_v13  }
0x12bb   : > { %7504 = vset.pattern.permute.xlu1 %v7846_v56 }
0x12bc   : > { %3752 = vperm.xlu1 %7504, %v3608_v13  }
0x12c0   : > { %7505 = vset.pattern.permute.xlu1 %v7844_v49  ;;  %v7588_v39 = vpop.eup %7587 }
0x12c1   : > { %3787 = vperm.xlu1 %7505, %v3608_v13   ;;  %v3523_v41 = vmul.f32 0.6931472, %v7588_v39 }
0x12c3   : > { %v3524_v44 = vadd.f32 %v3523_v41, %v3516_v42 }
0x12c5   : > { %7506 = vset.pattern.permute.xlu1 %v7846_v56  ;;  %v3620_v43 = vrot.slane %v3524_v44, %v8476_v61  ;;  %v3655_v7 = vrot.slane %v3524_v44, %v8480_v1  ;;  %v8671_v46 = vmul.f32 %v3524_v44, %v8624_v4  ;;  %v3711_v55 = vrot.slane %v3524_v44, %v8484_v2 }
0x12c6   : > { %3762 = vperm.xlu1 %7506, %v7186_v22   ;;  %v3746_v17 = vrot.slane %v3524_v44, %v8489_v5  ;;  %v3781_v12 = vrot.slane %v3524_v44, %v8546_v52  ;;  %v3688_v44 = vrot.slane %v8624_v4, %v8556_v10 }
0x12c7   : > { %v3621_v36 = vmul.f32 %v6767_v29, %v3620_v43  ;;  %v3656_v47 = vmul.f32 %v6767_v29, %v3655_v7  ;;  %v3633_v59 = vrot.slane %v8671_v46, %v8476_v61  ;;  %v3712_v53 = vmul.f32 %v6767_v29, %v3711_v55 }
0x12c8   : > { %v3747_v22 = vmul.f32 %v6767_v29, %v3746_v17  ;;  %v3667_v21 = vrot.slane %v8671_v46, %v8480_v1  ;;  %v3723_v37 = vrot.slane %v8671_v46, %v8484_v2  ;;  %v3689_v55 = vcombine.high %v3688_v44, %v3688_v44 }
0x12c9   : > { %v3622_v45 = vmul.f32 1.442695, %v3621_v36  ;;  %v3657_v63 = vmul.f32 1.442695, %v3656_v47  ;;  %v3713_v40 = vmul.f32 1.442695, %v3712_v53  ;;  %v3758_v47 = vrot.slane %v8671_v46, %v8489_v5 }
0x12ca   : > { %3836 = vrot.lane.b32.xlu1 %v3834_v19, %s9341_s21  ;;  %v3748_v16 = vmul.f32 1.442695, %v3747_v22  ;;  %v3782_v19 = vmul.f32 %v6767_v29, %v3781_v12  ;;  %v3696_v22 = vrot.slane %v3688_v44, %v8556_v10 }
0x12cb   : > { %7508 = vset.pattern.permute.xlu1 %v7826_v0  ;;  %7589 = vpow2.f32 %v3622_v45 }
0x12cc   : > { %7591 = vpow2.f32 %v3657_v63  ;;  %v3783_v24 = vmul.f32 1.442695, %v3782_v19 }
0x12cd   : > { %7593 = vpow2.f32 %v3713_v40 }
0x12ce   : > { %7595 = vpow2.f32 %v3748_v16 }
0x12cf   : > { %7597 = vpow2.f32 %v3783_v24 }
0x12d5   : > { %v7590_v57 = vpop.eup %7589 }
0x12d6   : > { %v3624_v3 = vmul.f32 0.0, %v7590_v57  ;;  %v7592_v54 = vpop.eup %7591 }
0x12d7   : > { %v7594_v26 = vpop.eup %7593 }
0x12d8   : > { %v7596_v7 = vpop.eup %7595 }
0x12ee   : > { %4035 = vadd.xlane.f32.xlu1 %v4034_v35 }
0x1322   : > { %v3639_v58 = vpop.permute.xlu1 %3638 }
0x1323   : > { %v3628_v60 = vpop.permute.xlu0 %3627 }
0x1324   : > { %v3634_v6 = vmul.f32 %v3633_v59, %v3628_v60 }
0x1326   : > { %v3635_v8 = vadd.f32 %v3634_v6, %v3624_v3 }
0x1327   : > { %v3672_v9 = vpop.permute.xlu1 %3671 }
0x1328   : > { %v3641_v11 = vmul.f32 %v3639_v58, %v3635_v8  ;;  %v3659_v27 = vmul.f32 %v7592_v54, %v3635_v8  ;;  %v7598_v8 = vpop.eup %7597  ;;  %v3798_v54 = vpop.permute.xlu0 %3797 }
0x132a   : > { %v3642_v13 = vsel %vm1788_vm5, %v3641_v11, 0.0  ;;  %v3793_v11 = vrot.slane %v8671_v46, %v8546_v52  ;;  %v3808_v46 = vcombine.high %v8624_v4, %v8624_v4 }
0x132b   : > { %v3643_v14 = vrot.slane %v3642_v13, 4 }
0x132c   : > { %v3728_v15 = vpop.permute.xlu1 %3727 }
0x132d   : > { %v3644_v18 = vadd.f32 %v3643_v14, %v3642_v13 }
0x132f   : > { %v3645_v20 = vrot.slane %v3644_v18, 2 }
0x1331   : > { %v3646_v23 = vadd.f32 %v3645_v20, %v3644_v18  ;;  %v3662_v32 = vpop.permute.xlu1 %3661 }
0x1332   : > { %v3668_v28 = vmul.f32 %v3667_v21, %v3662_v32 }
0x1333   : > { %v3647_v30 = vrot.slane %v3646_v23, 1 }
0x1334   : > { %v3669_v31 = vadd.f32 %v3668_v28, %v3659_v27 }
0x1335   : > { %v3648_v35 = vadd.f32 %v3647_v30, %v3646_v23  ;;  %v3738_v23 = vcombine.high %v3696_v22, %v3696_v22 }
0x1336   : > { %v3674_v38 = vmul.f32 %v3672_v9, %v3669_v31  ;;  %v3718_v39 = vpop.permute.xlu1 %3717  ;;  %v3715_v41 = vmul.f32 %v7594_v26, %v3669_v31  ;;  %v3703_v9 = vrot.slane %v3689_v55, %v8556_v10 }
0x1337   : > { %v3650_v42 = vadd.f32 %v3649_v33, %v3648_v35  ;;  %v3724_v43 = vmul.f32 %v3723_v37, %v3718_v39  ;;  %v3740_v33 = vmul.f32 %v8682_v25, %v3738_v23 }
0x1338   : > { %v3675_v29 = vsel %vm1788_vm5, %v3674_v38, 0.0  ;;  %v3705_v19 = vmul.f32 %v8682_v25, %v3703_v9 }
0x1339   : > { %3651 = vst.msk [vmem:[#allocation5] sm:$0x1] %vm1726_vm1, %v3650_v42  ;;  %v3676_v36 = vrot.slane %v3675_v29, 4  ;;  %v3725_v45 = vadd.f32 %v3724_v43, %v3715_v41  ;;  %v3815_v42 = vrot.slane %v3808_v46, %v8556_v10  ;;  %v6787_v46 = vld [vmem:[%s9304_s14 + $0x1] ss:$0 sm:$0xff]  ;;  %s9354_s14 = smov 120  }
0x133b   : > { %v3677_v57 = vadd.f32 %v3676_v36, %v3675_v29  ;;  %v3730_v58 = vmul.f32 %v3728_v15, %v3725_v45  ;;  %v3753_v59 = vpop.permute.xlu1 %3752  ;;  %v3750_v60 = vmul.f32 %v7596_v7, %v3725_v45  ;;  %v3822_v36 = vrot.slane %v3815_v42, %v8556_v10 }
0x133c   : > { %v3759_v63 = vmul.f32 %v3758_v47, %v3753_v59  ;;  %v3773_v7 = vcombine.high %v3703_v9, %v3703_v9 }
0x133d   : > { %v3678_v53 = vrot.slane %v3677_v57, 2  ;;  %v3731_v3 = vsel %vm1788_vm5, %v3730_v58, 0.0  ;;  %v3824_v58 = vmul.f32 %v8682_v25, %v3822_v36  ;;  %v3973_v36 = vld [vmem:[%s9350_s20 + $0x10] sm:$0xff] }
0x133e   : > { %v3732_v6 = vrot.slane %v3731_v3, 4  ;;  %v3760_v17 = vadd.f32 %v3759_v63, %v3750_v60  ;;  %v3775_v60 = vmul.f32 %v8682_v25, %v3773_v7 }
0x133f   : > { %v3679_v40 = vadd.f32 %v3678_v53, %v3677_v57 }
0x1340   : > { %v3733_v12 = vadd.f32 %v3732_v6, %v3731_v3  ;;  %v3788_v13 = vpop.permute.xlu1 %3787  ;;  %v3785_v14 = vmul.f32 %v7598_v8, %v3760_v17 }
0x1341   : > { %v3680_v15 = vrot.slane %v3679_v40, 1  ;;  %v3794_v16 = vmul.f32 %v3793_v11, %v3788_v13  ;;  %v3899_v13 = vld [vmem:[%s9348_s15] sm:$0xff]  ;;  %s9351_s15 = sld [smem:[#allocation47_spill]] }
0x1342   : > { %v3734_v18 = vrot.slane %v3733_v12, 2 }
0x1343   : > { %v3681_v20 = vadd.f32 %v3680_v15, %v3679_v40  ;;  %v3795_v21 = vadd.f32 %v3794_v16, %v3785_v14  ;;  %v3900_v14 = vld [vmem:[%s9349_s0 + $0x8] sm:$0xff]  ;;  %v3971_v16 = vld [vmem:[%s9350_s20] sm:$0xff] }
0x1344   : > { %v3735_v32 = vadd.f32 %v3734_v18, %v3733_v12  ;;  %v3902_v15 = vpack.c.bf16 %v3900_v14, %v3899_v13  ;;  %v3972_v18 = vld [vmem:[%s9350_s20 + $0x8] sm:$0xff] }
0x1345   : > { %v3706_v24 = vadd.f32 %v3705_v19, %v3681_v20  ;;  %v3800_v27 = vmul.f32 %v3798_v54, %v3795_v21  ;;  %v3763_v28 = vpop.permute.xlu1 %3762  ;;  %v3976_v19 = vpack.c.bf16 %v3972_v18, %v3971_v16 }
0x1346   : > { %v3736_v30 = vrot.slane %v3735_v32, 1  ;;  %v3765_v31 = vmul.f32 %v3763_v28, %v3760_v17  ;;  %7196 = vmatpush3.bf16.msra.mxu0 %v3902_v15  ;;  %v6790_v28 = vld [vmem:[%s9302_s24 + $0x28] sm:$0xff] }
0x1347   : > { %3707 = vst.msk [vmem:[#allocation5 + $0x1] sm:$0x1] %vm1726_vm1, %v3706_v24  ;;  %v3801_v26 = vsel %vm1788_vm5, %v3800_v27, 0.0  ;;  %7209 = vmatprep.subr.bf16.mxu0 %v7827_v62  ;;  %v6789_v27 = vld [vmem:[%s9302_s24 + $0x20] sm:$0xff]  ;;  %s9352_s12 = smov %s9351_s15 }
0x1348   : > { %v3737_v35 = vadd.f32 %v3736_v30, %v3735_v32  ;;  %v3802_v37 = vrot.slane %v3801_v26, 4  ;;  %v3766_v38 = vsel %vm1788_vm5, %v3765_v31, 0.0  ;;  %v6779_v32 = vld [vmem:[%s9345_s4 + $0x1] ss:$0 sm:$0xff] }
0x1349   : > { %v3767_v39 = vrot.slane %v3766_v38, 4  ;;  %v3837_v6 = vpop.permute.xlu1 %3836 }
0x134a   : > { %v3741_v41 = vadd.f32 %v3740_v33, %v3737_v35  ;;  %v3803_v44 = vadd.f32 %v3802_v37, %v3801_v26  ;;  %v4067_v35 = vpack.c.bf16 %v6790_v28, %v6789_v27 }
0x134b   : > { %v3768_v43 = vadd.f32 %v3767_v39, %v3766_v38  ;;  %v6791_v39 = vld [vmem:[%s9302_s24 + $0x30] sm:$0xff] }
0x134c   : > { %3742 = vst.msk [vmem:[#allocation5 + $0x2] sm:$0x1] %vm1726_vm1, %v3741_v41  ;;  %v3804_v4 = vrot.slane %v3803_v44, 2  ;;  %v6792_v41 = vld [vmem:[%s9302_s24 + $0x38] sm:$0xff]  ;;  %s9356_s24 = smov 112  }
0x134d   : > { %v3769_v29 = vrot.slane %v3768_v43, 2 }
0x134e   : > { %v3805_v45 = vadd.f32 %v3804_v4, %v3803_v44  ;;  %v6788_v44 = vld [vmem:[%s9303_s19 + $0x1] ss:$0 sm:$0xff]  ;;  %s9355_s19 = smov 80  }
0x134f   : > { %v3770_v47 = vadd.f32 %v3769_v29, %v3768_v43  ;;  %v4068_v43 = vpack.c.bf16 %v6792_v41, %v6791_v39 }
0x1350   : > { %v3806_v55 = vrot.slane %v3805_v45, 1 }
0x1351   : > { %v3771_v57 = vrot.slane %v3770_v47, 1 }
0x1352   : > { %v3807_v59 = vadd.f32 %v3806_v55, %v3805_v45  ;;  %v3974_v45 = vld [vmem:[%s9350_s20 + $0x18] sm:$0xff] }
0x1353   : > { %v3772_v63 = vadd.f32 %v3771_v57, %v3770_v47  ;;  %v3977_v7 = vpack.c.bf16 %v3974_v45, %v3973_v36  ;;  %v6781_v47 = vld [vmem:[%s9351_s15] ss:$0 sm:$0xff]  ;;  %s9353_s15 = smov 88  }
0x1354   : > { %v3825_v53 = vadd.f32 %v3824_v58, %v3807_v59 }
0x1355   : > { %v3776_v3 = vadd.f32 %v3775_v60, %v3772_v63 }
0x1356   : > { %3826 = vst.msk [vmem:[#allocation5 + $0x4] sm:$0x1] %vm1726_vm1, %v3825_v53  ;;  %v6794_v53 = vld [vmem:[%s9301_s30 + $0x1] ss:$0 sm:$0xff]  ;;  %s9357_s30 = smov 72  }
0x1357   : > { %3777 = vst.msk [vmem:[#allocation5 + $0x3] sm:$0x1] %vm1726_vm1, %v3776_v3 }
0x135e   : > { %v3827_v17 = vld [vmem:[#allocation5] sm:$0x1f] }
0x135f   : > { %v3839_v8 = vmul.f32 %v3837_v6, %v3827_v17 }
0x1361   : > { %v3845_v9 = vpack.c.bf16 %v3839_v8, %v3839_v8 }
0x1363   : > { %7192 = vmatmul.mubr.msk.bf16.vlgmr.msra.gmra.mrb[40].mxu1 %vm1788_vm5, %v3845_v9 }
0x1364   : > { %7205 = vmatprep.mubr.msk.bf16.mxu1 %vm7828_vm4, %v7827_v62  ;;  %7202 = vmatpush3.bf16.msra.mxu1 %v3976_v19 }
0x1365   : > { %7203 = vmatprep.subr.bf16.mxu1 %v7827_v62 }
0x1368   : > { %7204 = vmatpush3.bf16.msra.mxu1 %v3977_v7 }
0x1369   : > { %7217 = vmatprep.subr.mxu1 %v7827_v62 }
0x137b   : > { %v4036_v25 = vpop.xlane.xlu1 %4035 }
0x137c   : > { %v4037_v40 = vmul.f32 0.03125, %v4036_v25 }
0x137e   : > { %v4038_v11 = vsub.f32 %v8663_v34, %v4037_v40 }
0x1380   : > { %v4039_v22 = vmul.f32 %v4038_v11, %v4038_v11 }
0x1382   : > { %v4040_v12 = vsel %vm1745_vm3, %v4039_v22, 0.0 }
0x1383   : > { %4041 = vadd.xlane.f32.xlu0 %v4040_v12 }
0x1410   : > { %v4042_v20 = vpop.xlane.xlu0 %4041 }
0x1411   : > { %v4043_v21 = vmul.f32 0.03125, %v4042_v20 }
0x1413   : > { %v4044_v54 = vadd.f32 1e-05, %v4043_v21 }
0x1415   : > { %7599 = vrsqrt.f32 %v4044_v54 }
0x141f   : > { %v7600_v23 = vpop.eup %7599 }
0x1420   : > { %v4046_v24 = vmul.f32 %v7600_v23, %v4038_v11 }
0x1422   : > { %v4053_v42 = vmul.f32 %v6787_v46, %v4046_v24 }
0x1424   : > { %v4060_v4 = vadd.f32 %v6788_v44, %v4053_v42 }
0x1426   : > { %v4066_v29 = vpack.c.bf16 %v4060_v4, %v4060_v4 }
0x1436   : > { %v3893_v30 = vpop.f32.mrb[40].mxu1 }
0x1437   : > { %v8728_v31 = vadd.f32 %v6779_v32, %v3893_v30  ;;  %v7193_v26 = vpop.f32.mrb[41].mxu1 }
0x1438   : > { %v3896_v33 = vpop.f32.mrb[42].mxu1 }
0x1439   : > { %v3901_v37 = vpack.c.bf16 %v8728_v31, %v8728_v31  ;;  %v7194_v38 = vpop.f32.mrb[43].mxu1 }
0x143b   : > { %7198 = vmatmul.mubr.msk.bf16.vlgmr.msra.gmra.mrb[28].mxu0 %vm2795_vm2, %v3901_v37 }
0x143c   : > { %7210 = vmatpush3.bf16.msra.mxu0 %v4067_v35  ;;  %7213 = vmatprep.mubr.msk.bf16.mxu0 %vm7828_vm4, %v7827_v62 }
0x143d   : > { %7211 = vmatprep.subr.bf16.mxu0 %v7827_v62 }
0x1440   : > { %7212 = vmatpush3.bf16.msra.mxu0 %v4068_v43 }
0x1441   : > { %7222 = vmatprep.subr.mxu0 %v7827_v62 }
0x1443   : > { %7214 = vmatmul.mubr.msk.bf16.vlgmr.msra.gmra.mrb[32].mxu0 %vm1788_vm5, %v4066_v29 }
0x1444   : > { %7224 = vmatprep.mubr.msk.f32.mxu0 %vm7828_vm4, %v7827_v62 }
0x150e   : > { %v3947_v55 = vpop.f32.mrb[28].mxu0 }
0x150f   : > { %v8747_v57 = vadd.f32 %v6781_v47, %v3947_v55  ;;  %v7199_v58 = vpop.f32.mrb[29].mxu0 }
0x1510   : > { %v3950_v59 = vpop.f32.mrb[30].mxu0 }
0x1511   : > { %v3975_v60 = vpack.c.bf16 %v8747_v57, %v8747_v57  ;;  %v7200_v63 = vpop.f32.mrb[31].mxu0 }
0x1513   : > { %7206 = vmatmul.mubr.msk.bf16.vlgmr.msra.gmra.mrb[44].mxu1 %vm1788_vm5, %v3975_v60 }
0x1514   : > { %7219 = vmatprep.mubr.msk.f32.mxu1 %vm7828_vm4, %v7827_v62 }
0x1516   : > { %v4114_v3 = vpop.f32.mrb[32].mxu0 }
0x1517   : > { %v8755_v6 = vadd.f32 %v6794_v53, %v4114_v3  ;;  %v7215_v17 = vpop.f32.mrb[33].mxu0 }
0x1518   : > { %v4117_v8 = vpop.f32.mrb[34].mxu0 }
0x1519   : > { %4289 = vrot.lane.b32.xlu1 %v8755_v6, %s9353_s15  ;;  %4121 = vrot.lane.b32.xlu0 %v8755_v6, %s9341_s21  ;;  %v7216_v9 = vpop.f32.mrb[35].mxu0  ;;  %s9364_s15 = smov 16  }
0x151d   : > { %4287 = vrot.lane.b32.xlu1 %v8755_v6, %s9354_s14  ;;  %4461 = vrot.lane.b32.xlu0 %v8755_v6, %s9355_s19  ;;  %s9359_s14 = smov 56   ;;  %s9360_s19 = smov 48  }
0x1521   : > { %4459 = vrot.lane.b32.xlu1 %v8755_v6, %s9356_s24  ;;  %4633 = vrot.lane.b32.xlu0 %v8755_v6, %s9357_s30  ;;  %s9361_s24 = smov 64   ;;  %s9362_s30 = smov 40  }
0x1525   : > { %4631 = vrot.lane.b32.xlu1 %v8755_v6, %s9358_s16  ;;  %s9363_s16 = smov 8  }
0x158b   : > { %v4290_v25 = vpop.permute.xlu1 %4289  ;;  %v4122_v40 = vpop.permute.xlu0 %4121 }
0x158c   : > { %7218 = vmatpush3.xpose.msk.msra.mxu1 %vm1835_vm6, %v4122_v40 }
0x158d   : > { %7227 = vmatprep.subr.mxu1 %v7827_v62 }
0x158f   : > { %v4288_v11 = vpop.permute.xlu1 %4287  ;;  %7220 = vmatmul.mubr.msk.f32.vlgmr.msra.gmra.mrb[30].mxu1 %vm1835_vm6, %v8755_v6  ;;  %v4462_v22 = vpop.permute.xlu0 %4461 }
0x1590   : > { %7228 = vmatpush3.xpose.msk.msra.mxu1 %vm1835_vm6, %v4290_v25  ;;  %7229 = vmatprep.mubr.msk.f32.mxu1 %vm7828_vm4, %v7827_v62 }
0x1591   : > { %7237 = vmatprep.subr.mxu1 %v7827_v62 }
0x1593   : > { %7230 = vmatmul.mubr.msk.f32.vlgmr.msra.gmra.mrb[48].mxu1 %vm1835_vm6, %v4288_v11  ;;  %v4460_v12 = vpop.permute.xlu1 %4459  ;;  %v4634_v13 = vpop.permute.xlu0 %4633 }
0x1594   : > { %7238 = vmatpush3.xpose.msk.msra.mxu1 %vm1835_vm6, %v4462_v22  ;;  %7239 = vmatprep.mubr.msk.f32.mxu1 %vm7828_vm4, %v7827_v62 }
0x1595   : > { %7247 = vmatprep.subr.mxu1 %v7827_v62 }
0x1597   : > { %7240 = vmatmul.mubr.msk.f32.vlgmr.msra.gmra.mrb[50].mxu1 %vm1835_vm6, %v4460_v12  ;;  %v4632_v14 = vpop.permute.xlu1 %4631 }
0x1598   : > { %7248 = vmatpush3.xpose.msk.msra.mxu1 %vm1835_vm6, %v4634_v13  ;;  %7249 = vmatprep.mubr.msk.f32.mxu1 %vm7828_vm4, %v7827_v62 }
0x1599   : > { %7257 = vmatprep.subr.bf16.mxu1 %v7827_v62 }
0x159b   : > { %7250 = vmatmul.mubr.msk.f32.vlgmr.msra.gmra.mrb[52].mxu1 %vm1835_vm6, %v4632_v14  ;;  %vm6342_vm6 = vcmask 1042432  }
0x159c   : > { %7261 = vmatprep.mubr.msk.bf16.mxu1 %vm7828_vm4, %v7827_v62 }
0x15e6   : > { %v8792_v15 = vpop.f32.mrb[44].mxu1 }
0x15e7   : > { %v7207_v16 = vpop.f32.mrb[45].mxu1 }
0x15e8   : > { %v4018_v18 = vpop.f32.mrb[46].mxu1 }
0x15e9   : > { %v7208_v19 = vpop.f32.mrb[47].mxu1 }
0x1662   : > { %v4193_v20 = vpop.f32.mrb[30].mxu1 }
0x1663   : > { %v4197_v21 = vmul.f32 0.35355338, %v4193_v20  ;;  %v7221_v54 = vpop.f32.mrb[31].mxu1 }
0x1665   : > { %v4198_v23 = vsel %vm1911_vm10, %v4197_v21, -inf }
0x1666   : > { %4199 = vmax.xlane.f32.xlu0 %v4198_v23  ;;  %v4361_v32 = vpop.f32.mrb[48].mxu1 }
0x1667   : > { %v4365_v24 = vmul.f32 0.35355338, %v4361_v32  ;;  %v7231_v27 = vpop.f32.mrb[49].mxu1 }
0x1669   : > { %v4366_v28 = vsel %vm1911_vm10, %v4365_v24, -inf }
0x166a   : > { %4367 = vmax.xlane.f32.xlu1 %v4366_v28  ;;  %v4533_v30 = vpop.f32.mrb[50].mxu1 }
0x166b   : > { %v4537_v46 = vmul.f32 0.35355338, %v4533_v30  ;;  %v7241_v26 = vpop.f32.mrb[51].mxu1 }
0x166d   : > { %v4538_v33 = vsel %vm1911_vm10, %v4537_v46, -inf }
0x166e   : > { %4539 = vmax.xlane.f32.xlu0 %v4538_v33  ;;  %v4705_v35 = vpop.f32.mrb[52].mxu1  ;;  %v6812_v33 = vld [vmem:[%s7925_s6 + $0x20] sm:$0xff] }
0x166f   : > { %v4709_v37 = vmul.f32 0.35355338, %v4705_v35  ;;  %v7251_v38 = vpop.f32.mrb[53].mxu1  ;;  %v6813_v35 = vld [vmem:[%s7925_s6 + $0x28] sm:$0xff] }
0x1670   : > { %v4810_v38 = vpack.c.bf16 %v6813_v35, %v6812_v33  ;;  %v6822_v35 = vld [vmem:[%s9328_s11 + $0x1] ss:$0 sm:$0xff] }
0x1671   : > { %v4710_v39 = vsel %vm1911_vm10, %v4709_v37, -inf }
0x1672   : > { %4711 = vmax.xlane.f32.xlu0 %v4710_v39  ;;  %v6815_v39 = vld [vmem:[%s7925_s6 + $0x38] sm:$0xff]  ;;  %7258 = vmatpush3.bf16.msra.mxu1 %v4810_v38  ;;  %v6852_v38 = vld [vmem:[%s9329_s22 + $0x20] sm:$0xff] }
0x1673   : > { %7259 = vmatprep.subr.bf16.mxu1 %v7827_v62 }
0x16f3   : > { %v4200_v41 = vpop.xlane.xlu0 %4199 }
0x16f4   : > { %v4201_v42 = vsub.f32 %v4197_v21, %v4200_v41 }
0x16f6   : > { %v4202_v44 = vmul.f32 1.442695, %v4201_v42 }
0x16f7   : > { %v4368_v43 = vpop.xlane.xlu1 %4367 }
0x16f8   : > { %7601 = vpow2.f32 %v4202_v44  ;;  %v4369_v4 = vsub.f32 %v4365_v24, %v4368_v43  ;;  %v4021_v43 = vadd.f32 %v8792_v15, %v8728_v31 }
0x16fa   : > { %v4370_v29 = vmul.f32 1.442695, %v4369_v4 }
0x16fb   : > { %v4540_v36 = vpop.xlane.xlu0 %4539 }
0x16fc   : > { %7603 = vpow2.f32 %v4370_v29  ;;  %v4541_v45 = vsub.f32 %v4537_v46, %v4540_v36 }
0x16fe   : > { %v4542_v7 = vmul.f32 1.442695, %v4541_v45 }
0x16ff   : > { %v4712_v53 = vpop.xlane.xlu0 %4711 }
0x1700   : > { %7605 = vpow2.f32 %v4542_v7  ;;  %v4713_v3 = vsub.f32 %v4709_v37, %v4712_v53  ;;  %v6814_v37 = vld [vmem:[%s7925_s6 + $0x30] sm:$0xff] }
0x1701   : > { %v4811_v41 = vpack.c.bf16 %v6815_v39, %v6814_v37  ;;  %v6853_v39 = vld [vmem:[%s9329_s22 + $0x28] sm:$0xff] }
0x1702   : > { %v7602_v47 = vpop.eup %7601  ;;  %v4714_v17 = vmul.f32 1.442695, %v4713_v3 }
0x1703   : > { %v4204_v55 = vsel %vm1911_vm10, %v7602_v47, 0.0  ;;  %7260 = vmatpush3.bf16.msra.mxu1 %v4811_v41 }
0x1704   : > { %4205 = vadd.xlane.f32.xlu0 %v4204_v55  ;;  %7607 = vpow2.f32 %v4714_v17  ;;  %7273 = vmatprep.subr.bf16.mxu1 %v7827_v62 }
0x1706   : > { %v7604_v58 = vpop.eup %7603 }
0x1707   : > { %v4372_v59 = vsel %vm1911_vm10, %v7604_v58, 0.0 }
0x1708   : > { %4373 = vadd.xlane.f32.xlu1 %v4372_v59 }
0x170a   : > { %v7606_v60 = vpop.eup %7605 }
0x170b   : > { %v4544_v63 = vsel %vm1911_vm10, %v7606_v60, 0.0 }
0x170c   : > { %4545 = vadd.xlane.f32.xlu0 %v4544_v63 }
0x170e   : > { %v7608_v8 = vpop.eup %7607 }
0x170f   : > { %v4716_v9 = vsel %vm1911_vm10, %v7608_v8, 0.0  ;;  %vm6495_vm10 = vcmask 5120  }
0x1719   : > { %4377 = vrot.lane.b32.xlu1 %v8755_v6, %s9359_s14  ;;  %s9365_s14 = sld [smem:[#allocation49_spill]] }
0x171d   : > { %4549 = vrot.lane.b32.xlu1 %v8755_v6, %s9360_s19  ;;  %s9366_s19 = smov 24  }
0x171f   : > { %v6784_v4 = vld [vmem:[%s9365_s14] ss:$0 sm:$0xff] }
0x1720   : > { %v4029_v29 = vadd.f32 %v6784_v4, %v4021_v43  ;;  %v5076_v4 = vpack.c.bf16 %v6853_v39, %v6852_v38 }
0x1722   : > { %4209 = vrot.lane.b32.xlu0 %v8755_v6, %s9361_s24  ;;  %v8844_v36 = vadd.f32 %v4029_v29, %v8592_v51  ;;  %s9368_s24 = sld [smem:[#allocation50_spill]] }
0x1724   : > { %v5045_v45 = vsel %vm2755_vm13, %v8844_v36, 0.0 }
0x1741   : > { %4717 = vadd.xlane.f32.xlu1 %v4716_v9 }
0x1752   : > { %4721 = vrot.lane.b32.xlu1 %v8755_v6, %s9362_s30  ;;  %s9369_s30 = sld [smem:[#allocation53_spill]] }
0x1791   : > { %v4206_v25 = vpop.xlane.xlu0 %4205 }
0x1792   : > { %7609 = vrcp.f32 %v4206_v25 }
0x1795   : > { %v4374_v40 = vpop.xlane.xlu1 %4373 }
0x1796   : > { %7611 = vrcp.f32 %v4374_v40 }
0x1799   : > { %v4546_v11 = vpop.xlane.xlu0 %4545  ;;  %v4378_v13 = vpop.permute.xlu1 %4377 }
0x179a   : > { %7613 = vrcp.f32 %v4546_v11 }
0x179c   : > { %v7610_v22 = vpop.eup %7609 }
0x179d   : > { %v4208_v12 = vmul.f32 %v7610_v22, %v7602_v47  ;;  %v4210_v14 = vpop.permute.xlu0 %4209  ;;  %v4550_v18 = vpop.permute.xlu1 %4549 }
0x179e   : > { %7223 = vmatpush3.msk.msra.mxu0 %vm1929_vm7, %v4210_v14 }
0x179f   : > { %7225 = vmatmul.mubr.msk.f32.vlgmr.msra.gmra.mrb[26].mxu0 %vm1925_vm11, %v4208_v12  ;;  %7232 = vmatprep.subr.mxu0 %v7827_v62 }
0x17a0   : > { %v7612_v16 = vpop.eup %7611  ;;  %7233 = vmatpush3.msk.msra.mxu0 %vm1929_vm7, %v4378_v13  ;;  %7234 = vmatprep.mubr.msk.f32.mxu0 %vm7828_vm4, %v7827_v62 }
0x17a1   : > { %v4376_v6 = vmul.f32 %v7612_v16, %v7604_v58  ;;  %7242 = vmatprep.subr.mxu0 %v7827_v62  ;;  %v6818_v58 = vld [vmem:[%s9325_s1 + $0x1] ss:$0 sm:$0xff] }
0x17a3   : > { %7235 = vmatmul.mubr.msk.f32.vlgmr.msra.gmra.mrb[36].mxu0 %vm1925_vm11, %v4376_v6  ;;  %v6823_v6 = vld [vmem:[%s9326_s26 + $0x20] sm:$0xff] }
0x17a4   : > { %v7614_v19 = vpop.eup %7613  ;;  %7243 = vmatpush3.msk.msra.mxu0 %vm1929_vm7, %v4550_v18  ;;  %7244 = vmatprep.mubr.msk.f32.mxu0 %vm7828_vm4, %v7827_v62  ;;  %v6824_v18 = vld [vmem:[%s9326_s26 + $0x28] sm:$0xff] }
0x17a5   : > { %v4548_v20 = vmul.f32 %v7614_v19, %v7606_v60  ;;  %7252 = vmatprep.subr.mxu0 %v7827_v62  ;;  %v4902_v19 = vpack.c.bf16 %v6824_v18, %v6823_v6  ;;  %v6843_v6 = vld [vmem:[%s9332_s23 + $0xe8] sm:$0xff] }
0x17a7   : > { %7245 = vmatmul.mubr.msk.f32.vlgmr.msra.gmra.mrb[38].mxu0 %vm1925_vm11, %v4548_v20  ;;  %v6825_v20 = vld [vmem:[%s9326_s26 + $0x30] sm:$0xff] }
0x17a8   : > { %7254 = vmatprep.mubr.msk.f32.mxu0 %vm7828_vm4, %v7827_v62 }
0x17ce   : > { %v4718_v21 = vpop.xlane.xlu1 %4717 }
0x17cf   : > { %7615 = vrcp.f32 %v4718_v21  ;;  %v6826_v21 = vld [vmem:[%s9326_s26 + $0x38] sm:$0xff] }
0x17d2   : > { %v4722_v54 = vpop.permute.xlu1 %4721 }
0x17d3   : > { %7253 = vmatpush3.msk.msra.mxu0 %vm1929_vm7, %v4722_v54  ;;  %v4903_v54 = vpack.c.bf16 %v6826_v21, %v6825_v20  ;;  %v6845_v20 = vld [vmem:[%s9332_s23 + $0xf8] sm:$0xff]  ;;  %vm6445_vm7 = vcmask 259072  }
0x17d4   : > { %7265 = vmatprep.subr.bf16.mxu0 %v7827_v62 }
0x17d9   : > { %v7616_v23 = vpop.eup %7615 }
0x17da   : > { %v4720_v32 = vmul.f32 %v7616_v23, %v7608_v8 }
0x17dc   : > { %7255 = vmatmul.mubr.msk.f32.vlgmr.msra.gmra.mrb[40].mxu0 %vm1925_vm11, %v4720_v32 }
0x17dd   : > { %7269 = vmatprep.mubr.msk.bf16.mxu0 %vm7828_vm4, %v7827_v62  ;;  %7266 = vmatpush3.bf16.msra.mxu0 %v4902_v19  ;;  %v6844_v19 = vld [vmem:[%s9332_s23 + $0xf0] sm:$0xff] }
0x17de   : > { %7267 = vmatprep.subr.bf16.mxu0 %v7827_v62  ;;  %v4989_v21 = vpack.c.bf16 %v6845_v20, %v6844_v19 }
0x17e1   : > { %7268 = vmatpush3.bf16.msra.mxu0 %v4903_v54  ;;  %v6860_v54 = vld [vmem:[%s9333_s10 + $0x40] sm:$0xff] }
0x17e2   : > { %7293 = vmatprep.subr.bf16.mxu0 %v7827_v62 }
0x1872   : > { %v4282_v24 = vpop.f32.mrb[26].mxu0 }
0x1873   : > { %4286 = vst.msk [vmem:[#allocation2] sm:$0x1f] %vm2002_vm12, %v4282_v24  ;;  %v7226_v27 = vpop.f32.mrb[27].mxu0 }
0x1876   : > { %v4450_v28 = vpop.f32.mrb[36].mxu0 }
0x1877   : > { %4455 = vrot.lane.b32.xlu0 %v4450_v28, %s9363_s16  ;;  %v7236_v30 = vpop.f32.mrb[37].mxu0  ;;  %s9370_s16 = sld [smem:[#allocation58_spill]] }
0x187a   : > { %v4622_v46 = vpop.f32.mrb[38].mxu0 }
0x187b   : > { %4627 = vrot.lane.b32.xlu1 %v4622_v46, %s9364_s15  ;;  %v7246_v26 = vpop.f32.mrb[39].mxu0  ;;  %s9249_s15 = smov 126  }
0x187c   : > { %v6821_v26 = vld [vmem:[%s9327_s18 + $0x1] ss:$0 sm:$0xff] }
0x18af   : > { %v4794_v42 = vpop.f32.mrb[40].mxu0 }
0x18b0   : > { %4799 = vrot.lane.b32.xlu0 %v4794_v42, %s9366_s19  ;;  %v7256_v44 = vpop.f32.mrb[41].mxu0  ;;  %v6850_v42 = vld [vmem:[%s9330_s7 + $0x2] ss:$0 sm:$0xff]  ;;  %s9248_s19 = smov 125  }
0x18cf   : > { %5046 = vadd.xlane.f32.xlu0 %v5045_v45 }
0x18e9   : > { %v4456_v7 = vpop.permute.xlu0 %4455 }
0x18ea   : > { %4458 = vst.msk [vmem:[#allocation2] sm:$0x1f] %vm2175_vm14, %v4456_v7  ;;  %v6851_v7 = vld [vmem:[%s9331_s28 + $0x2] ss:$0 sm:$0xff] }
0x18ed   : > { %v4628_v47 = vpop.permute.xlu1 %4627 }
0x18ee   : > { %4630 = vst.msk [vmem:[#allocation2] sm:$0x1f] %vm2348_vm15, %v4628_v47 }
0x1922   : > { %v4800_v55 = vpop.permute.xlu0 %4799 }
0x1923   : > { %4802 = vst.msk [vmem:[#allocation2] sm:$0x1f] %vm2521_vm0, %v4800_v55 }
0x192a   : > { %v4803_v31 = vld [vmem:[#allocation2] sm:$0x1f] }
0x192b   : > { %v4809_v15 = vpack.c.bf16 %v4803_v31, %v4803_v31  ;;  %v6830_v31 = vld [vmem:[%s9332_s23 + $0x80] sm:$0xff] }
0x192d   : > { %7262 = vmatmul.mubr.msk.bf16.vlgmr.msra.gmra.mrb[56].mxu1 %vm1788_vm5, %v4809_v15  ;;  %v6831_v15 = vld [vmem:[%s9332_s23 + $0x88] sm:$0xff] }
0x192e   : > { %7289 = vmatprep.mubr.msk.bf16.mxu1 %vm7828_vm4, %v7827_v62 }
0x195c   : > { %v5047_v8 = vpop.xlane.xlu0 %5046 }
0x195d   : > { %v5048_v9 = vmul.f32 0.0625, %v5047_v8  ;;  %v6836_v8 = vld [vmem:[%s9332_s23 + $0xb0] sm:$0xff] }
0x195f   : > { %v5049_v11 = vsub.f32 %v8844_v36, %v5048_v9  ;;  %v6837_v9 = vld [vmem:[%s9332_s23 + $0xb8] sm:$0xff] }
0x1961   : > { %v5050_v14 = vmul.f32 %v5049_v11, %v5049_v11 }
0x1963   : > { %v5051_v16 = vsel %vm2755_vm13, %v5050_v14, 0.0 }
0x1a00   : > { %v4849_v51 = vpop.f32.mrb[56].mxu1 }
0x1a01   : > { %v4855_v59 = vadd.f32 %v4849_v51, %v8663_v34  ;;  %v7263_v60 = vpop.f32.mrb[57].mxu1  ;;  %v4982_v51 = vpack.c.bf16 %v6831_v15, %v6830_v31  ;;  %v6859_v15 = vld [vmem:[%s9337_s8 + $0x2] ss:$0 sm:$0xff] }
0x1a02   : > { %v4852_v63 = vpop.f32.mrb[58].mxu1 }
0x1a03   : > { %v8856_v53 = vadd.f32 %v6818_v58, %v4855_v59  ;;  %v7264_v3 = vpop.f32.mrb[59].mxu1  ;;  %7274 = vmatpush3.bf16.msra.mxu1 %v4982_v51  ;;  %v6832_v58 = vld [vmem:[%s9332_s23 + $0x90] sm:$0xff]  ;;  %v6833_v59 = vld [vmem:[%s9332_s23 + $0x98] sm:$0xff]  ;;  %v6834_v63 = vld [vmem:[%s9332_s23 + $0xa0] sm:$0xff] }
0x1a04   : > { %7275 = vmatprep.subr.bf16.mxu1 %v7827_v62  ;;  %v4983_v60 = vpack.c.bf16 %v6833_v59, %v6832_v58  ;;  %v6835_v3 = vld [vmem:[%s9332_s23 + $0xa8] sm:$0xff] }
0x1a05   : > { %v4869_v17 = vsel %vm1745_vm3, %v8856_v53, 0.0 }
0x1a06   : > { %4870 = vadd.xlane.f32.xlu1 %v4869_v17  ;;  %v4984_v17 = vpack.c.bf16 %v6835_v3, %v6834_v63 }
0x1a07   : > { %7276 = vmatpush3.bf16.msra.mxu1 %v4983_v60 }
0x1a08   : > { %7277 = vmatprep.subr.bf16.mxu1 %v7827_v62 }
0x1a0b   : > { %7278 = vmatpush3.bf16.msra.mxu1 %v4984_v17 }
0x1a0c   : > { %7279 = vmatprep.subr.bf16.mxu1 %v7827_v62 }
0x1a93   : > { %v4871_v25 = vpop.xlane.xlu1 %4870 }
0x1a94   : > { %v4872_v40 = vmul.f32 0.03125, %v4871_v25  ;;  %v4985_v25 = vpack.c.bf16 %v6837_v9, %v6836_v8 }
0x1a96   : > { %v4873_v22 = vsub.f32 %v8856_v53, %v4872_v40  ;;  %7280 = vmatpush3.bf16.msra.mxu1 %v4985_v25  ;;  %v6838_v40 = vld [vmem:[%s9332_s23 + $0xc0] sm:$0xff] }
0x1a97   : > { %7281 = vmatprep.subr.bf16.mxu1 %v7827_v62 }
0x1a98   : > { %v4874_v12 = vmul.f32 %v4873_v22, %v4873_v22 }
0x1a9a   : > { %v4875_v13 = vsel %vm1745_vm3, %v4874_v12, 0.0  ;;  %v6840_v12 = vld [vmem:[%s9332_s23 + $0xd0] sm:$0xff] }
0x1a9b   : > { %4876 = vadd.xlane.f32.xlu0 %v4875_v13  ;;  %v6841_v13 = vld [vmem:[%s9332_s23 + $0xd8] sm:$0xff] }
0x1a9c   : > { %v4987_v14 = vpack.c.bf16 %v6841_v13, %v6840_v12 }
0x1a9f   : > { %5052 = vadd.xlane.f32.xlu0 %v5051_v16  ;;  %v6842_v16 = vld [vmem:[%s9332_s23 + $0xe0] sm:$0xff] }
0x1aa0   : > { %v4988_v18 = vpack.c.bf16 %v6843_v6, %v6842_v16 }
0x1b28   : > { %v4877_v23 = vpop.xlane.xlu0 %4876 }
0x1b29   : > { %v4878_v32 = vmul.f32 0.03125, %v4877_v23  ;;  %v6861_v23 = vld [vmem:[%s9333_s10 + $0x48] sm:$0xff] }
0x1b2b   : > { %v4879_v24 = vadd.f32 1e-05, %v4878_v32  ;;  %v6862_v32 = vld [vmem:[%s9333_s10 + $0x50] sm:$0xff] }
0x1b2c   : > { %v5053_v27 = vpop.xlane.xlu0 %5052 }
0x1b2d   : > { %7617 = vrsqrt.f32 %v4879_v24  ;;  %v5054_v28 = vmul.f32 0.0625, %v5053_v27  ;;  %v5182_v24 = vpack.c.bf16 %v6861_v23, %v6860_v54  ;;  %v6863_v27 = vld [vmem:[%s9333_s10 + $0x58] sm:$0xff] }
0x1b2f   : > { %v5055_v30 = vadd.f32 1e-05, %v5054_v28  ;;  %v5183_v28 = vpack.c.bf16 %v6863_v27, %v6862_v32 }
0x1b31   : > { %7619 = vrsqrt.f32 %v5055_v30  ;;  %v6828_v30 = vld [vmem:[%s9334_s2 + $0x1] ss:$0 sm:$0xff] }
0x1b37   : > { %v7618_v46 = vpop.eup %7617 }
0x1b38   : > { %v4881_v33 = vmul.f32 %v7618_v46, %v4873_v22 }
0x1b3a   : > { %v4888_v37 = vmul.f32 %v6821_v26, %v4881_v33 }
0x1b3b   : > { %v7620_v41 = vpop.eup %7619 }
0x1b3c   : > { %v5057_v44 = vmul.f32 %v7620_v41, %v5049_v11  ;;  %v4895_v43 = vadd.f32 %v6822_v35, %v4888_v37  ;;  %v6839_v11 = vld [vmem:[%s9332_s23 + $0xc8] sm:$0xff]  ;;  %v6855_v41 = vld [vmem:[%s9335_s3 + $0x2] ss:$0 sm:$0xff] }
0x1b3d   : > { %v4986_v22 = vpack.c.bf16 %v6839_v11, %v6838_v40 }
0x1b3e   : > { %v4901_v29 = vpack.c.bf16 %v4895_v43, %v4895_v43  ;;  %v5064_v45 = vmul.f32 %v6850_v42, %v5057_v44 }
0x1b3f   : > { %7282 = vmatpush3.bf16.msra.mxu1 %v4986_v22 }
0x1b40   : > { %7270 = vmatmul.mubr.msk.bf16.vlgmr.msra.gmra.mrb[44].mxu0 %vm1788_vm5, %v4901_v29  ;;  %v5071_v47 = vadd.f32 %v6851_v7, %v5064_v45  ;;  %7283 = vmatprep.subr.bf16.mxu1 %v7827_v62 }
0x1b41   : > { %7294 = vmatpush3.bf16.msra.mxu0 %v5076_v4  ;;  %7295 = vmatprep.mubr.msk.bf16.mxu0 %vm7828_vm4, %v7827_v62 }
0x1b42   : > { %7299 = vmatprep.subr.bf16.mxu0 %v7827_v62  ;;  %v5075_v55 = vpack.c.bf16 %v5071_v47, %v5071_v47 }
0x1b43   : > { %7284 = vmatpush3.bf16.msra.mxu1 %v4987_v14 }
0x1b44   : > { %7285 = vmatprep.subr.bf16.mxu1 %v7827_v62 }
0x1b47   : > { %7286 = vmatpush3.bf16.msra.mxu1 %v4988_v18 }
0x1b48   : > { %7296 = vmatmul.mubr.msk.bf16.vlgmr.msra.gmra.mrb[48].mxu0 %vm2795_vm2, %v5075_v55  ;;  %7287 = vmatprep.subr.bf16.mxu1 %v7827_v62  ;;  %v6857_v55 = vld [vmem:[%s9336_s5 + $0x8] sm:$0xf] }
0x1b49   : > { %7303 = vmatprep.mubr.msk.bf16.mxu0 %vm7828_vm4, %v7827_v62  ;;  %7300 = vmatpush3.bf16.msra.mxu0 %v5182_v24  ;;  %v5145_v31 = vrot.slane %v6857_v55, %v8476_v61  ;;  %v5152_v51 = vrot.slane %v6857_v55, %v8480_v1  ;;  %v5159_v3 = vrot.slane %v6857_v55, %v8484_v2 }
0x1b4a   : > { %7301 = vmatprep.subr.bf16.mxu0 %v7827_v62  ;;  %v5166_v9 = vrot.slane %v6857_v55, %v8489_v5 }
0x1b4b   : > { %7288 = vmatpush3.bf16.msra.mxu1 %v4989_v21 }
0x1b4c   : > { %7320 = vmatprep.subr.bf16.mxu1 %v7827_v62 }
0x1b4d   : > { %7302 = vmatpush3.bf16.msra.mxu0 %v5183_v28  ;;  %v6869_v28 = vld [vmem:[%s9338_s9 + $0x20] sm:$0xff] }
0x1c13   : > { %v4949_v46 = vpop.f32.mrb[44].mxu0 }
0x1c14   : > { %v4950_v26 = vadd.f32 %v6828_v30, %v4949_v46  ;;  %v7271_v33 = vpop.f32.mrb[45].mxu0  ;;  %v6870_v30 = vld [vmem:[%s9338_s9 + $0x28] sm:$0xff] }
0x1c15   : > { %v4952_v35 = vpop.f32.mrb[46].mxu0 }
0x1c16   : > { %v4955_v37 = vmul.f32 %v4950_v26, %v4950_v26  ;;  %v7272_v38 = vpop.f32.mrb[47].mxu0 }
0x1c18   : > { %v4956_v39 = vmul.f32 %v4955_v37, %v4950_v26 }
0x1c1a   : > { %v4957_v42 = vmul.f32 0.044715, %v4956_v39 }
0x1c1b   : > { %v5122_v44 = vpop.f32.mrb[48].mxu0 }
0x1c1c   : > { %v4958_v43 = vadd.f32 %v4957_v42, %v4950_v26  ;;  %v8914_v4 = vadd.f32 %v6855_v41, %v5122_v44  ;;  %v7297_v29 = vpop.f32.mrb[49].mxu0 }
0x1c1d   : > { %v5125_v45 = vpop.f32.mrb[50].mxu0 }
0x1c1e   : > { %v4959_v7 = vmul.f32 0.7978846, %v4958_v43  ;;  %5129 = vst.msk [vmem:[#allocation4 + $0x3] sm:$0x1f] %vm1745_vm3, %v8914_v4  ;;  %v7298_v47 = vpop.f32.mrb[51].mxu0  ;;  %v5547_v35 = vsub.f32 0.0, %v8914_v4 }
0x1c20   : > { %7621 = vtanh.f32 %v4959_v7  ;;  %v5548_v38 = vmul.f32 1.442695, %v5547_v35 }
0x1c25   : > { %v5141_v58 = vld [vmem:[#allocation4] sm:$0x1f] }
0x1c26   : > { %v5148_v59 = vld [vmem:[#allocation4 + $0x1] sm:$0x1f]  ;;  %v5146_v63 = vmul.f32 %v5145_v31, %v5141_v58  ;;  %v6875_v58 = vld [vmem:[%s9340_s17 + $0x48] sm:$0xff] }
0x1c27   : > { %v5155_v60 = vld [vmem:[#allocation4 + $0x2] sm:$0x1f]  ;;  %v5153_v8 = vmul.f32 %v5152_v51, %v5148_v59  ;;  %v6874_v51 = vld [vmem:[%s9340_s17 + $0x40] sm:$0xff] }
0x1c28   : > { %5706 = vst.msk [vmem:[#allocation4] sm:$0x7] %vm2839_vm8, %v7827_v62  ;;  %v5147_v17 = vadd.f32 %v6859_v15, %v5146_v63  ;;  %v5162_v25 = vld [vmem:[#allocation4 + $0x3] sm:$0x1f]  ;;  %v5160_v22 = vmul.f32 %v5159_v3, %v5155_v60  ;;  %v5565_v60 = vpack.c.bf16 %v6875_v58, %v6874_v51  ;;  %v6877_v63 = vld [vmem:[%s9340_s17 + $0x58] sm:$0xff] }
0x1c29   : > { %v5167_v14 = vmul.f32 %v5166_v9, %v5162_v25  ;;  %v6876_v59 = vld [vmem:[%s9340_s17 + $0x50] sm:$0xff] }
0x1c2a   : > { %v7622_v40 = vpop.eup %7621  ;;  %v5154_v11 = vadd.f32 %v5153_v8, %v5147_v17  ;;  %v5566_v17 = vpack.c.bf16 %v6877_v63, %v6876_v59 }
0x1c2b   : > { %v4961_v12 = vadd.f32 1.0, %v7622_v40 }
0x1c2c   : > { %v5161_v13 = vadd.f32 %v5160_v22, %v5154_v11 }
0x1c2d   : > { %v4962_v16 = vmul.f32 0.5, %v4961_v12 }
0x1c2e   : > { %v5168_v6 = vadd.f32 %v5167_v14, %v5161_v13  ;;  %v6867_v14 = vld [vmem:[%s9342_s25 + $0x10] sm:$0xff] }
0x1c2f   : > { %v4963_v18 = vmul.f32 %v4962_v16, %v4950_v26 }
0x1c30   : > { %v5169_v19 = vsub.f32 0.0, %v5168_v6 }
0x1c31   : > { %v4981_v20 = vpack.c.bf16 %v4963_v18, %v4963_v18 }
0x1c32   : > { %v5170_v21 = vmul.f32 1.442695, %v5169_v19 }
0x1c33   : > { %7290 = vmatmul.mubr.bf16.vlgmr.msra.gmra.mrb[60].mxu1 %v4981_v20 }
0x1c34   : > { %7623 = vpow2.f32 %v5170_v21  ;;  %7322 = vmatprep.mubr.msk.bf16.mxu1 %vm7828_vm4, %v7827_v62 }
0x1c3e   : > { %v7624_v54 = vpop.eup %7623 }
0x1c3f   : > { %v5172_v23 = vadd.f32 1.0, %v7624_v54 }
0x1c41   : > { %7625 = vrcp.f32 %v5172_v23 }
0x1c42   : > { %7627 = vpow2.f32 %v5548_v38 }
0x1c4b   : > { %v7626_v32 = vpop.eup %7625 }
0x1c4c   : > { %v8928_v24 = vmul.f32 %v7626_v32, %v5168_v6  ;;  %v7628_v39 = vpop.eup %7627 }
0x1c4d   : > { %v5550_v41 = vadd.f32 1.0, %v7628_v39 }
0x1c4e   : > { %7307 = vmatprep.subr.msk.mxu0 %vm1788_vm5, %v8928_v24  ;;  %v5181_v27 = vpack.c.bf16 %v8928_v24, %v8928_v24  ;;  %v5407_v51 = vrot.slane %v8928_v24, %v8556_v10 }
0x1c4f   : > { %7629 = vrcp.f32 %v5550_v41 }
0x1c50   : > { %7304 = vmatmul.mubr.msk.bf16.vlgmr.msra.gmra.mrb[52].mxu0 %vm1788_vm5, %v5181_v27 }
0x1c51   : > { %7308 = vmatpush3.xpose.msk.msra.mxu0 %vm1788_vm5, %v8928_v24  ;;  %7309 = vmatprep.mubr.msk.f32.mxu0 %vm1788_vm5, %v6869_v28 }
0x1c52   : > { %7312 = vmatprep.subr.bf16.mxu0 %v7827_v62 }
0x1c58   : > { %7310 = vmatmul.mubr.msk.f32.vlgmr.msra.gmra.mrb[42].mxu0 %vm1788_vm5, %v6870_v30 }
0x1c59   : > { %7316 = vmatprep.mubr.msk.bf16.mxu0 %vm7828_vm4, %v7827_v62  ;;  %v7630_v7 = vpop.eup %7629  ;;  %7313 = vmatpush3.bf16.msra.mxu0 %v5565_v60 }
0x1c5a   : > { %v5553_v55 = vmul.f32 %v7630_v7, %v8914_v4  ;;  %v6865_v4 = vld [vmem:[%s9339_s13 + $0x2] ss:$0 sm:$0xff]  ;;  %7314 = vmatprep.subr.bf16.mxu0 %v7827_v62 }
0x1c5d   : > { %7315 = vmatpush3.bf16.msra.mxu0 %v5566_v17 }
0x1c5e   : > { %7326 = vmatprep.subr.bf16.mxu0 %v7827_v62 }
0x1d06   : > { %v8944_v46 = vpop.f32.mrb[60].mxu1 }
0x1d07   : > { %v7291_v26 = vpop.f32.mrb[61].mxu1 }
0x1d08   : > { %v5027_v33 = vpop.f32.mrb[62].mxu1 }
0x1d09   : > { %v7292_v37 = vpop.f32.mrb[63].mxu1 }
0x1d23   : > { %v5229_v42 = vpop.f32.mrb[52].mxu0 }
0x1d24   : > { %v7305_v44 = vpop.f32.mrb[53].mxu0  ;;  %v5230_v31 = vadd.f32 %v6865_v4, %v5229_v42 }
0x1d25   : > { %v5232_v43 = vpop.f32.mrb[54].mxu0 }
0x1d26   : > { %v7306_v29 = vpop.f32.mrb[55].mxu0  ;;  %v5236_v15 = vand.u32 2147483647, %v5230_v31  ;;  %v5235_v22 = vmax.f32 %v5230_v31, 0.0 }
0x1d28   : > { %v5237_v3 = vsub.f32 0.0, %v5236_v15 }
0x1d2a   : > { %v5238_v8 = vmul.f32 1.442695, %v5237_v3 }
0x1d2b   : > { %v7311_v45 = vpop.f32.mrb[42].mxu0 }
0x1d2c   : > { %v5327_v47 = vpop.f32.mrb[43].mxu0  ;;  %7631 = vpow2.f32 %v5238_v8 }
0x1d2d   : > { %5380 = vperm.xlu0 %7509, %v5327_v47   ;;  %5346 = vperm.xlu1 %7508, %v5327_v47  }
0x1d31   : > { %5555 = vrot.lane.b32.xlu0 %v5553_v55, %s9341_s21  ;;  %5357 = vperm.xlu1 %7508, %v7311_v45  }
0x1d32   : > { %7516 = vset.pattern.permute.xlu0 %v7826_v0 }
0x1d35   : > { %7510 = vset.pattern.permute.xlu1 %v7843_v48 }
0x1d36   : > { %5390 = vperm.xlu1 %7510, %v7311_v45   ;;  %v7632_v9 = vpop.eup %7631 }
0x1d37   : > { %v5240_v25 = vadd.f32 1.0, %v7632_v9  ;;  %v8982_v9 = vld [vmem:[%s9343_s29 + $0x2] sm:$0x1] }
0x1d39   : > { %7633 = vlog2.f32 %v5240_v25  ;;  %v5408_v25 = vcombine.high %v5407_v51, %v5407_v51 }
0x1d3a   : > { %7511 = vset.pattern.permute.xlu1 %v7845_v50 }
0x1d3b   : > { %5446 = vperm.xlu1 %7511, %v7311_v45  }
0x1d3f   : > { %7512 = vset.pattern.permute.xlu1 %v7846_v56 }
0x1d40   : > { %5481 = vperm.xlu1 %7512, %v7311_v45  }
0x1d43   : > { %v7634_v40 = vpop.eup %7633 }
0x1d44   : > { %7513 = vset.pattern.permute.xlu1 %v7845_v50  ;;  %v5242_v11 = vmul.f32 0.6931472, %v7634_v40 }
0x1d45   : > { %5436 = vperm.xlu1 %7513, %v5327_v47  }
0x1d46   : > { %v5243_v12 = vadd.f32 %v5242_v11, %v5235_v22 }
0x1d48   : > { %v5339_v13 = vrot.slane %v5243_v12, %v8476_v61  ;;  %v5374_v6 = vrot.slane %v5243_v12, %v8480_v1  ;;  %v8968_v21 = vmul.f32 %v5243_v12, %v8928_v24  ;;  %v5430_v26 = vrot.slane %v5243_v12, %v8484_v2 }
0x1d49   : > { %7514 = vset.pattern.permute.xlu1 %v7846_v56  ;;  %v5465_v43 = vrot.slane %v5243_v12, %v8489_v5  ;;  %v5500_v58 = vrot.slane %v5243_v12, %v8546_v52  ;;  %v5422_v12 = vrot.slane %v5408_v25, %v8556_v10 }
0x1d4a   : > { %5471 = vperm.xlu1 %7514, %v5327_v47   ;;  %v5340_v16 = vmul.f32 %v6867_v14, %v5339_v13  ;;  %v5375_v19 = vmul.f32 %v6867_v14, %v5374_v6  ;;  %v5352_v23 = vrot.slane %v8968_v21, %v8476_v61  ;;  %v5386_v33 = vrot.slane %v8968_v21, %v8480_v1 }
0x1d4b   : > { %v5431_v44 = vmul.f32 %v6867_v14, %v5430_v26  ;;  %v5466_v15 = vmul.f32 %v6867_v14, %v5465_v43  ;;  %v5501_v11 = vmul.f32 %v6867_v14, %v5500_v58  ;;  %v5442_v14 = vrot.slane %v8968_v21, %v8484_v2 }
0x1d4c   : > { %v5341_v18 = vmul.f32 1.442695, %v5340_v16  ;;  %v5376_v20 = vmul.f32 1.442695, %v5375_v19  ;;  %v5368_v16 = vmul.f32 %v8982_v9, %v8928_v24 }
0x1d4d   : > { %v5432_v31 = vmul.f32 1.442695, %v5431_v44  ;;  %v5467_v8 = vmul.f32 1.442695, %v5466_v15 }
0x1d4e   : > { %7515 = vset.pattern.permute.xlu1 %v7844_v49  ;;  %7635 = vpow2.f32 %v5341_v18 }
0x1d4f   : > { %5506 = vperm.xlu1 %7515, %v5327_v47   ;;  %7637 = vpow2.f32 %v5376_v20  ;;  %v5502_v20 = vmul.f32 1.442695, %v5501_v11 }
0x1d50   : > { %7639 = vpow2.f32 %v5432_v31 }
0x1d51   : > { %7641 = vpow2.f32 %v5467_v8 }
0x1d52   : > { %7643 = vpow2.f32 %v5502_v20 }
0x1d53   : > { %5516 = vperm.xlu1 %7515, %v7311_v45  }
0x1d57   : > { %7517 = vset.pattern.permute.xlu1 %v7826_v0 }
0x1d58   : > { %v7636_v54 = vpop.eup %7635 }
0x1d59   : > { %v5343_v28 = vmul.f32 0.0, %v7636_v54  ;;  %v7638_v37 = vpop.eup %7637 }
0x1dac   : > { %v5347_v32 = vpop.permute.xlu1 %5346  ;;  %v5381_v30 = vpop.permute.xlu0 %5380 }
0x1dad   : > { %v5353_v27 = vmul.f32 %v5352_v23, %v5347_v32  ;;  %v5387_v39 = vmul.f32 %v5386_v33, %v5381_v30  ;;  %v5424_v32 = vmul.f32 %v8982_v9, %v5422_v12 }
0x1daf   : > { %v5354_v35 = vadd.f32 %v5353_v27, %v5343_v28  ;;  %v7640_v28 = vpop.eup %7639 }
0x1db0   : > { %v5358_v38 = vpop.permute.xlu1 %5357 }
0x1db1   : > { %v5360_v41 = vmul.f32 %v5358_v38, %v5354_v35  ;;  %v5378_v42 = vmul.f32 %v7638_v37, %v5354_v35  ;;  %v7642_v38 = vpop.eup %7641 }
0x1db3   : > { %v5361_v29 = vsel %vm1788_vm5, %v5360_v41, 0.0  ;;  %v5388_v45 = vadd.f32 %v5387_v39, %v5378_v42  ;;  %v5477_v39 = vrot.slane %v8968_v21, %v8489_v5 }
0x1db4   : > { %v5362_v7 = vrot.slane %v5361_v29, 4 }
0x1db5   : > { %v5391_v47 = vpop.permute.xlu1 %5390  ;;  %v5434_v33 = vmul.f32 %v7640_v28, %v5388_v45 }
0x1db6   : > { %v5363_v55 = vadd.f32 %v5362_v7, %v5361_v29  ;;  %v5393_v4 = vmul.f32 %v5391_v47, %v5388_v45  ;;  %v5512_v45 = vrot.slane %v8968_v21, %v8546_v52  ;;  %v5527_v21 = vcombine.high %v8928_v24, %v8928_v24 }
0x1db8   : > { %v5364_v59 = vrot.slane %v5363_v55, 2  ;;  %v5394_v60 = vsel %vm1788_vm5, %v5393_v4, 0.0  ;;  %v5415_v4 = vrot.slane %v5407_v51, %v8556_v10 }
0x1db9   : > { %v5395_v63 = vrot.slane %v5394_v60, 4 }
0x1dba   : > { %v5365_v3 = vadd.f32 %v5364_v59, %v5363_v55  ;;  %v5447_v17 = vpop.permute.xlu1 %5446  ;;  %v7644_v55 = vpop.eup %7643  ;;  %v5457_v25 = vcombine.high %v5415_v4, %v5415_v4 }
0x1dbb   : > { %v5396_v40 = vadd.f32 %v5395_v63, %v5394_v60 }
0x1dbc   : > { %v5366_v22 = vrot.slane %v5365_v3, 1 }
0x1dbd   : > { %v5397_v13 = vrot.slane %v5396_v40, 2 }
0x1dbe   : > { %v5367_v6 = vadd.f32 %v5366_v22, %v5365_v3 }
0x1dbf   : > { %v5398_v18 = vadd.f32 %v5397_v13, %v5396_v40  ;;  %v5482_v19 = vpop.permute.xlu1 %5481 }
0x1dc0   : > { %v5369_v54 = vadd.f32 %v5368_v16, %v5367_v6 }
0x1dc1   : > { %v5399_v23 = vrot.slane %v5398_v18, 1 }
0x1dc2   : > { %5370 = vst.msk [vmem:[#allocation5] sm:$0x1] %vm1726_vm1, %v5369_v54  ;;  %v5492_v54 = vcombine.high %v5422_v12, %v5422_v12 }
0x1dc3   : > { %v5400_v27 = vadd.f32 %v5399_v23, %v5398_v18  ;;  %v5459_v18 = vmul.f32 %v8982_v9, %v5457_v25 }
0x1dc4   : > { %v5437_v30 = vpop.permute.xlu1 %5436 }
0x1dc5   : > { %v5425_v26 = vadd.f32 %v5424_v32, %v5400_v27  ;;  %v5443_v35 = vmul.f32 %v5442_v14, %v5437_v30  ;;  %v5534_v27 = vrot.slane %v5527_v21, %v8556_v10  ;;  %v6884_v21 = vld [vmem:[%s9331_s28 + $0x3] ss:$0 sm:$0xff] }
0x1dc7   : > { %5426 = vst.msk [vmem:[#allocation5 + $0x1] sm:$0x1] %vm1726_vm1, %v5425_v26  ;;  %v5444_v37 = vadd.f32 %v5443_v35, %v5434_v33  ;;  %v5494_v26 = vmul.f32 %v8982_v9, %v5492_v54  ;;  %v5541_v33 = vrot.slane %v5534_v27, %v8556_v10  ;;  %v6895_v54 = vld [vmem:[%s9333_s10 + $0x70] sm:$0xff] }
0x1dc9   : > { %v5449_v41 = vmul.f32 %v5447_v17, %v5444_v37  ;;  %v5469_v42 = vmul.f32 %v7642_v38, %v5444_v37  ;;  %v5472_v44 = vpop.permute.xlu1 %5471  ;;  %v5543_v12 = vmul.f32 %v8982_v9, %v5541_v33 }
0x1dca   : > { %v5478_v43 = vmul.f32 %v5477_v39, %v5472_v44 }
0x1dcb   : > { %v5450_v29 = vsel %vm1788_vm5, %v5449_v41, 0.0 }
0x1dcc   : > { %v5451_v7 = vrot.slane %v5450_v29, 4  ;;  %v5479_v47 = vadd.f32 %v5478_v43, %v5469_v42  ;;  %v5556_v42 = vpop.permute.xlu0 %5555 }
0x1dce   : > { %v5452_v31 = vadd.f32 %v5451_v7, %v5450_v29  ;;  %v5484_v15 = vmul.f32 %v5482_v19, %v5479_v47  ;;  %v5507_v58 = vpop.permute.xlu1 %5506  ;;  %v5504_v59 = vmul.f32 %v7644_v55, %v5479_v47  ;;  %v6879_v7 = vld [vmem:[%s9345_s4 + $0x2] ss:$0 sm:$0xff] }
0x1dcf   : > { %v5513_v60 = vmul.f32 %v5512_v45, %v5507_v58 }
0x1dd0   : > { %v5453_v63 = vrot.slane %v5452_v31, 2  ;;  %v5485_v3 = vsel %vm1788_vm5, %v5484_v15, 0.0 }
0x1dd1   : > { %v5486_v17 = vrot.slane %v5485_v3, 4  ;;  %v5514_v8 = vadd.f32 %v5513_v60, %v5504_v59 }
0x1dd2   : > { %v5454_v40 = vadd.f32 %v5453_v63, %v5452_v31  ;;  %v5517_v11 = vpop.permute.xlu1 %5516 }
0x1dd3   : > { %v5487_v22 = vadd.f32 %v5486_v17, %v5485_v3  ;;  %v5519_v13 = vmul.f32 %v5517_v11, %v5514_v8  ;;  %v6885_v17 = vld [vmem:[%s9329_s22 + $0x30] sm:$0xff]  ;;  %v6886_v8 = vld [vmem:[%s9329_s22 + $0x38] sm:$0xff] }
0x1dd4   : > { %v5455_v16 = vrot.slane %v5454_v40, 1  ;;  %v5654_v25 = vpack.c.bf16 %v6886_v8, %v6885_v17 }
0x1dd5   : > { %v5488_v51 = vrot.slane %v5487_v22, 2  ;;  %v5520_v6 = vsel %vm1788_vm5, %v5519_v13, 0.0  ;;  %v6883_v13 = vld [vmem:[%s9330_s7 + $0x3] ss:$0 sm:$0xff] }
0x1dd6   : > { %v5456_v19 = vadd.f32 %v5455_v16, %v5454_v40  ;;  %v5521_v20 = vrot.slane %v5520_v6, 4  ;;  %7321 = vmatpush3.bf16.msra.mxu1 %v5654_v25 }
0x1dd7   : > { %v5489_v23 = vadd.f32 %v5488_v51, %v5487_v22 }
0x1dd8   : > { %v5460_v32 = vadd.f32 %v5459_v18, %v5456_v19  ;;  %v5522_v14 = vadd.f32 %v5521_v20, %v5520_v6  ;;  %v6893_v19 = vld [vmem:[%s9333_s10 + $0x60] sm:$0xff]  ;;  %v6894_v20 = vld [vmem:[%s9333_s10 + $0x68] sm:$0xff] }
0x1dd9   : > { %v5490_v28 = vrot.slane %v5489_v23, 1 }
0x1dda   : > { %5461 = vst.msk [vmem:[#allocation5 + $0x2] sm:$0x1] %vm1726_vm1, %v5460_v32  ;;  %v5523_v30 = vrot.slane %v5522_v14, 2  ;;  %v6896_v32 = vld [vmem:[%s9333_s10 + $0x78] sm:$0xff] }
0x1ddb   : > { %v5491_v24 = vadd.f32 %v5490_v28, %v5489_v23  ;;  %v5760_v23 = vpack.c.bf16 %v6894_v20, %v6893_v19  ;;  %v5761_v27 = vpack.c.bf16 %v6896_v32, %v6895_v54  ;;  %v6888_v28 = vld [vmem:[%s9335_s3 + $0x3] ss:$0 sm:$0xff] }
0x1ddc   : > { %v5524_v35 = vadd.f32 %v5523_v30, %v5522_v14  ;;  %v6902_v14 = vld [vmem:[%s9338_s9 + $0x30] sm:$0xff] }
0x1ddd   : > { %v5495_v37 = vadd.f32 %v5494_v26, %v5491_v24 }
0x1dde   : > { %v5525_v38 = vrot.slane %v5524_v35, 1 }
0x1ddf   : > { %5496 = vst.msk [vmem:[#allocation5 + $0x3] sm:$0x1] %vm1726_vm1, %v5495_v37  ;;  %v6890_v37 = vld [vmem:[%s9336_s5 + $0xc] sm:$0xf] }
0x1de0   : > { %v5526_v39 = vadd.f32 %v5525_v38, %v5524_v35  ;;  %v5723_v38 = vrot.slane %v6890_v37, %v8476_v61 }
0x1de2   : > { %v5544_v41 = vadd.f32 %v5543_v12, %v5526_v39  ;;  %v5730_v12 = vrot.slane %v6890_v37, %v8480_v1  ;;  %v6892_v39 = vld [vmem:[%s9337_s8 + $0x3] ss:$0 sm:$0xff] }
0x1de4   : > { %5545 = vst.msk [vmem:[#allocation5 + $0x4] sm:$0x1] %vm1726_vm1, %v5544_v41 }
0x1deb   : > { %v5546_v44 = vld [vmem:[#allocation5] sm:$0x1f] }
0x1dec   : > { %v5558_v43 = vmul.f32 %v5556_v42, %v5546_v44 }
0x1dee   : > { %v5564_v29 = vpack.c.bf16 %v5558_v43, %v5558_v43  ;;  %v5737_v43 = vrot.slane %v6890_v37, %v8484_v2 }
0x1df0   : > { %7317 = vmatmul.mubr.msk.bf16.vlgmr.msra.gmra.mrb[56].mxu0 %vm1788_vm5, %v5564_v29 }
0x1df1   : > { %7330 = vmatprep.mubr.msk.bf16.mxu0 %vm7828_vm4, %v7827_v62  ;;  %7327 = vmatpush3.bf16.msra.mxu0 %v5760_v23 }
0x1df2   : > { %7328 = vmatprep.subr.bf16.mxu0 %v7827_v62 }
0x1df5   : > { %7329 = vmatpush3.bf16.msra.mxu0 %v5761_v27  ;;  %v6907_v27 = vld [vmem:[%s9340_s17 + $0x60] sm:$0xff] }
0x1df6   : > { %7339 = vmatprep.subr.bf16.mxu0 %v7827_v62 }
0x1ec3   : > { %v5612_v47 = vpop.f32.mrb[56].mxu0 }
0x1ec4   : > { %v5613_v55 = vadd.f32 %v6879_v7, %v5612_v47  ;;  %v7318_v45 = vpop.f32.mrb[57].mxu0 }
0x1ec5   : > { %v5615_v9 = vpop.f32.mrb[58].mxu0 }
0x1ec6   : > { %v5618_v4 = vadd.f32 %v5613_v55, %v8844_v36  ;;  %v7319_v31 = vpop.f32.mrb[59].mxu0  ;;  %v5744_v55 = vrot.slane %v6890_v37, %v8489_v5 }
0x1ec8   : > { %v5623_v15 = vsel %vm2755_vm13, %v5618_v4, 0.0 }
0x1ec9   : > { %5624 = vadd.xlane.f32.xlu1 %v5623_v15 }
0x1f56   : > { %v5625_v58 = vpop.xlane.xlu1 %5624 }
0x1f57   : > { %v5626_v59 = vmul.f32 0.0625, %v5625_v58 }
0x1f59   : > { %v5627_v60 = vsub.f32 %v5618_v4, %v5626_v59 }
0x1f5b   : > { %v5628_v63 = vmul.f32 %v5627_v60, %v5627_v60 }
0x1f5d   : > { %v5629_v3 = vsel %vm2755_vm13, %v5628_v63, 0.0 }
0x1f5e   : > { %5630 = vadd.xlane.f32.xlu0 %v5629_v3 }
0x1feb   : > { %v5631_v36 = vpop.xlane.xlu0 %5630 }
0x1fec   : > { %v5632_v40 = vmul.f32 0.0625, %v5631_v36  ;;  %v6903_v36 = vld [vmem:[%s9338_s9 + $0x38] sm:$0xff] }
0x1fee   : > { %v5633_v11 = vadd.f32 1e-05, %v5632_v40 }
0x1ff0   : > { %7645 = vrsqrt.f32 %v5633_v11 }
0x1ffa   : > { %v7646_v22 = vpop.eup %7645 }
0x1ffb   : > { %v5635_v16 = vmul.f32 %v7646_v22, %v5627_v60 }
0x1ffd   : > { %v5642_v51 = vmul.f32 %v6883_v13, %v5635_v16 }
0x1fff   : > { %v5649_v6 = vadd.f32 %v6884_v21, %v5642_v51 }
0x2001   : > { %v5653_v18 = vpack.c.bf16 %v5649_v6, %v5649_v6 }
0x2003   : > { %7323 = vmatmul.mubr.msk.bf16.vlgmr.msra.gmra.mrb[64].mxu1 %vm2795_vm2, %v5653_v18 }
0x2004   : > { %7336 = vmatprep.mubr.msk.f32.mxu1 %vm1788_vm5, %v6902_v14  ;;  %v6908_v14 = vld [vmem:[%s9340_s17 + $0x68] sm:$0xff] }
0x20d6   : > { %v5700_v30 = vpop.f32.mrb[64].mxu1 }
0x20d7   : > { %v9031_v26 = vadd.f32 %v6888_v28, %v5700_v30  ;;  %v7324_v24 = vpop.f32.mrb[65].mxu1  ;;  %v6910_v30 = vld [vmem:[%s9340_s17 + $0x78] sm:$0xff] }
0x20d8   : > { %v5703_v33 = vpop.f32.mrb[66].mxu1 }
0x20d9   : > { %5707 = vst.msk [vmem:[#allocation4 + $0x3] sm:$0x1f] %vm1745_vm3, %v9031_v26  ;;  %v7325_v35 = vpop.f32.mrb[67].mxu1  ;;  %v6125_v22 = vsub.f32 0.0, %v9031_v26  ;;  %vm3955_vm3 = vcmask 258049  }
0x20db   : > { %v6126_v6 = vmul.f32 1.442695, %v6125_v22 }
0x20e0   : > { %v5719_v41 = vld [vmem:[#allocation4] sm:$0x1f] }
0x20e1   : > { %v5726_v42 = vld [vmem:[#allocation4 + $0x1] sm:$0x1f]  ;;  %v5724_v44 = vmul.f32 %v5723_v38, %v5719_v41 }
0x20e2   : > { %v5733_v29 = vld [vmem:[#allocation4 + $0x2] sm:$0x1f]  ;;  %v5731_v47 = vmul.f32 %v5730_v12, %v5726_v42 }
0x20e3   : > { %v5725_v7 = vadd.f32 %v6892_v39, %v5724_v44  ;;  %v5740_v45 = vld [vmem:[#allocation4 + $0x3] sm:$0x1f]  ;;  %v5738_v4 = vmul.f32 %v5737_v43, %v5733_v29  ;;  %v6900_v44 = vld [vmem:[%s9342_s25 + $0x18] sm:$0xff] }
0x20e4   : > { %v5745_v15 = vmul.f32 %v5744_v55, %v5740_v45 }
0x20e5   : > { %v5732_v9 = vadd.f32 %v5731_v47, %v5725_v7 }
0x20e7   : > { %v5739_v31 = vadd.f32 %v5738_v4, %v5732_v9 }
0x20e9   : > { %v5746_v58 = vadd.f32 %v5745_v15, %v5739_v31 }
0x20eb   : > { %v5747_v59 = vsub.f32 0.0, %v5746_v58 }
0x20ed   : > { %v5748_v60 = vmul.f32 1.442695, %v5747_v59 }
0x20ef   : > { %7647 = vpow2.f32 %v5748_v60 }
0x20f9   : > { %v7648_v63 = vpop.eup %7647 }
0x20fa   : > { %v5750_v3 = vadd.f32 1.0, %v7648_v63 }
0x20fc   : > { %7649 = vrcp.f32 %v5750_v3 }
0x20fd   : > { %7651 = vpow2.f32 %v6126_v6 }
0x2106   : > { %v7650_v17 = vpop.eup %7649 }
0x2107   : > { %v9041_v8 = vmul.f32 %v7650_v17, %v5746_v58  ;;  %v7652_v18 = vpop.eup %7651 }
0x2108   : > { %v6128_v19 = vadd.f32 1.0, %v7652_v18 }
0x2109   : > { %7334 = vmatprep.subr.msk.mxu1 %vm1788_vm5, %v9041_v8  ;;  %v5759_v25 = vpack.c.bf16 %v9041_v8, %v9041_v8 }
0x210a   : > { %7335 = vmatpush3.xpose.msk.msra.mxu1 %vm1788_vm5, %v9041_v8  ;;  %7653 = vrcp.f32 %v6128_v19 }
0x210b   : > { %7331 = vmatmul.mubr.msk.bf16.vlgmr.msra.gmra.mrb[60].mxu0 %vm1788_vm5, %v5759_v25  ;;  %7347 = vmatprep.subr.bf16.mxu1 %v7827_v62 }
0x210c   : > { %7343 = vmatprep.mubr.msk.bf16.mxu0 %vm7828_vm4, %v7827_v62 }
0x210d   : > { %7337 = vmatmul.mubr.msk.f32.vlgmr.msra.gmra.mrb[54].mxu1 %vm1788_vm5, %v6903_v36 }
0x210e   : > { %7349 = vmatprep.mubr.msk.bf16.mxu1 %vm7828_vm4, %v7827_v62 }
0x2114   : > { %v7654_v20 = vpop.eup %7653 }
0x21de   : > { %v5807_v40 = vpop.f32.mrb[60].mxu0 }
0x21df   : > { %v7332_v11 = vpop.f32.mrb[61].mxu0 }
0x21e0   : > { %v5810_v13 = vpop.f32.mrb[62].mxu0  ;;  %v7338_v16 = vpop.f32.mrb[54].mxu1 }
0x21e1   : > { %5935 = vperm.xlu1 %7517, %v7338_v16   ;;  %v7333_v21 = vpop.f32.mrb[63].mxu0  ;;  %v5905_v51 = vpop.f32.mrb[55].mxu1 }
0x21e2   : > { %5924 = vperm.xlu0 %7516, %v5905_v51  }
0x21e5   : > { %7518 = vset.pattern.permute.xlu1 %v7843_v48 }
0x21e6   : > { %5968 = vperm.xlu1 %7518, %v7338_v16   ;;  %7525 = vset.pattern.permute.xlu0 %v7844_v49 }
0x21e7   : > { %6094 = vperm.xlu0 %7525, %v7338_v16  }
0x21ea   : > { %7519 = vset.pattern.permute.xlu1 %v7845_v50 }
0x21eb   : > { %6024 = vperm.xlu1 %7519, %v7338_v16   ;;  %7526 = vset.pattern.permute.xlu0 %v7826_v0 }
0x21ef   : > { %7520 = vset.pattern.permute.xlu1 %v7843_v48  ;;  %v6131_v48 = vmul.f32 %v7654_v20, %v9031_v26  ;;  %v3953_v26 = vsub.f32 %v8663_v34, %v8747_v57 }
0x21f0   : > { %5958 = vperm.xlu1 %7520, %v5905_v51  }
0x21f4   : > { %7521 = vset.pattern.permute.xlu1 %v7845_v50  ;;  %v6898_v50 = vld [vmem:[%s9339_s13 + $0x3] ss:$0 sm:$0xff] }
0x21f5   : > { %6014 = vperm.xlu1 %7521, %v5905_v51   ;;  %v5808_v54 = vadd.f32 %v6898_v50, %v5807_v40  ;;  %v9095_v50 = vld [vmem:[%s9343_s29 + $0x3] sm:$0x1] }
0x21f7   : > { %v5814_v23 = vand.u32 2147483647, %v5808_v54  ;;  %v5813_v39 = vmax.f32 %v5808_v54, 0.0 }
0x21f9   : > { %7522 = vset.pattern.permute.xlu1 %v7846_v56  ;;  %v5815_v32 = vsub.f32 0.0, %v5814_v23 }
0x21fa   : > { %6049 = vperm.xlu1 %7522, %v5905_v51  }
0x21fb   : > { %v5816_v28 = vmul.f32 1.442695, %v5815_v32 }
0x21fd   : > { %7655 = vpow2.f32 %v5816_v28 }
0x21fe   : > { %7523 = vset.pattern.permute.xlu1 %v7844_v49  ;;  %v6143_v49 = vpack.c.bf16 %v6908_v14, %v6907_v27 }
0x21ff   : > { %6084 = vperm.xlu1 %7523, %v5905_v51  }
0x2200   : > { %7340 = vmatpush3.bf16.msra.mxu0 %v6143_v49  ;;  %v5946_v49 = vmul.f32 %v9095_v50, %v9041_v8 }
0x2201   : > { %7341 = vmatprep.subr.bf16.mxu0 %v7827_v62 }
0x2203   : > { %7524 = vset.pattern.permute.xlu1 %v7846_v56  ;;  %v6909_v56 = vld [vmem:[%s9340_s17 + $0x70] sm:$0xff] }
0x2204   : > { %6059 = vperm.xlu1 %7524, %v7338_v16   ;;  %v6144_v24 = vpack.c.bf16 %v6910_v30, %v6909_v56 }
0x2206   : > { %7342 = vmatpush3.bf16.msra.mxu0 %v6144_v24 }
0x2207   : > { %7353 = vmatprep.subr.bf16.mxu0 %v7827_v62  ;;  %v7656_v35 = vpop.eup %7655 }
0x2208   : > { %6133 = vrot.lane.b32.xlu1 %v6131_v48, %s9341_s21  ;;  %v5818_v37 = vadd.f32 1.0, %v7656_v35  ;;  %s9367_s21 = sld [smem:[#allocation51_spill]] }
0x2209   : > { %7527 = vset.pattern.permute.xlu1 %v7826_v0  ;;  %v3954_v0 = vmul.f32 %v3953_v26, %v3953_v26 }
0x220a   : > { %7657 = vlog2.f32 %v5818_v37 }
0x220b   : > { %v3956_v33 = vsel %vm3955_vm3, %v3954_v0, 0.0  ;;  %v5985_v0 = vrot.slane %v9041_v8, %v8556_v10 }
0x2214   : > { %v7658_v38 = vpop.eup %7657 }
0x2215   : > { %v5820_v12 = vmul.f32 0.6931472, %v7658_v38 }
0x2217   : > { %v5821_v41 = vadd.f32 %v5820_v12, %v5813_v39 }
0x2219   : > { %v5917_v42 = vrot.slane %v5821_v41, %v8476_v61  ;;  %v5952_v57 = vrot.slane %v5821_v41, %v8480_v1  ;;  %v9084_v29 = vmul.f32 %v5821_v41, %v9041_v8  ;;  %v6008_v47 = vrot.slane %v5821_v41, %v8484_v2 }
0x221a   : > { %v6043_v60 = vrot.slane %v5821_v41, %v8489_v5  ;;  %v6078_v40 = vrot.slane %v5821_v41, %v8546_v52 }
0x221b   : > { %v5918_v43 = vmul.f32 %v6900_v44, %v5917_v42  ;;  %v5953_v7 = vmul.f32 %v6900_v44, %v5952_v57  ;;  %v5930_v9 = vrot.slane %v9084_v29, %v8476_v61  ;;  %v6009_v15 = vmul.f32 %v6900_v44, %v6008_v47 }
0x221c   : > { %v6044_v36 = vmul.f32 %v6900_v44, %v6043_v60  ;;  %v6079_v21 = vmul.f32 %v6900_v44, %v6078_v40  ;;  %v5964_v6 = vrot.slane %v9084_v29, %v8480_v1  ;;  %v6020_v56 = vrot.slane %v9084_v29, %v8484_v2 }
0x221d   : > { %v5919_v34 = vmul.f32 1.442695, %v5918_v43  ;;  %v5954_v31 = vmul.f32 1.442695, %v5953_v7  ;;  %v6010_v17 = vmul.f32 1.442695, %v6009_v15  ;;  %v6055_v39 = vrot.slane %v9084_v29, %v8489_v5 }
0x221e   : > { %v6045_v13 = vmul.f32 1.442695, %v6044_v36  ;;  %v6080_v48 = vmul.f32 1.442695, %v6079_v21  ;;  %v5986_v2 = vcombine.high %v5985_v0, %v5985_v0  ;;  %v5993_v5 = vrot.slane %v5985_v0, %v8556_v10 }
0x221f   : > { %7659 = vpow2.f32 %v5919_v34 }
0x2220   : > { %7661 = vpow2.f32 %v5954_v31  ;;  %v6090_v31 = vrot.slane %v9084_v29, %v8546_v52  ;;  %v6105_v52 = vcombine.high %v9041_v8, %v9041_v8 }
0x2221   : > { %7663 = vpow2.f32 %v6010_v17 }
0x2222   : > { %7665 = vpow2.f32 %v6045_v13 }
0x2223   : > { %7667 = vpow2.f32 %v6080_v48 }
0x2229   : > { %v7660_v55 = vpop.eup %7659 }
0x222a   : > { %v5921_v58 = vmul.f32 0.0, %v7660_v55  ;;  %v7662_v18 = vpop.eup %7661 }
0x222b   : > { %v7664_v14 = vpop.eup %7663 }
0x222c   : > { %3957 = vadd.xlane.f32.xlu1 %v3956_v33  ;;  %v7666_v12 = vpop.eup %7665 }
0x2260   : > { %v5936_v45 = vpop.permute.xlu1 %5935 }
0x2261   : > { %v5925_v4 = vpop.permute.xlu0 %5924 }
0x2262   : > { %v5931_v59 = vmul.f32 %v5930_v9, %v5925_v4  ;;  %v6000_v9 = vrot.slane %v5986_v2, %v8556_v10 }
0x2264   : > { %v5932_v63 = vadd.f32 %v5931_v59, %v5921_v58  ;;  %v6002_v17 = vmul.f32 %v9095_v50, %v6000_v9 }
0x2265   : > { %v5969_v3 = vpop.permute.xlu1 %5968 }
0x2266   : > { %v5938_v25 = vmul.f32 %v5936_v45, %v5932_v63  ;;  %v5956_v54 = vmul.f32 %v7662_v18, %v5932_v63  ;;  %v7668_v45 = vpop.eup %7667  ;;  %v6095_v40 = vpop.permute.xlu0 %6094 }
0x2268   : > { %v5939_v11 = vsel %vm1788_vm5, %v5938_v25, 0.0 }
0x2269   : > { %v5940_v22 = vrot.slane %v5939_v11, 4 }
0x226a   : > { %v6025_v61 = vpop.permute.xlu1 %6024 }
0x226b   : > { %v5941_v16 = vadd.f32 %v5940_v22, %v5939_v11  ;;  %v6035_v11 = vcombine.high %v5993_v5, %v5993_v5 }
0x226d   : > { %v5942_v51 = vrot.slane %v5941_v16, 2 }
0x226f   : > { %v5943_v19 = vadd.f32 %v5942_v51, %v5941_v16  ;;  %v5959_v20 = vpop.permute.xlu1 %5958 }
0x2270   : > { %v5965_v23 = vmul.f32 %v5964_v6, %v5959_v20  ;;  %v6037_v6 = vmul.f32 %v9095_v50, %v6035_v11 }
0x2271   : > { %v5944_v32 = vrot.slane %v5943_v19, 1 }
0x2272   : > { %v5966_v27 = vadd.f32 %v5965_v23, %v5956_v54  ;;  %v6112_v23 = vrot.slane %v6105_v52, %v8556_v10 }
0x2273   : > { %v5945_v28 = vadd.f32 %v5944_v32, %v5943_v19 }
0x2274   : > { %v5971_v1 = vmul.f32 %v5969_v3, %v5966_v27  ;;  %v6015_v30 = vpop.permute.xlu1 %6014  ;;  %v6012_v24 = vmul.f32 %v7664_v14, %v5966_v27 }
0x2275   : > { %v5947_v26 = vadd.f32 %v5946_v49, %v5945_v28  ;;  %v6021_v33 = vmul.f32 %v6020_v56, %v6015_v30  ;;  %v6119_v49 = vrot.slane %v6112_v23, %v8556_v10  ;;  %v6070_v56 = vcombine.high %v6000_v9, %v6000_v9 }
0x2276   : > { %v5972_v35 = vsel %vm1788_vm5, %v5971_v1, 0.0 }
0x2277   : > { %5948 = vst.msk [vmem:[#allocation5] sm:$0x1] %vm1726_vm1, %v5947_v26  ;;  %v5973_v37 = vrot.slane %v5972_v35, 4  ;;  %v6022_v38 = vadd.f32 %v6021_v33, %v6012_v24  ;;  %v6121_v26 = vmul.f32 %v9095_v50, %v6119_v49  ;;  %v6072_v33 = vmul.f32 %v9095_v50, %v6070_v56  ;;  %v6914_v50 = vld [vmem:[%s9349_s0 + $0x10] sm:$0xff] }
0x2279   : > { %v5974_v41 = vadd.f32 %v5973_v37, %v5972_v35  ;;  %v6027_v42 = vmul.f32 %v6025_v61, %v6022_v38  ;;  %v6050_v44 = vpop.permute.xlu1 %6049  ;;  %v6047_v43 = vmul.f32 %v7666_v12, %v6022_v38 }
0x227a   : > { %v6056_v34 = vmul.f32 %v6055_v39, %v6050_v44  ;;  %v6332_v44 = vld [vmem:[%s9367_s21] sm:$0x3f]  ;;  %s9371_s21 = sld [smem:[#allocation64_spill]] }
0x227b   : > { %v5975_v57 = vrot.slane %v5974_v41, 2  ;;  %v6028_v7 = vsel %vm1788_vm5, %v6027_v42, 0.0  ;;  %6335 = vperm.xlu0 %7526, %v6332_v44  }
0x227c   : > { %v6029_v47 = vrot.slane %v6028_v7, 4  ;;  %v6057_v55 = vadd.f32 %v6056_v34, %v6047_v43  ;;  %v6919_v43 = vld [vmem:[%s9350_s20 + $0x20] sm:$0xff]  ;;  %v6920_v34 = vld [vmem:[%s9350_s20 + $0x28] sm:$0xff] }
0x227d   : > { %v5976_v4 = vadd.f32 %v5975_v57, %v5974_v41  ;;  %v6915_v41 = vld [vmem:[%s9349_s0 + $0x18] sm:$0xff]  ;;  %v6274_v57 = vpack.c.bf16 %v6920_v34, %v6919_v43  ;;  %s9379_s0 = sld [smem:[#allocation55_spill]] }
0x227e   : > { %v6030_v15 = vadd.f32 %v6029_v47, %v6028_v7  ;;  %v6085_v58 = vpop.permute.xlu1 %6084  ;;  %v6082_v59 = vmul.f32 %v7668_v45, %v6057_v55  ;;  %v6200_v42 = vpack.c.bf16 %v6915_v41, %v6914_v50  ;;  %v5030_v7 = vadd.f32 %v8944_v46, %v8856_v53  ;;  %v6847_v47 = vld [vmem:[%s9347_s27 + $0x1] ss:$0 sm:$0xff] }
0x227f   : > { %v5977_v60 = vrot.slane %v5976_v4, 1  ;;  %v6091_v63 = vmul.f32 %v6090_v31, %v6085_v58  ;;  %v7848_v45 = vmov 65535  }
0x2280   : > { %v6031_v3 = vrot.slane %v6030_v15, 2  ;;  %7348 = vmatpush3.bf16.msra.mxu1 %v6200_v42 }
0x2281   : > { %v5978_v25 = vadd.f32 %v5977_v60, %v5976_v4  ;;  %v6092_v36 = vadd.f32 %v6091_v63, %v6082_v59  ;;  %7361 = vmatprep.subr.bf16.mxu1 %v7827_v62  ;;  %v6912_v4 = vld [vmem:[%s9345_s4 + $0x3] ss:$0 sm:$0xff] }
0x2282   : > { %v6032_v22 = vadd.f32 %v6031_v3, %v6030_v15  ;;  %v6921_v3 = vld [vmem:[%s9350_s20 + $0x30] sm:$0xff] }
0x2283   : > { %v6003_v61 = vadd.f32 %v6002_v17, %v5978_v25  ;;  %v6097_v13 = vmul.f32 %v6095_v40, %v6092_v36  ;;  %v6060_v16 = vpop.permute.xlu1 %6059  ;;  %v6922_v17 = vld [vmem:[%s9350_s20 + $0x38] sm:$0xff]  ;;  %v6917_v36 = vld [vmem:[%s9352_s12 + $0x1] ss:$0 sm:$0xff] }
0x2284   : > { %v6033_v21 = vrot.slane %v6032_v22, 1  ;;  %v6062_v29 = vmul.f32 %v6060_v16, %v6057_v55  ;;  %v5039_v55 = vadd.f32 %v6847_v47, %v5030_v7  ;;  %v6275_v25 = vpack.c.bf16 %v6922_v17, %v6921_v3 }
0x2285   : > { %6004 = vst.msk [vmem:[#allocation5 + $0x1] sm:$0x1] %vm1726_vm1, %v6003_v61  ;;  %v6098_v51 = vsel %vm1788_vm5, %v6097_v13, 0.0 }
0x2286   : > { %v6034_v18 = vadd.f32 %v6033_v21, %v6032_v22  ;;  %v6099_v19 = vrot.slane %v6098_v51, 4  ;;  %v6063_v20 = vsel %vm1788_vm5, %v6062_v29, 0.0  ;;  %v6331_v31 = vpack.c.bf16 %v5039_v55, %v5039_v55 }
0x2287   : > { %v6064_v48 = vrot.slane %v6063_v20, 4  ;;  %v6134_v10 = vpop.permute.xlu1 %6133 }
0x2288   : > { %v6038_v54 = vadd.f32 %v6037_v6, %v6034_v18  ;;  %v6100_v32 = vadd.f32 %v6099_v19, %v6098_v51  ;;  %v6329_v51 = vld [vmem:[%s9368_s24] sm:$0x3f]  ;;  %s9372_s24 = sld [smem:[#allocation62_spill]] }
0x2289   : > { %v6065_v27 = vadd.f32 %v6064_v48, %v6063_v20  ;;  %v6330_v6 = vpack.c.bf16 %v6329_v51, %v6329_v51  ;;  %v6391_v18 = vld [vmem:[%s9369_s30] sm:$0x3f]  ;;  %s9373_s30 = sld [smem:[#allocation52_spill]] }
0x228a   : > { %6039 = vst.msk [vmem:[#allocation5 + $0x2] sm:$0x1] %vm1726_vm1, %v6038_v54  ;;  %v6101_v8 = vrot.slane %v6100_v32, 2  ;;  %v9162_v19 = vld [vmem:[%s9370_s16] sm:$0x3f]  ;;  %6394 = vperm.xlu1 %7527, %v6391_v18  }
0x228b   : > { %v6066_v14 = vrot.slane %v6065_v27, 2  ;;  %v6466_v20 = vadd.f32 1e-05, %v9162_v19 }
0x228c   : > { %v6102_v28 = vadd.f32 %v6101_v8, %v6100_v32 }
0x228d   : > { %v6067_v1 = vadd.f32 %v6066_v14, %v6065_v27  ;;  %7669 = vrsqrt.f32 %v6466_v20 }
0x228e   : > { %v6103_v30 = vrot.slane %v6102_v28, 1  ;;  %6462 = vrot.lane.b32.xlu1 %v9162_v19, %s9249_s15  ;;  %s1545_s16 = scalar_lea.vmem %s9372_s24, %s9371_s21  ;;  %s9375_s15 = sld [smem:[#allocation59_spill]] }
0x228f   : > { %v6068_v24 = vrot.slane %v6067_v1, 1  ;;  %v6388_v34 = vld [vmem:[%s9373_s30] sm:$0x3f]  ;;  %s9376_s21 = sld [smem:[#allocation56_spill]]  ;;  %s9377_s24 = smov 126  }
0x2290   : > { %v6104_v0 = vadd.f32 %v6103_v30, %v6102_v28  ;;  %v6389_v7 = vpack.c.bf16 %v6388_v34, %v6388_v34  ;;  %s9378_s30 = smov 125  }
0x2291   : > { %v6069_v35 = vadd.f32 %v6068_v24, %v6067_v1 }
0x2292   : > { %v6122_v37 = vadd.f32 %v6121_v26, %v6104_v0 }
0x2293   : > { %v6073_v38 = vadd.f32 %v6072_v33, %v6069_v35 }
0x2294   : > { %6123 = vst.msk [vmem:[#allocation5 + $0x4] sm:$0x1] %vm1726_vm1, %v6122_v37 }
0x2295   : > { %6074 = vst.msk [vmem:[#allocation5 + $0x3] sm:$0x1] %vm1726_vm1, %v6073_v38  ;;  %vm6341_vm1 = vcmask 1041408  }
0x2296   : > { %v6343_v9 = vsel %vm6341_vm1, 4294967295, %v7848_v45 }
0x2297   : > { %v9140_v15 = vsel %vm6342_vm6, %v6343_v9, 0  ;;  %v7670_v48 = vpop.eup %7669 }
0x2298   : > { %v6346_v63 = vand.u32 %v9140_v15, %v6331_v31  ;;  %6469 = vrot.lane.b32.xlu1 %v7670_v48, %s9248_s19  ;;  %s9374_s19 = sld [smem:[#allocation54_spill]] }
0x229c   : > { %v6124_v12 = vld [vmem:[#allocation5] sm:$0x1f] }
0x229d   : > { %v6136_v39 = vmul.f32 %v6134_v10, %v6124_v12 }
0x229f   : > { %v6142_v2 = vpack.c.bf16 %v6136_v39, %v6136_v39  ;;  %v6925_v39 = vld [vmem:[%s9365_s14 + $0x1] ss:$0 sm:$0xff] }
0x22a1   : > { %7344 = vmatmul.mubr.msk.bf16.vlgmr.msra.gmra.mrb[64].mxu0 %vm1788_vm5, %v6142_v2 }
0x22a2   : > { %7357 = vmatprep.mubr.msk.bf16.mxu0 %vm7828_vm4, %v7827_v62  ;;  %7354 = vmatpush3.bf16.msra.mxu0 %v6274_v57 }
0x22a3   : > { %7355 = vmatprep.subr.bf16.mxu0 %v7827_v62 }
0x22a6   : > { %7356 = vmatpush3.bf16.msra.mxu0 %v6275_v25 }
0x22a7   : > { %7367 = vmatprep.subr.bf16.mxu0 %v7827_v62 }
0x22fa   : > { %v6336_v27 = vpop.permute.xlu0 %6335 }
0x2374   : > { %v6190_v5 = vpop.f32.mrb[64].mxu0 }
0x2375   : > { %v9142_v58 = vadd.f32 %v6912_v4, %v6190_v5  ;;  %v7345_v59 = vpop.f32.mrb[65].mxu0 }
0x2376   : > { %v6193_v60 = vpop.f32.mrb[66].mxu0  ;;  %v6460_v59 = vld [vmem:[%s9375_s15] sm:$0x3f]  ;;  %s9381_s15 = sld [smem:[#allocation65_spill]] }
0x2377   : > { %v6199_v53 = vpack.c.bf16 %v9142_v58, %v9142_v58  ;;  %v7346_v46 = vpop.f32.mrb[67].mxu0  ;;  %v6483_v60 = vadd.f32 1e-05, %v6460_v59 }
0x2379   : > { %7350 = vmatmul.mubr.msk.bf16.vlgmr.msra.gmra.mrb[68].mxu1 %vm2795_vm2, %v6199_v53  ;;  %7671 = vrsqrt.f32 %v6483_v60 }
0x237a   : > { %7362 = vmatpush3.bf16.msra.mxu1 %v6346_v63  ;;  %7363 = vmatprep.mubr.msk.bf16.mxu1 %vm7828_vm4, %v7827_v62  ;;  %v6451_v63 = vld [vmem:[%s9376_s21] sm:$0x3f]  ;;  %s9383_s21 = sld [smem:[#allocation61_spill]] }
0x2381   : > { %7364 = vmatmul.mubr.msk.bf16.vlgmr.msra.gmra.mrb[72].mxu1 %vm1925_vm11, %v6330_v6 }
0x244c   : > { %v6246_v40 = vpop.f32.mrb[68].mxu1 }
0x244d   : > { %v6247_v11 = vadd.f32 %v6917_v36, %v6246_v40  ;;  %v7351_v22 = vpop.f32.mrb[69].mxu1 }
0x244e   : > { %v6249_v61 = vpop.f32.mrb[70].mxu1 }
0x244f   : > { %v6252_v13 = vsub.f32 %v5039_v55, %v6247_v11  ;;  %v6273_v16 = vpack.c.bf16 %v6247_v11, %v6247_v11  ;;  %v7352_v21 = vpop.f32.mrb[71].mxu1  ;;  %v6443_v55 = vld [vmem:[%s9374_s19] sm:$0x3f]  ;;  %s9380_s19 = sld [smem:[#allocation57_spill]] }
0x2451   : > { %7358 = vmatmul.mubr.msk.bf16.vlgmr.msra.gmra.mrb[68].mxu0 %vm1788_vm5, %v6273_v16  ;;  %v6253_v52 = vmul.f32 %v6252_v13, %v6252_v13  ;;  %vm6498_vm5 = vcmask 0   ;;  %v6449_v13 = vld [vmem:[%s9379_s0] sm:$0x3f]  ;;  %s1542_s0 = scalar_lea.vmem %s9383_s21, %s9381_s15 }
0x2452   : > { %7369 = vmatprep.mubr.msk.bf16.mxu0 %vm7828_vm4, %v7827_v62  ;;  %v3958_v62 = vpop.xlane.xlu1 %3957  ;;  %vm3962_vm4 = vcmask 1043456  }
0x2453   : > { %v6254_v29 = vsel %vm3955_vm3, %v6253_v52, 0.0  ;;  %v3960_v54 = vrot.slane %v3958_v62, 1 }
0x2454   : > { %6255 = vadd.xlane.f32.xlu0 %v6254_v29  ;;  %v6382_v47 = vpop.f32.mrb[72].mxu1 }
0x2455   : > { %v3963_v23 = vsel %vm3962_vm4, %v3960_v54, 0.0  ;;  %v6383_v45 = vadd.f32 %v6382_v47, %v6336_v27  ;;  %v7365_v9 = vpop.f32.mrb[73].mxu1  ;;  %v6457_v51 = vld [vmem:[%s9380_s19] sm:$0x3f] }
0x2456   : > { %v3964_v32 = vrot.slane %v3963_v23, 4  ;;  %v6385_v4 = vpop.f32.mrb[74].mxu1  ;;  %v6395_v53 = vpop.permute.xlu1 %6394 }
0x2457   : > { %v6444_v31 = vmul.f32 %v6443_v55, %v6383_v45  ;;  %v7366_v5 = vpop.f32.mrb[75].mxu1 }
0x2458   : > { %v3965_v8 = vadd.f32 %v3964_v32, %v3963_v23 }
0x245a   : > { %v3966_v28 = vrot.slane %v3965_v8, 2  ;;  %v6463_v22 = vpop.permute.xlu1 %6462 }
0x245c   : > { %v3967_v30 = vadd.f32 %v3966_v28, %v3965_v8 }
0x245e   : > { %v3968_v0 = vrot.slane %v3967_v30, 1  ;;  %v6470_v61 = vpop.permute.xlu1 %6469 }
0x2460   : > { %v3969_v37 = vadd.f32 %v3968_v0, %v3967_v30 }
0x24e1   : > { %v6256_v14 = vpop.xlane.xlu0 %6255 }
0x24e2   : > { %v6258_v49 = vrot.slane %v6256_v14, 1 }
0x24e4   : > { %v6260_v56 = vsel %vm3962_vm4, %v6258_v49, 0.0 }
0x24e5   : > { %v6261_v1 = vrot.slane %v6260_v56, 4 }
0x24e7   : > { %v6262_v24 = vadd.f32 %v6261_v1, %v6260_v56 }
0x24e9   : > { %v6263_v26 = vrot.slane %v6262_v24, 2 }
0x24eb   : > { %v6264_v33 = vadd.f32 %v6263_v26, %v6262_v24 }
0x24ed   : > { %v6265_v35 = vrot.slane %v6264_v33, 1 }
0x24ef   : > { %v6266_v38 = vadd.f32 %v6265_v35, %v6264_v33 }
0x24f1   : > { %v6267_v10 = vadd.f32 %v6266_v38, %v3969_v37 }
0x24f3   : > { %6499 = vst.msk [vmem:[%s1545_s16] sm:$0x1] %vm6498_vm5, %v6267_v10  ;;  %s7851_s16 = smov 127  }
0x2524   : > { %v6313_v12 = vpop.f32.mrb[68].mxu0 }
0x2525   : > { %v6319_v2 = vadd.f32 %v6313_v12, %v9142_v58  ;;  %v7359_v50 = vpop.f32.mrb[69].mxu0  ;;  %v6446_v58 = vsel %vm6445_vm7, %v6444_v31, 0.0 }
0x2526   : > { %v6316_v41 = vpop.f32.mrb[70].mxu0  ;;  %6447 = vadd.xlane.f32.xlu1 %v6446_v58 }
0x2527   : > { %v6328_v42 = vadd.f32 %v6925_v39, %v6319_v2  ;;  %v7360_v44 = vpop.f32.mrb[71].mxu0 }
0x2529   : > { %v6390_v43 = vpack.c.bf16 %v6328_v42, %v6328_v42 }
0x252b   : > { %v6401_v57 = vand.u32 %v6390_v43, %v9140_v15  ;;  %v7672_v15 = vpop.eup %7671 }
0x252d   : > { %7368 = vmatpush3.bf16.msra.mxu0 %v6401_v57 }
0x2530   : > { %7370 = vmatmul.mubr.msk.bf16.vlgmr.msra.gmra.mrb[72].mxu0 %vm1925_vm11, %v6389_v7 }
0x2537   : > { %6479 = vrot.lane.b32.xlu1 %v6460_v59, %s9377_s24  ;;  %s9382_s24 = sld [smem:[#allocation60_spill]] }
0x253b   : > { %6486 = vrot.lane.b32.xlu1 %v7672_v15, %s9378_s30 }
0x253d   : > { %s1538_s30 = scalar_lea.vmem %s9382_s24, %s9381_s15 }
0x253f   : > { %6491 = vrot.lane.b32.xlu1 %v6460_v59, %s7851_s16 }
0x25b3   : > { %v6448_v16 = vpop.xlane.xlu1 %6447 }
0x25b4   : > { %v6450_v21 = vadd.f32 %v6449_v13, %v6448_v16 }
0x25b6   : > { %v6465_v29 = vsub.f32 %v6450_v21, %v6463_v22 }
0x25b7   : > { %v6480_v52 = vpop.permute.xlu1 %6479 }
0x25b8   : > { %v6472_v6 = vmul.f32 %v6470_v61, %v6465_v29 }
0x25ba   : > { %v6473_v54 = vmul.f32 %v6472_v6, %v9162_v19 }
0x25bb   : > { %v6487_v20 = vpop.permute.xlu1 %6486 }
0x25bf   : > { %v6492_v8 = vpop.permute.xlu1 %6491 }
0x2603   : > { %v6437_v46 = vpop.f32.mrb[72].mxu0 }
0x2604   : > { %v6438_v3 = vadd.f32 %v6437_v46, %v6395_v53  ;;  %v7371_v17 = vpop.f32.mrb[73].mxu0 }
0x2605   : > { %v6440_v25 = vpop.f32.mrb[74].mxu0 }
0x2606   : > { %v7372_v36 = vpop.f32.mrb[75].mxu0  ;;  %v6452_v40 = vmul.f32 %v6451_v63, %v6438_v3 }
0x2608   : > { %v6454_v11 = vsel %vm6453_vm9, %v6452_v40, 0.0 }
0x2609   : > { %6455 = vadd.xlane.f32.xlu0 %v6454_v11 }
0x261f   : > { %6474 = vrot.lane.b32.xlu0 %v9162_v19, %s7851_s16 }
0x2696   : > { %v6456_v18 = vpop.xlane.xlu0 %6455 }
0x2697   : > { %v6458_v48 = vadd.f32 %v6457_v51, %v6456_v18 }
0x2699   : > { %v6482_v62 = vsub.f32 %v6458_v48, %v6480_v52 }
0x269a   : > { %v6475_v23 = vpop.permute.xlu0 %6474 }
0x269b   : > { %v6477_v32 = vadd.f32 %v6475_v23, %v6473_v54  ;;  %v6489_v27 = vmul.f32 %v6487_v20, %v6482_v62 }
0x269d   : > { %6496 = vst.msk [vmem:[%s1538_s30] sm:$0x3f] %vm6495_vm10, %v6477_v32  ;;  %v6490_v14 = vmul.f32 %v6489_v27, %v6460_v59 }
0x269f   : > { %v6494_v49 = vadd.f32 %v6492_v8, %v6490_v14 }
0x26a1   : > { %6497 = vst.msk [vmem:[%s1542_s0] sm:$0x3f] %vm6495_vm10, %v6494_v49 }
0x26a2 PF: > { %s9384_s16 = sld [smem:[#allocation63_spill]] }
0x26a8   : > { %s114_s15 = sadd.s32 1, %s9384_s16  }
0x26a9   : > { %p111_p11 = scmp.ge.s32.totalorder %s114_s15, 4  }
0x26ab   :  { %113 = sbr.rel (!%p111_p11) target bundleno = 126 (0x7e), region = 384 }
0x26b2   :  { %6545 = vsyncpa [#allocation7], 1 }
0x26b3   :  { %6547 = vsyncpa [#allocation7 + $0x1], 1 }
0x26b4   :  { %6548 = vsyncpa [#allocation9], 1 }

</bundles_post_ra>
